<compile_context>
chip_gen: v7x
topology: tpu7x:2x2x1
jax: 0.10.0
libtpu: 0.0.40
codegen_flags: <defaults>
</compile_context>

<pallas_src>
import functools

import jax
import jax.numpy as jnp
from jax import lax
from jax.experimental import pallas as pl
from jax.experimental.pallas import tpu as pltpu

LANE = 128
EPS = 1e-5
NEG_SLOPE = 0.2
CONV_DTYPE = jnp.bfloat16   # MXU operand dtype; accumulation is always f32.


def _conv_act(x_planes, w_ref, b_ref, ksize, wg, rows):
    """Fused 3-D conv (stride 1) + bias + LeakyReLU for one (n, d) output plane.

    x_planes : ksize refs, each (plane_rows, c_in_p) CONV_DTYPE -- the haloed,
               channels-last, flattened input planes for depths d .. d+ksize-1.
    Returns  : (rows, LANE) f32 activations on the *padded* (Hg, Wg) output
               grid (garbage border rows are masked / cropped by the callers).
    """
    acc = None
    for kd in range(ksize):
        # Promote once to f32: value slices at odd sublane offsets are then
        # plain (unpacked) shifts; the cast back to CONV_DTYPE below is exact.
        xv = x_planes[kd][...].astype(jnp.float32)
        for kh in range(ksize):
            for kw in range(ksize):
                off = kh * wg + kw
                xs = xv[off:off + rows, :].astype(CONV_DTYPE)
                wk = w_ref[(kd * ksize + kh) * ksize + kw]      # (c_in_p, LANE)
                part = jnp.dot(xs, wk, preferred_element_type=jnp.float32)
                acc = part if acc is None else acc + part
    y = acc + b_ref[...]
    return jnp.where(y >= 0.0, y, NEG_SLOPE * y)                # LeakyReLU(0.2)


def _make_stats_kernel(ksize, wg, rows):
    """Pass 1: conv + bias + LeakyReLU -> per-(n, d) shifted partial BN stats."""
    def kernel(*refs):
        x_planes = refs[:ksize]
        w_ref, b_ref, c_ref, mask_ref, psum_ref, pssq_ref = refs[ksize:]
        y = _conv_act(x_planes, w_ref, b_ref, ksize, wg, rows)
        # Shifted & masked deviations: d = (y - c) on valid rows, 0 elsewhere.
        dev = (y - c_ref[...]) * mask_ref[...]
        dz = dev.reshape(rows // 8, 8, LANE)        # sublane groups, VPU adds
        psum_ref[...] = jnp.sum(dz, axis=0)
        pssq_ref[...] = jnp.sum(dz * dz, axis=0)
    return kernel


def _make_apply_kernel(ksize, wg, rows, c_out):
    """Pass 2: recompute conv + bias + LeakyReLU, apply folded BN affine."""
    def kernel(*refs):
        x_planes = refs[:ksize]
        w_ref, b_ref, scale_ref, shift_ref, o_ref = refs[ksize:]
        y = _conv_act(x_planes, w_ref, b_ref, ksize, wg, rows)
        o_ref[...] = (y * scale_ref[...] + shift_ref[...])[:, :c_out]
    return kernel


def _make_plane_index_map(kd):
    def index_map(n, d):
        return (n, d + kd, 0, 0)
    return index_map


@functools.partial(jax.jit, static_argnames=("ksize", "padding"))
def conv3_forward(x, weight, bias, gamma, beta, *, ksize, padding):
    """x: (N, C_in, D, H, W) f32.  weight: (C_out, C_in, k, k, k) f32."""
    n, c_in, d, h, w = x.shape
    c_out = weight.shape[0]
    assert c_out <= LANE
    dg, hg, wg = d + 2 * padding, h + 2 * padding, w + 2 * padding
    do, ho, wo = dg - ksize + 1, hg - ksize + 1, wg - ksize + 1
    assert min(do, ho, wo) >= 1

    c_in_p = max(8, -(-c_in // 8) * 8)            # clean MXU contraction dim
    rows = -(-(hg * wg) // 8) * 8                 # output rows/plane, 8-aligned
    plane_rows = rows + (ksize - 1) * wg + (ksize - 1)   # + flattened halo

    # ---- cheap XLA-side prep: one NDHWC transpose + pad + cast (no im2col) --
    x_cl = jnp.transpose(x, (0, 2, 3, 4, 1)).astype(CONV_DTYPE)
    x_cl = jnp.pad(x_cl, ((0, 0), (padding, padding), (padding, padding),
                          (padding, padding), (0, c_in_p - c_in)))
    x_pp = x_cl.reshape(n, dg, hg * wg, c_in_p)
    x_pp = jnp.pad(x_pp, ((0, 0), (0, 0), (0, plane_rows - hg * wg), (0, 0)))

    k3 = ksize ** 3
    w_k = jnp.transpose(weight, (2, 3, 4, 1, 0)).reshape(k3, c_in, c_out)
    w_pad = (jnp.zeros((k3, c_in_p, LANE), jnp.float32)
             .at[:, :c_in, :c_out].set(w_k).astype(CONV_DTYPE))
    b_pad = jnp.zeros((1, LANE), jnp.float32).at[0, :c_out].set(bias)
    c_act = jnp.where(bias >= 0.0, bias, NEG_SLOPE * bias)   # stats center
    c_pad = jnp.zeros((1, LANE), jnp.float32).at[0, :c_out].set(c_act)

    r_idx = jnp.arange(rows)
    valid = ((r_idx // wg) < ho) & ((r_idx % wg) < wo)
    mask = valid.astype(jnp.float32)[:, None]                 # (rows, 1)

    grid = (n, do)
    plane_specs = [pl.BlockSpec((None, None, plane_rows, c_in_p),
                                _make_plane_index_map(kd))
                   for kd in range(ksize)]
    w_spec = pl.BlockSpec((k3, c_in_p, LANE), lambda nn, dd: (0, 0, 0))
    vec_spec = pl.BlockSpec((1, LANE), lambda nn, dd: (0, 0))
    mask_spec = pl.BlockSpec((rows, 1), lambda nn, dd: (0, 0))
    stat_spec = pl.BlockSpec((None, None, 8, LANE), lambda nn, dd: (nn, dd, 0, 0))
    cparams = pltpu.CompilerParams(
        dimension_semantics=("parallel", "parallel"),
        vmem_limit_bytes=32 * 1024 * 1024)

    # Pass 1: fused conv + bias + LeakyReLU -> per-(n, d) partial BN statistics.
    psum, pssq = pl.pallas_call(
        _make_stats_kernel(ksize, wg, rows),
        out_shape=(jax.ShapeDtypeStruct((n, do, 8, LANE), jnp.float32),
                   jax.ShapeDtypeStruct((n, do, 8, LANE), jnp.float32)),
        grid_spec=pltpu.PrefetchScalarGridSpec(
            num_scalar_prefetch=0,
            grid=grid,
            in_specs=plane_specs + [w_spec, vec_spec, vec_spec, mask_spec],
            out_specs=[stat_spec, stat_spec]),
        compiler_params=cparams,
    )(*([x_pp] * ksize), w_pad, b_pad, c_pad, mask)

    # BatchNorm3d (training mode): biased per-channel stats over (N, D, H, W),
    # from shifted sums (center = LeakyReLU(bias)) to avoid cancellation.
    count = jnp.float32(n * do * ho * wo)
    s1 = jnp.sum(psum, axis=(0, 1, 2))[:c_out]
    s2 = jnp.sum(pssq, axis=(0, 1, 2))[:c_out]
    mean_c = s1 / count
    var = jnp.maximum(s2 / count - mean_c * mean_c, 0.0)
    mean = c_act + mean_c
    inv_std = lax.rsqrt(var + EPS)
    scale = gamma * inv_std
    shift = beta - mean * scale
    scale_pad = jnp.zeros((1, LANE), jnp.float32).at[0, :c_out].set(scale)
    shift_pad = jnp.zeros((1, LANE), jnp.float32).at[0, :c_out].set(shift)
    # TODO(synk): BatchNorm3d's running-stat update (momentum=0.8) is a training
    # side effect on module buffers only; it does not affect the returned tensor.

    # Pass 2: recompute conv + bias + LeakyReLU (re-reading the small C_in input
    # stream is far cheaper than storing an f32 y) and apply the folded affine.
    out_flat = pl.pallas_call(
        _make_apply_kernel(ksize, wg, rows, c_out),
        out_shape=jax.ShapeDtypeStruct((n, do, rows, c_out), jnp.float32),
        grid_spec=pltpu.PrefetchScalarGridSpec(
            num_scalar_prefetch=0,
            grid=grid,
            in_specs=plane_specs + [w_spec, vec_spec, vec_spec, vec_spec],
            out_specs=pl.BlockSpec((None, None, rows, c_out),
                                   lambda nn, dd: (nn, dd, 0, 0))),
        compiler_params=cparams,
    )(*([x_pp] * ksize), w_pad, b_pad, scale_pad, shift_pad)

    # Crop the padded-grid garbage rows and return NCDHW.
    out = out_flat[:, :, :hg * wg, :].reshape(n, do, hg, wg, c_out)
    out = out[:, :, :ho, :wo, :]
    return jnp.transpose(out, (0, 4, 1, 2, 3))


def _reference(x, weight, bias, gamma, beta, padding):
    """Pure-JAX reference with the same conv operand dtype / f32 accumulation."""
    y = lax.conv_general_dilated(
        x.astype(CONV_DTYPE), weight.astype(CONV_DTYPE),
        window_strides=(1, 1, 1),
        padding=[(padding, padding)] * 3,
        dimension_numbers=("NCDHW", "OIDHW", "NCDHW"),
        preferred_element_type=jnp.float32,
    ) + bias[None, :, None, None, None]
    y = jnp.where(y >= 0.0, y, NEG_SLOPE * y)
    mean = jnp.mean(y, axis=(0, 2, 3, 4), keepdims=True)
    var = jnp.mean((y - mean) ** 2, axis=(0, 2, 3, 4), keepdims=True)
    g = gamma[None, :, None, None, None]
    b = beta[None, :, None, None, None]
    return (y - mean) / jnp.sqrt(var + EPS) * g + b


if __name__ == "__main__":
    # Small shapes consistent with the module: Conv3d(4 -> 16, k=3, s=1, p=1).
    N, C_IN, C_OUT, K = 2, 4, 16, 3
    D = H = W = 8
    PAD = 1

    key = jax.random.PRNGKey(0)
    kx, kw_, kb = jax.random.split(key, 3)
    x = jax.random.normal(kx, (N, C_IN, D, H, W), jnp.float32)
    fan_in = C_IN * K * K * K
    weight = (jax.random.normal(kw_, (C_OUT, C_IN, K, K, K), jnp.float32)
              * jnp.sqrt(2.0 / fan_in))
    bias = jax.random.normal(kb, (C_OUT,), jnp.float32) * 0.1
    gamma = jnp.ones((C_OUT,), jnp.float32)    # BatchNorm3d default affine init
    beta = jnp.zeros((C_OUT,), jnp.float32)

    out = conv3_forward(x, weight, bias, gamma, beta, ksize=K, padding=PAD)
    out = jax.block_until_ready(out)

    ref = _reference(x, weight, bias, gamma, beta, PAD)
    assert out.shape == (N, C_OUT, D, H, W), out.shape
    max_err = float(jnp.max(jnp.abs(out - ref)))
    assert max_err < 1e-2, max_err

    print("KERNEL_OK")
</pallas_src>

<mosaic_0001>
module attributes {stable_mosaic.version = 11 : i64} {
  func.func @kernel(%arg0: i32, %arg1: i32, %arg2: memref<1x1x126x8xbf16, #tpu.memory_space<vmem>>, %arg3: memref<1x1x126x8xbf16, #tpu.memory_space<vmem>>, %arg4: memref<1x1x126x8xbf16, #tpu.memory_space<vmem>>, %arg5: memref<27x8x128xbf16, #tpu.memory_space<vmem>>, %arg6: memref<1x128xf32, #tpu.memory_space<vmem>>, %arg7: memref<1x128xf32, #tpu.memory_space<vmem>>, %arg8: memref<1x128xf32, #tpu.memory_space<vmem>>, %arg9: memref<1x1x104x16xf32, #tpu.memory_space<vmem>>) attributes {dimension_semantics = [#tpu.dimension_semantics<parallel>, #tpu.dimension_semantics<parallel>], iteration_bounds = array<i64: 2, 8>, scalar_prefetch = 0 : i64, scratch_operands = 0 : i64, tpu.core_type = #tpu.core_type<tc>, window_params = [{transform_indices = @transform_0, window_bounds = array<i64: 1, 1, 126, 8>}, {transform_indices = @transform_1, window_bounds = array<i64: 1, 1, 126, 8>}, {transform_indices = @transform_2, window_bounds = array<i64: 1, 1, 126, 8>}, {pipeline_mode = #tpu.pipeline_mode<synchronous>, transform_indices = @transform_3, window_bounds = array<i64: 27, 8, 128>}, {pipeline_mode = #tpu.pipeline_mode<synchronous>, transform_indices = @transform_4, window_bounds = array<i64: 1, 128>}, {pipeline_mode = #tpu.pipeline_mode<synchronous>, transform_indices = @transform_5, window_bounds = array<i64: 1, 128>}, {pipeline_mode = #tpu.pipeline_mode<synchronous>, transform_indices = @transform_6, window_bounds = array<i64: 1, 128>}, {transform_indices = @transform_7, window_bounds = array<i64: 1, 1, 104, 16>}]} {
    %c0 = arith.constant 0 : index
    %c0_0 = arith.constant 0 : index
    %c0_1 = arith.constant 0 : index
    %c0_2 = arith.constant 0 : index
    %0 = vector.load %arg2[%c0, %c0_0, %c0_1, %c0_2] : memref<1x1x126x8xbf16, #tpu.memory_space<vmem>>, vector<1x1x126x8xbf16>
    %1 = vector.shape_cast %0 : vector<1x1x126x8xbf16> to vector<126x8xbf16>
    %2 = arith.extf %1 : vector<126x8xbf16> to vector<126x8xf32>
    %3 = vector.extract_strided_slice %2 {offsets = [0, 0], sizes = [104, 8], strides = [1, 1]} : vector<126x8xf32> to vector<104x8xf32>
    %4 = arith.truncf %3 : vector<104x8xf32> to vector<104x8xbf16>
    %c0_3 = arith.constant 0 : index
    %c0_4 = arith.constant 0 : index
    %c0_5 = arith.constant 0 : index
    %5 = vector.load %arg5[%c0_3, %c0_4, %c0_5] : memref<27x8x128xbf16, #tpu.memory_space<vmem>>, vector<1x8x128xbf16>
    %6 = vector.shape_cast %5 : vector<1x8x128xbf16> to vector<8x128xbf16>
    %cst = arith.constant dense<0.000000e+00> : vector<104x128xf32>
    %7 = tpu.matmul %4, %6, %cst {dimension_numbers = #tpu.dot_dimension_numbers<[1], [0], [0], [1], [0, 0, 1, 1], [], []>} : vector<104x8xbf16>, vector<8x128xbf16>, vector<104x128xf32> -> vector<104x128xf32>
    %8 = vector.extract_strided_slice %2 {offsets = [1, 0], sizes = [104, 8], strides = [1, 1]} : vector<126x8xf32> to vector<104x8xf32>
    %9 = arith.truncf %8 : vector<104x8xf32> to vector<104x8xbf16>
    %c1 = arith.constant 1 : index
    %c0_6 = arith.constant 0 : index
    %c0_7 = arith.constant 0 : index
    %10 = vector.load %arg5[%c1, %c0_6, %c0_7] : memref<27x8x128xbf16, #tpu.memory_space<vmem>>, vector<1x8x128xbf16>
    %11 = vector.shape_cast %10 : vector<1x8x128xbf16> to vector<8x128xbf16>
    %cst_8 = arith.constant dense<0.000000e+00> : vector<104x128xf32>
    %12 = tpu.matmul %9, %11, %cst_8 {dimension_numbers = #tpu.dot_dimension_numbers<[1], [0], [0], [1], [0, 0, 1, 1], [], []>} : vector<104x8xbf16>, vector<8x128xbf16>, vector<104x128xf32> -> vector<104x128xf32>
    %13 = arith.addf %7, %12 : vector<104x128xf32>
    %14 = vector.extract_strided_slice %2 {offsets = [2, 0], sizes = [104, 8], strides = [1, 1]} : vector<126x8xf32> to vector<104x8xf32>
    %15 = arith.truncf %14 : vector<104x8xf32> to vector<104x8xbf16>
    %c2 = arith.constant 2 : index
    %c0_9 = arith.constant 0 : index
    %c0_10 = arith.constant 0 : index
    %16 = vector.load %arg5[%c2, %c0_9, %c0_10] : memref<27x8x128xbf16, #tpu.memory_space<vmem>>, vector<1x8x128xbf16>
    %17 = vector.shape_cast %16 : vector<1x8x128xbf16> to vector<8x128xbf16>
    %cst_11 = arith.constant dense<0.000000e+00> : vector<104x128xf32>
    %18 = tpu.matmul %15, %17, %cst_11 {dimension_numbers = #tpu.dot_dimension_numbers<[1], [0], [0], [1], [0, 0, 1, 1], [], []>} : vector<104x8xbf16>, vector<8x128xbf16>, vector<104x128xf32> -> vector<104x128xf32>
    %19 = arith.addf %13, %18 : vector<104x128xf32>
    %20 = vector.extract_strided_slice %2 {offsets = [10, 0], sizes = [104, 8], strides = [1, 1]} : vector<126x8xf32> to vector<104x8xf32>
    %21 = arith.truncf %20 : vector<104x8xf32> to vector<104x8xbf16>
    %c3 = arith.constant 3 : index
    %c0_12 = arith.constant 0 : index
    %c0_13 = arith.constant 0 : index
    %22 = vector.load %arg5[%c3, %c0_12, %c0_13] : memref<27x8x128xbf16, #tpu.memory_space<vmem>>, vector<1x8x128xbf16>
    %23 = vector.shape_cast %22 : vector<1x8x128xbf16> to vector<8x128xbf16>
    %cst_14 = arith.constant dense<0.000000e+00> : vector<104x128xf32>
    %24 = tpu.matmul %21, %23, %cst_14 {dimension_numbers = #tpu.dot_dimension_numbers<[1], [0], [0], [1], [0, 0, 1, 1], [], []>} : vector<104x8xbf16>, vector<8x128xbf16>, vector<104x128xf32> -> vector<104x128xf32>
    %25 = arith.addf %19, %24 : vector<104x128xf32>
    %26 = vector.extract_strided_slice %2 {offsets = [11, 0], sizes = [104, 8], strides = [1, 1]} : vector<126x8xf32> to vector<104x8xf32>
    %27 = arith.truncf %26 : vector<104x8xf32> to vector<104x8xbf16>
    %c4 = arith.constant 4 : index
    %c0_15 = arith.constant 0 : index
    %c0_16 = arith.constant 0 : index
    %28 = vector.load %arg5[%c4, %c0_15, %c0_16] : memref<27x8x128xbf16, #tpu.memory_space<vmem>>, vector<1x8x128xbf16>
    %29 = vector.shape_cast %28 : vector<1x8x128xbf16> to vector<8x128xbf16>
    %cst_17 = arith.constant dense<0.000000e+00> : vector<104x128xf32>
    %30 = tpu.matmul %27, %29, %cst_17 {dimension_numbers = #tpu.dot_dimension_numbers<[1], [0], [0], [1], [0, 0, 1, 1], [], []>} : vector<104x8xbf16>, vector<8x128xbf16>, vector<104x128xf32> -> vector<104x128xf32>
    %31 = arith.addf %25, %30 : vector<104x128xf32>
    %32 = vector.extract_strided_slice %2 {offsets = [12, 0], sizes = [104, 8], strides = [1, 1]} : vector<126x8xf32> to vector<104x8xf32>
    %33 = arith.truncf %32 : vector<104x8xf32> to vector<104x8xbf16>
    %c5 = arith.constant 5 : index
    %c0_18 = arith.constant 0 : index
    %c0_19 = arith.constant 0 : index
    %34 = vector.load %arg5[%c5, %c0_18, %c0_19] : memref<27x8x128xbf16, #tpu.memory_space<vmem>>, vector<1x8x128xbf16>
    %35 = vector.shape_cast %34 : vector<1x8x128xbf16> to vector<8x128xbf16>
    %cst_20 = arith.constant dense<0.000000e+00> : vector<104x128xf32>
    %36 = tpu.matmul %33, %35, %cst_20 {dimension_numbers = #tpu.dot_dimension_numbers<[1], [0], [0], [1], [0, 0, 1, 1], [], []>} : vector<104x8xbf16>, vector<8x128xbf16>, vector<104x128xf32> -> vector<104x128xf32>
    %37 = arith.addf %31, %36 : vector<104x128xf32>
    %38 = vector.extract_strided_slice %2 {offsets = [20, 0], sizes = [104, 8], strides = [1, 1]} : vector<126x8xf32> to vector<104x8xf32>
    %39 = arith.truncf %38 : vector<104x8xf32> to vector<104x8xbf16>
    %c6 = arith.constant 6 : index
    %c0_21 = arith.constant 0 : index
    %c0_22 = arith.constant 0 : index
    %40 = vector.load %arg5[%c6, %c0_21, %c0_22] : memref<27x8x128xbf16, #tpu.memory_space<vmem>>, vector<1x8x128xbf16>
    %41 = vector.shape_cast %40 : vector<1x8x128xbf16> to vector<8x128xbf16>
    %cst_23 = arith.constant dense<0.000000e+00> : vector<104x128xf32>
    %42 = tpu.matmul %39, %41, %cst_23 {dimension_numbers = #tpu.dot_dimension_numbers<[1], [0], [0], [1], [0, 0, 1, 1], [], []>} : vector<104x8xbf16>, vector<8x128xbf16>, vector<104x128xf32> -> vector<104x128xf32>
    %43 = arith.addf %37, %42 : vector<104x128xf32>
    %44 = vector.extract_strided_slice %2 {offsets = [21, 0], sizes = [104, 8], strides = [1, 1]} : vector<126x8xf32> to vector<104x8xf32>
    %45 = arith.truncf %44 : vector<104x8xf32> to vector<104x8xbf16>
    %c7 = arith.constant 7 : index
    %c0_24 = arith.constant 0 : index
    %c0_25 = arith.constant 0 : index
    %46 = vector.load %arg5[%c7, %c0_24, %c0_25] : memref<27x8x128xbf16, #tpu.memory_space<vmem>>, vector<1x8x128xbf16>
    %47 = vector.shape_cast %46 : vector<1x8x128xbf16> to vector<8x128xbf16>
    %cst_26 = arith.constant dense<0.000000e+00> : vector<104x128xf32>
    %48 = tpu.matmul %45, %47, %cst_26 {dimension_numbers = #tpu.dot_dimension_numbers<[1], [0], [0], [1], [0, 0, 1, 1], [], []>} : vector<104x8xbf16>, vector<8x128xbf16>, vector<104x128xf32> -> vector<104x128xf32>
    %49 = arith.addf %43, %48 : vector<104x128xf32>
    %50 = vector.extract_strided_slice %2 {offsets = [22, 0], sizes = [104, 8], strides = [1, 1]} : vector<126x8xf32> to vector<104x8xf32>
    %51 = arith.truncf %50 : vector<104x8xf32> to vector<104x8xbf16>
    %c8 = arith.constant 8 : index
    %c0_27 = arith.constant 0 : index
    %c0_28 = arith.constant 0 : index
    %52 = vector.load %arg5[%c8, %c0_27, %c0_28] : memref<27x8x128xbf16, #tpu.memory_space<vmem>>, vector<1x8x128xbf16>
    %53 = vector.shape_cast %52 : vector<1x8x128xbf16> to vector<8x128xbf16>
    %cst_29 = arith.constant dense<0.000000e+00> : vector<104x128xf32>
    %54 = tpu.matmul %51, %53, %cst_29 {dimension_numbers = #tpu.dot_dimension_numbers<[1], [0], [0], [1], [0, 0, 1, 1], [], []>} : vector<104x8xbf16>, vector<8x128xbf16>, vector<104x128xf32> -> vector<104x128xf32>
    %55 = arith.addf %49, %54 : vector<104x128xf32>
    %c0_30 = arith.constant 0 : index
    %c0_31 = arith.constant 0 : index
    %c0_32 = arith.constant 0 : index
    %c0_33 = arith.constant 0 : index
    %56 = vector.load %arg3[%c0_30, %c0_31, %c0_32, %c0_33] : memref<1x1x126x8xbf16, #tpu.memory_space<vmem>>, vector<1x1x126x8xbf16>
    %57 = vector.shape_cast %56 : vector<1x1x126x8xbf16> to vector<126x8xbf16>
    %58 = arith.extf %57 : vector<126x8xbf16> to vector<126x8xf32>
    %59 = vector.extract_strided_slice %58 {offsets = [0, 0], sizes = [104, 8], strides = [1, 1]} : vector<126x8xf32> to vector<104x8xf32>
    %60 = arith.truncf %59 : vector<104x8xf32> to vector<104x8xbf16>
    %c9 = arith.constant 9 : index
    %c0_34 = arith.constant 0 : index
    %c0_35 = arith.constant 0 : index
    %61 = vector.load %arg5[%c9, %c0_34, %c0_35] : memref<27x8x128xbf16, #tpu.memory_space<vmem>>, vector<1x8x128xbf16>
    %62 = vector.shape_cast %61 : vector<1x8x128xbf16> to vector<8x128xbf16>
    %cst_36 = arith.constant dense<0.000000e+00> : vector<104x128xf32>
    %63 = tpu.matmul %60, %62, %cst_36 {dimension_numbers = #tpu.dot_dimension_numbers<[1], [0], [0], [1], [0, 0, 1, 1], [], []>} : vector<104x8xbf16>, vector<8x128xbf16>, vector<104x128xf32> -> vector<104x128xf32>
    %64 = arith.addf %55, %63 : vector<104x128xf32>
    %65 = vector.extract_strided_slice %58 {offsets = [1, 0], sizes = [104, 8], strides = [1, 1]} : vector<126x8xf32> to vector<104x8xf32>
    %66 = arith.truncf %65 : vector<104x8xf32> to vector<104x8xbf16>
    %c10 = arith.constant 10 : index
    %c0_37 = arith.constant 0 : index
    %c0_38 = arith.constant 0 : index
    %67 = vector.load %arg5[%c10, %c0_37, %c0_38] : memref<27x8x128xbf16, #tpu.memory_space<vmem>>, vector<1x8x128xbf16>
    %68 = vector.shape_cast %67 : vector<1x8x128xbf16> to vector<8x128xbf16>
    %cst_39 = arith.constant dense<0.000000e+00> : vector<104x128xf32>
    %69 = tpu.matmul %66, %68, %cst_39 {dimension_numbers = #tpu.dot_dimension_numbers<[1], [0], [0], [1], [0, 0, 1, 1], [], []>} : vector<104x8xbf16>, vector<8x128xbf16>, vector<104x128xf32> -> vector<104x128xf32>
    %70 = arith.addf %64, %69 : vector<104x128xf32>
    %71 = vector.extract_strided_slice %58 {offsets = [2, 0], sizes = [104, 8], strides = [1, 1]} : vector<126x8xf32> to vector<104x8xf32>
    %72 = arith.truncf %71 : vector<104x8xf32> to vector<104x8xbf16>
    %c11 = arith.constant 11 : index
    %c0_40 = arith.constant 0 : index
    %c0_41 = arith.constant 0 : index
    %73 = vector.load %arg5[%c11, %c0_40, %c0_41] : memref<27x8x128xbf16, #tpu.memory_space<vmem>>, vector<1x8x128xbf16>
    %74 = vector.shape_cast %73 : vector<1x8x128xbf16> to vector<8x128xbf16>
    %cst_42 = arith.constant dense<0.000000e+00> : vector<104x128xf32>
    %75 = tpu.matmul %72, %74, %cst_42 {dimension_numbers = #tpu.dot_dimension_numbers<[1], [0], [0], [1], [0, 0, 1, 1], [], []>} : vector<104x8xbf16>, vector<8x128xbf16>, vector<104x128xf32> -> vector<104x128xf32>
    %76 = arith.addf %70, %75 : vector<104x128xf32>
    %77 = vector.extract_strided_slice %58 {offsets = [10, 0], sizes = [104, 8], strides = [1, 1]} : vector<126x8xf32> to vector<104x8xf32>
    %78 = arith.truncf %77 : vector<104x8xf32> to vector<104x8xbf16>
    %c12 = arith.constant 12 : index
    %c0_43 = arith.constant 0 : index
    %c0_44 = arith.constant 0 : index
    %79 = vector.load %arg5[%c12, %c0_43, %c0_44] : memref<27x8x128xbf16, #tpu.memory_space<vmem>>, vector<1x8x128xbf16>
    %80 = vector.shape_cast %79 : vector<1x8x128xbf16> to vector<8x128xbf16>
    %cst_45 = arith.constant dense<0.000000e+00> : vector<104x128xf32>
    %81 = tpu.matmul %78, %80, %cst_45 {dimension_numbers = #tpu.dot_dimension_numbers<[1], [0], [0], [1], [0, 0, 1, 1], [], []>} : vector<104x8xbf16>, vector<8x128xbf16>, vector<104x128xf32> -> vector<104x128xf32>
    %82 = arith.addf %76, %81 : vector<104x128xf32>
    %83 = vector.extract_strided_slice %58 {offsets = [11, 0], sizes = [104, 8], strides = [1, 1]} : vector<126x8xf32> to vector<104x8xf32>
    %84 = arith.truncf %83 : vector<104x8xf32> to vector<104x8xbf16>
    %c13 = arith.constant 13 : index
    %c0_46 = arith.constant 0 : index
    %c0_47 = arith.constant 0 : index
    %85 = vector.load %arg5[%c13, %c0_46, %c0_47] : memref<27x8x128xbf16, #tpu.memory_space<vmem>>, vector<1x8x128xbf16>
    %86 = vector.shape_cast %85 : vector<1x8x128xbf16> to vector<8x128xbf16>
    %cst_48 = arith.constant dense<0.000000e+00> : vector<104x128xf32>
    %87 = tpu.matmul %84, %86, %cst_48 {dimension_numbers = #tpu.dot_dimension_numbers<[1], [0], [0], [1], [0, 0, 1, 1], [], []>} : vector<104x8xbf16>, vector<8x128xbf16>, vector<104x128xf32> -> vector<104x128xf32>
    %88 = arith.addf %82, %87 : vector<104x128xf32>
    %89 = vector.extract_strided_slice %58 {offsets = [12, 0], sizes = [104, 8], strides = [1, 1]} : vector<126x8xf32> to vector<104x8xf32>
    %90 = arith.truncf %89 : vector<104x8xf32> to vector<104x8xbf16>
    %c14 = arith.constant 14 : index
    %c0_49 = arith.constant 0 : index
    %c0_50 = arith.constant 0 : index
    %91 = vector.load %arg5[%c14, %c0_49, %c0_50] : memref<27x8x128xbf16, #tpu.memory_space<vmem>>, vector<1x8x128xbf16>
    %92 = vector.shape_cast %91 : vector<1x8x128xbf16> to vector<8x128xbf16>
    %cst_51 = arith.constant dense<0.000000e+00> : vector<104x128xf32>
    %93 = tpu.matmul %90, %92, %cst_51 {dimension_numbers = #tpu.dot_dimension_numbers<[1], [0], [0], [1], [0, 0, 1, 1], [], []>} : vector<104x8xbf16>, vector<8x128xbf16>, vector<104x128xf32> -> vector<104x128xf32>
    %94 = arith.addf %88, %93 : vector<104x128xf32>
    %95 = vector.extract_strided_slice %58 {offsets = [20, 0], sizes = [104, 8], strides = [1, 1]} : vector<126x8xf32> to vector<104x8xf32>
    %96 = arith.truncf %95 : vector<104x8xf32> to vector<104x8xbf16>
    %c15 = arith.constant 15 : index
    %c0_52 = arith.constant 0 : index
    %c0_53 = arith.constant 0 : index
    %97 = vector.load %arg5[%c15, %c0_52, %c0_53] : memref<27x8x128xbf16, #tpu.memory_space<vmem>>, vector<1x8x128xbf16>
    %98 = vector.shape_cast %97 : vector<1x8x128xbf16> to vector<8x128xbf16>
    %cst_54 = arith.constant dense<0.000000e+00> : vector<104x128xf32>
    %99 = tpu.matmul %96, %98, %cst_54 {dimension_numbers = #tpu.dot_dimension_numbers<[1], [0], [0], [1], [0, 0, 1, 1], [], []>} : vector<104x8xbf16>, vector<8x128xbf16>, vector<104x128xf32> -> vector<104x128xf32>
    %100 = arith.addf %94, %99 : vector<104x128xf32>
    %101 = vector.extract_strided_slice %58 {offsets = [21, 0], sizes = [104, 8], strides = [1, 1]} : vector<126x8xf32> to vector<104x8xf32>
    %102 = arith.truncf %101 : vector<104x8xf32> to vector<104x8xbf16>
    %c16 = arith.constant 16 : index
    %c0_55 = arith.constant 0 : index
    %c0_56 = arith.constant 0 : index
    %103 = vector.load %arg5[%c16, %c0_55, %c0_56] : memref<27x8x128xbf16, #tpu.memory_space<vmem>>, vector<1x8x128xbf16>
    %104 = vector.shape_cast %103 : vector<1x8x128xbf16> to vector<8x128xbf16>
    %cst_57 = arith.constant dense<0.000000e+00> : vector<104x128xf32>
    %105 = tpu.matmul %102, %104, %cst_57 {dimension_numbers = #tpu.dot_dimension_numbers<[1], [0], [0], [1], [0, 0, 1, 1], [], []>} : vector<104x8xbf16>, vector<8x128xbf16>, vector<104x128xf32> -> vector<104x128xf32>
    %106 = arith.addf %100, %105 : vector<104x128xf32>
    %107 = vector.extract_strided_slice %58 {offsets = [22, 0], sizes = [104, 8], strides = [1, 1]} : vector<126x8xf32> to vector<104x8xf32>
    %108 = arith.truncf %107 : vector<104x8xf32> to vector<104x8xbf16>
    %c17 = arith.constant 17 : index
    %c0_58 = arith.constant 0 : index
    %c0_59 = arith.constant 0 : index
    %109 = vector.load %arg5[%c17, %c0_58, %c0_59] : memref<27x8x128xbf16, #tpu.memory_space<vmem>>, vector<1x8x128xbf16>
    %110 = vector.shape_cast %109 : vector<1x8x128xbf16> to vector<8x128xbf16>
    %cst_60 = arith.constant dense<0.000000e+00> : vector<104x128xf32>
    %111 = tpu.matmul %108, %110, %cst_60 {dimension_numbers = #tpu.dot_dimension_numbers<[1], [0], [0], [1], [0, 0, 1, 1], [], []>} : vector<104x8xbf16>, vector<8x128xbf16>, vector<104x128xf32> -> vector<104x128xf32>
    %112 = arith.addf %106, %111 : vector<104x128xf32>
    %c0_61 = arith.constant 0 : index
    %c0_62 = arith.constant 0 : index
    %c0_63 = arith.constant 0 : index
    %c0_64 = arith.constant 0 : index
    %113 = vector.load %arg4[%c0_61, %c0_62, %c0_63, %c0_64] : memref<1x1x126x8xbf16, #tpu.memory_space<vmem>>, vector<1x1x126x8xbf16>
    %114 = vector.shape_cast %113 : vector<1x1x126x8xbf16> to vector<126x8xbf16>
    %115 = arith.extf %114 : vector<126x8xbf16> to vector<126x8xf32>
    %116 = vector.extract_strided_slice %115 {offsets = [0, 0], sizes = [104, 8], strides = [1, 1]} : vector<126x8xf32> to vector<104x8xf32>
    %117 = arith.truncf %116 : vector<104x8xf32> to vector<104x8xbf16>
    %c18 = arith.constant 18 : index
    %c0_65 = arith.constant 0 : index
    %c0_66 = arith.constant 0 : index
    %118 = vector.load %arg5[%c18, %c0_65, %c0_66] : memref<27x8x128xbf16, #tpu.memory_space<vmem>>, vector<1x8x128xbf16>
    %119 = vector.shape_cast %118 : vector<1x8x128xbf16> to vector<8x128xbf16>
    %cst_67 = arith.constant dense<0.000000e+00> : vector<104x128xf32>
    %120 = tpu.matmul %117, %119, %cst_67 {dimension_numbers = #tpu.dot_dimension_numbers<[1], [0], [0], [1], [0, 0, 1, 1], [], []>} : vector<104x8xbf16>, vector<8x128xbf16>, vector<104x128xf32> -> vector<104x128xf32>
    %121 = arith.addf %112, %120 : vector<104x128xf32>
    %122 = vector.extract_strided_slice %115 {offsets = [1, 0], sizes = [104, 8], strides = [1, 1]} : vector<126x8xf32> to vector<104x8xf32>
    %123 = arith.truncf %122 : vector<104x8xf32> to vector<104x8xbf16>
    %c19 = arith.constant 19 : index
    %c0_68 = arith.constant 0 : index
    %c0_69 = arith.constant 0 : index
    %124 = vector.load %arg5[%c19, %c0_68, %c0_69] : memref<27x8x128xbf16, #tpu.memory_space<vmem>>, vector<1x8x128xbf16>
    %125 = vector.shape_cast %124 : vector<1x8x128xbf16> to vector<8x128xbf16>
    %cst_70 = arith.constant dense<0.000000e+00> : vector<104x128xf32>
    %126 = tpu.matmul %123, %125, %cst_70 {dimension_numbers = #tpu.dot_dimension_numbers<[1], [0], [0], [1], [0, 0, 1, 1], [], []>} : vector<104x8xbf16>, vector<8x128xbf16>, vector<104x128xf32> -> vector<104x128xf32>
    %127 = arith.addf %121, %126 : vector<104x128xf32>
    %128 = vector.extract_strided_slice %115 {offsets = [2, 0], sizes = [104, 8], strides = [1, 1]} : vector<126x8xf32> to vector<104x8xf32>
    %129 = arith.truncf %128 : vector<104x8xf32> to vector<104x8xbf16>
    %c20 = arith.constant 20 : index
    %c0_71 = arith.constant 0 : index
    %c0_72 = arith.constant 0 : index
    %130 = vector.load %arg5[%c20, %c0_71, %c0_72] : memref<27x8x128xbf16, #tpu.memory_space<vmem>>, vector<1x8x128xbf16>
    %131 = vector.shape_cast %130 : vector<1x8x128xbf16> to vector<8x128xbf16>
    %cst_73 = arith.constant dense<0.000000e+00> : vector<104x128xf32>
    %132 = tpu.matmul %129, %131, %cst_73 {dimension_numbers = #tpu.dot_dimension_numbers<[1], [0], [0], [1], [0, 0, 1, 1], [], []>} : vector<104x8xbf16>, vector<8x128xbf16>, vector<104x128xf32> -> vector<104x128xf32>
    %133 = arith.addf %127, %132 : vector<104x128xf32>
    %134 = vector.extract_strided_slice %115 {offsets = [10, 0], sizes = [104, 8], strides = [1, 1]} : vector<126x8xf32> to vector<104x8xf32>
    %135 = arith.truncf %134 : vector<104x8xf32> to vector<104x8xbf16>
    %c21 = arith.constant 21 : index
    %c0_74 = arith.constant 0 : index
    %c0_75 = arith.constant 0 : index
    %136 = vector.load %arg5[%c21, %c0_74, %c0_75] : memref<27x8x128xbf16, #tpu.memory_space<vmem>>, vector<1x8x128xbf16>
    %137 = vector.shape_cast %136 : vector<1x8x128xbf16> to vector<8x128xbf16>
    %cst_76 = arith.constant dense<0.000000e+00> : vector<104x128xf32>
    %138 = tpu.matmul %135, %137, %cst_76 {dimension_numbers = #tpu.dot_dimension_numbers<[1], [0], [0], [1], [0, 0, 1, 1], [], []>} : vector<104x8xbf16>, vector<8x128xbf16>, vector<104x128xf32> -> vector<104x128xf32>
    %139 = arith.addf %133, %138 : vector<104x128xf32>
    %140 = vector.extract_strided_slice %115 {offsets = [11, 0], sizes = [104, 8], strides = [1, 1]} : vector<126x8xf32> to vector<104x8xf32>
    %141 = arith.truncf %140 : vector<104x8xf32> to vector<104x8xbf16>
    %c22 = arith.constant 22 : index
    %c0_77 = arith.constant 0 : index
    %c0_78 = arith.constant 0 : index
    %142 = vector.load %arg5[%c22, %c0_77, %c0_78] : memref<27x8x128xbf16, #tpu.memory_space<vmem>>, vector<1x8x128xbf16>
    %143 = vector.shape_cast %142 : vector<1x8x128xbf16> to vector<8x128xbf16>
    %cst_79 = arith.constant dense<0.000000e+00> : vector<104x128xf32>
    %144 = tpu.matmul %141, %143, %cst_79 {dimension_numbers = #tpu.dot_dimension_numbers<[1], [0], [0], [1], [0, 0, 1, 1], [], []>} : vector<104x8xbf16>, vector<8x128xbf16>, vector<104x128xf32> -> vector<104x128xf32>
    %145 = arith.addf %139, %144 : vector<104x128xf32>
    %146 = vector.extract_strided_slice %115 {offsets = [12, 0], sizes = [104, 8], strides = [1, 1]} : vector<126x8xf32> to vector<104x8xf32>
    %147 = arith.truncf %146 : vector<104x8xf32> to vector<104x8xbf16>
    %c23 = arith.constant 23 : index
    %c0_80 = arith.constant 0 : index
    %c0_81 = arith.constant 0 : index
    %148 = vector.load %arg5[%c23, %c0_80, %c0_81] : memref<27x8x128xbf16, #tpu.memory_space<vmem>>, vector<1x8x128xbf16>
    %149 = vector.shape_cast %148 : vector<1x8x128xbf16> to vector<8x128xbf16>
    %cst_82 = arith.constant dense<0.000000e+00> : vector<104x128xf32>
    %150 = tpu.matmul %147, %149, %cst_82 {dimension_numbers = #tpu.dot_dimension_numbers<[1], [0], [0], [1], [0, 0, 1, 1], [], []>} : vector<104x8xbf16>, vector<8x128xbf16>, vector<104x128xf32> -> vector<104x128xf32>
    %151 = arith.addf %145, %150 : vector<104x128xf32>
    %152 = vector.extract_strided_slice %115 {offsets = [20, 0], sizes = [104, 8], strides = [1, 1]} : vector<126x8xf32> to vector<104x8xf32>
    %153 = arith.truncf %152 : vector<104x8xf32> to vector<104x8xbf16>
    %c24 = arith.constant 24 : index
    %c0_83 = arith.constant 0 : index
    %c0_84 = arith.constant 0 : index
    %154 = vector.load %arg5[%c24, %c0_83, %c0_84] : memref<27x8x128xbf16, #tpu.memory_space<vmem>>, vector<1x8x128xbf16>
    %155 = vector.shape_cast %154 : vector<1x8x128xbf16> to vector<8x128xbf16>
    %cst_85 = arith.constant dense<0.000000e+00> : vector<104x128xf32>
    %156 = tpu.matmul %153, %155, %cst_85 {dimension_numbers = #tpu.dot_dimension_numbers<[1], [0], [0], [1], [0, 0, 1, 1], [], []>} : vector<104x8xbf16>, vector<8x128xbf16>, vector<104x128xf32> -> vector<104x128xf32>
    %157 = arith.addf %151, %156 : vector<104x128xf32>
    %158 = vector.extract_strided_slice %115 {offsets = [21, 0], sizes = [104, 8], strides = [1, 1]} : vector<126x8xf32> to vector<104x8xf32>
    %159 = arith.truncf %158 : vector<104x8xf32> to vector<104x8xbf16>
    %c25 = arith.constant 25 : index
    %c0_86 = arith.constant 0 : index
    %c0_87 = arith.constant 0 : index
    %160 = vector.load %arg5[%c25, %c0_86, %c0_87] : memref<27x8x128xbf16, #tpu.memory_space<vmem>>, vector<1x8x128xbf16>
    %161 = vector.shape_cast %160 : vector<1x8x128xbf16> to vector<8x128xbf16>
    %cst_88 = arith.constant dense<0.000000e+00> : vector<104x128xf32>
    %162 = tpu.matmul %159, %161, %cst_88 {dimension_numbers = #tpu.dot_dimension_numbers<[1], [0], [0], [1], [0, 0, 1, 1], [], []>} : vector<104x8xbf16>, vector<8x128xbf16>, vector<104x128xf32> -> vector<104x128xf32>
    %163 = arith.addf %157, %162 : vector<104x128xf32>
    %164 = vector.extract_strided_slice %115 {offsets = [22, 0], sizes = [104, 8], strides = [1, 1]} : vector<126x8xf32> to vector<104x8xf32>
    %165 = arith.truncf %164 : vector<104x8xf32> to vector<104x8xbf16>
    %c26 = arith.constant 26 : index
    %c0_89 = arith.constant 0 : index
    %c0_90 = arith.constant 0 : index
    %166 = vector.load %arg5[%c26, %c0_89, %c0_90] : memref<27x8x128xbf16, #tpu.memory_space<vmem>>, vector<1x8x128xbf16>
    %167 = vector.shape_cast %166 : vector<1x8x128xbf16> to vector<8x128xbf16>
    %cst_91 = arith.constant dense<0.000000e+00> : vector<104x128xf32>
    %168 = tpu.matmul %165, %167, %cst_91 {dimension_numbers = #tpu.dot_dimension_numbers<[1], [0], [0], [1], [0, 0, 1, 1], [], []>} : vector<104x8xbf16>, vector<8x128xbf16>, vector<104x128xf32> -> vector<104x128xf32>
    %169 = arith.addf %163, %168 : vector<104x128xf32>
    %c0_92 = arith.constant 0 : index
    %c0_93 = arith.constant 0 : index
    %170 = vector.load %arg6[%c0_92, %c0_93] : memref<1x128xf32, #tpu.memory_space<vmem>>, vector<1x128xf32>
    %171 = vector.broadcast %170 : vector<1x128xf32> to vector<104x128xf32>
    %172 = arith.addf %169, %171 : vector<104x128xf32>
    %cst_94 = arith.constant 0.000000e+00 : f32
    %173 = vector.broadcast %cst_94 : f32 to vector<104x128xf32>
    %174 = arith.cmpf oge, %172, %173 : vector<104x128xf32>
    %cst_95 = arith.constant 2.000000e-01 : f32
    %175 = vector.broadcast %cst_95 : f32 to vector<104x128xf32>
    %176 = arith.mulf %175, %172 : vector<104x128xf32>
    %177 = arith.select %174, %172, %176 : vector<104x128xi1>, vector<104x128xf32>
    %c0_96 = arith.constant 0 : index
    %c0_97 = arith.constant 0 : index
    %178 = vector.load %arg7[%c0_96, %c0_97] : memref<1x128xf32, #tpu.memory_space<vmem>>, vector<1x128xf32>
    %179 = vector.broadcast %178 : vector<1x128xf32> to vector<104x128xf32>
    %180 = arith.mulf %177, %179 : vector<104x128xf32>
    %c0_98 = arith.constant 0 : index
    %c0_99 = arith.constant 0 : index
    %181 = vector.load %arg8[%c0_98, %c0_99] : memref<1x128xf32, #tpu.memory_space<vmem>>, vector<1x128xf32>
    %182 = vector.broadcast %181 : vector<1x128xf32> to vector<104x128xf32>
    %183 = arith.addf %180, %182 : vector<104x128xf32>
    %184 = vector.extract_strided_slice %183 {offsets = [0, 0], sizes = [104, 16], strides = [1, 1]} : vector<104x128xf32> to vector<104x16xf32>
    %c0_100 = arith.constant 0 : index
    %c0_101 = arith.constant 0 : index
    %c0_102 = arith.constant 0 : index
    %c0_103 = arith.constant 0 : index
    %185 = vector.load %arg9[%c0_100, %c0_101, %c0_102, %c0_103] : memref<1x1x104x16xf32, #tpu.memory_space<vmem>>, vector<1x1x104x16xf32>
    %186 = vector.shape_cast %185 : vector<1x1x104x16xf32> to vector<104x16xf32>
    %187 = vector.shape_cast %184 : vector<104x16xf32> to vector<1x1x104x16xf32>
    tpu.vector_store %arg9[%c0_100, %c0_101, %c0_102, %c0_103], %187 {strides = array<i32>} : memref<1x1x104x16xf32, #tpu.memory_space<vmem>>, vector<1x1x104x16xf32>,
    return
  }
  func.func @transform_0(%arg0: i32, %arg1: i32) -> (i32, i32, i32, i32) {
    %c0_i32 = arith.constant 0 : i32
    %0 = arith.addi %arg1, %c0_i32 : i32
    %c0_i32_0 = arith.constant 0 : i32
    %c0_i32_1 = arith.constant 0 : i32
    %c0_i32_2 = arith.constant 0 : i32
    return %arg0, %0, %c0_i32_0, %c0_i32_1 : i32, i32, i32, i32
  }
  func.func @transform_1(%arg0: i32, %arg1: i32) -> (i32, i32, i32, i32) {
    %c1_i32 = arith.constant 1 : i32
    %0 = arith.addi %arg1, %c1_i32 : i32
    %c0_i32 = arith.constant 0 : i32
    %c0_i32_0 = arith.constant 0 : i32
    %c0_i32_1 = arith.constant 0 : i32
    return %arg0, %0, %c0_i32, %c0_i32_0 : i32, i32, i32, i32
  }
  func.func @transform_2(%arg0: i32, %arg1: i32) -> (i32, i32, i32, i32) {
    %c2_i32 = arith.constant 2 : i32
    %0 = arith.addi %arg1, %c2_i32 : i32
    %c0_i32 = arith.constant 0 : i32
    %c0_i32_0 = arith.constant 0 : i32
    %c0_i32_1 = arith.constant 0 : i32
    return %arg0, %0, %c0_i32, %c0_i32_0 : i32, i32, i32, i32
  }
  func.func @transform_3(%arg0: i32, %arg1: i32) -> (i32, i32, i32) {
    %c0_i32 = arith.constant 0 : i32
    %c0_i32_0 = arith.constant 0 : i32
    %c0_i32_1 = arith.constant 0 : i32
    %c0_i32_2 = arith.constant 0 : i32
    return %c0_i32, %c0_i32_0, %c0_i32_1 : i32, i32, i32
  }
  func.func @transform_4(%arg0: i32, %arg1: i32) -> (i32, i32) {
    %c0_i32 = arith.constant 0 : i32
    %c0_i32_0 = arith.constant 0 : i32
    %c0_i32_1 = arith.constant 0 : i32
    return %c0_i32, %c0_i32_0 : i32, i32
  }
  func.func @transform_5(%arg0: i32, %arg1: i32) -> (i32, i32) {
    %c0_i32 = arith.constant 0 : i32
    %c0_i32_0 = arith.constant 0 : i32
    %c0_i32_1 = arith.constant 0 : i32
    return %c0_i32, %c0_i32_0 : i32, i32
  }
  func.func @transform_6(%arg0: i32, %arg1: i32) -> (i32, i32) {
    %c0_i32 = arith.constant 0 : i32
    %c0_i32_0 = arith.constant 0 : i32
    %c0_i32_1 = arith.constant 0 : i32
    return %c0_i32, %c0_i32_0 : i32, i32
  }
  func.func @transform_7(%arg0: i32, %arg1: i32) -> (i32, i32, i32, i32) {
    %c0_i32 = arith.constant 0 : i32
    %c0_i32_0 = arith.constant 0 : i32
    %c0_i32_1 = arith.constant 0 : i32
    return %arg0, %arg1, %c0_i32, %c0_i32_0 : i32, i32, i32, i32
  }
}

module attributes {stable_mosaic.version = 11 : i64} {
  func.func @kernel(%arg0: i32, %arg1: i32, %arg2: memref<1x1x126x8xbf16, #tpu.memory_space<vmem>>, %arg3: memref<1x1x126x8xbf16, #tpu.memory_space<vmem>>, %arg4: memref<1x1x126x8xbf16, #tpu.memory_space<vmem>>, %arg5: memref<27x8x128xbf16, #tpu.memory_space<vmem>>, %arg6: memref<1x128xf32, #tpu.memory_space<vmem>>, %arg7: memref<1x128xf32, #tpu.memory_space<vmem>>, %arg8: memref<104x1xf32, #tpu.memory_space<vmem>>, %arg9: memref<1x1x8x128xf32, #tpu.memory_space<vmem>>, %arg10: memref<1x1x8x128xf32, #tpu.memory_space<vmem>>) attributes {dimension_semantics = [#tpu.dimension_semantics<parallel>, #tpu.dimension_semantics<parallel>], iteration_bounds = array<i64: 2, 8>, scalar_prefetch = 0 : i64, scratch_operands = 0 : i64, tpu.core_type = #tpu.core_type<tc>, window_params = [{transform_indices = @transform_0, window_bounds = array<i64: 1, 1, 126, 8>}, {transform_indices = @transform_1, window_bounds = array<i64: 1, 1, 126, 8>}, {transform_indices = @transform_2, window_bounds = array<i64: 1, 1, 126, 8>}, {pipeline_mode = #tpu.pipeline_mode<synchronous>, transform_indices = @transform_3, window_bounds = array<i64: 27, 8, 128>}, {pipeline_mode = #tpu.pipeline_mode<synchronous>, transform_indices = @transform_4, window_bounds = array<i64: 1, 128>}, {pipeline_mode = #tpu.pipeline_mode<synchronous>, transform_indices = @transform_5, window_bounds = array<i64: 1, 128>}, {pipeline_mode = #tpu.pipeline_mode<synchronous>, transform_indices = @transform_6, window_bounds = array<i64: 104, 1>}, {transform_indices = @transform_7, window_bounds = array<i64: 1, 1, 8, 128>}, {transform_indices = @transform_8, window_bounds = array<i64: 1, 1, 8, 128>}]} {
    %c0 = arith.constant 0 : index
    %c0_0 = arith.constant 0 : index
    %c0_1 = arith.constant 0 : index
    %c0_2 = arith.constant 0 : index
    %0 = vector.load %arg2[%c0, %c0_0, %c0_1, %c0_2] : memref<1x1x126x8xbf16, #tpu.memory_space<vmem>>, vector<1x1x126x8xbf16>
    %1 = vector.shape_cast %0 : vector<1x1x126x8xbf16> to vector<126x8xbf16>
    %2 = arith.extf %1 : vector<126x8xbf16> to vector<126x8xf32>
    %3 = vector.extract_strided_slice %2 {offsets = [0, 0], sizes = [104, 8], strides = [1, 1]} : vector<126x8xf32> to vector<104x8xf32>
    %4 = arith.truncf %3 : vector<104x8xf32> to vector<104x8xbf16>
    %c0_3 = arith.constant 0 : index
    %c0_4 = arith.constant 0 : index
    %c0_5 = arith.constant 0 : index
    %5 = vector.load %arg5[%c0_3, %c0_4, %c0_5] : memref<27x8x128xbf16, #tpu.memory_space<vmem>>, vector<1x8x128xbf16>
    %6 = vector.shape_cast %5 : vector<1x8x128xbf16> to vector<8x128xbf16>
    %cst = arith.constant dense<0.000000e+00> : vector<104x128xf32>
    %7 = tpu.matmul %4, %6, %cst {dimension_numbers = #tpu.dot_dimension_numbers<[1], [0], [0], [1], [0, 0, 1, 1], [], []>} : vector<104x8xbf16>, vector<8x128xbf16>, vector<104x128xf32> -> vector<104x128xf32>
    %8 = vector.extract_strided_slice %2 {offsets = [1, 0], sizes = [104, 8], strides = [1, 1]} : vector<126x8xf32> to vector<104x8xf32>
    %9 = arith.truncf %8 : vector<104x8xf32> to vector<104x8xbf16>
    %c1 = arith.constant 1 : index
    %c0_6 = arith.constant 0 : index
    %c0_7 = arith.constant 0 : index
    %10 = vector.load %arg5[%c1, %c0_6, %c0_7] : memref<27x8x128xbf16, #tpu.memory_space<vmem>>, vector<1x8x128xbf16>
    %11 = vector.shape_cast %10 : vector<1x8x128xbf16> to vector<8x128xbf16>
    %cst_8 = arith.constant dense<0.000000e+00> : vector<104x128xf32>
    %12 = tpu.matmul %9, %11, %cst_8 {dimension_numbers = #tpu.dot_dimension_numbers<[1], [0], [0], [1], [0, 0, 1, 1], [], []>} : vector<104x8xbf16>, vector<8x128xbf16>, vector<104x128xf32> -> vector<104x128xf32>
    %13 = arith.addf %7, %12 : vector<104x128xf32>
    %14 = vector.extract_strided_slice %2 {offsets = [2, 0], sizes = [104, 8], strides = [1, 1]} : vector<126x8xf32> to vector<104x8xf32>
    %15 = arith.truncf %14 : vector<104x8xf32> to vector<104x8xbf16>
    %c2 = arith.constant 2 : index
    %c0_9 = arith.constant 0 : index
    %c0_10 = arith.constant 0 : index
    %16 = vector.load %arg5[%c2, %c0_9, %c0_10] : memref<27x8x128xbf16, #tpu.memory_space<vmem>>, vector<1x8x128xbf16>
    %17 = vector.shape_cast %16 : vector<1x8x128xbf16> to vector<8x128xbf16>
    %cst_11 = arith.constant dense<0.000000e+00> : vector<104x128xf32>
    %18 = tpu.matmul %15, %17, %cst_11 {dimension_numbers = #tpu.dot_dimension_numbers<[1], [0], [0], [1], [0, 0, 1, 1], [], []>} : vector<104x8xbf16>, vector<8x128xbf16>, vector<104x128xf32> -> vector<104x128xf32>
    %19 = arith.addf %13, %18 : vector<104x128xf32>
    %20 = vector.extract_strided_slice %2 {offsets = [10, 0], sizes = [104, 8], strides = [1, 1]} : vector<126x8xf32> to vector<104x8xf32>
    %21 = arith.truncf %20 : vector<104x8xf32> to vector<104x8xbf16>
    %c3 = arith.constant 3 : index
    %c0_12 = arith.constant 0 : index
    %c0_13 = arith.constant 0 : index
    %22 = vector.load %arg5[%c3, %c0_12, %c0_13] : memref<27x8x128xbf16, #tpu.memory_space<vmem>>, vector<1x8x128xbf16>
    %23 = vector.shape_cast %22 : vector<1x8x128xbf16> to vector<8x128xbf16>
    %cst_14 = arith.constant dense<0.000000e+00> : vector<104x128xf32>
    %24 = tpu.matmul %21, %23, %cst_14 {dimension_numbers = #tpu.dot_dimension_numbers<[1], [0], [0], [1], [0, 0, 1, 1], [], []>} : vector<104x8xbf16>, vector<8x128xbf16>, vector<104x128xf32> -> vector<104x128xf32>
    %25 = arith.addf %19, %24 : vector<104x128xf32>
    %26 = vector.extract_strided_slice %2 {offsets = [11, 0], sizes = [104, 8], strides = [1, 1]} : vector<126x8xf32> to vector<104x8xf32>
    %27 = arith.truncf %26 : vector<104x8xf32> to vector<104x8xbf16>
    %c4 = arith.constant 4 : index
    %c0_15 = arith.constant 0 : index
    %c0_16 = arith.constant 0 : index
    %28 = vector.load %arg5[%c4, %c0_15, %c0_16] : memref<27x8x128xbf16, #tpu.memory_space<vmem>>, vector<1x8x128xbf16>
    %29 = vector.shape_cast %28 : vector<1x8x128xbf16> to vector<8x128xbf16>
    %cst_17 = arith.constant dense<0.000000e+00> : vector<104x128xf32>
    %30 = tpu.matmul %27, %29, %cst_17 {dimension_numbers = #tpu.dot_dimension_numbers<[1], [0], [0], [1], [0, 0, 1, 1], [], []>} : vector<104x8xbf16>, vector<8x128xbf16>, vector<104x128xf32> -> vector<104x128xf32>
    %31 = arith.addf %25, %30 : vector<104x128xf32>
    %32 = vector.extract_strided_slice %2 {offsets = [12, 0], sizes = [104, 8], strides = [1, 1]} : vector<126x8xf32> to vector<104x8xf32>
    %33 = arith.truncf %32 : vector<104x8xf32> to vector<104x8xbf16>
    %c5 = arith.constant 5 : index
    %c0_18 = arith.constant 0 : index
    %c0_19 = arith.constant 0 : index
    %34 = vector.load %arg5[%c5, %c0_18, %c0_19] : memref<27x8x128xbf16, #tpu.memory_space<vmem>>, vector<1x8x128xbf16>
    %35 = vector.shape_cast %34 : vector<1x8x128xbf16> to vector<8x128xbf16>
    %cst_20 = arith.constant dense<0.000000e+00> : vector<104x128xf32>
    %36 = tpu.matmul %33, %35, %cst_20 {dimension_numbers = #tpu.dot_dimension_numbers<[1], [0], [0], [1], [0, 0, 1, 1], [], []>} : vector<104x8xbf16>, vector<8x128xbf16>, vector<104x128xf32> -> vector<104x128xf32>
    %37 = arith.addf %31, %36 : vector<104x128xf32>
    %38 = vector.extract_strided_slice %2 {offsets = [20, 0], sizes = [104, 8], strides = [1, 1]} : vector<126x8xf32> to vector<104x8xf32>
    %39 = arith.truncf %38 : vector<104x8xf32> to vector<104x8xbf16>
    %c6 = arith.constant 6 : index
    %c0_21 = arith.constant 0 : index
    %c0_22 = arith.constant 0 : index
    %40 = vector.load %arg5[%c6, %c0_21, %c0_22] : memref<27x8x128xbf16, #tpu.memory_space<vmem>>, vector<1x8x128xbf16>
    %41 = vector.shape_cast %40 : vector<1x8x128xbf16> to vector<8x128xbf16>
    %cst_23 = arith.constant dense<0.000000e+00> : vector<104x128xf32>
    %42 = tpu.matmul %39, %41, %cst_23 {dimension_numbers = #tpu.dot_dimension_numbers<[1], [0], [0], [1], [0, 0, 1, 1], [], []>} : vector<104x8xbf16>, vector<8x128xbf16>, vector<104x128xf32> -> vector<104x128xf32>
    %43 = arith.addf %37, %42 : vector<104x128xf32>
    %44 = vector.extract_strided_slice %2 {offsets = [21, 0], sizes = [104, 8], strides = [1, 1]} : vector<126x8xf32> to vector<104x8xf32>
    %45 = arith.truncf %44 : vector<104x8xf32> to vector<104x8xbf16>
    %c7 = arith.constant 7 : index
    %c0_24 = arith.constant 0 : index
    %c0_25 = arith.constant 0 : index
    %46 = vector.load %arg5[%c7, %c0_24, %c0_25] : memref<27x8x128xbf16, #tpu.memory_space<vmem>>, vector<1x8x128xbf16>
    %47 = vector.shape_cast %46 : vector<1x8x128xbf16> to vector<8x128xbf16>
    %cst_26 = arith.constant dense<0.000000e+00> : vector<104x128xf32>
    %48 = tpu.matmul %45, %47, %cst_26 {dimension_numbers = #tpu.dot_dimension_numbers<[1], [0], [0], [1], [0, 0, 1, 1], [], []>} : vector<104x8xbf16>, vector<8x128xbf16>, vector<104x128xf32> -> vector<104x128xf32>
    %49 = arith.addf %43, %48 : vector<104x128xf32>
    %50 = vector.extract_strided_slice %2 {offsets = [22, 0], sizes = [104, 8], strides = [1, 1]} : vector<126x8xf32> to vector<104x8xf32>
    %51 = arith.truncf %50 : vector<104x8xf32> to vector<104x8xbf16>
    %c8 = arith.constant 8 : index
    %c0_27 = arith.constant 0 : index
    %c0_28 = arith.constant 0 : index
    %52 = vector.load %arg5[%c8, %c0_27, %c0_28] : memref<27x8x128xbf16, #tpu.memory_space<vmem>>, vector<1x8x128xbf16>
    %53 = vector.shape_cast %52 : vector<1x8x128xbf16> to vector<8x128xbf16>
    %cst_29 = arith.constant dense<0.000000e+00> : vector<104x128xf32>
    %54 = tpu.matmul %51, %53, %cst_29 {dimension_numbers = #tpu.dot_dimension_numbers<[1], [0], [0], [1], [0, 0, 1, 1], [], []>} : vector<104x8xbf16>, vector<8x128xbf16>, vector<104x128xf32> -> vector<104x128xf32>
    %55 = arith.addf %49, %54 : vector<104x128xf32>
    %c0_30 = arith.constant 0 : index
    %c0_31 = arith.constant 0 : index
    %c0_32 = arith.constant 0 : index
    %c0_33 = arith.constant 0 : index
    %56 = vector.load %arg3[%c0_30, %c0_31, %c0_32, %c0_33] : memref<1x1x126x8xbf16, #tpu.memory_space<vmem>>, vector<1x1x126x8xbf16>
    %57 = vector.shape_cast %56 : vector<1x1x126x8xbf16> to vector<126x8xbf16>
    %58 = arith.extf %57 : vector<126x8xbf16> to vector<126x8xf32>
    %59 = vector.extract_strided_slice %58 {offsets = [0, 0], sizes = [104, 8], strides = [1, 1]} : vector<126x8xf32> to vector<104x8xf32>
    %60 = arith.truncf %59 : vector<104x8xf32> to vector<104x8xbf16>
    %c9 = arith.constant 9 : index
    %c0_34 = arith.constant 0 : index
    %c0_35 = arith.constant 0 : index
    %61 = vector.load %arg5[%c9, %c0_34, %c0_35] : memref<27x8x128xbf16, #tpu.memory_space<vmem>>, vector<1x8x128xbf16>
    %62 = vector.shape_cast %61 : vector<1x8x128xbf16> to vector<8x128xbf16>
    %cst_36 = arith.constant dense<0.000000e+00> : vector<104x128xf32>
    %63 = tpu.matmul %60, %62, %cst_36 {dimension_numbers = #tpu.dot_dimension_numbers<[1], [0], [0], [1], [0, 0, 1, 1], [], []>} : vector<104x8xbf16>, vector<8x128xbf16>, vector<104x128xf32> -> vector<104x128xf32>
    %64 = arith.addf %55, %63 : vector<104x128xf32>
    %65 = vector.extract_strided_slice %58 {offsets = [1, 0], sizes = [104, 8], strides = [1, 1]} : vector<126x8xf32> to vector<104x8xf32>
    %66 = arith.truncf %65 : vector<104x8xf32> to vector<104x8xbf16>
    %c10 = arith.constant 10 : index
    %c0_37 = arith.constant 0 : index
    %c0_38 = arith.constant 0 : index
    %67 = vector.load %arg5[%c10, %c0_37, %c0_38] : memref<27x8x128xbf16, #tpu.memory_space<vmem>>, vector<1x8x128xbf16>
    %68 = vector.shape_cast %67 : vector<1x8x128xbf16> to vector<8x128xbf16>
    %cst_39 = arith.constant dense<0.000000e+00> : vector<104x128xf32>
    %69 = tpu.matmul %66, %68, %cst_39 {dimension_numbers = #tpu.dot_dimension_numbers<[1], [0], [0], [1], [0, 0, 1, 1], [], []>} : vector<104x8xbf16>, vector<8x128xbf16>, vector<104x128xf32> -> vector<104x128xf32>
    %70 = arith.addf %64, %69 : vector<104x128xf32>
    %71 = vector.extract_strided_slice %58 {offsets = [2, 0], sizes = [104, 8], strides = [1, 1]} : vector<126x8xf32> to vector<104x8xf32>
    %72 = arith.truncf %71 : vector<104x8xf32> to vector<104x8xbf16>
    %c11 = arith.constant 11 : index
    %c0_40 = arith.constant 0 : index
    %c0_41 = arith.constant 0 : index
    %73 = vector.load %arg5[%c11, %c0_40, %c0_41] : memref<27x8x128xbf16, #tpu.memory_space<vmem>>, vector<1x8x128xbf16>
    %74 = vector.shape_cast %73 : vector<1x8x128xbf16> to vector<8x128xbf16>
    %cst_42 = arith.constant dense<0.000000e+00> : vector<104x128xf32>
    %75 = tpu.matmul %72, %74, %cst_42 {dimension_numbers = #tpu.dot_dimension_numbers<[1], [0], [0], [1], [0, 0, 1, 1], [], []>} : vector<104x8xbf16>, vector<8x128xbf16>, vector<104x128xf32> -> vector<104x128xf32>
    %76 = arith.addf %70, %75 : vector<104x128xf32>
    %77 = vector.extract_strided_slice %58 {offsets = [10, 0], sizes = [104, 8], strides = [1, 1]} : vector<126x8xf32> to vector<104x8xf32>
    %78 = arith.truncf %77 : vector<104x8xf32> to vector<104x8xbf16>
    %c12 = arith.constant 12 : index
    %c0_43 = arith.constant 0 : index
    %c0_44 = arith.constant 0 : index
    %79 = vector.load %arg5[%c12, %c0_43, %c0_44] : memref<27x8x128xbf16, #tpu.memory_space<vmem>>, vector<1x8x128xbf16>
    %80 = vector.shape_cast %79 : vector<1x8x128xbf16> to vector<8x128xbf16>
    %cst_45 = arith.constant dense<0.000000e+00> : vector<104x128xf32>
    %81 = tpu.matmul %78, %80, %cst_45 {dimension_numbers = #tpu.dot_dimension_numbers<[1], [0], [0], [1], [0, 0, 1, 1], [], []>} : vector<104x8xbf16>, vector<8x128xbf16>, vector<104x128xf32> -> vector<104x128xf32>
    %82 = arith.addf %76, %81 : vector<104x128xf32>
    %83 = vector.extract_strided_slice %58 {offsets = [11, 0], sizes = [104, 8], strides = [1, 1]} : vector<126x8xf32> to vector<104x8xf32>
    %84 = arith.truncf %83 : vector<104x8xf32> to vector<104x8xbf16>
    %c13 = arith.constant 13 : index
    %c0_46 = arith.constant 0 : index
    %c0_47 = arith.constant 0 : index
    %85 = vector.load %arg5[%c13, %c0_46, %c0_47] : memref<27x8x128xbf16, #tpu.memory_space<vmem>>, vector<1x8x128xbf16>
    %86 = vector.shape_cast %85 : vector<1x8x128xbf16> to vector<8x128xbf16>
    %cst_48 = arith.constant dense<0.000000e+00> : vector<104x128xf32>
    %87 = tpu.matmul %84, %86, %cst_48 {dimension_numbers = #tpu.dot_dimension_numbers<[1], [0], [0], [1], [0, 0, 1, 1], [], []>} : vector<104x8xbf16>, vector<8x128xbf16>, vector<104x128xf32> -> vector<104x128xf32>
    %88 = arith.addf %82, %87 : vector<104x128xf32>
    %89 = vector.extract_strided_slice %58 {offsets = [12, 0], sizes = [104, 8], strides = [1, 1]} : vector<126x8xf32> to vector<104x8xf32>
    %90 = arith.truncf %89 : vector<104x8xf32> to vector<104x8xbf16>
    %c14 = arith.constant 14 : index
    %c0_49 = arith.constant 0 : index
    %c0_50 = arith.constant 0 : index
    %91 = vector.load %arg5[%c14, %c0_49, %c0_50] : memref<27x8x128xbf16, #tpu.memory_space<vmem>>, vector<1x8x128xbf16>
    %92 = vector.shape_cast %91 : vector<1x8x128xbf16> to vector<8x128xbf16>
    %cst_51 = arith.constant dense<0.000000e+00> : vector<104x128xf32>
    %93 = tpu.matmul %90, %92, %cst_51 {dimension_numbers = #tpu.dot_dimension_numbers<[1], [0], [0], [1], [0, 0, 1, 1], [], []>} : vector<104x8xbf16>, vector<8x128xbf16>, vector<104x128xf32> -> vector<104x128xf32>
    %94 = arith.addf %88, %93 : vector<104x128xf32>
    %95 = vector.extract_strided_slice %58 {offsets = [20, 0], sizes = [104, 8], strides = [1, 1]} : vector<126x8xf32> to vector<104x8xf32>
    %96 = arith.truncf %95 : vector<104x8xf32> to vector<104x8xbf16>
    %c15 = arith.constant 15 : index
    %c0_52 = arith.constant 0 : index
    %c0_53 = arith.constant 0 : index
    %97 = vector.load %arg5[%c15, %c0_52, %c0_53] : memref<27x8x128xbf16, #tpu.memory_space<vmem>>, vector<1x8x128xbf16>
    %98 = vector.shape_cast %97 : vector<1x8x128xbf16> to vector<8x128xbf16>
    %cst_54 = arith.constant dense<0.000000e+00> : vector<104x128xf32>
    %99 = tpu.matmul %96, %98, %cst_54 {dimension_numbers = #tpu.dot_dimension_numbers<[1], [0], [0], [1], [0, 0, 1, 1], [], []>} : vector<104x8xbf16>, vector<8x128xbf16>, vector<104x128xf32> -> vector<104x128xf32>
    %100 = arith.addf %94, %99 : vector<104x128xf32>
    %101 = vector.extract_strided_slice %58 {offsets = [21, 0], sizes = [104, 8], strides = [1, 1]} : vector<126x8xf32> to vector<104x8xf32>
    %102 = arith.truncf %101 : vector<104x8xf32> to vector<104x8xbf16>
    %c16 = arith.constant 16 : index
    %c0_55 = arith.constant 0 : index
    %c0_56 = arith.constant 0 : index
    %103 = vector.load %arg5[%c16, %c0_55, %c0_56] : memref<27x8x128xbf16, #tpu.memory_space<vmem>>, vector<1x8x128xbf16>
    %104 = vector.shape_cast %103 : vector<1x8x128xbf16> to vector<8x128xbf16>
    %cst_57 = arith.constant dense<0.000000e+00> : vector<104x128xf32>
    %105 = tpu.matmul %102, %104, %cst_57 {dimension_numbers = #tpu.dot_dimension_numbers<[1], [0], [0], [1], [0, 0, 1, 1], [], []>} : vector<104x8xbf16>, vector<8x128xbf16>, vector<104x128xf32> -> vector<104x128xf32>
    %106 = arith.addf %100, %105 : vector<104x128xf32>
    %107 = vector.extract_strided_slice %58 {offsets = [22, 0], sizes = [104, 8], strides = [1, 1]} : vector<126x8xf32> to vector<104x8xf32>
    %108 = arith.truncf %107 : vector<104x8xf32> to vector<104x8xbf16>
    %c17 = arith.constant 17 : index
    %c0_58 = arith.constant 0 : index
    %c0_59 = arith.constant 0 : index
    %109 = vector.load %arg5[%c17, %c0_58, %c0_59] : memref<27x8x128xbf16, #tpu.memory_space<vmem>>, vector<1x8x128xbf16>
    %110 = vector.shape_cast %109 : vector<1x8x128xbf16> to vector<8x128xbf16>
    %cst_60 = arith.constant dense<0.000000e+00> : vector<104x128xf32>
    %111 = tpu.matmul %108, %110, %cst_60 {dimension_numbers = #tpu.dot_dimension_numbers<[1], [0], [0], [1], [0, 0, 1, 1], [], []>} : vector<104x8xbf16>, vector<8x128xbf16>, vector<104x128xf32> -> vector<104x128xf32>
    %112 = arith.addf %106, %111 : vector<104x128xf32>
    %c0_61 = arith.constant 0 : index
    %c0_62 = arith.constant 0 : index
    %c0_63 = arith.constant 0 : index
    %c0_64 = arith.constant 0 : index
    %113 = vector.load %arg4[%c0_61, %c0_62, %c0_63, %c0_64] : memref<1x1x126x8xbf16, #tpu.memory_space<vmem>>, vector<1x1x126x8xbf16>
    %114 = vector.shape_cast %113 : vector<1x1x126x8xbf16> to vector<126x8xbf16>
    %115 = arith.extf %114 : vector<126x8xbf16> to vector<126x8xf32>
    %116 = vector.extract_strided_slice %115 {offsets = [0, 0], sizes = [104, 8], strides = [1, 1]} : vector<126x8xf32> to vector<104x8xf32>
    %117 = arith.truncf %116 : vector<104x8xf32> to vector<104x8xbf16>
    %c18 = arith.constant 18 : index
    %c0_65 = arith.constant 0 : index
    %c0_66 = arith.constant 0 : index
    %118 = vector.load %arg5[%c18, %c0_65, %c0_66] : memref<27x8x128xbf16, #tpu.memory_space<vmem>>, vector<1x8x128xbf16>
    %119 = vector.shape_cast %118 : vector<1x8x128xbf16> to vector<8x128xbf16>
    %cst_67 = arith.constant dense<0.000000e+00> : vector<104x128xf32>
    %120 = tpu.matmul %117, %119, %cst_67 {dimension_numbers = #tpu.dot_dimension_numbers<[1], [0], [0], [1], [0, 0, 1, 1], [], []>} : vector<104x8xbf16>, vector<8x128xbf16>, vector<104x128xf32> -> vector<104x128xf32>
    %121 = arith.addf %112, %120 : vector<104x128xf32>
    %122 = vector.extract_strided_slice %115 {offsets = [1, 0], sizes = [104, 8], strides = [1, 1]} : vector<126x8xf32> to vector<104x8xf32>
    %123 = arith.truncf %122 : vector<104x8xf32> to vector<104x8xbf16>
    %c19 = arith.constant 19 : index
    %c0_68 = arith.constant 0 : index
    %c0_69 = arith.constant 0 : index
    %124 = vector.load %arg5[%c19, %c0_68, %c0_69] : memref<27x8x128xbf16, #tpu.memory_space<vmem>>, vector<1x8x128xbf16>
    %125 = vector.shape_cast %124 : vector<1x8x128xbf16> to vector<8x128xbf16>
    %cst_70 = arith.constant dense<0.000000e+00> : vector<104x128xf32>
    %126 = tpu.matmul %123, %125, %cst_70 {dimension_numbers = #tpu.dot_dimension_numbers<[1], [0], [0], [1], [0, 0, 1, 1], [], []>} : vector<104x8xbf16>, vector<8x128xbf16>, vector<104x128xf32> -> vector<104x128xf32>
    %127 = arith.addf %121, %126 : vector<104x128xf32>
    %128 = vector.extract_strided_slice %115 {offsets = [2, 0], sizes = [104, 8], strides = [1, 1]} : vector<126x8xf32> to vector<104x8xf32>
    %129 = arith.truncf %128 : vector<104x8xf32> to vector<104x8xbf16>
    %c20 = arith.constant 20 : index
    %c0_71 = arith.constant 0 : index
    %c0_72 = arith.constant 0 : index
    %130 = vector.load %arg5[%c20, %c0_71, %c0_72] : memref<27x8x128xbf16, #tpu.memory_space<vmem>>, vector<1x8x128xbf16>
    %131 = vector.shape_cast %130 : vector<1x8x128xbf16> to vector<8x128xbf16>
    %cst_73 = arith.constant dense<0.000000e+00> : vector<104x128xf32>
    %132 = tpu.matmul %129, %131, %cst_73 {dimension_numbers = #tpu.dot_dimension_numbers<[1], [0], [0], [1], [0, 0, 1, 1], [], []>} : vector<104x8xbf16>, vector<8x128xbf16>, vector<104x128xf32> -> vector<104x128xf32>
    %133 = arith.addf %127, %132 : vector<104x128xf32>
    %134 = vector.extract_strided_slice %115 {offsets = [10, 0], sizes = [104, 8], strides = [1, 1]} : vector<126x8xf32> to vector<104x8xf32>
    %135 = arith.truncf %134 : vector<104x8xf32> to vector<104x8xbf16>
    %c21 = arith.constant 21 : index
    %c0_74 = arith.constant 0 : index
    %c0_75 = arith.constant 0 : index
    %136 = vector.load %arg5[%c21, %c0_74, %c0_75] : memref<27x8x128xbf16, #tpu.memory_space<vmem>>, vector<1x8x128xbf16>
    %137 = vector.shape_cast %136 : vector<1x8x128xbf16> to vector<8x128xbf16>
    %cst_76 = arith.constant dense<0.000000e+00> : vector<104x128xf32>
    %138 = tpu.matmul %135, %137, %cst_76 {dimension_numbers = #tpu.dot_dimension_numbers<[1], [0], [0], [1], [0, 0, 1, 1], [], []>} : vector<104x8xbf16>, vector<8x128xbf16>, vector<104x128xf32> -> vector<104x128xf32>
    %139 = arith.addf %133, %138 : vector<104x128xf32>
    %140 = vector.extract_strided_slice %115 {offsets = [11, 0], sizes = [104, 8], strides = [1, 1]} : vector<126x8xf32> to vector<104x8xf32>
    %141 = arith.truncf %140 : vector<104x8xf32> to vector<104x8xbf16>
    %c22 = arith.constant 22 : index
    %c0_77 = arith.constant 0 : index
    %c0_78 = arith.constant 0 : index
    %142 = vector.load %arg5[%c22, %c0_77, %c0_78] : memref<27x8x128xbf16, #tpu.memory_space<vmem>>, vector<1x8x128xbf16>
    %143 = vector.shape_cast %142 : vector<1x8x128xbf16> to vector<8x128xbf16>
    %cst_79 = arith.constant dense<0.000000e+00> : vector<104x128xf32>
    %144 = tpu.matmul %141, %143, %cst_79 {dimension_numbers = #tpu.dot_dimension_numbers<[1], [0], [0], [1], [0, 0, 1, 1], [], []>} : vector<104x8xbf16>, vector<8x128xbf16>, vector<104x128xf32> -> vector<104x128xf32>
    %145 = arith.addf %139, %144 : vector<104x128xf32>
    %146 = vector.extract_strided_slice %115 {offsets = [12, 0], sizes = [104, 8], strides = [1, 1]} : vector<126x8xf32> to vector<104x8xf32>
    %147 = arith.truncf %146 : vector<104x8xf32> to vector<104x8xbf16>
    %c23 = arith.constant 23 : index
    %c0_80 = arith.constant 0 : index
    %c0_81 = arith.constant 0 : index
    %148 = vector.load %arg5[%c23, %c0_80, %c0_81] : memref<27x8x128xbf16, #tpu.memory_space<vmem>>, vector<1x8x128xbf16>
    %149 = vector.shape_cast %148 : vector<1x8x128xbf16> to vector<8x128xbf16>
    %cst_82 = arith.constant dense<0.000000e+00> : vector<104x128xf32>
    %150 = tpu.matmul %147, %149, %cst_82 {dimension_numbers = #tpu.dot_dimension_numbers<[1], [0], [0], [1], [0, 0, 1, 1], [], []>} : vector<104x8xbf16>, vector<8x128xbf16>, vector<104x128xf32> -> vector<104x128xf32>
    %151 = arith.addf %145, %150 : vector<104x128xf32>
    %152 = vector.extract_strided_slice %115 {offsets = [20, 0], sizes = [104, 8], strides = [1, 1]} : vector<126x8xf32> to vector<104x8xf32>
    %153 = arith.truncf %152 : vector<104x8xf32> to vector<104x8xbf16>
    %c24 = arith.constant 24 : index
    %c0_83 = arith.constant 0 : index
    %c0_84 = arith.constant 0 : index
    %154 = vector.load %arg5[%c24, %c0_83, %c0_84] : memref<27x8x128xbf16, #tpu.memory_space<vmem>>, vector<1x8x128xbf16>
    %155 = vector.shape_cast %154 : vector<1x8x128xbf16> to vector<8x128xbf16>
    %cst_85 = arith.constant dense<0.000000e+00> : vector<104x128xf32>
    %156 = tpu.matmul %153, %155, %cst_85 {dimension_numbers = #tpu.dot_dimension_numbers<[1], [0], [0], [1], [0, 0, 1, 1], [], []>} : vector<104x8xbf16>, vector<8x128xbf16>, vector<104x128xf32> -> vector<104x128xf32>
    %157 = arith.addf %151, %156 : vector<104x128xf32>
    %158 = vector.extract_strided_slice %115 {offsets = [21, 0], sizes = [104, 8], strides = [1, 1]} : vector<126x8xf32> to vector<104x8xf32>
    %159 = arith.truncf %158 : vector<104x8xf32> to vector<104x8xbf16>
    %c25 = arith.constant 25 : index
    %c0_86 = arith.constant 0 : index
    %c0_87 = arith.constant 0 : index
    %160 = vector.load %arg5[%c25, %c0_86, %c0_87] : memref<27x8x128xbf16, #tpu.memory_space<vmem>>, vector<1x8x128xbf16>
    %161 = vector.shape_cast %160 : vector<1x8x128xbf16> to vector<8x128xbf16>
    %cst_88 = arith.constant dense<0.000000e+00> : vector<104x128xf32>
    %162 = tpu.matmul %159, %161, %cst_88 {dimension_numbers = #tpu.dot_dimension_numbers<[1], [0], [0], [1], [0, 0, 1, 1], [], []>} : vector<104x8xbf16>, vector<8x128xbf16>, vector<104x128xf32> -> vector<104x128xf32>
    %163 = arith.addf %157, %162 : vector<104x128xf32>
    %164 = vector.extract_strided_slice %115 {offsets = [22, 0], sizes = [104, 8], strides = [1, 1]} : vector<126x8xf32> to vector<104x8xf32>
    %165 = arith.truncf %164 : vector<104x8xf32> to vector<104x8xbf16>
    %c26 = arith.constant 26 : index
    %c0_89 = arith.constant 0 : index
    %c0_90 = arith.constant 0 : index
    %166 = vector.load %arg5[%c26, %c0_89, %c0_90] : memref<27x8x128xbf16, #tpu.memory_space<vmem>>, vector<1x8x128xbf16>
    %167 = vector.shape_cast %166 : vector<1x8x128xbf16> to vector<8x128xbf16>
    %cst_91 = arith.constant dense<0.000000e+00> : vector<104x128xf32>
    %168 = tpu.matmul %165, %167, %cst_91 {dimension_numbers = #tpu.dot_dimension_numbers<[1], [0], [0], [1], [0, 0, 1, 1], [], []>} : vector<104x8xbf16>, vector<8x128xbf16>, vector<104x128xf32> -> vector<104x128xf32>
    %169 = arith.addf %163, %168 : vector<104x128xf32>
    %c0_92 = arith.constant 0 : index
    %c0_93 = arith.constant 0 : index
    %170 = vector.load %arg6[%c0_92, %c0_93] : memref<1x128xf32, #tpu.memory_space<vmem>>, vector<1x128xf32>
    %171 = vector.broadcast %170 : vector<1x128xf32> to vector<104x128xf32>
    %172 = arith.addf %169, %171 : vector<104x128xf32>
    %cst_94 = arith.constant 0.000000e+00 : f32
    %173 = vector.broadcast %cst_94 : f32 to vector<104x128xf32>
    %174 = arith.cmpf oge, %172, %173 : vector<104x128xf32>
    %cst_95 = arith.constant 2.000000e-01 : f32
    %175 = vector.broadcast %cst_95 : f32 to vector<104x128xf32>
    %176 = arith.mulf %175, %172 : vector<104x128xf32>
    %177 = arith.select %174, %172, %176 : vector<104x128xi1>, vector<104x128xf32>
    %c0_96 = arith.constant 0 : index
    %c0_97 = arith.constant 0 : index
    %178 = vector.load %arg7[%c0_96, %c0_97] : memref<1x128xf32, #tpu.memory_space<vmem>>, vector<1x128xf32>
    %179 = vector.broadcast %178 : vector<1x128xf32> to vector<104x128xf32>
    %180 = arith.subf %177, %179 : vector<104x128xf32>
    %c0_98 = arith.constant 0 : index
    %c0_99 = arith.constant 0 : index
    %181 = vector.load %arg8[%c0_98, %c0_99] : memref<104x1xf32, #tpu.memory_space<vmem>>, vector<104x1xf32>
    %182 = vector.broadcast %181 : vector<104x1xf32> to vector<104x128xf32>
    %183 = arith.mulf %180, %182 : vector<104x128xf32>
    %184 = vector.shape_cast %183 : vector<104x128xf32> to vector<13x8x128xf32>
    %cst_100 = arith.constant dense<0.000000e+00> : vector<8x128xf32>
    %185 = vector.multi_reduction <add>, %184, %cst_100 [0] : vector<13x8x128xf32> to vector<8x128xf32>
    %c0_101 = arith.constant 0 : index
    %c0_102 = arith.constant 0 : index
    %c0_103 = arith.constant 0 : index
    %c0_104 = arith.constant 0 : index
    %186 = vector.load %arg9[%c0_101, %c0_102, %c0_103, %c0_104] : memref<1x1x8x128xf32, #tpu.memory_space<vmem>>, vector<1x1x8x128xf32>
    %187 = vector.shape_cast %186 : vector<1x1x8x128xf32> to vector<8x128xf32>
    %188 = vector.shape_cast %185 : vector<8x128xf32> to vector<1x1x8x128xf32>
    tpu.vector_store %arg9[%c0_101, %c0_102, %c0_103, %c0_104], %188 {strides = array<i32>} : memref<1x1x8x128xf32, #tpu.memory_space<vmem>>, vector<1x1x8x128xf32>,
    %189 = arith.mulf %184, %184 : vector<13x8x128xf32>
    %cst_105 = arith.constant dense<0.000000e+00> : vector<8x128xf32>
    %190 = vector.multi_reduction <add>, %189, %cst_105 [0] : vector<13x8x128xf32> to vector<8x128xf32>
    %c0_106 = arith.constant 0 : index
    %c0_107 = arith.constant 0 : index
    %c0_108 = arith.constant 0 : index
    %c0_109 = arith.constant 0 : index
    %191 = vector.load %arg10[%c0_106, %c0_107, %c0_108, %c0_109] : memref<1x1x8x128xf32, #tpu.memory_space<vmem>>, vector<1x1x8x128xf32>
    %192 = vector.shape_cast %191 : vector<1x1x8x128xf32> to vector<8x128xf32>
    %193 = vector.shape_cast %190 : vector<8x128xf32> to vector<1x1x8x128xf32>
    tpu.vector_store %arg10[%c0_106, %c0_107, %c0_108, %c0_109], %193 {strides = array<i32>} : memref<1x1x8x128xf32, #tpu.memory_space<vmem>>, vector<1x1x8x128xf32>,
    return
  }
  func.func @transform_0(%arg0: i32, %arg1: i32) -> (i32, i32, i32, i32) {
    %c0_i32 = arith.constant 0 : i32
    %0 = arith.addi %arg1, %c0_i32 : i32
    %c0_i32_0 = arith.constant 0 : i32
    %c0_i32_1 = arith.constant 0 : i32
    %c0_i32_2 = arith.constant 0 : i32
    return %arg0, %0, %c0_i32_0, %c0_i32_1 : i32, i32, i32, i32
  }
  func.func @transform_1(%arg0: i32, %arg1: i32) -> (i32, i32, i32, i32) {
    %c1_i32 = arith.constant 1 : i32
    %0 = arith.addi %arg1, %c1_i32 : i32
    %c0_i32 = arith.constant 0 : i32
    %c0_i32_0 = arith.constant 0 : i32
    %c0_i32_1 = arith.constant 0 : i32
    return %arg0, %0, %c0_i32, %c0_i32_0 : i32, i32, i32, i32
  }
  func.func @transform_2(%arg0: i32, %arg1: i32) -> (i32, i32, i32, i32) {
    %c2_i32 = arith.constant 2 : i32
    %0 = arith.addi %arg1, %c2_i32 : i32
    %c0_i32 = arith.constant 0 : i32
    %c0_i32_0 = arith.constant 0 : i32
    %c0_i32_1 = arith.constant 0 : i32
    return %arg0, %0, %c0_i32, %c0_i32_0 : i32, i32, i32, i32
  }
  func.func @transform_3(%arg0: i32, %arg1: i32) -> (i32, i32, i32) {
    %c0_i32 = arith.constant 0 : i32
    %c0_i32_0 = arith.constant 0 : i32
    %c0_i32_1 = arith.constant 0 : i32
    %c0_i32_2 = arith.constant 0 : i32
    return %c0_i32, %c0_i32_0, %c0_i32_1 : i32, i32, i32
  }
  func.func @transform_4(%arg0: i32, %arg1: i32) -> (i32, i32) {
    %c0_i32 = arith.constant 0 : i32
    %c0_i32_0 = arith.constant 0 : i32
    %c0_i32_1 = arith.constant 0 : i32
    return %c0_i32, %c0_i32_0 : i32, i32
  }
  func.func @transform_5(%arg0: i32, %arg1: i32) -> (i32, i32) {
    %c0_i32 = arith.constant 0 : i32
    %c0_i32_0 = arith.constant 0 : i32
    %c0_i32_1 = arith.constant 0 : i32
    return %c0_i32, %c0_i32_0 : i32, i32
  }
  func.func @transform_6(%arg0: i32, %arg1: i32) -> (i32, i32) {
    %c0_i32 = arith.constant 0 : i32
    %c0_i32_0 = arith.constant 0 : i32
    %c0_i32_1 = arith.constant 0 : i32
    return %c0_i32, %c0_i32_0 : i32, i32
  }
  func.func @transform_7(%arg0: i32, %arg1: i32) -> (i32, i32, i32, i32) {
    %c0_i32 = arith.constant 0 : i32
    %c0_i32_0 = arith.constant 0 : i32
    %c0_i32_1 = arith.constant 0 : i32
    return %arg0, %arg1, %c0_i32, %c0_i32_0 : i32, i32, i32, i32
  }
  func.func @transform_8(%arg0: i32, %arg1: i32) -> (i32, i32, i32, i32) {
    %c0_i32 = arith.constant 0 : i32
    %c0_i32_0 = arith.constant 0 : i32
    %c0_i32_1 = arith.constant 0 : i32
    return %arg0, %arg1, %c0_i32, %c0_i32_0 : i32, i32, i32, i32
  }
}

</mosaic_0001>

<bundles_post_ra>
// kernel: conv3_forward.3
= control target key start
LH: loop header
LB: loop body
LE: loop exit
PB: predicated region body
PF: predicated region fallthrough
CT: control target
= control target key end

     0   :  { %s6355_s24 = smov 0   ;;  %s6357_s25 = smov 0   ;;  %s8671_s0 = inlined_call_operand.vmem [shape: bf16[2,10,126,8], index: 0, kind: input, shape index: {}, may-alias: {0,1,2}]   ;;  %s8672_s1 = inlined_call_operand.vmem [shape: bf16[2,10,126,8], index: 1, kind: input, shape index: {}, may-alias: {0,1,2}]   ;;  %s8673_s2 = inlined_call_operand.vmem [shape: bf16[2,10,126,8], index: 2, kind: input, shape index: {}, may-alias: {0,1,2}]   ;;  %s8674_s3 = inlined_call_operand.vmem [shape: bf16[27,8,128], index: 3, kind: input, shape index: {}]   ;;  %s8675_s4 = inlined_call_operand.vmem [shape: f32[1,128], index: 4, kind: input, shape index: {}]   ;;  %s8676_s5 = inlined_call_operand.vmem [shape: f32[1,128], index: 5, kind: input, shape index: {}]   ;;  %s8677_s6 = inlined_call_operand.vmem [shape: f32[1,128], index: 6, kind: input, shape index: {}]   ;;  %s8678_s7 = inlined_call_operand.vmem [shape: f32[2,8,104,16], index: 7, kind: output, shape index: {}]  }
   0x1   :  { %s6359_s26 = smov 0   ;;  %s6361_s27 = smov 0  }
   0x2   :  { %s6363_s28 = smov 0  }
   0x3 LB: > { %s26_s29 = sadd.s32 1, %s6303_s26  ;;  %s29_s30 = sadd.s32 1, %s6307_s27  ;;  %s6311_s28 = sphi %s6363_s28, %s17_s28   ;;  %s6307_s27 = sphi %s6361_s27, %s8719_s27   ;;  %s6303_s26 = sphi %s6359_s26, %s8718_s26   ;;  %s6299_s25 = sphi %s6357_s25, %s8717_s25   ;;  %s6295_s24 = sphi %s6355_s24, %s8716_s24  }
   0x4   : > { %p27_p0 = scmp.ge.s32.totalorder %s26_s29, 8  ;;  %p4875_p1 = scmp.ge.s32.totalorder %s6311_s28, 1 }
   0x5   : > { %p297_p2 = scmp.lt.s32.totalorder %s6311_s28, 17 }
   0x6   : > { %s8721_s29 = smov (%p27_p0, %s26_s29), 0  ;;  %s8723_s30 = smov (!%p27_p0, %s29_s30), %s6307_s27 }
   0x7   : > { %p298_p3 = pnand %p4875_p1, %p297_p2  ;;  %p31_p4 = scmp.ge.s32.totalorder %s8723_s30, 2 }
   0x9   : > { %s8725_s30 = smov (%p31_p4, %s8723_s30), 0  ;;  %301 = sbr.rel (%p298_p3) target bundleno = 1011 (0x3f3), region = 48 }
  0x10   : > { %v4891_v0 = vld [vmem:[%s8674_s3 + $0x4] sm:$0xf]  ;;  %vm519_vm0 = vcmask 1043456   ;;  %p357_p5 = scmp.lt.s32.totalorder %s6299_s25, 1  ;;  %v8687_v1 = vmov 0.0   ;;  %p359_p6 = scmp.lt.s32.totalorder %s6295_s24, 9 }
  0x11   : > { %5367 = vmatprep.subr.bf16.mxu0 %v8687_v1  ;;  %6177 = vmatprep.subr.bf16.mxu1 %v8687_v1  ;;  %v521_v2 = vsel %vm519_vm0, %v4891_v0, 0  ;;  %vm6314_vm1 = vmmov 0   ;;  %vm441_vm2 = vsmask.f32 7424  ;;  %vm497_vm3 = vcmask 64512   ;;  %s366_s23 = sadd.s32 1, %s6295_s24 }
  0x12   : > { %5368 = vmatpush3.bf16.msra.mxu0 %v521_v2  ;;  %6178 = vmatpush3.bf16.msra.mxu1 %v521_v2  ;;  %s8727_s25 = smov (!%p357_p5, %s6299_s25), 1  ;;  %v4906_v29 = vld [vmem:[%s8674_s3 + $0x8] sm:$0xf]  ;;  %v437_v30 = vld [vmem:[%s8674_s3] sm:$0xf]  ;;  %vm726_vm4 = vcmask 1046528  }
  0x13   : > { %5369 = vmatprep.mubr.msk.bf16.mxu0 %vm6314_vm1, %v8687_v1  ;;  %5385 = vmatprep.mubr.msk.bf16.mxu1 %vm6314_vm1, %v8687_v1  ;;  %s360_s10 = scalar_select %p359_p6, %s6295_s24, 9  ;;  %v762_v41 = vsel %vm519_vm0, %v4906_v29, 0  ;;  %v627_v44 = vsel %vm519_vm0, %v437_v30, 0  ;;  %vm1021_vm5 = vsmask.f32 6400  ;;  %vm1211_vm6 = vcmask 1045504  }
  0x14   : > { %5427 = vmatprep.subr.bf16.mxu0 %v8687_v1  ;;  %s6403_s11 = smul.u32 160, %s8727_s25  ;;  %5397 = vmatprep.subr.bf16.mxu1 %v8687_v1  ;;  %vm1494_vm7 = vsmask.f32 5376  ;;  %vm1654_vm8 = vcmask 1044480   ;;  %p369_p7 = scmp.lt.s32.totalorder %s366_s23, 9  ;;  %vm4720_vm11 = vcmask 130048  }
  0x15   : > { %s4876_s12 = sshll.u32 %s360_s10, 4  ;;  %p390_p9 = scmp.lt.s32.totalorder %s6295_s24, 7 }
  0x16   : > { %s363_s13 = sadd.s32 %s6403_s11, %s4876_s12  ;;  %s8729_s23 = smov (!%p369_p7, %s366_s23), 9 }
  0x17   : > { %s4877_s14 = sshll.u32 %s363_s13, 2  ;;  %s4878_s8 = sshll.u32 %s8729_s23, 4 }
  0x18   : > { %s6410_s17 = scalar_lea.vmem %s8671_s0, %s4877_s14  ;;  %s373_s9 = sadd.s32 %s6403_s11, %s4878_s8 }
  0x19   : > { %v398_v3 = vld [vmem:[%s6410_s17] sm:$0xf]  ;;  %v399_v4 = vld [vmem:[%s6410_s17 + $0x4] sm:$0xf]  ;;  %v400_v5 = vld [vmem:[%s6410_s17 + $0x8] sm:$0xf] }
  0x1a   : > { %v401_v6 = vld [vmem:[%s6410_s17 + $0xc] sm:$0xf]  ;;  %v6416_v7 = vcombine.low %v398_v3, %v399_v4  ;;  %v6418_v8 = vcombine.low %v399_v4, %v400_v5  ;;  %v6421_v9 = vld [vmem:[%s6410_s17 + $0x20] sm:$0xf]  ;;  %v6424_v10 = vld [vmem:[%s6410_s17 + $0x24] sm:$0xf] }
  0x1b   : > { %v6426_v11 = vcombine.low %v400_v5, %v401_v6  ;;  %v6429_v12 = vld [vmem:[%s6410_s17 + $0x28] sm:$0xf]  ;;  %v6432_v13 = vld [vmem:[%s6410_s17 + $0x2c] sm:$0xf]  ;;  %v6436_v14 = vcombine.low %v6421_v9, %v6424_v10  ;;  %v402_v15 = vld [vmem:[%s6410_s17 + $0x10] sm:$0xf] }
  0x1c   : > { %v443_v16 = vshrl.u32 %v6416_v7, 16  ;;  %v445_v17 = vshll.u32 %v6416_v7, 16  ;;  %v6443_v18 = vcombine.low %v6429_v12, %v6432_v13  ;;  %v403_v19 = vld [vmem:[%s6410_s17 + $0x14] sm:$0xf]  ;;  %v6447_v20 = vld [vmem:[%s6410_s17 + $0x30] sm:$0xf]  ;;  %v6449_v21 = vcombine.low %v401_v6, %v402_v15 }
  0x1d   : > { %v450_v22 = vshll.u32 %v6426_v11, 16  ;;  %v474_v23 = vshll.u32 %v6436_v14, 16  ;;  %v478_v24 = vshrl.u32 %v6436_v14, 16  ;;  %v6454_v25 = vcombine.low %v402_v15, %v403_v19  ;;  %v6457_v26 = vld [vmem:[%s6410_s17 + $0x34] sm:$0xf]  ;;  %s4879_s10 = sshll.u32 %s373_s9, 2 }
  0x1e   : > { %v447_v27 = vrot.slane %v445_v17, 1  ;;  %v482_v28 = vshll.u32 %v6443_v18, 16  ;;  %v6468_v31 = vcombine.low %v6447_v20, %v6457_v26  ;;  %v404_v34 = vld [vmem:[%s6410_s17 + $0x18] sm:$0xf]  ;;  %v405_v35 = vld [vmem:[%s6410_s17 + $0x1c] sm:$0xf]  ;;  %s6983_s14 = scalar_lea.vmem %s8672_s1, %s4879_s10 }
  0x1f   : > { %v452_v32 = vrot.slane %v450_v22, 1  ;;  %v476_v33 = vrot.slane %v474_v23, 1  ;;  %v454_v38 = vshrl.u32 %v6426_v11, 16  ;;  %v458_v39 = vshll.u32 %v6454_v25, 16  ;;  %s377_s23 = sadd.s32 2, %s6295_s24  ;;  %s8733_s24 = smov (!%p390_p9, %s6295_s24), 7 }
  0x20   : > { %v448_v36 = vor.u32 %v447_v27, %v443_v16  ;;  %v484_v37 = vrot.slane %v482_v28, 1  ;;  %v486_v42 = vshrl.u32 %v6443_v18, 16  ;;  %v490_v45 = vshll.u32 %v6468_v31, 16  ;;  %p380_p8 = scmp.lt.s32.totalorder %s377_s23, 9 }
  0x21   : > { %v480_v40 = vor.u32 %v478_v24, %v476_v33  ;;  %v6487_v46 = vcombine.low %v404_v34, %v405_v35  ;;  %v462_v48 = vshrl.u32 %v6454_v25, 16  ;;  %v456_v49 = vor.u32 %v454_v38, %v452_v32 }
  0x22   : > { %v453_v43 = vsel %vm441_vm2, %v448_v36, %v452_v32  ;;  %v460_v50 = vrot.slane %v458_v39, 1  ;;  %v488_v53 = vor.u32 %v486_v42, %v484_v37  ;;  %v492_v54 = vrot.slane %v490_v45, 1  ;;  %s8731_s23 = smov (!%p380_p8, %s377_s23), 9 }
  0x23   : > { %5370 = vmatmul.mubr.msk.bf16.vlgmr.msra.gmra.mrb[0].mxu0 %vm497_vm3, %v453_v43  ;;  %v485_v47 = vsel %vm441_vm2, %v480_v40, %v484_v37  ;;  %v466_v51 = vshll.u32 %v6487_v46, 16  ;;  %v470_v52 = vshrl.u32 %v6487_v46, 16  ;;  %v494_v55 = vshrl.u32 %v6468_v31, 16  ;;  %s4880_s8 = sshll.u32 %s8731_s23, 4  ;;  %s6180_s23 = smul.u32 13, %s8733_s24 }
  0x24   : > { %5386 = vmatmul.mubr.msk.bf16.vlgmr.msra.gmra.mrb[0].mxu1 %vm497_vm3, %v485_v47  ;;  %5428 = vmatpush3.bf16.msra.mxu0 %v762_v41  ;;  %v464_v56 = vor.u32 %v462_v48, %v460_v50  ;;  %v461_v58 = vsel %vm441_vm2, %v456_v49, %v460_v50  ;;  %v493_v60 = vsel %vm441_vm2, %v488_v53, %v492_v54  ;;  %v881_v62 = vrot.slane %v6418_v8, 1  ;;  %v6562_v53 = vld [vmem:[%s6410_s17 + $0x38] sm:$0xf]  ;;  %s384_s9 = sadd.s32 %s6403_s11, %s4880_s8 }
  0x25   : > { %5398 = vmatpush3.bf16.msra.mxu1 %v627_v44  ;;  %5373 = vmatprep.mubr.msk.bf16.mxu0 %vm6314_vm1, %v8687_v1  ;;  %v468_v57 = vrot.slane %v466_v51, 1  ;;  %v496_v61 = vor.u32 %v494_v55, %v492_v54  ;;  %v882_v0 = vrot.slane %v6449_v21, 1  ;;  %v6523_v2 = vcombine.low %v403_v19, %v404_v34  ;;  %s4881_s10 = sshll.u32 %s384_s9, 2 }
  0x26   : > { %5389 = vmatprep.mubr.msk.bf16.mxu1 %vm6314_vm1, %v8687_v1  ;;  %5457 = vmatprep.subr.bf16.mxu1 %v8687_v1  ;;  %v1023_v3 = vshrl.u32 %v6418_v8, 16  ;;  %v1026_v5 = vshll.u32 %v6418_v8, 16  ;;  %v1031_v6 = vshrl.u32 %v6449_v21, 16  ;;  %v1034_v15 = vshll.u32 %v6449_v21, 16  ;;  %s7394_s16 = scalar_lea.vmem %s8673_s2, %s4881_s10 }
  0x27   : > { %5487 = vmatprep.subr.bf16.mxu0 %v8687_v1  ;;  %v472_v59 = vor.u32 %v470_v52, %v468_v57  ;;  %v469_v63 = vsel %vm441_vm2, %v464_v56, %v468_v57  ;;  %v6537_v16 = vsel %vm726_vm4, %v881_v62, %v882_v0  ;;  %v884_v17 = vrot.slane %v6523_v2, 1 }
  0x28   : > { %v1025_v19 = vrot.slane %v1023_v3, 1  ;;  %v6541_v27 = vcombine.low %v405_v35, %v6421_v9  ;;  %v1028_v29 = vrot.slane %v1026_v5, 2  ;;  %v1033_v30 = vrot.slane %v1031_v6, 1 }
  0x29   : > { %v6528_v4 = vsel %vm441_vm2, %v472_v59, %v476_v33  ;;  %v1036_v32 = vrot.slane %v1034_v15, 2  ;;  %v1040_v33 = vshrl.u32 %v6523_v2, 16  ;;  %v6547_v34 = vsel %vm726_vm4, %v882_v0, %v884_v17 }
  0x2a   : > { %v886_v36 = vrot.slane %v6541_v27, 1  ;;  %v1043_v37 = vshll.u32 %v6523_v2, 16  ;;  %v6553_v9 = vcombine.low %v6424_v10, %v6429_v12  ;;  %v1029_v35 = vor.u32 %v1028_v29, %v1025_v19 }
  0x2b   : > { %5374 = vmatmul.mubr.msk.bf16.gmra.mrb[4].mxu0 %vm497_vm3, %v461_v58  ;;  %v1037_v40 = vor.u32 %v1036_v32, %v1033_v30  ;;  %v1042_v41 = vrot.slane %v1040_v33, 1  ;;  %v1049_v43 = vshrl.u32 %v6541_v27, 16  ;;  %v1052_v50 = vshll.u32 %v6541_v27, 16 }
  0x2c   : > { %5390 = vmatmul.mubr.msk.bf16.gmra.mrb[4].mxu1 %vm497_vm3, %v493_v60  ;;  %5377 = vmatprep.mubr.msk.bf16.mxu0 %vm6314_vm1, %v8687_v1  ;;  %v6557_v44 = vsel %vm726_vm4, %v884_v17, %v886_v36  ;;  %v1045_v47 = vrot.slane %v1043_v37, 2  ;;  %v888_v49 = vrot.slane %v6553_v9, 1  ;;  %v6569_v12 = vcombine.low %v6432_v13, %v6447_v20 }
  0x2d   : > { %5393 = vmatprep.mubr.msk.bf16.mxu1 %vm6314_vm1, %v8687_v1  ;;  %v6565_v54 = vsel %vm1021_vm5, %v1029_v35, %v1037_v40  ;;  %v1051_v10 = vrot.slane %v1049_v43, 1  ;;  %v1058_v56 = vshrl.u32 %v6553_v9, 16  ;;  %v1054_v59 = vrot.slane %v1052_v50, 2 }
  0x2e   : > { %v1046_v57 = vor.u32 %v1045_v47, %v1042_v41  ;;  %v6573_v58 = vsel %vm726_vm4, %v886_v36, %v888_v49  ;;  %v1061_v60 = vshll.u32 %v6553_v9, 16  ;;  %v890_v62 = vrot.slane %v6569_v12, 1  ;;  %v4921_v36 = vld [vmem:[%s8674_s3 + $0xc] sm:$0xf] }
  0x2f   : > { %v1060_v0 = vrot.slane %v1058_v56, 1  ;;  %v6580_v3 = vcombine.low %v6457_v26, %v6562_v53  ;;  %v1067_v13 = vshrl.u32 %v6569_v12, 16  ;;  %v1055_v6 = vor.u32 %v1054_v59, %v1051_v10 }
  0x30   : > { %v6587_v5 = vsel %vm1021_vm5, %v1037_v40, %v1046_v57  ;;  %v1063_v15 = vrot.slane %v1061_v60, 2  ;;  %v6593_v26 = vsel %vm726_vm4, %v888_v49, %v890_v62  ;;  %v1212_v40 = vrot.slane %v6418_v8, 2 }
  0x31   : > { %v892_v17 = vrot.slane %v6580_v3, 1  ;;  %v1069_v19 = vrot.slane %v1067_v13, 1  ;;  %v6598_v29 = vsel %vm1021_vm5, %v1046_v57, %v1055_v6  ;;  %v1079_v33 = vshll.u32 %v6580_v3, 16 }
  0x32   : > { %v1064_v30 = vor.u32 %v1063_v15, %v1060_v0  ;;  %v1213_v49 = vrot.slane %v6449_v21, 2  ;;  %v1215_v50 = vrot.slane %v6523_v2, 2  ;;  %v916_v10 = vsel %vm519_vm0, %v4921_v36, 0  ;;  %v4929_v0 = vld [vmem:[%s8674_s3 + $0x10] sm:$0xf] }
  0x33   : > { %5378 = vmatmul.mubr.msk.bf16.gmra.mrb[8].mxu0 %vm497_vm3, %v469_v63  ;;  %v1070_v63 = vshll.u32 %v6569_v12, 16  ;;  %v6607_v37 = vsel %vm726_vm4, %v890_v62, %v892_v17  ;;  %v1081_v47 = vrot.slane %v1079_v33, 2  ;;  %v1217_v21 = vrot.slane %v6541_v27, 2 }
  0x34   : > { %5394 = vmatmul.mubr.msk.bf16.gmra.mrb[8].mxu1 %vm497_vm3, %v496_v61  ;;  %5381 = vmatprep.mubr.msk.bf16.mxu0 %vm6314_vm1, %v8687_v1  ;;  %v1076_v61 = vshrl.u32 %v6580_v3, 16  ;;  %v6611_v41 = vsel %vm1021_vm5, %v1055_v6, %v1064_v30  ;;  %v6622_v59 = vsel %vm1211_vm6, %v1212_v40, %v1213_v49  ;;  %v6627_v8 = vsel %vm1211_vm6, %v1213_v49, %v1215_v50 }
  0x35   : > { %5399 = vmatprep.mubr.msk.bf16.mxu1 %vm6314_vm1, %v8687_v1  ;;  %v1072_v32 = vrot.slane %v1070_v63, 2  ;;  %v727_v2 = vrot.slane %v6416_v7, 1  ;;  %v728_v60 = vrot.slane %v6426_v11, 1  ;;  %v1219_v27 = vrot.slane %v6553_v9, 2 }
  0x36   : > { %v1078_v35 = vrot.slane %v1076_v61, 1  ;;  %v1106_v6 = vsel %vm519_vm0, %v4929_v0, 0  ;;  %v730_v9 = vrot.slane %v6454_v25, 1  ;;  %v1221_v15 = vrot.slane %v6569_v12, 2 }
  0x37   : > { %v1073_v43 = vor.u32 %v1072_v32, %v1069_v19  ;;  %v729_v13 = vsel %vm726_vm4, %v727_v2, %v728_v60  ;;  %v732_v61 = vrot.slane %v6487_v46, 1  ;;  %v1223_v12 = vrot.slane %v6580_v3, 2 }
  0x38   : > { %v6619_v57 = vor.u32 %v1081_v47, %v1078_v35  ;;  %v6666_v63 = vsel %vm1211_vm6, %v1219_v27, %v1221_v15  ;;  %v731_v19 = vsel %vm726_vm4, %v728_v60, %v730_v9  ;;  %v734_v33 = vrot.slane %v6436_v14, 1 }
  0x39   : > { %v6617_v56 = vsel %vm1021_vm5, %v1064_v30, %v1073_v43  ;;  %v6681_v30 = vsel %vm1211_vm6, %v1221_v15, %v1223_v12  ;;  %v733_v32 = vsel %vm726_vm4, %v730_v9, %v732_v61  ;;  %v736_v35 = vrot.slane %v6443_v18, 1 }
  0x3a   : > { %v6638_v62 = vsel %vm1021_vm5, %v1073_v43, %v6619_v57  ;;  %v735_v36 = vsel %vm726_vm4, %v732_v61, %v734_v33  ;;  %v1496_v40 = vrot.slane %v450_v22, 3  ;;  %v1495_v43 = vrot.slane %v454_v38, 2 }
  0x3b   : > { %5382 = vmatmul.mubr.msk.bf16.gmra.mrb[12].mxu0 %vm497_vm3, %v6528_v4  ;;  %v6643_v4 = vsel %vm1211_vm6, %v1215_v50, %v1217_v21  ;;  %v1499_v47 = vrot.slane %v458_v39, 3  ;;  %v1498_v49 = vrot.slane %v462_v48, 2  ;;  %v737_v50 = vsel %vm726_vm4, %v734_v33, %v736_v35 }
  0x3c   : > { %5400 = vmatmul.mubr.msk.bf16.vlgmr.msra.gmra.mrb[12].mxu1 %vm497_vm3, %v6416_v7  ;;  %5429 = vmatprep.mubr.msk.bf16.mxu0 %vm6314_vm1, %v8687_v1  ;;  %v6651_v7 = vsel %vm1211_vm6, %v1217_v21, %v1219_v27  ;;  %v738_v38 = vrot.slane %v6468_v31, 1  ;;  %v1502_v39 = vrot.slane %v470_v52, 2  ;;  %v1503_v48 = vrot.slane %v466_v51, 3  ;;  %v4946_v52 = vld [vmem:[%s8674_s3 + $0x18] sm:$0xf] }
  0x3d   : > { %5458 = vmatpush3.bf16.msra.mxu1 %v916_v10  ;;  %5403 = vmatprep.mubr.msk.bf16.mxu1 %vm6314_vm1, %v8687_v1  ;;  %v1497_v10 = vor.u32 %v1496_v40, %v1495_v43  ;;  %v1500_v21 = vor.u32 %v1499_v47, %v1498_v49  ;;  %v4889_v60 = vcombine.low %v6447_v20, %v6447_v20  ;;  %v4937_v20 = vld [vmem:[%s8674_s3 + $0x14] sm:$0xf]  ;;  %v1655_v3 = vrot.slane %v6426_v11, 3 }
  0x3e   : > { %5517 = vmatprep.subr.bf16.mxu1 %v8687_v1  ;;  %v6725_v2 = vor.u32 %v1503_v48, %v1502_v39  ;;  %v739_v27 = vsel %vm726_vm4, %v736_v35, %v738_v38  ;;  %v1247_v51 = vsel %vm519_vm0, %v4937_v20, 0  ;;  %v1656_v15 = vrot.slane %v6454_v25, 3 }
  0x3f   : > { %v6712_v22 = vsel %vm1494_vm7, %v1497_v10, %v1500_v21  ;;  %v1660_v33 = vrot.slane %v6436_v14, 3  ;;  %v1514_v10 = vrot.slane %v494_v55, 2 }
  0x40   : > { %v6732_v0 = vsel %vm1494_vm7, %v1500_v21, %v6725_v2  ;;  %v1515_v21 = vrot.slane %v490_v45, 3 }
  0x42   : > { %v1516_v39 = vor.u32 %v1515_v21, %v1514_v10 }
  0x43   : > { %5430 = vmatmul.mubr.msk.bf16.vlgmr.msra.gmra.mrb[16].mxu0 %vm497_vm3, %v729_v13  ;;  %v1389_v13 = vsel %vm519_vm0, %v4946_v52, 0 }
  0x44   : > { %5404 = vmatmul.mubr.msk.bf16.gmra.mrb[16].mxu1 %vm497_vm3, %v6426_v11  ;;  %5488 = vmatpush3.bf16.msra.mxu0 %v1106_v6 }
  0x45   : > { %5407 = vmatprep.mubr.msk.bf16.mxu1 %vm6314_vm1, %v8687_v1  ;;  %5433 = vmatprep.mubr.msk.bf16.mxu0 %vm6314_vm1, %v8687_v1 }
  0x46   : > { %5547 = vmatprep.subr.bf16.mxu0 %v8687_v1 }
  0x4b   : > { %5434 = vmatmul.mubr.msk.bf16.gmra.mrb[20].mxu0 %vm497_vm3, %v731_v19  ;;  %v1657_v19 = vsel %vm1654_vm8, %v1655_v3, %v1656_v15 }
  0x4c   : > { %5408 = vmatmul.mubr.msk.bf16.gmra.mrb[20].mxu1 %vm497_vm3, %v6454_v25  ;;  %5437 = vmatprep.mubr.msk.bf16.mxu0 %vm6314_vm1, %v8687_v1 }
  0x4d   : > { %5411 = vmatprep.mubr.msk.bf16.mxu1 %vm6314_vm1, %v8687_v1 }
  0x53   : > { %5438 = vmatmul.mubr.msk.bf16.gmra.mrb[24].mxu0 %vm497_vm3, %v733_v32  ;;  %v1510_v32 = vrot.slane %v486_v42, 2 }
  0x54   : > { %5412 = vmatmul.mubr.msk.bf16.gmra.mrb[24].mxu1 %vm497_vm3, %v6487_v46  ;;  %5441 = vmatprep.mubr.msk.bf16.mxu0 %vm6314_vm1, %v8687_v1 }
  0x55   : > { %5415 = vmatprep.mubr.msk.bf16.mxu1 %vm6314_vm1, %v8687_v1 }
  0x5b   : > { %5442 = vmatmul.mubr.msk.bf16.gmra.mrb[28].mxu0 %vm497_vm3, %v735_v36 }
  0x5c   : > { %5416 = vmatmul.mubr.msk.bf16.gmra.mrb[28].mxu1 %vm497_vm3, %v6436_v14  ;;  %5445 = vmatprep.mubr.msk.bf16.mxu0 %vm6314_vm1, %v8687_v1 }
  0x5d   : > { %5419 = vmatprep.mubr.msk.bf16.mxu1 %vm6314_vm1, %v8687_v1 }
  0x63   : > { %5446 = vmatmul.mubr.msk.bf16.gmra.mrb[32].mxu0 %vm497_vm3, %v737_v50 }
  0x64   : > { %5420 = vmatmul.mubr.msk.bf16.gmra.mrb[32].mxu1 %vm497_vm3, %v6443_v18  ;;  %5449 = vmatprep.mubr.msk.bf16.mxu0 %vm6314_vm1, %v8687_v1 }
  0x65   : > { %5423 = vmatprep.mubr.msk.bf16.mxu1 %vm6314_vm1, %v8687_v1 }
  0x6b   : > { %5450 = vmatmul.mubr.msk.bf16.gmra.mrb[36].mxu0 %vm497_vm3, %v739_v27 }
  0x6c   : > { %5424 = vmatmul.mubr.msk.bf16.gmra.mrb[36].mxu1 %vm497_vm3, %v4889_v60  ;;  %5453 = vmatprep.mubr.msk.bf16.mxu0 %vm6314_vm1, %v8687_v1 }
  0x6d   : > { %5459 = vmatprep.mubr.msk.bf16.mxu1 %vm6314_vm1, %v8687_v1 }
  0x73   : > { %5454 = vmatmul.mubr.msk.bf16.gmra.mrb[40].mxu0 %vm497_vm3, %v738_v38  ;;  %v1662_v38 = vrot.slane %v6443_v18, 3 }
  0x74   : > { %5460 = vmatmul.mubr.msk.bf16.vlgmr.msra.gmra.mrb[40].mxu1 %vm497_vm3, %v6537_v16  ;;  %5489 = vmatprep.mubr.msk.bf16.mxu0 %vm6314_vm1, %v8687_v1  ;;  %v4954_v16 = vld [vmem:[%s8674_s3 + $0x1c] sm:$0xf] }
  0x75   : > { %5518 = vmatpush3.bf16.msra.mxu1 %v1247_v51  ;;  %5463 = vmatprep.mubr.msk.bf16.mxu1 %vm6314_vm1, %v8687_v1 }
  0x76   : > { %5577 = vmatprep.subr.bf16.mxu1 %v8687_v1 }
  0x7b   : > { %5490 = vmatmul.mubr.msk.bf16.vlgmr.msra.gmra.mrb[44].mxu0 %vm497_vm3, %v6565_v54  ;;  %v1355_v54 = vrot.slane %v6454_v25, 2  ;;  %v1507_v25 = vrot.slane %v474_v23, 3 }
  0x7c   : > { %5464 = vmatmul.mubr.msk.bf16.gmra.mrb[44].mxu1 %vm497_vm3, %v6547_v34  ;;  %5548 = vmatpush3.bf16.msra.mxu0 %v1389_v13  ;;  %v1549_v34 = vsel %vm519_vm0, %v4954_v16, 0 }
  0x7d   : > { %5467 = vmatprep.mubr.msk.bf16.mxu1 %vm6314_vm1, %v8687_v1  ;;  %5493 = vmatprep.mubr.msk.bf16.mxu0 %vm6314_vm1, %v8687_v1 }
  0x7e   : > { %5607 = vmatprep.subr.bf16.mxu0 %v8687_v1 }
  0x83   : > { %5494 = vmatmul.mubr.msk.bf16.gmra.mrb[48].mxu0 %vm497_vm3, %v6587_v5 }
  0x84   : > { %5468 = vmatmul.mubr.msk.bf16.gmra.mrb[48].mxu1 %vm497_vm3, %v6557_v44  ;;  %5497 = vmatprep.mubr.msk.bf16.mxu0 %vm6314_vm1, %v8687_v1  ;;  %v1354_v44 = vrot.slane %v6426_v11, 2  ;;  %v1506_v11 = vrot.slane %v478_v24, 2 }
  0x85   : > { %5471 = vmatprep.mubr.msk.bf16.mxu1 %vm6314_vm1, %v8687_v1 }
  0x86   : > { %v1356_v5 = vsel %vm1211_vm6, %v1354_v44, %v1355_v54  ;;  %v1664_v44 = vrot.slane %v6468_v31, 3 }
  0x8b   : > { %5498 = vmatmul.mubr.msk.bf16.gmra.mrb[52].mxu0 %vm497_vm3, %v6598_v29 }
  0x8c   : > { %5472 = vmatmul.mubr.msk.bf16.gmra.mrb[52].mxu1 %vm497_vm3, %v6573_v58  ;;  %5501 = vmatprep.mubr.msk.bf16.mxu0 %vm6314_vm1, %v8687_v1  ;;  %v4962_v58 = vld [vmem:[%s8674_s3 + $0x20] sm:$0xf] }
  0x8d   : > { %5475 = vmatprep.mubr.msk.bf16.mxu1 %vm6314_vm1, %v8687_v1 }
  0x93   : > { %5502 = vmatmul.mubr.msk.bf16.gmra.mrb[56].mxu0 %vm497_vm3, %v6611_v41 }
  0x94   : > { %5476 = vmatmul.mubr.msk.bf16.gmra.mrb[56].mxu1 %vm497_vm3, %v6593_v26  ;;  %5505 = vmatprep.mubr.msk.bf16.mxu0 %vm6314_vm1, %v8687_v1  ;;  %v1690_v26 = vsel %vm519_vm0, %v4962_v58, 0 }
  0x95   : > { %5479 = vmatprep.mubr.msk.bf16.mxu1 %vm6314_vm1, %v8687_v1 }
  0x9b   : > { %5506 = vmatmul.mubr.msk.bf16.gmra.mrb[60].mxu0 %vm497_vm3, %v6617_v56  ;;  %v1361_v56 = vrot.slane %v6443_v18, 2  ;;  %v1663_v18 = vsel %vm1654_vm8, %v1660_v33, %v1662_v38 }
  0x9c   : > { %5480 = vmatmul.mubr.msk.bf16.gmra.mrb[60].mxu1 %vm497_vm3, %v6607_v37  ;;  %5509 = vmatprep.mubr.msk.bf16.mxu0 %vm6314_vm1, %v8687_v1  ;;  %v1359_v37 = vrot.slane %v6436_v14, 2 }
  0x9d   : > { %5483 = vmatprep.mubr.msk.bf16.mxu1 %vm6314_vm1, %v8687_v1 }
  0xa3   : > { %5510 = vmatmul.mubr.msk.bf16.gmra.mrb[64].mxu0 %vm497_vm3, %v6638_v62 }
  0xa4   : > { %5484 = vmatmul.mubr.msk.bf16.gmra.mrb[64].mxu1 %vm497_vm3, %v892_v17  ;;  %5513 = vmatprep.mubr.msk.bf16.mxu0 %vm6314_vm1, %v8687_v1  ;;  %v1357_v17 = vrot.slane %v6487_v46, 2 }
  0xa5   : > { %5519 = vmatprep.mubr.msk.bf16.mxu1 %vm6314_vm1, %v8687_v1 }
  0xa6   : > { %v1358_v29 = vsel %vm1211_vm6, %v1355_v54, %v1357_v17  ;;  %v1360_v41 = vsel %vm1211_vm6, %v1357_v17, %v1359_v37 }
  0xab   : > { %5514 = vmatmul.mubr.msk.bf16.gmra.mrb[68].mxu0 %vm497_vm3, %v6619_v57  ;;  %v1362_v57 = vsel %vm1211_vm6, %v1359_v37, %v1361_v56  ;;  %v1665_v37 = vsel %vm1654_vm8, %v1662_v38, %v1664_v44  ;;  %v7034_v38 = vld [vmem:[%s6983_s14 + $0x10] sm:$0xf] }
  0xac   : > { %5520 = vmatmul.mubr.msk.bf16.vlgmr.msra.gmra.mrb[68].mxu1 %vm497_vm3, %v6622_v59  ;;  %5549 = vmatprep.mubr.msk.bf16.mxu0 %vm6314_vm1, %v8687_v1  ;;  %v1363_v59 = vrot.slane %v6468_v31, 2 }
  0xad   : > { %5578 = vmatpush3.bf16.msra.mxu1 %v1549_v34  ;;  %5523 = vmatprep.mubr.msk.bf16.mxu1 %vm6314_vm1, %v8687_v1 }
  0xae   : > { %5637 = vmatprep.subr.bf16.mxu1 %v8687_v1  ;;  %v1364_v62 = vsel %vm1211_vm6, %v1361_v56, %v1363_v59 }
  0xb3   : > { %5550 = vmatmul.mubr.msk.bf16.vlgmr.msra.gmra.mrb[72].mxu0 %vm497_vm3, %v1356_v5 }
  0xb4   : > { %5524 = vmatmul.mubr.msk.bf16.gmra.mrb[72].mxu1 %vm497_vm3, %v6627_v8  ;;  %5608 = vmatpush3.bf16.msra.mxu0 %v1690_v26  ;;  %v413_v8 = vld [vmem:[%s6410_s17 + $0x3c] sm:$0x7] }
  0xb5   : > { %5527 = vmatprep.mubr.msk.bf16.mxu1 %vm6314_vm1, %v8687_v1  ;;  %5553 = vmatprep.mubr.msk.bf16.mxu0 %vm6314_vm1, %v8687_v1 }
  0xb6   : > { %5667 = vmatprep.subr.bf16.mxu0 %v8687_v1 }
  0xbb   : > { %5554 = vmatmul.mubr.msk.bf16.gmra.mrb[76].mxu0 %vm497_vm3, %v1358_v29 }
  0xbc   : > { %5528 = vmatmul.mubr.msk.bf16.gmra.mrb[76].mxu1 %vm497_vm3, %v6643_v4  ;;  %5557 = vmatprep.mubr.msk.bf16.mxu0 %vm6314_vm1, %v8687_v1  ;;  %v6865_v4 = vcombine.low %v6562_v53, %v413_v8  ;;  %v4977_v53 = vld [vmem:[%s8674_s3 + $0x24] sm:$0xf]  ;;  %v1793_v8 = vld [vmem:[%s6983_s14] sm:$0xf] }
  0xbd   : > { %5531 = vmatprep.mubr.msk.bf16.mxu1 %vm6314_vm1, %v8687_v1  ;;  %v1856_v9 = vsel %vm519_vm0, %v4977_v53, 0 }
  0xbe   : > { %v1519_v55 = vshrl.u32 %v6865_v4, 16  ;;  %v1522_v45 = vshll.u32 %v6865_v4, 16 }
  0xc0   : > { %v1521_v13 = vrot.slane %v1519_v55, 2  ;;  %v1524_v16 = vrot.slane %v1522_v45, 3 }
  0xc2   : > { %v1525_v54 = vor.u32 %v1524_v16, %v1521_v13 }
  0xc3   : > { %5558 = vmatmul.mubr.msk.bf16.gmra.mrb[80].mxu0 %vm497_vm3, %v1360_v41 }
  0xc4   : > { %5532 = vmatmul.mubr.msk.bf16.gmra.mrb[80].mxu1 %vm497_vm3, %v6651_v7  ;;  %5561 = vmatprep.mubr.msk.bf16.mxu0 %vm6314_vm1, %v8687_v1  ;;  %v1365_v7 = vrot.slane %v6865_v4, 2 }
  0xc5   : > { %5535 = vmatprep.mubr.msk.bf16.mxu1 %vm6314_vm1, %v8687_v1 }
  0xc6   : > { %v1366_v6 = vsel %vm1211_vm6, %v1363_v59, %v1365_v7  ;;  %v1666_v59 = vrot.slane %v6865_v4, 3 }
  0xc8   : > { %v1667_v4 = vsel %vm1654_vm8, %v1664_v44, %v1666_v59 }
  0xcb   : > { %5562 = vmatmul.mubr.msk.bf16.gmra.mrb[84].mxu0 %vm497_vm3, %v1362_v57  ;;  %v1526_v57 = vsel %vm1494_vm7, %v1516_v39, %v1525_v54 }
  0xcc   : > { %5536 = vmatmul.mubr.msk.bf16.gmra.mrb[84].mxu1 %vm497_vm3, %v6666_v63  ;;  %5565 = vmatprep.mubr.msk.bf16.mxu0 %vm6314_vm1, %v8687_v1  ;;  %v4986_v63 = vld [vmem:[%s8674_s3 + $0x28] sm:$0xf] }
  0xcd   : > { %5539 = vmatprep.mubr.msk.bf16.mxu1 %vm6314_vm1, %v8687_v1  ;;  %v2033_v61 = vsel %vm519_vm0, %v4986_v63, 0 }
  0xd3   : > { %5566 = vmatmul.mubr.msk.bf16.gmra.mrb[88].mxu0 %vm497_vm3, %v1364_v62  ;;  %v6992_v62 = vld [vmem:[%s6983_s14 + $0x4] sm:$0xf] }
  0xd4   : > { %5540 = vmatmul.mubr.msk.bf16.gmra.mrb[88].mxu1 %vm497_vm3, %v6681_v30  ;;  %5569 = vmatprep.mubr.msk.bf16.mxu0 %vm6314_vm1, %v8687_v1  ;;  %v1508_v30 = vor.u32 %v1507_v25, %v1506_v11 }
  0xd5   : > { %5543 = vmatprep.mubr.msk.bf16.mxu1 %vm6314_vm1, %v8687_v1 }
  0xd6   : > { %v1509_v24 = vsel %vm1494_vm7, %v6725_v2, %v1508_v30 }
  0xdb   : > { %5570 = vmatmul.mubr.msk.bf16.gmra.mrb[92].mxu0 %vm497_vm3, %v1366_v6 }
  0xdc   : > { %5544 = vmatmul.mubr.msk.bf16.gmra.mrb[92].mxu1 %vm497_vm3, %v1223_v12  ;;  %5573 = vmatprep.mubr.msk.bf16.mxu0 %vm6314_vm1, %v8687_v1  ;;  %v1658_v12 = vrot.slane %v6487_v46, 3  ;;  %v1511_v46 = vrot.slane %v482_v28, 3 }
  0xdd   : > { %5579 = vmatprep.mubr.msk.bf16.mxu1 %vm6314_vm1, %v8687_v1 }
  0xde   : > { %v1659_v23 = vsel %vm1654_vm8, %v1656_v15, %v1658_v12  ;;  %v1512_v36 = vor.u32 %v1511_v46, %v1510_v32  ;;  %v1661_v47 = vsel %vm1654_vm8, %v1658_v12, %v1660_v33 }
  0xe0   : > { %v1513_v14 = vsel %vm1494_vm7, %v1508_v30, %v1512_v36  ;;  %v1517_v52 = vsel %vm1494_vm7, %v1512_v36, %v1516_v39  ;;  %v7037_v39 = vld [vmem:[%s6983_s14 + $0x14] sm:$0xf] }
  0xe3   : > { %5574 = vmatmul.mubr.msk.bf16.gmra.mrb[96].mxu0 %vm497_vm3, %v1365_v7 }
  0xe4   : > { %5580 = vmatmul.mubr.msk.bf16.vlgmr.msra.gmra.mrb[96].mxu1 %vm497_vm3, %v6712_v22  ;;  %5609 = vmatprep.mubr.msk.bf16.mxu0 %vm6314_vm1, %v8687_v1 }
  0xe5   : > { %5638 = vmatpush3.bf16.msra.mxu1 %v1856_v9  ;;  %5583 = vmatprep.mubr.msk.bf16.mxu1 %vm6314_vm1, %v8687_v1  ;;  %v6999_v9 = vcombine.low %v1793_v8, %v6992_v62  ;;  %v7071_v8 = vld [vmem:[%s6983_s14 + $0x1c] sm:$0xf] }
  0xe6   : > { %5697 = vmatprep.subr.bf16.mxu1 %v8687_v1 }
  0xe7   : > { %v1962_v46 = vshrl.u32 %v6999_v9, 16 }
  0xeb   : > { %5610 = vmatmul.mubr.msk.bf16.vlgmr.msra.gmra.mrb[100].mxu0 %vm497_vm3, %v1657_v19  ;;  %v7006_v19 = vld [vmem:[%s6983_s14 + $0x8] sm:$0xf] }
  0xec   : > { %5584 = vmatmul.mubr.msk.bf16.gmra.mrb[100].mxu1 %vm497_vm3, %v6732_v0  ;;  %5668 = vmatpush3.bf16.msra.mxu0 %v2033_v61  ;;  %v7009_v61 = vld [vmem:[%s6983_s14 + $0xc] sm:$0xf] }
  0xed   : > { %5587 = vmatprep.mubr.msk.bf16.mxu1 %vm6314_vm1, %v8687_v1  ;;  %5613 = vmatprep.mubr.msk.bf16.mxu0 %vm6314_vm1, %v8687_v1 }
  0xee   : > { %5727 = vmatprep.subr.bf16.mxu0 %v8687_v1 }
  0xf3   : > { %5614 = vmatmul.mubr.msk.bf16.gmra.mrb[104].mxu0 %vm497_vm3, %v1659_v23  ;;  %v7015_v23 = vcombine.low %v7006_v19, %v7009_v61 }
  0xf4   : > { %5588 = vmatmul.mubr.msk.bf16.gmra.mrb[104].mxu1 %vm497_vm3, %v1509_v24  ;;  %5617 = vmatprep.mubr.msk.bf16.mxu0 %vm6314_vm1, %v8687_v1  ;;  %v1964_v24 = vshll.u32 %v6999_v9, 16 }
  0xf5   : > { %5591 = vmatprep.mubr.msk.bf16.mxu1 %vm6314_vm1, %v8687_v1 }
  0xf6   : > { %v6931_v35 = vpop.f32.mrb[0].mxu0 }
  0xf7   : > { %v5371_v42 = vpop.f32.mrb[1].mxu0  ;;  %v6933_v40 = vpop.f32.mrb[0].mxu1 }
  0xf8   : > { %v6935_v28 = vpop.f32.mrb[2].mxu0  ;;  %v5387_v43 = vpop.f32.mrb[1].mxu1  ;;  %v4994_v42 = vld [vmem:[%s8674_s3 + $0x2c] sm:$0xf] }
  0xf9   : > { %v5372_v49 = vpop.f32.mrb[3].mxu0  ;;  %v6938_v50 = vpop.f32.mrb[2].mxu1  ;;  %v1968_v43 = vshll.u32 %v7015_v23, 16 }
  0xfa   : > { %v5388_v22 = vpop.f32.mrb[3].mxu1 }
  0xfb   : > { %5618 = vmatmul.mubr.msk.bf16.gmra.mrb[108].mxu0 %vm497_vm3, %v1661_v47 }
  0xfc   : > { %5592 = vmatmul.mubr.msk.bf16.gmra.mrb[108].mxu1 %vm497_vm3, %v1513_v14  ;;  %5621 = vmatprep.mubr.msk.bf16.mxu0 %vm6314_vm1, %v8687_v1 }
  0xfd   : > { %5595 = vmatprep.mubr.msk.bf16.mxu1 %vm6314_vm1, %v8687_v1 }
  0xfe   : > { %v6954_v48 = vpop.f32.mrb[4].mxu0 }
  0xff   : > { %v5375_v2 = vpop.f32.mrb[5].mxu0  ;;  %v6956_v60 = vpop.f32.mrb[4].mxu1 }
 0x100   : > { %v6958_v27 = vpop.f32.mrb[6].mxu0  ;;  %v5391_v0 = vpop.f32.mrb[5].mxu1  ;;  %v2180_v2 = vsel %vm519_vm0, %v4994_v42, 0 }
 0x101   : > { %v5376_v20 = vpop.f32.mrb[7].mxu0  ;;  %v6961_v51 = vpop.f32.mrb[6].mxu1 }
 0x102   : > { %v5392_v34 = vpop.f32.mrb[7].mxu1 }
 0x103   : > { %5622 = vmatmul.mubr.msk.bf16.gmra.mrb[112].mxu0 %vm497_vm3, %v1663_v18  ;;  %v7050_v18 = vcombine.low %v7034_v38, %v7037_v39 }
 0x104   : > { %5596 = vmatmul.mubr.msk.bf16.gmra.mrb[112].mxu1 %vm497_vm3, %v1517_v52  ;;  %5625 = vmatprep.mubr.msk.bf16.mxu0 %vm6314_vm1, %v8687_v1 }
 0x105   : > { %5599 = vmatprep.mubr.msk.bf16.mxu1 %vm6314_vm1, %v8687_v1 }
 0x106   : > { %v6972_v58 = vpop.f32.mrb[8].mxu0 }
 0x107   : > { %v5379_v5 = vpop.f32.mrb[9].mxu0  ;;  %v6974_v26 = vpop.f32.mrb[8].mxu1 }
 0x108   : > { %v6976_v17 = vpop.f32.mrb[10].mxu0  ;;  %v5395_v29 = vpop.f32.mrb[9].mxu1 }
 0x109   : > { %v5380_v41 = vpop.f32.mrb[11].mxu0  ;;  %v608_v56 = vpop.f32.mrb[10].mxu1 }
 0x10a   : > { %v5396_v31 = vpop.f32.mrb[11].mxu1  ;;  %v1975_v41 = vshll.u32 %v7050_v18, 16 }
 0x10b   : > { %5626 = vmatmul.mubr.msk.bf16.gmra.mrb[116].mxu0 %vm497_vm3, %v1665_v37  ;;  %v1972_v37 = vshrl.u32 %v7015_v23, 16 }
 0x10c   : > { %5600 = vmatmul.mubr.msk.bf16.gmra.mrb[116].mxu1 %vm497_vm3, %v1526_v57  ;;  %5629 = vmatprep.mubr.msk.bf16.mxu0 %vm6314_vm1, %v8687_v1 }
 0x10d   : > { %5603 = vmatprep.mubr.msk.bf16.mxu1 %vm6314_vm1, %v8687_v1 }
 0x10e   : > { %v6996_v7 = vpop.f32.mrb[12].mxu0 }
 0x10f   : > { %v663_v6 = vpop.f32.mrb[12].mxu1  ;;  %v5383_v53 = vpop.f32.mrb[13].mxu0 }
 0x110   : > { %v664_v3 = vadd.f32 %v663_v6, %v6931_v35  ;;  %v5401_v15 = vpop.f32.mrb[13].mxu1  ;;  %v7002_v63 = vpop.f32.mrb[14].mxu0 }
 0x111   : > { %v666_v11 = vpop.f32.mrb[14].mxu1  ;;  %v5384_v25 = vpop.f32.mrb[15].mxu0 }
 0x112   : > { %v667_v12 = vadd.f32 %v666_v11, %v6935_v28  ;;  %v5402_v30 = vpop.f32.mrb[15].mxu1  ;;  %v1966_v28 = vrot.slane %v1964_v24, 1 }
 0x113   : > { %5630 = vmatmul.mubr.msk.bf16.gmra.mrb[120].mxu0 %vm497_vm3, %v1667_v4 }
 0x114   : > { %5604 = vmatmul.mubr.msk.bf16.gmra.mrb[120].mxu1 %vm497_vm3, %v1525_v54  ;;  %5633 = vmatprep.mubr.msk.bf16.mxu0 %vm6314_vm1, %v8687_v1  ;;  %v1967_v0 = vor.u32 %v1966_v28, %v1962_v46  ;;  %v1979_v46 = vshrl.u32 %v7050_v18, 16 }
 0x115   : > { %5639 = vmatprep.mubr.msk.bf16.mxu1 %vm6314_vm1, %v8687_v1 }
 0x116   : > { %v798_v32 = vpop.f32.mrb[16].mxu0 }
 0x117   : > { %v671_v33 = vpop.f32.mrb[16].mxu1  ;;  %v7024_v36 = vadd.f32 %v798_v32, %v664_v3  ;;  %v5431_v35 = vpop.f32.mrb[17].mxu0  ;;  %v1977_v3 = vrot.slane %v1975_v41, 1 }
 0x118   : > { %v672_v47 = vadd.f32 %v671_v33, %v6954_v48  ;;  %v5405_v49 = vpop.f32.mrb[17].mxu1  ;;  %v801_v14 = vpop.f32.mrb[18].mxu0  ;;  %v1970_v48 = vrot.slane %v1968_v43, 1 }
 0x119   : > { %v674_v10 = vpop.f32.mrb[18].mxu1  ;;  %v7031_v21 = vadd.f32 %v801_v14, %v667_v12  ;;  %v5432_v22 = vpop.f32.mrb[19].mxu0  ;;  %v7102_v49 = vld [vmem:[%s6983_s14 + $0x24] sm:$0xf] }
 0x11a   : > { %v675_v55 = vadd.f32 %v674_v10, %v6958_v27  ;;  %v5406_v45 = vpop.f32.mrb[19].mxu1  ;;  %v5009_v27 = vld [vmem:[%s8674_s3 + $0x30] sm:$0xf]  ;;  %v1971_v34 = vsel %vm441_vm2, %v1967_v0, %v1970_v48 }
 0x11b   : > { %5634 = vmatmul.mubr.msk.bf16.gmra.mrb[124].mxu0 %vm497_vm3, %v1666_v59  ;;  %v2334_v29 = vsel %vm519_vm0, %v5009_v27, 0  ;;  %v7068_v59 = vld [vmem:[%s6983_s14 + $0x18] sm:$0xf] }
 0x11c   : > { %5640 = vmatmul.mubr.msk.bf16.vlgmr.msra.gmra.mrb[124].mxu1 %vm497_vm3, %v6999_v9  ;;  %5669 = vmatprep.mubr.msk.bf16.mxu0 %vm6314_vm1, %v8687_v1  ;;  %v7083_v15 = vcombine.low %v7068_v59, %v7071_v8 }
 0x11d   : > { %5698 = vmatpush3.bf16.msra.mxu1 %v2180_v2  ;;  %5643 = vmatprep.mubr.msk.bf16.mxu1 %vm6314_vm1, %v8687_v1 }
 0x11e   : > { %v806_v20 = vpop.f32.mrb[20].mxu0  ;;  %5757 = vmatprep.subr.bf16.mxu1 %v8687_v1  ;;  %v8685_v33 = vshll.u32 %v7083_v15, 16 }
 0x11f   : > { %v679_v52 = vpop.f32.mrb[20].mxu1  ;;  %v7058_v13 = vadd.f32 %v806_v20, %v672_v47  ;;  %v5435_v16 = vpop.f32.mrb[21].mxu0  ;;  %v7099_v47 = vld [vmem:[%s6983_s14 + $0x20] sm:$0xf] }
 0x120   : > { %v680_v44 = vadd.f32 %v679_v52, %v6972_v58  ;;  %v5409_v54 = vpop.f32.mrb[21].mxu1  ;;  %v809_v5 = vpop.f32.mrb[22].mxu0  ;;  %v1974_v58 = vor.u32 %v1972_v37, %v1970_v48  ;;  %v1984_v22 = vrot.slane %v8685_v33, 1  ;;  %v8686_v16 = vshrl.u32 %v7083_v15, 16 }
 0x121   : > { %v682_v56 = vpop.f32.mrb[22].mxu1  ;;  %v7065_v57 = vadd.f32 %v809_v5, %v675_v55  ;;  %v5436_v31 = vpop.f32.mrb[23].mxu0  ;;  %v7116_v55 = vcombine.low %v7099_v47, %v7102_v49 }
 0x122   : > { %v683_v6 = vadd.f32 %v682_v56, %v6976_v17  ;;  %v5410_v53 = vpop.f32.mrb[23].mxu1  ;;  %v1978_v32 = vsel %vm441_vm2, %v1974_v58, %v1977_v3  ;;  %v7132_v56 = vld [vmem:[%s6983_s14 + $0x2c] sm:$0xf] }
 0x123   : > { %5670 = vmatmul.mubr.msk.bf16.vlgmr.msra.gmra.mrb[128].mxu0 %vm497_vm3, %v1971_v34  ;;  %v8683_v34 = vshll.u32 %v7116_v55, 16 }
 0x124   : > { %5644 = vmatmul.mubr.msk.bf16.gmra.mrb[128].mxu1 %vm497_vm3, %v7015_v23  ;;  %5728 = vmatpush3.bf16.msra.mxu0 %v2334_v29  ;;  %v7129_v29 = vld [vmem:[%s6983_s14 + $0x28] sm:$0xf] }
 0x125   : > { %5647 = vmatprep.mubr.msk.bf16.mxu1 %vm6314_vm1, %v8687_v1  ;;  %5673 = vmatprep.mubr.msk.bf16.mxu0 %vm6314_vm1, %v8687_v1  ;;  %v1991_v53 = vrot.slane %v8683_v34, 1  ;;  %v7146_v58 = vcombine.low %v7129_v29, %v7132_v56 }
 0x126   : > { %v814_v17 = vpop.f32.mrb[24].mxu0  ;;  %5787 = vmatprep.subr.bf16.mxu0 %v8687_v1 }
 0x127   : > { %v687_v4 = vpop.f32.mrb[24].mxu1  ;;  %v7090_v11 = vadd.f32 %v814_v17, %v680_v44  ;;  %v5439_v25 = vpop.f32.mrb[25].mxu0 }
 0x128   : > { %v688_v12 = vadd.f32 %v687_v4, %v6996_v7  ;;  %v5413_v30 = vpop.f32.mrb[25].mxu1  ;;  %v817_v24 = vpop.f32.mrb[26].mxu0  ;;  %v1981_v7 = vor.u32 %v1979_v46, %v1977_v3 }
 0x129   : > { %v690_v35 = vpop.f32.mrb[26].mxu1  ;;  %v7096_v42 = vadd.f32 %v817_v24, %v683_v6  ;;  %v5440_v28 = vpop.f32.mrb[27].mxu0 }
 0x12a   : > { %v691_v14 = vadd.f32 %v690_v35, %v7002_v63  ;;  %v5414_v10 = vpop.f32.mrb[27].mxu1  ;;  %v1985_v52 = vsel %vm441_vm2, %v1981_v7, %v1984_v22  ;;  %v8681_v35 = vshll.u32 %v7146_v58, 16  ;;  %v7159_v7 = vld [vmem:[%s6983_s14 + $0x30] sm:$0xf] }
 0x12b   : > { %5674 = vmatmul.mubr.msk.bf16.gmra.mrb[132].mxu0 %vm497_vm3, %v1978_v32  ;;  %v8684_v32 = vshrl.u32 %v7116_v55, 16 }
 0x12c   : > { %5648 = vmatmul.mubr.msk.bf16.gmra.mrb[132].mxu1 %vm497_vm3, %v7050_v18  ;;  %5677 = vmatprep.mubr.msk.bf16.mxu0 %vm6314_vm1, %v8687_v1 }
 0x12d   : > { %5651 = vmatprep.mubr.msk.bf16.mxu1 %vm6314_vm1, %v8687_v1 }
 0x12e   : > { %v822_v63 = vpop.f32.mrb[28].mxu0 }
 0x12f   : > { %v695_v45 = vpop.f32.mrb[28].mxu1  ;;  %v7120_v2 = vadd.f32 %v822_v63, %v688_v12  ;;  %v5443_v0 = vpop.f32.mrb[29].mxu0 }
 0x130   : > { %v696_v48 = vadd.f32 %v695_v45, %v6933_v40  ;;  %v5417_v27 = vpop.f32.mrb[29].mxu1  ;;  %v825_v20 = vpop.f32.mrb[30].mxu0  ;;  %v1988_v40 = vor.u32 %v8686_v16, %v1984_v22  ;;  %v7162_v22 = vld [vmem:[%s6983_s14 + $0x34] sm:$0xf]  ;;  %v1998_v0 = vrot.slane %v8681_v35, 1 }
 0x131   : > { %v698_v44 = vpop.f32.mrb[30].mxu1  ;;  %v7126_v54 = vadd.f32 %v825_v20, %v691_v14  ;;  %v5444_v5 = vpop.f32.mrb[31].mxu0 }
 0x132   : > { %v699_v31 = vadd.f32 %v698_v44, %v6938_v50  ;;  %v5418_v6 = vpop.f32.mrb[31].mxu1  ;;  %v1992_v24 = vsel %vm441_vm2, %v1988_v40, %v1991_v53  ;;  %v8682_v40 = vshrl.u32 %v7146_v58, 16 }
 0x133   : > { %5678 = vmatmul.mubr.msk.bf16.gmra.mrb[136].mxu0 %vm497_vm3, %v1985_v52 }
 0x134   : > { %5652 = vmatmul.mubr.msk.bf16.gmra.mrb[136].mxu1 %vm497_vm3, %v7083_v15  ;;  %5681 = vmatprep.mubr.msk.bf16.mxu0 %vm6314_vm1, %v8687_v1 }
 0x135   : > { %5655 = vmatprep.mubr.msk.bf16.mxu1 %vm6314_vm1, %v8687_v1 }
 0x136   : > { %v830_v50 = vpop.f32.mrb[32].mxu0 }
 0x137   : > { %v703_v3 = vpop.f32.mrb[32].mxu1  ;;  %v7150_v17 = vadd.f32 %v830_v50, %v696_v48  ;;  %v5447_v4 = vpop.f32.mrb[33].mxu0  ;;  %v7176_v48 = vcombine.low %v7159_v7, %v7162_v22 }
 0x138   : > { %v704_v25 = vadd.f32 %v703_v3, %v6956_v60  ;;  %v5421_v12 = vpop.f32.mrb[33].mxu1  ;;  %v833_v30 = vpop.f32.mrb[34].mxu0  ;;  %v1995_v60 = vor.u32 %v8684_v32, %v1991_v53 }
 0x139   : > { %v706_v28 = vpop.f32.mrb[34].mxu1  ;;  %v7156_v14 = vadd.f32 %v833_v30, %v699_v31  ;;  %v5448_v10 = vpop.f32.mrb[35].mxu0  ;;  %v8679_v53 = vshll.u32 %v7176_v48, 16  ;;  %v2910_v30 = vrot.slane %v1972_v37, 2 }
 0x13a   : > { %v707_v63 = vadd.f32 %v706_v28, %v6961_v51  ;;  %v5422_v45 = vpop.f32.mrb[35].mxu1  ;;  %v1999_v6 = vsel %vm441_vm2, %v1995_v60, %v1998_v0  ;;  %v2913_v28 = vrot.slane %v1979_v46, 2 }
 0x13b   : > { %5682 = vmatmul.mubr.msk.bf16.gmra.mrb[140].mxu0 %vm497_vm3, %v1992_v24  ;;  %v2914_v24 = vrot.slane %v1975_v41, 3  ;;  %v4976_v41 = vcombine.low %v7159_v7, %v7159_v7 }
 0x13c   : > { %5656 = vmatmul.mubr.msk.bf16.gmra.mrb[140].mxu1 %vm497_vm3, %v7116_v55  ;;  %5685 = vmatprep.mubr.msk.bf16.mxu0 %vm6314_vm1, %v8687_v1 }
 0x13d   : > { %5659 = vmatprep.mubr.msk.bf16.mxu1 %vm6314_vm1, %v8687_v1 }
 0x13e   : > { %v838_v51 = vpop.f32.mrb[36].mxu0 }
 0x13f   : > { %v711_v27 = vpop.f32.mrb[36].mxu1  ;;  %v7180_v20 = vadd.f32 %v838_v51, %v704_v25  ;;  %v5451_v52 = vpop.f32.mrb[37].mxu0  ;;  %v2006_v25 = vrot.slane %v8679_v53, 1 }
 0x140   : > { %v712_v44 = vadd.f32 %v711_v27, %v6974_v26  ;;  %v841_v5 = vpop.f32.mrb[38].mxu0  ;;  %v5425_v31 = vpop.f32.mrb[37].mxu1  ;;  %v2002_v26 = vor.u32 %v8682_v40, %v1998_v0  ;;  %v2911_v0 = vrot.slane %v1968_v43, 3  ;;  %v8680_v43 = vshrl.u32 %v7176_v48, 16 }
 0x141   : > { %v7186_v50 = vadd.f32 %v841_v5, %v707_v63  ;;  %v5452_v3 = vpop.f32.mrb[39].mxu0  ;;  %v714_v4 = vpop.f32.mrb[38].mxu1 }
 0x142   : > { %v5426_v12 = vpop.f32.mrb[39].mxu1  ;;  %v2007_v46 = vsel %vm441_vm2, %v2002_v26, %v2006_v25  ;;  %v2912_v31 = vor.u32 %v2911_v0, %v2910_v30  ;;  %v2145_v4 = vrot.slane %v6999_v9, 1  ;;  %v7242_v9 = vcombine.low %v7009_v61, %v7034_v38 }
 0x143   : > { %5686 = vmatmul.mubr.msk.bf16.gmra.mrb[144].mxu0 %vm497_vm3, %v1999_v6  ;;  %v7213_v6 = vor.u32 %v2914_v24, %v2913_v28  ;;  %v2010_v28 = vor.u32 %v8680_v43, %v2006_v25  ;;  %v2148_v38 = vrot.slane %v7050_v18, 1 }
 0x144   : > { %5660 = vmatmul.mubr.msk.bf16.gmra.mrb[144].mxu1 %vm497_vm3, %v7146_v58  ;;  %5689 = vmatprep.mubr.msk.bf16.mxu0 %vm6314_vm1, %v8687_v1  ;;  %v2300_v61 = vrot.slane %v7242_v9, 1 }
 0x145   : > { %5663 = vmatprep.mubr.msk.bf16.mxu1 %vm6314_vm1, %v8687_v1 }
 0x146   : > { %v846_v10 = vpop.f32.mrb[40].mxu0 }
 0x147   : > { %v7205_v63 = vadd.f32 %v846_v10, %v712_v44  ;;  %v952_v45 = vpop.f32.mrb[40].mxu1  ;;  %v5455_v60 = vpop.f32.mrb[41].mxu0  ;;  %v5017_v10 = vld [vmem:[%s8674_s3 + $0x34] sm:$0xf] }
 0x148   : > { %v1006_v51 = vadd.f32 %v952_v45, %v7024_v36  ;;  %v5461_v37 = vpop.f32.mrb[41].mxu1  ;;  %v849_v27 = vpop.f32.mrb[42].mxu0  ;;  %v7220_v36 = vsel %vm1494_vm7, %v2912_v31, %v7213_v6  ;;  %v7238_v45 = vcombine.low %v6992_v62, %v7006_v19  ;;  %v2523_v62 = vsel %vm519_vm0, %v5017_v10, 0 }
 0x149   : > { %v955_v52 = vpop.f32.mrb[42].mxu1  ;;  %v5456_v5 = vpop.f32.mrb[43].mxu0 }
 0x14a   : > { %v1007_v44 = vadd.f32 %v955_v52, %v7031_v21  ;;  %v5462_v3 = vpop.f32.mrb[43].mxu1  ;;  %v2146_v21 = vrot.slane %v7015_v23, 1  ;;  %v2299_v19 = vrot.slane %v7238_v45, 1 }
 0x14b   : > { %5690 = vmatmul.mubr.msk.bf16.gmra.mrb[148].mxu0 %vm497_vm3, %v2007_v46 }
 0x14c   : > { %5664 = vmatmul.mubr.msk.bf16.gmra.mrb[148].mxu1 %vm497_vm3, %v4976_v41  ;;  %5693 = vmatprep.mubr.msk.bf16.mxu0 %vm6314_vm1, %v8687_v1  ;;  %v2147_v41 = vsel %vm726_vm4, %v2145_v4, %v2146_v21 }
 0x14d   : > { %5699 = vmatprep.mubr.msk.bf16.mxu1 %vm6314_vm1, %v8687_v1 }
 0x14e   : > { %v1142_v12 = vpop.f32.mrb[44].mxu0 }
 0x14f   : > { %v960_v26 = vpop.f32.mrb[44].mxu1  ;;  %v7229_v30 = vadd.f32 %v1142_v12, %v1006_v51  ;;  %v5491_v24 = vpop.f32.mrb[45].mxu0 }
 0x150   : > { %v1008_v60 = vadd.f32 %v960_v26, %v7058_v13  ;;  %v5465_v0 = vpop.f32.mrb[45].mxu1  ;;  %v1145_v51 = vpop.f32.mrb[46].mxu0  ;;  %v2301_v26 = vsel %vm726_vm4, %v2299_v19, %v2300_v61  ;;  %v7269_v24 = vcombine.low %v7037_v39, %v7068_v59  ;;  %v2150_v39 = vrot.slane %v7083_v15, 1 }
 0x151   : > { %v963_v37 = vpop.f32.mrb[46].mxu1  ;;  %v7245_v27 = vadd.f32 %v1145_v51, %v1007_v44  ;;  %v5492_v25 = vpop.f32.mrb[47].mxu0  ;;  %v2149_v51 = vsel %vm726_vm4, %v2146_v21, %v2148_v38 }
 0x152   : > { %v1009_v46 = vadd.f32 %v963_v37, %v7065_v57  ;;  %v5466_v52 = vpop.f32.mrb[47].mxu1  ;;  %v5025_v57 = vld [vmem:[%s8674_s3 + $0x38] sm:$0xf] }
 0x153   : > { %5694 = vmatmul.mubr.msk.bf16.gmra.mrb[152].mxu0 %vm497_vm3, %v2010_v28 }
 0x154   : > { %5700 = vmatmul.mubr.msk.bf16.vlgmr.msra.gmra.mrb[152].mxu1 %vm497_vm3, %v2147_v41  ;;  %5729 = vmatprep.mubr.msk.bf16.mxu0 %vm6314_vm1, %v8687_v1 }
 0x155   : > { %5758 = vmatpush3.bf16.msra.mxu1 %v2523_v62  ;;  %5703 = vmatprep.mubr.msk.bf16.mxu1 %vm6314_vm1, %v8687_v1 }
 0x156   : > { %v1150_v13 = vpop.f32.mrb[48].mxu0  ;;  %5817 = vmatprep.subr.bf16.mxu1 %v8687_v1 }
 0x157   : > { %v968_v5 = vpop.f32.mrb[48].mxu1  ;;  %v7263_v31 = vadd.f32 %v1150_v13, %v1008_v60  ;;  %v5495_v44 = vpop.f32.mrb[49].mxu0  ;;  %v2663_v60 = vsel %vm519_vm0, %v5025_v57, 0  ;;  %v7291_v13 = vcombine.low %v7071_v8, %v7099_v47  ;;  %v2152_v8 = vrot.slane %v7116_v55, 1 }
 0x158   : > { %v1010_v3 = vadd.f32 %v968_v5, %v7090_v11  ;;  %v5469_v4 = vpop.f32.mrb[49].mxu1  ;;  %v1153_v12 = vpop.f32.mrb[50].mxu0  ;;  %v2302_v11 = vrot.slane %v7269_v24, 1 }
 0x159   : > { %v971_v28 = vpop.f32.mrb[50].mxu1  ;;  %v7271_v10 = vadd.f32 %v1153_v12, %v1009_v46  ;;  %v5496_v0 = vpop.f32.mrb[51].mxu0  ;;  %v2151_v4 = vsel %vm726_vm4, %v2148_v38, %v2150_v39 }
 0x15a   : > { %v1011_v37 = vadd.f32 %v971_v28, %v7096_v42  ;;  %v5470_v25 = vpop.f32.mrb[51].mxu1  ;;  %v2303_v19 = vsel %vm726_vm4, %v2300_v61, %v2302_v11 }
 0x15b   : > { %5730 = vmatmul.mubr.msk.bf16.vlgmr.msra.gmra.mrb[156].mxu0 %vm497_vm3, %v2301_v26 }
 0x15c   : > { %5704 = vmatmul.mubr.msk.bf16.gmra.mrb[156].mxu1 %vm497_vm3, %v2149_v51  ;;  %5788 = vmatpush3.bf16.msra.mxu0 %v2663_v60  ;;  %v7311_v60 = vcombine.low %v7102_v49, %v7129_v29  ;;  %v2154_v49 = vrot.slane %v7146_v58, 1 }
 0x15d   : > { %5707 = vmatprep.mubr.msk.bf16.mxu1 %vm6314_vm1, %v8687_v1  ;;  %5733 = vmatprep.mubr.msk.bf16.mxu0 %vm6314_vm1, %v8687_v1 }
 0x15e   : > { %v1158_v59 = vpop.f32.mrb[52].mxu0  ;;  %5847 = vmatprep.subr.bf16.mxu0 %v8687_v1 }
 0x15f   : > { %v976_v42 = vpop.f32.mrb[52].mxu1  ;;  %v7285_v21 = vadd.f32 %v1158_v59, %v1010_v3  ;;  %v5499_v41 = vpop.f32.mrb[53].mxu0 }
 0x160   : > { %v1012_v46 = vadd.f32 %v976_v42, %v7120_v2  ;;  %v5473_v52 = vpop.f32.mrb[53].mxu1  ;;  %v1161_v62 = vpop.f32.mrb[54].mxu0  ;;  %v2304_v2 = vrot.slane %v7291_v13, 1  ;;  %v2153_v42 = vsel %vm726_vm4, %v2150_v39, %v2152_v8 }
 0x161   : > { %v979_v57 = vpop.f32.mrb[54].mxu1  ;;  %v7293_v5 = vadd.f32 %v1161_v62, %v1011_v37  ;;  %v5500_v44 = vpop.f32.mrb[55].mxu0  ;;  %v7329_v52 = vcombine.low %v7132_v56, %v7159_v7  ;;  %v7343_v7 = vld [vmem:[%s6983_s14 + $0x38] sm:$0xf] }
 0x162   : > { %v1013_v3 = vadd.f32 %v979_v57, %v7126_v54  ;;  %v5474_v12 = vpop.f32.mrb[55].mxu1  ;;  %v2305_v51 = vsel %vm726_vm4, %v2302_v11, %v2304_v2 }
 0x163   : > { %5734 = vmatmul.mubr.msk.bf16.gmra.mrb[160].mxu0 %vm497_vm3, %v2303_v19  ;;  %v2308_v56 = vrot.slane %v7329_v52, 1 }
 0x164   : > { %5708 = vmatmul.mubr.msk.bf16.gmra.mrb[160].mxu1 %vm497_vm3, %v2151_v4  ;;  %5737 = vmatprep.mubr.msk.bf16.mxu0 %vm6314_vm1, %v8687_v1 }
 0x165   : > { %5711 = vmatprep.mubr.msk.bf16.mxu1 %vm6314_vm1, %v8687_v1 }
 0x166   : > { %v1166_v47 = vpop.f32.mrb[56].mxu0 }
 0x167   : > { %v984_v61 = vpop.f32.mrb[56].mxu1  ;;  %v7305_v38 = vadd.f32 %v1166_v47, %v1012_v46  ;;  %v5503_v54 = vpop.f32.mrb[57].mxu0  ;;  %v2155_v47 = vsel %vm726_vm4, %v2152_v8, %v2154_v49 }
 0x168   : > { %v1014_v26 = vadd.f32 %v984_v61, %v7150_v17  ;;  %v5477_v28 = vpop.f32.mrb[57].mxu1  ;;  %v1169_v0 = vpop.f32.mrb[58].mxu0  ;;  %v2306_v17 = vrot.slane %v7311_v60, 1 }
 0x169   : > { %v987_v37 = vpop.f32.mrb[58].mxu1  ;;  %v7313_v25 = vadd.f32 %v1169_v0, %v1013_v3  ;;  %v5504_v59 = vpop.f32.mrb[59].mxu0  ;;  %v7352_v28 = vcombine.low %v7162_v22, %v7343_v7 }
 0x16a   : > { %v1015_v41 = vadd.f32 %v987_v37, %v7156_v14  ;;  %v5478_v46 = vpop.f32.mrb[59].mxu1  ;;  %v2307_v44 = vsel %vm726_vm4, %v2304_v2, %v2306_v17  ;;  %v2309_v59 = vsel %vm726_vm4, %v2306_v17, %v2308_v56  ;;  %v2443_v17 = vshll.u32 %v7238_v45, 16 }
 0x16b   : > { %5738 = vmatmul.mubr.msk.bf16.gmra.mrb[164].mxu0 %vm497_vm3, %v2305_v51  ;;  %v2310_v22 = vrot.slane %v7352_v28, 1 }
 0x16c   : > { %5712 = vmatmul.mubr.msk.bf16.gmra.mrb[164].mxu1 %vm497_vm3, %v2153_v42  ;;  %5741 = vmatprep.mubr.msk.bf16.mxu0 %vm6314_vm1, %v8687_v1 }
 0x16d   : > { %5715 = vmatprep.mubr.msk.bf16.mxu1 %vm6314_vm1, %v8687_v1 }
 0x16e   : > { %v1174_v29 = vpop.f32.mrb[60].mxu0 }
 0x16f   : > { %v992_v11 = vpop.f32.mrb[60].mxu1  ;;  %v7325_v39 = vadd.f32 %v1174_v29, %v1014_v26  ;;  %v5507_v14 = vpop.f32.mrb[61].mxu0 }
 0x170   : > { %v1016_v62 = vadd.f32 %v992_v11, %v7180_v20  ;;  %v5481_v19 = vpop.f32.mrb[61].mxu1  ;;  %v1177_v57 = vpop.f32.mrb[62].mxu0  ;;  %v2156_v20 = vrot.slane %v7176_v48, 1  ;;  %v2451_v14 = vshll.u32 %v7242_v9, 16 }
 0x171   : > { %v995_v4 = vpop.f32.mrb[62].mxu1  ;;  %v7333_v3 = vadd.f32 %v1177_v57, %v1015_v41  ;;  %v5508_v12 = vpop.f32.mrb[63].mxu0 }
 0x172   : > { %v1017_v61 = vadd.f32 %v995_v4, %v7186_v50  ;;  %v5482_v54 = vpop.f32.mrb[63].mxu1  ;;  %v2157_v29 = vsel %vm726_vm4, %v2154_v49, %v2156_v20  ;;  %v2448_v49 = vshrl.u32 %v7242_v9, 16 }
 0x173   : > { %5742 = vmatmul.mubr.msk.bf16.gmra.mrb[168].mxu0 %vm497_vm3, %v2307_v44 }
 0x174   : > { %5716 = vmatmul.mubr.msk.bf16.gmra.mrb[168].mxu1 %vm497_vm3, %v2155_v47  ;;  %5745 = vmatprep.mubr.msk.bf16.mxu0 %vm6314_vm1, %v8687_v1 }
 0x175   : > { %5719 = vmatprep.mubr.msk.bf16.mxu1 %vm6314_vm1, %v8687_v1 }
 0x176   : > { %v1182_v2 = vpop.f32.mrb[64].mxu0 }
 0x177   : > { %v1000_v50 = vpop.f32.mrb[64].mxu1  ;;  %v7348_v8 = vadd.f32 %v1182_v2, %v1016_v62  ;;  %v5511_v26 = vpop.f32.mrb[65].mxu0 }
 0x178   : > { %v1018_v0 = vadd.f32 %v1000_v50, %v7205_v63  ;;  %v1185_v51 = vpop.f32.mrb[66].mxu0  ;;  %v5485_v37 = vpop.f32.mrb[65].mxu1  ;;  %v2440_v63 = vshrl.u32 %v7238_v45, 16  ;;  %v2445_v26 = vrot.slane %v2443_v17, 2 }
 0x179   : > { %v7357_v42 = vadd.f32 %v1185_v51, %v1017_v61  ;;  %v5512_v41 = vpop.f32.mrb[67].mxu0  ;;  %v1003_v46 = vpop.f32.mrb[66].mxu1  ;;  %v2311_v61 = vsel %vm726_vm4, %v2308_v56, %v2310_v22  ;;  %v2450_v51 = vrot.slane %v2448_v49, 1  ;;  %v2453_v37 = vrot.slane %v2451_v14, 2 }
 0x17a   : > { %v5486_v11 = vpop.f32.mrb[67].mxu1  ;;  %v2442_v50 = vrot.slane %v2440_v63, 1  ;;  %v2460_v56 = vshll.u32 %v7269_v24, 16 }
 0x17b   : > { %5746 = vmatmul.mubr.msk.bf16.gmra.mrb[172].mxu0 %vm497_vm3, %v2309_v59  ;;  %v2454_v46 = vor.u32 %v2453_v37, %v2450_v51  ;;  %v2628_v51 = vrot.slane %v7238_v45, 2  ;;  %v2629_v37 = vrot.slane %v7242_v9, 2 }
 0x17c   : > { %5720 = vmatmul.mubr.msk.bf16.gmra.mrb[172].mxu1 %vm497_vm3, %v2157_v29  ;;  %5749 = vmatprep.mubr.msk.bf16.mxu0 %vm6314_vm1, %v8687_v1  ;;  %v2446_v41 = vor.u32 %v2445_v26, %v2442_v50  ;;  %v7406_v50 = vld [vmem:[%s7394_s16 + $0x8] sm:$0xf] }
 0x17d   : > { %5723 = vmatprep.mubr.msk.bf16.mxu1 %vm6314_vm1, %v8687_v1 }
 0x17e   : > { %v1190_v62 = vpop.f32.mrb[68].mxu0 }
 0x17f   : > { %v7371_v19 = vadd.f32 %v1190_v62, %v1018_v0  ;;  %v1283_v57 = vpop.f32.mrb[68].mxu1  ;;  %v5515_v44 = vpop.f32.mrb[69].mxu0 }
 0x180   : > { %v1337_v4 = vadd.f32 %v1283_v57, %v7229_v30  ;;  %v5521_v12 = vpop.f32.mrb[69].mxu1  ;;  %v1193_v47 = vpop.f32.mrb[70].mxu0  ;;  %v2457_v30 = vshrl.u32 %v7269_v24, 16  ;;  %v2462_v57 = vrot.slane %v2460_v56, 2 }
 0x181   : > { %v1286_v54 = vpop.f32.mrb[70].mxu1  ;;  %v5516_v2 = vpop.f32.mrb[71].mxu0  ;;  %v2455_v47 = vsel %vm1021_vm5, %v2446_v41, %v2454_v46 }
 0x182   : > { %v1338_v59 = vadd.f32 %v1286_v54, %v7245_v27  ;;  %v5522_v0 = vpop.f32.mrb[71].mxu1  ;;  %v2459_v62 = vrot.slane %v2457_v30, 1  ;;  %v7403_v2 = vld [vmem:[%s7394_s16 + $0x4] sm:$0xf]  ;;  %v5042_v30 = vld [vmem:[%s8674_s3 + $0x40] sm:$0xf] }
 0x183   : > { %5750 = vmatmul.mubr.msk.bf16.gmra.mrb[176].mxu0 %vm497_vm3, %v2311_v61 }
 0x184   : > { %5724 = vmatmul.mubr.msk.bf16.gmra.mrb[176].mxu1 %vm497_vm3, %v2156_v20  ;;  %5753 = vmatprep.mubr.msk.bf16.mxu0 %vm6314_vm1, %v8687_v1  ;;  %v5034_v20 = vld [vmem:[%s8674_s3 + $0x3c] sm:$0xf]  ;;  %v2463_v26 = vor.u32 %v2462_v57, %v2459_v62  ;;  %v2964_v57 = vsel %vm519_vm0, %v5042_v30, 0 }
 0x185   : > { %5759 = vmatprep.mubr.msk.bf16.mxu1 %vm6314_vm1, %v8687_v1  ;;  %v2805_v54 = vsel %vm519_vm0, %v5034_v20, 0  ;;  %v2630_v20 = vsel %vm1211_vm6, %v2628_v51, %v2629_v37 }
 0x186   : > { %v1425_v27 = vpop.f32.mrb[72].mxu0 }
 0x187   : > { %v1291_v29 = vpop.f32.mrb[72].mxu1  ;;  %v7385_v11 = vadd.f32 %v1425_v27, %v1337_v4  ;;  %v5551_v63 = vpop.f32.mrb[73].mxu0 }
 0x188   : > { %v1339_v17 = vadd.f32 %v1291_v29, %v7263_v31  ;;  %v5525_v49 = vpop.f32.mrb[73].mxu1  ;;  %v1428_v14 = vpop.f32.mrb[74].mxu0  ;;  %v2464_v63 = vsel %vm1021_vm5, %v2454_v46, %v2463_v26  ;;  %v2631_v46 = vrot.slane %v7269_v24, 2 }
 0x189   : > { %v1294_v44 = vpop.f32.mrb[74].mxu1  ;;  %v7396_v4 = vadd.f32 %v1428_v14, %v1338_v59  ;;  %v5552_v12 = vpop.f32.mrb[75].mxu0  ;;  %v2469_v59 = vshll.u32 %v7291_v13, 16 }
 0x18a   : > { %v1340_v61 = vadd.f32 %v1294_v44, %v7271_v10  ;;  %v5526_v31 = vpop.f32.mrb[75].mxu1  ;;  %v7415_v10 = vcombine.low %v7403_v2, %v7406_v50 }
 0x18b   : > { %5754 = vmatmul.mubr.msk.bf16.gmra.mrb[180].mxu0 %vm497_vm3, %v2310_v22  ;;  %v2466_v22 = vshrl.u32 %v7291_v13, 16  ;;  %v7439_v31 = vld [vmem:[%s7394_s16 + $0x10] sm:$0xf] }
 0x18c   : > { %5760 = vmatmul.mubr.msk.bf16.vlgmr.msra.gmra.mrb[180].mxu1 %vm497_vm3, %v2455_v47  ;;  %5789 = vmatprep.mubr.msk.bf16.mxu0 %vm6314_vm1, %v8687_v1 }
 0x18d   : > { %5818 = vmatpush3.bf16.msra.mxu1 %v2805_v54  ;;  %5763 = vmatprep.mubr.msk.bf16.mxu1 %vm6314_vm1, %v8687_v1  ;;  %v2468_v44 = vrot.slane %v2466_v22, 1  ;;  %v2478_v54 = vshll.u32 %v7311_v60, 16 }
 0x18e   : > { %v1433_v0 = vpop.f32.mrb[76].mxu0  ;;  %5877 = vmatprep.subr.bf16.mxu1 %v8687_v1 }
 0x18f   : > { %v1299_v45 = vpop.f32.mrb[76].mxu1  ;;  %v7425_v9 = vadd.f32 %v1433_v0, %v1339_v17  ;;  %v5555_v56 = vpop.f32.mrb[77].mxu0  ;;  %v2471_v17 = vrot.slane %v2469_v59, 2 }
 0x190   : > { %v1341_v41 = vadd.f32 %v1299_v45, %v7285_v21  ;;  %v5529_v27 = vpop.f32.mrb[77].mxu1  ;;  %v1436_v29 = vpop.f32.mrb[78].mxu0  ;;  %v7436_v21 = vld [vmem:[%s7394_s16 + $0xc] sm:$0xf] }
 0x191   : > { %v1302_v49 = vpop.f32.mrb[78].mxu1  ;;  %v7430_v14 = vadd.f32 %v1436_v29, %v1340_v61  ;;  %v5556_v62 = vpop.f32.mrb[79].mxu0  ;;  %v2475_v61 = vshrl.u32 %v7311_v60, 16  ;;  %v7447_v51 = vcombine.low %v7436_v21, %v7439_v31  ;;  %v2632_v27 = vsel %vm1211_vm6, %v2629_v37, %v2631_v46  ;;  %v7465_v37 = vld [vmem:[%s7394_s16 + $0x14] sm:$0xf] }
 0x192   : > { %v1342_v12 = vadd.f32 %v1302_v49, %v7293_v5  ;;  %v5530_v47 = vpop.f32.mrb[79].mxu1  ;;  %v2472_v5 = vor.u32 %v2471_v17, %v2468_v44  ;;  %v7468_v17 = vld [vmem:[%s7394_s16 + $0x18] sm:$0xf] }
 0x193   : > { %5790 = vmatmul.mubr.msk.bf16.vlgmr.msra.gmra.mrb[184].mxu0 %vm497_vm3, %v2630_v20  ;;  %v2477_v29 = vrot.slane %v2475_v61, 1  ;;  %v7471_v47 = vld [vmem:[%s7394_s16 + $0x1c] sm:$0xf]  ;;  %v7487_v61 = vcombine.low %v7465_v37, %v7468_v17 }
 0x194   : > { %5764 = vmatmul.mubr.msk.bf16.gmra.mrb[184].mxu1 %vm497_vm3, %v2464_v63  ;;  %5848 = vmatpush3.bf16.msra.mxu0 %v2964_v57  ;;  %v2480_v63 = vrot.slane %v2478_v54, 2  ;;  %v2473_v62 = vsel %vm1021_vm5, %v2463_v26, %v2472_v5  ;;  %v2484_v54 = vshrl.u32 %v7329_v52, 16 }
 0x195   : > { %5767 = vmatprep.mubr.msk.bf16.mxu1 %vm6314_vm1, %v8687_v1  ;;  %5793 = vmatprep.mubr.msk.bf16.mxu0 %vm6314_vm1, %v8687_v1 }
 0x196   : > { %v1441_v22 = vpop.f32.mrb[80].mxu0  ;;  %5907 = vmatprep.subr.bf16.mxu0 %v8687_v1  ;;  %v2481_v26 = vor.u32 %v2480_v63, %v2477_v29  ;;  %v2486_v33 = vrot.slane %v2484_v54, 1 }
 0x197   : > { %v1307_v59 = vpop.f32.mrb[80].mxu1  ;;  %v7454_v24 = vadd.f32 %v1441_v22, %v1341_v41  ;;  %v5559_v0 = vpop.f32.mrb[81].mxu0  ;;  %v2487_v22 = vshll.u32 %v7329_v52, 16 }
 0x198   : > { %v1343_v30 = vadd.f32 %v1307_v59, %v7305_v38  ;;  %v5533_v45 = vpop.f32.mrb[81].mxu1  ;;  %v1444_v56 = vpop.f32.mrb[82].mxu0  ;;  %v2633_v38 = vrot.slane %v7291_v13, 2  ;;  %v7483_v13 = vld [vmem:[%s7394_s16 + $0x28] sm:$0xf]  ;;  %v2482_v32 = vsel %vm1021_vm5, %v2472_v5, %v2481_v26  ;;  %v2496_v5 = vshll.u32 %v7352_v28, 16 }
 0x199   : > { %v1310_v20 = vpop.f32.mrb[82].mxu1  ;;  %v7458_v49 = vadd.f32 %v1444_v56, %v1342_v12  ;;  %v5560_v41 = vpop.f32.mrb[83].mxu0  ;;  %v7480_v12 = vld [vmem:[%s7394_s16 + $0x24] sm:$0xf]  ;;  %v7494_v59 = vld [vmem:[%s7394_s16 + $0x2c] sm:$0xf] }
 0x19a   : > { %v1344_v57 = vadd.f32 %v1310_v20, %v7313_v25  ;;  %v5534_v44 = vpop.f32.mrb[83].mxu1  ;;  %v7477_v25 = vld [vmem:[%s7394_s16 + $0x20] sm:$0xf]  ;;  %v7497_v0 = vld [vmem:[%s7394_s16 + $0x30] sm:$0xf]  ;;  %v7505_v56 = vcombine.low %v7480_v12, %v7483_v13  ;;  %v2634_v43 = vsel %vm1211_vm6, %v2631_v46, %v2633_v38  ;;  %v2489_v16 = vrot.slane %v2487_v22, 2 }
 0x19b   : > { %5794 = vmatmul.mubr.msk.bf16.gmra.mrb[188].mxu0 %vm497_vm3, %v2632_v27  ;;  %8697 = vst [vmem:[#allocation2_spill] sm:$0xff] %v7497_v0  ;;  %v7501_v45 = vcombine.low %v7471_v47, %v7477_v25  ;;  %v7509_v29 = vcombine.low %v7494_v59, %v7497_v0  ;;  %v2635_v46 = vrot.slane %v7311_v60, 2 }
 0x19c   : > { %5768 = vmatmul.mubr.msk.bf16.gmra.mrb[188].mxu1 %vm497_vm3, %v2473_v62  ;;  %5797 = vmatprep.mubr.msk.bf16.mxu0 %vm6314_vm1, %v8687_v1 }
 0x19d   : > { %5771 = vmatprep.mubr.msk.bf16.mxu1 %vm6314_vm1, %v8687_v1  ;;  %v2636_v22 = vsel %vm1211_vm6, %v2633_v38, %v2635_v46 }
 0x19e   : > { %v1449_v27 = vpop.f32.mrb[84].mxu0 }
 0x19f   : > { %v1315_v63 = vpop.f32.mrb[84].mxu1  ;;  %v7511_v20 = vadd.f32 %v1449_v27, %v1343_v30  ;;  %v5563_v41 = vpop.f32.mrb[85].mxu0 }
 0x1a0   : > { %v1345_v62 = vadd.f32 %v1315_v63, %v7325_v39  ;;  %v5537_v44 = vpop.f32.mrb[85].mxu1  ;;  %v1452_v53 = vpop.f32.mrb[86].mxu0  ;;  %v8698_v39 = vmov 0.0   ;;  %v2498_v63 = vrot.slane %v2496_v5, 2 }
 0x1a1   : > { %v1318_v35 = vpop.f32.mrb[86].mxu1  ;;  %v7515_v40 = vadd.f32 %v1452_v53, %v1344_v57  ;;  %v5564_v34 = vpop.f32.mrb[87].mxu0  ;;  %v2493_v53 = vshrl.u32 %v7352_v28, 16 }
 0x1a2   : > { %v1346_v1 = vadd.f32 %v1318_v35, %v7333_v3  ;;  %v5538_v0 = vpop.f32.mrb[87].mxu1  ;;  %v2490_v34 = vor.u32 %v2489_v16, %v2486_v33 }
 0x1a3   : > { %5798 = vmatmul.mubr.msk.bf16.gmra.mrb[192].mxu0 %vm497_vm3, %v2634_v43  ;;  %v2495_v16 = vrot.slane %v2493_v53, 1 }
 0x1a4   : > { %5772 = vmatmul.mubr.msk.bf16.gmra.mrb[192].mxu1 %vm497_vm3, %v2482_v32  ;;  %5801 = vmatprep.mubr.msk.bf16.mxu0 %vm6314_vm1, %v8698_v39  ;;  %v2491_v33 = vsel %vm1021_vm5, %v2481_v26, %v2490_v34 }
 0x1a5   : > { %5775 = vmatprep.mubr.msk.bf16.mxu1 %vm6314_vm1, %v8698_v39 }
 0x1a6   : > { %v1457_v30 = vpop.f32.mrb[88].mxu0 }
 0x1a7   : > { %v1323_v35 = vpop.f32.mrb[88].mxu1  ;;  %v7528_v3 = vadd.f32 %v1457_v30, %v1345_v62  ;;  %v5567_v43 = vpop.f32.mrb[89].mxu0 }
 0x1a8   : > { %v1347_v32 = vadd.f32 %v1323_v35, %v7348_v8  ;;  %v5541_v57 = vpop.f32.mrb[89].mxu1  ;;  %v1460_v54 = vpop.f32.mrb[90].mxu0  ;;  %v2637_v8 = vrot.slane %v7329_v52, 2 }
 0x1a9   : > { %v1326_v60 = vpop.f32.mrb[90].mxu1  ;;  %v7532_v0 = vadd.f32 %v1460_v54, %v1346_v1  ;;  %v5568_v27 = vpop.f32.mrb[91].mxu0  ;;  %v2499_v1 = vor.u32 %v2498_v63, %v2495_v16 }
 0x1aa   : > { %v1348_v41 = vadd.f32 %v1326_v60, %v7357_v42  ;;  %v5542_v44 = vpop.f32.mrb[91].mxu1  ;;  %v2638_v35 = vsel %vm1211_vm6, %v2635_v46, %v2637_v8 }
 0x1ab   : > { %5802 = vmatmul.mubr.msk.bf16.gmra.mrb[196].mxu0 %vm497_vm3, %v2636_v22  ;;  %v2500_v52 = vsel %vm1021_vm5, %v2490_v34, %v2499_v1 }
 0x1ac   : > { %5776 = vmatmul.mubr.msk.bf16.gmra.mrb[196].mxu1 %vm497_vm3, %v2491_v33  ;;  %5805 = vmatprep.mubr.msk.bf16.mxu0 %vm6314_vm1, %v8698_v39 }
 0x1ad   : > { %5779 = vmatprep.mubr.msk.bf16.mxu1 %vm6314_vm1, %v8698_v39 }
 0x1ae   : > { %v1465_v38 = vpop.f32.mrb[92].mxu0 }
 0x1af   : > { %v1331_v26 = vpop.f32.mrb[92].mxu1  ;;  %v7543_v62 = vadd.f32 %v1465_v38, %v1347_v32  ;;  %v5571_v53 = vpop.f32.mrb[93].mxu0 }
 0x1b0   : > { %v1349_v42 = vadd.f32 %v1331_v26, %v7371_v19  ;;  %v1468_v5 = vpop.f32.mrb[94].mxu0  ;;  %v5545_v30 = vpop.f32.mrb[93].mxu1  ;;  %v2639_v19 = vrot.slane %v7352_v28, 2 }
 0x1b1   : > { %v7547_v43 = vadd.f32 %v1468_v5, %v1348_v41  ;;  %v5572_v57 = vpop.f32.mrb[95].mxu0  ;;  %v1334_v54 = vpop.f32.mrb[94].mxu1  ;;  %v7563_v41 = vcombine.low %v7406_v50, %v7436_v21  ;;  %v2771_v21 = vrot.slane %v7050_v18, 2 }
 0x1b2   : > { %v5546_v22 = vpop.f32.mrb[95].mxu1  ;;  %v2640_v63 = vsel %vm1211_vm6, %v2637_v8, %v2639_v19  ;;  %v5050_v57 = vld [vmem:[%s8674_s3 + $0x44] sm:$0xf] }
 0x1b3   : > { %5806 = vmatmul.mubr.msk.bf16.gmra.mrb[200].mxu0 %vm497_vm3, %v2638_v35  ;;  %v8693_v53 = vshll.u32 %v7563_v41, 16 }
 0x1b4   : > { %5780 = vmatmul.mubr.msk.bf16.gmra.mrb[200].mxu1 %vm497_vm3, %v2500_v52  ;;  %5809 = vmatprep.mubr.msk.bf16.mxu0 %vm6314_vm1, %v8698_v39 }
 0x1b5   : > { %5783 = vmatprep.mubr.msk.bf16.mxu1 %vm6314_vm1, %v8698_v39  ;;  %v7578_v50 = vrot.slane %v8693_v53, 3 }
 0x1b6   : > { %v1473_v46 = vpop.f32.mrb[96].mxu0 }
 0x1b7   : > { %v1585_v32 = vpop.f32.mrb[96].mxu1  ;;  %v5575_v60 = vpop.f32.mrb[97].mxu0  ;;  %v7557_v27 = vadd.f32 %v1473_v46, %v1349_v42  ;;  %v8692_v42 = vshrl.u32 %v7563_v41, 16 }
 0x1b8   : > { %v1639_v34 = vadd.f32 %v1585_v32, %v7385_v11  ;;  %v5581_v33 = vpop.f32.mrb[97].mxu1  ;;  %v1476_v16 = vpop.f32.mrb[98].mxu0 }
 0x1b9   : > { %v1588_v44 = vpop.f32.mrb[98].mxu1  ;;  %v5576_v28 = vpop.f32.mrb[99].mxu0  ;;  %v7574_v11 = vrot.slane %v8692_v42, 2 }
 0x1ba   : > { %v1640_v38 = vadd.f32 %v1588_v44, %v7396_v4  ;;  %v5582_v26 = vpop.f32.mrb[99].mxu1  ;;  %v2770_v4 = vrot.slane %v7015_v23, 2  ;;  %v3104_v44 = vsel %vm519_vm0, %v5050_v57, 0 }
 0x1bb   : > { %5810 = vmatmul.mubr.msk.bf16.gmra.mrb[204].mxu0 %vm497_vm3, %v2640_v63  ;;  %v5065_v26 = vld [vmem:[%s8674_s3 + $0x48] sm:$0xf] }
 0x1bc   : > { %5784 = vmatmul.mubr.msk.bf16.gmra.mrb[204].mxu1 %vm497_vm3, %v2499_v1  ;;  %5813 = vmatprep.mubr.msk.bf16.mxu0 %vm6314_vm1, %v8698_v39  ;;  %v7586_v1 = vcombine.low %v7439_v31, %v7465_v37  ;;  %v2772_v37 = vsel %vm1211_vm6, %v2770_v4, %v2771_v21 }
 0x1bd   : > { %5819 = vmatprep.mubr.msk.bf16.mxu1 %vm6314_vm1, %v8698_v39 }
 0x1be   : > { %v1726_v8 = vpop.f32.mrb[100].mxu0  ;;  %v8691_v32 = vshll.u32 %v7586_v1, 16 }
 0x1bf   : > { %v1593_v30 = vpop.f32.mrb[100].mxu1  ;;  %v5611_v35 = vpop.f32.mrb[101].mxu0  ;;  %v7593_v54 = vadd.f32 %v1726_v8, %v1639_v34 }
 0x1c0   : > { %v1641_v52 = vadd.f32 %v1593_v30, %v7425_v9  ;;  %v5585_v22 = vpop.f32.mrb[101].mxu1  ;;  %v1729_v46 = vpop.f32.mrb[102].mxu0  ;;  %v4328_v34 = vrot.slane %v8691_v32, 3  ;;  %v8690_v9 = vshrl.u32 %v7586_v1, 16 }
 0x1c1   : > { %v1596_v60 = vpop.f32.mrb[102].mxu1  ;;  %v5612_v31 = vpop.f32.mrb[103].mxu0  ;;  %v7598_v33 = vadd.f32 %v1729_v46, %v1640_v38  ;;  %v8699_v46 = vshrl.u32 %v7083_v15, 16 }
 0x1c2   : > { %v1642_v16 = vadd.f32 %v1596_v60, %v7430_v14  ;;  %v5586_v63 = vpop.f32.mrb[103].mxu1  ;;  %v4327_v28 = vrot.slane %v8690_v9, 2  ;;  %v2773_v14 = vrot.slane %v7083_v15, 2  ;;  %v8700_v31 = vshll.u32 %v7083_v15, 16 }
 0x1c3   : > { %5814 = vmatmul.mubr.msk.bf16.gmra.mrb[208].mxu0 %vm497_vm3, %v2639_v19  ;;  %v2917_v60 = vrot.slane %v8699_v46, 2  ;;  %v3865_v9 = vshll.u32 %v7447_v51, 16 }
 0x1c4   : > { %5820 = vmatmul.mubr.msk.bf16.vlgmr.msra.gmra.mrb[208].mxu1 %vm497_vm3, %v2772_v37  ;;  %5849 = vmatprep.mubr.msk.bf16.mxu0 %vm6314_vm1, %v8698_v39  ;;  %v7618_v19 = vor.u32 %v4328_v34, %v4327_v28  ;;  %v2918_v37 = vrot.slane %v8700_v31, 3  ;;  %v2774_v5 = vsel %vm1211_vm6, %v2771_v21, %v2773_v14  ;;  %v3270_v34 = vsel %vm519_vm0, %v5065_v26, 0 }
 0x1c5   : > { %5878 = vmatpush3.bf16.msra.mxu1 %v3104_v44  ;;  %5823 = vmatprep.mubr.msk.bf16.mxu1 %vm6314_vm1, %v8698_v39  ;;  %v2775_v21 = vrot.slane %v7116_v55, 2 }
 0x1c6   : > { %v1734_v38 = vpop.f32.mrb[104].mxu0  ;;  %5937 = vmatprep.subr.bf16.mxu1 %v8698_v39 }
 0x1c7   : > { %v1601_v4 = vpop.f32.mrb[104].mxu1  ;;  %v5615_v8 = vpop.f32.mrb[105].mxu0  ;;  %v7620_v30 = vadd.f32 %v1734_v38, %v1641_v52 }
 0x1c8   : > { %v1643_v35 = vadd.f32 %v1601_v4, %v7454_v24  ;;  %v5589_v57 = vpop.f32.mrb[105].mxu1  ;;  %v1737_v22 = vpop.f32.mrb[106].mxu0  ;;  %v2919_v24 = vor.u32 %v2918_v37, %v2917_v60  ;;  %v8702_v60 = vshll.u32 %v7116_v55, 16 }
 0x1c9   : > { %v1604_v63 = vpop.f32.mrb[106].mxu1  ;;  %v5616_v44 = vpop.f32.mrb[107].mxu0  ;;  %v7629_v28 = vadd.f32 %v1737_v22, %v1642_v16  ;;  %v8701_v22 = vshrl.u32 %v7116_v55, 16 }
 0x1ca   : > { %v1644_v52 = vadd.f32 %v1604_v63, %v7458_v49  ;;  %v5590_v38 = vpop.f32.mrb[107].mxu1  ;;  %v2920_v57 = vsel %vm1494_vm7, %v7213_v6, %v2919_v24  ;;  %v2922_v31 = vrot.slane %v8702_v60, 3  ;;  %v2776_v44 = vsel %vm1211_vm6, %v2773_v14, %v2775_v21 }
 0x1cb   : > { %5850 = vmatmul.mubr.msk.bf16.vlgmr.msra.gmra.mrb[212].mxu0 %vm497_vm3, %v7220_v36  ;;  %v2921_v46 = vrot.slane %v8701_v22, 2  ;;  %v2777_v38 = vrot.slane %v7146_v58, 2 }
 0x1cc   : > { %5824 = vmatmul.mubr.msk.bf16.gmra.mrb[212].mxu1 %vm497_vm3, %v2774_v5  ;;  %5908 = vmatpush3.bf16.msra.mxu0 %v3270_v34 }
 0x1cd   : > { %5827 = vmatprep.mubr.msk.bf16.mxu1 %vm6314_vm1, %v8698_v39  ;;  %5853 = vmatprep.mubr.msk.bf16.mxu0 %vm6314_vm1, %v8698_v39  ;;  %v2923_v6 = vor.u32 %v2922_v31, %v2921_v46  ;;  %v8704_v46 = vshll.u32 %v7146_v58, 16 }
 0x1ce   : > { %v1742_v16 = vpop.f32.mrb[108].mxu0  ;;  %5967 = vmatprep.subr.bf16.mxu0 %v8698_v39 }
 0x1cf   : > { %v1609_v49 = vpop.f32.mrb[108].mxu1  ;;  %v5619_v26 = vpop.f32.mrb[109].mxu0  ;;  %v7641_v4 = vadd.f32 %v1742_v16, %v1643_v35  ;;  %v2926_v60 = vrot.slane %v8704_v46, 3 }
 0x1d0   : > { %v1645_v36 = vadd.f32 %v1609_v49, %v7511_v20  ;;  %v5593_v5 = vpop.f32.mrb[109].mxu1  ;;  %v1745_v8 = vpop.f32.mrb[110].mxu0 }
 0x1d1   : > { %v1612_v37 = vpop.f32.mrb[110].mxu1  ;;  %v5620_v63 = vpop.f32.mrb[111].mxu0  ;;  %v7651_v34 = vadd.f32 %v1745_v8, %v1644_v52  ;;  %v2924_v8 = vsel %vm1494_vm7, %v2919_v24, %v2923_v6 }
 0x1d2   : > { %v1646_v35 = vadd.f32 %v1612_v37, %v7515_v40  ;;  %v5594_v20 = vpop.f32.mrb[111].mxu1  ;;  %v2778_v63 = vsel %vm1211_vm6, %v2775_v21, %v2777_v38 }
 0x1d3   : > { %5854 = vmatmul.mubr.msk.bf16.gmra.mrb[216].mxu0 %vm497_vm3, %v2920_v57  ;;  %v8703_v57 = vshrl.u32 %v7146_v58, 16 }
 0x1d4   : > { %5828 = vmatmul.mubr.msk.bf16.gmra.mrb[216].mxu1 %vm497_vm3, %v2776_v44  ;;  %5857 = vmatprep.mubr.msk.bf16.mxu0 %vm6314_vm1, %v8698_v39 }
 0x1d5   : > { %5831 = vmatprep.mubr.msk.bf16.mxu1 %vm6314_vm1, %v8698_v39  ;;  %v2925_v22 = vrot.slane %v8703_v57, 2 }
 0x1d6   : > { %v1750_v16 = vpop.f32.mrb[112].mxu0 }
 0x1d7   : > { %v1617_v14 = vpop.f32.mrb[112].mxu1  ;;  %v5623_v52 = vpop.f32.mrb[113].mxu0  ;;  %v7661_v49 = vadd.f32 %v1750_v16, %v1645_v36  ;;  %v2927_v24 = vor.u32 %v2926_v60, %v2925_v22  ;;  %v2779_v16 = vrot.slane %v7176_v48, 2 }
 0x1d8   : > { %v1647_v40 = vadd.f32 %v1617_v14, %v7528_v3  ;;  %v5597_v26 = vpop.f32.mrb[113].mxu1  ;;  %v1753_v5 = vpop.f32.mrb[114].mxu0  ;;  %v1808_v3 = vld [vmem:[%s6983_s14 + $0x3c] sm:$0x7]  ;;  %v8705_v52 = vshrl.u32 %v7176_v48, 16 }
 0x1d9   : > { %v1620_v31 = vpop.f32.mrb[114].mxu1  ;;  %v5624_v37 = vpop.f32.mrb[115].mxu0  ;;  %v7670_v44 = vadd.f32 %v1753_v5, %v1646_v35  ;;  %v7682_v35 = vcombine.low %v7343_v7, %v1808_v3  ;;  %v8706_v5 = vshll.u32 %v7176_v48, 16  ;;  %v2780_v7 = vsel %vm1211_vm6, %v2777_v38, %v2779_v16 }
 0x1da   : > { %v1648_v36 = vadd.f32 %v1620_v31, %v7532_v0  ;;  %v5598_v20 = vpop.f32.mrb[115].mxu1  ;;  %v2929_v26 = vrot.slane %v8705_v52, 2  ;;  %v2928_v31 = vsel %vm1494_vm7, %v2923_v6, %v2927_v24 }
 0x1db   : > { %5858 = vmatmul.mubr.msk.bf16.gmra.mrb[220].mxu0 %vm497_vm3, %v2924_v8  ;;  %v2930_v8 = vrot.slane %v8706_v5, 3  ;;  %v2781_v52 = vrot.slane %v7682_v35, 2  ;;  %v2937_v6 = vshll.u32 %v7682_v35, 16  ;;  %v3714_v5 = vrot.slane %v7447_v51, 1 }
 0x1dc   : > { %5832 = vmatmul.mubr.msk.bf16.gmra.mrb[220].mxu1 %vm497_vm3, %v2778_v63  ;;  %5861 = vmatprep.mubr.msk.bf16.mxu0 %vm6314_vm1, %v8698_v39 }
 0x1dd   : > { %5835 = vmatprep.mubr.msk.bf16.mxu1 %vm6314_vm1, %v8698_v39 }
 0x1de   : > { %v1758_v21 = vpop.f32.mrb[116].mxu0 }
 0x1df   : > { %v1625_v0 = vpop.f32.mrb[116].mxu1  ;;  %v5627_v14 = vpop.f32.mrb[117].mxu0  ;;  %v7688_v57 = vadd.f32 %v1758_v21, %v1647_v40  ;;  %v2931_v40 = vor.u32 %v2930_v8, %v2929_v26  ;;  %v3713_v26 = vrot.slane %v7415_v10, 1 }
 0x1e0   : > { %v1649_v22 = vadd.f32 %v1625_v0, %v7543_v62  ;;  %v5601_v46 = vpop.f32.mrb[117].mxu1  ;;  %v1761_v60 = vpop.f32.mrb[118].mxu0  ;;  %v2934_v62 = vshrl.u32 %v7682_v35, 16 }
 0x1e1   : > { %v1628_v37 = vpop.f32.mrb[118].mxu1  ;;  %v5628_v63 = vpop.f32.mrb[119].mxu0  ;;  %v7693_v20 = vadd.f32 %v1761_v60, %v1648_v36  ;;  %v2932_v0 = vsel %vm1494_vm7, %v2927_v24, %v2931_v40  ;;  %v3862_v24 = vshrl.u32 %v7447_v51, 16 }
 0x1e2   : > { %v1650_v3 = vadd.f32 %v1628_v37, %v7547_v43  ;;  %v5602_v14 = vpop.f32.mrb[119].mxu1  ;;  %v2782_v43 = vsel %vm1211_vm6, %v2779_v16, %v2781_v52  ;;  %v2936_v37 = vrot.slane %v2934_v62, 2  ;;  %v2939_v63 = vrot.slane %v2937_v6, 3 }
 0x1e3   : > { %5862 = vmatmul.mubr.msk.bf16.gmra.mrb[224].mxu0 %vm497_vm3, %v2928_v31 }
 0x1e4   : > { %5836 = vmatmul.mubr.msk.bf16.gmra.mrb[224].mxu1 %vm497_vm3, %v2780_v7  ;;  %5865 = vmatprep.mubr.msk.bf16.mxu0 %vm6314_vm1, %v8698_v39  ;;  %v3854_v7 = vshrl.u32 %v7415_v10, 16  ;;  %v2940_v62 = vor.u32 %v2939_v63, %v2936_v37  ;;  %v3716_v63 = vrot.slane %v7487_v61, 1 }
 0x1e5   : > { %5839 = vmatprep.mubr.msk.bf16.mxu1 %vm6314_vm1, %v8698_v39 }
 0x1e6   : > { %v1766_v38 = vpop.f32.mrb[120].mxu0  ;;  %v3856_v6 = vrot.slane %v3854_v7, 1 }
 0x1e7   : > { %v1633_v36 = vpop.f32.mrb[120].mxu1  ;;  %v5631_v21 = vpop.f32.mrb[121].mxu0  ;;  %v7709_v8 = vadd.f32 %v1766_v38, %v1649_v22 }
 0x1e8   : > { %v1651_v46 = vadd.f32 %v1633_v36, %v7557_v27  ;;  %v1769_v60 = vpop.f32.mrb[122].mxu0  ;;  %v5605_v31 = vpop.f32.mrb[121].mxu1  ;;  %v3857_v21 = vshll.u32 %v7415_v10, 16  ;;  %v7720_v27 = vsel %vm726_vm4, %v3713_v26, %v3714_v5  ;;  %v3864_v36 = vrot.slane %v3862_v24, 1 }
 0x1e9   : > { %v5632_v14 = vpop.f32.mrb[123].mxu0  ;;  %v1636_v16 = vpop.f32.mrb[122].mxu1  ;;  %v7716_v32 = vadd.f32 %v1769_v60, %v1650_v3  ;;  %v3867_v3 = vrot.slane %v3865_v9, 2 }
 0x1ea   : > { %v5606_v22 = vpop.f32.mrb[123].mxu1  ;;  %v3859_v38 = vrot.slane %v3857_v21, 2 }
 0x1eb   : > { %5866 = vmatmul.mubr.msk.bf16.gmra.mrb[228].mxu0 %vm497_vm3, %v2932_v0  ;;  %v2941_v22 = vsel %vm1494_vm7, %v2931_v40, %v2940_v62  ;;  %v3868_v7 = vor.u32 %v3867_v3, %v3864_v36  ;;  %v3069_v40 = vrot.slane %v7015_v23, 3 }
 0x1ec   : > { %5840 = vmatmul.mubr.msk.bf16.gmra.mrb[228].mxu1 %vm497_vm3, %v2782_v43  ;;  %5869 = vmatprep.mubr.msk.bf16.mxu0 %vm6314_vm1, %v8698_v39  ;;  %v3860_v53 = vor.u32 %v3859_v38, %v3856_v6 }
 0x1ed   : > { %5843 = vmatprep.mubr.msk.bf16.mxu1 %vm6314_vm1, %v8698_v39 }
 0x1ee   : > { %v1774_v60 = vpop.f32.mrb[124].mxu0 }
 0x1ef   : > { %v7727_v31 = vadd.f32 %v1774_v60, %v1651_v46  ;;  %v1892_v0 = vpop.f32.mrb[124].mxu1  ;;  %v5635_v14 = vpop.f32.mrb[125].mxu0  ;;  %v7735_v46 = vsel %vm726_vm4, %v3714_v5, %v3716_v63  ;;  %v3874_v5 = vshll.u32 %v7487_v61, 16 }
 0x1f0   : > { %v1946_v26 = vadd.f32 %v1892_v0, %v7593_v54  ;;  %v5641_v16 = vpop.f32.mrb[125].mxu1  ;;  %v1777_v43 = vpop.f32.mrb[126].mxu0  ;;  %v7738_v54 = vsel %vm1021_vm5, %v3860_v53, %v3868_v7 }
 0x1f1   : > { %v1895_v42 = vpop.f32.mrb[126].mxu1  ;;  %v5636_v37 = vpop.f32.mrb[127].mxu0  ;;  %v3876_v3 = vrot.slane %v3874_v5, 2 }
 0x1f2   : > { %v1947_v21 = vadd.f32 %v1895_v42, %v7598_v33  ;;  %v5642_v9 = vpop.f32.mrb[127].mxu1  ;;  %v3070_v42 = vrot.slane %v7050_v18, 3  ;;  %v3871_v33 = vshrl.u32 %v7487_v61, 16 }
 0x1f3   : > { %5870 = vmatmul.mubr.msk.bf16.gmra.mrb[232].mxu0 %vm497_vm3, %v2941_v22 }
 0x1f4   : > { %5844 = vmatmul.mubr.msk.bf16.gmra.mrb[232].mxu1 %vm497_vm3, %v2781_v52  ;;  %5873 = vmatprep.mubr.msk.bf16.mxu0 %vm6314_vm1, %v8698_v39  ;;  %v5074_v52 = vld [vmem:[%s8674_s3 + $0x4c] sm:$0xf]  ;;  %v3873_v36 = vrot.slane %v3871_v33, 1  ;;  %v3071_v43 = vsel %vm1654_vm8, %v3069_v40, %v3070_v42  ;;  %v3207_v40 = vld [vmem:[%s7394_s16] sm:$0xf] }
 0x1f5   : > { %5879 = vmatprep.mubr.msk.bf16.mxu1 %vm6314_vm1, %v8698_v39  ;;  %v3447_v33 = vsel %vm519_vm0, %v5074_v52, 0 }
 0x1f6   : > { %v2069_v24 = vpop.f32.mrb[128].mxu0  ;;  %v3877_v22 = vor.u32 %v3876_v3, %v3873_v36 }
 0x1f7   : > { %v1900_v6 = vpop.f32.mrb[128].mxu1  ;;  %v7749_v53 = vadd.f32 %v2069_v24, %v1946_v26  ;;  %v5671_v38 = vpop.f32.mrb[129].mxu0  ;;  %v3718_v26 = vrot.slane %v7501_v45, 1 }
 0x1f8   : > { %v1948_v60 = vadd.f32 %v1900_v6, %v7620_v30  ;;  %v5645_v23 = vpop.f32.mrb[129].mxu1  ;;  %v2072_v0 = vpop.f32.mrb[130].mxu0  ;;  %v7766_v5 = vsel %vm1021_vm5, %v3868_v7, %v3877_v22  ;;  %v5082_v7 = vld [vmem:[%s8674_s3 + $0x50] sm:$0xf]  ;;  %v7784_v38 = vcombine.low %v3207_v40, %v7403_v2 }
 0x1f9   : > { %v1903_v18 = vpop.f32.mrb[130].mxu1  ;;  %v7755_v14 = vadd.f32 %v2072_v0, %v1947_v21  ;;  %v5672_v16 = vpop.f32.mrb[131].mxu0  ;;  %v7763_v30 = vsel %vm726_vm4, %v3716_v63, %v3718_v26  ;;  %v3072_v21 = vrot.slane %v7083_v15, 3 }
 0x1fa   : > { %v1949_v37 = vadd.f32 %v1903_v18, %v7629_v28  ;;  %v5646_v9 = vpop.f32.mrb[131].mxu1  ;;  %v3880_v28 = vshrl.u32 %v7501_v45, 16 }
 0x1fb   : > { %5874 = vmatmul.mubr.msk.bf16.gmra.mrb[236].mxu0 %vm497_vm3, %v2940_v62  ;;  %v3883_v62 = vshll.u32 %v7501_v45, 16  ;;  %v3073_v18 = vsel %vm1654_vm8, %v3070_v42, %v3072_v21 }
 0x1fc   : > { %5880 = vmatmul.mubr.msk.bf16.vlgmr.msra.gmra.mrb[236].mxu1 %vm497_vm3, %v3071_v43  ;;  %5909 = vmatprep.mubr.msk.bf16.mxu0 %vm6314_vm1, %v8698_v39  ;;  %v3882_v52 = vrot.slane %v3880_v28, 1  ;;  %v3892_v28 = vshll.u32 %v7505_v56, 16 }
 0x1fd   : > { %5938 = vmatpush3.bf16.msra.mxu1 %v3447_v33  ;;  %5883 = vmatprep.mubr.msk.bf16.mxu1 %vm6314_vm1, %v8698_v39  ;;  %v3885_v36 = vrot.slane %v3883_v62, 2  ;;  %v3594_v33 = vsel %vm519_vm0, %v5082_v7, 0 }
 0x1fe   : > { %v2077_v63 = vpop.f32.mrb[132].mxu0  ;;  %5997 = vmatprep.subr.bf16.mxu1 %v8698_v39 }
 0x1ff   : > { %v1908_v24 = vpop.f32.mrb[132].mxu1  ;;  %v7781_v6 = vadd.f32 %v2077_v63, %v1948_v60  ;;  %v5675_v15 = vpop.f32.mrb[133].mxu0  ;;  %v3720_v60 = vrot.slane %v7505_v56, 1  ;;  %v3886_v63 = vor.u32 %v3885_v36, %v3882_v52 }
 0x200   : > { %v1950_v3 = vadd.f32 %v1908_v24, %v7641_v4  ;;  %v5649_v23 = vpop.f32.mrb[133].mxu1  ;;  %v2080_v0 = vpop.f32.mrb[134].mxu0  ;;  %v3894_v15 = vrot.slane %v3892_v28, 2 }
 0x201   : > { %v1911_v16 = vpop.f32.mrb[134].mxu1  ;;  %v7788_v43 = vadd.f32 %v2080_v0, %v1949_v37  ;;  %v5676_v9 = vpop.f32.mrb[135].mxu0  ;;  %v7796_v4 = vsel %vm726_vm4, %v3718_v26, %v3720_v60  ;;  %v7799_v42 = vsel %vm1021_vm5, %v3877_v22, %v3886_v63  ;;  %v3889_v37 = vshrl.u32 %v7505_v56, 16 }
 0x202   : > { %v1951_v2 = vadd.f32 %v1911_v16, %v7651_v34  ;;  %v5650_v40 = vpop.f32.mrb[135].mxu1  ;;  %v3074_v34 = vrot.slane %v7116_v55, 3  ;;  %v8694_v9 = vrot.slane %v7509_v29, 1 }
 0x203   : > { %5910 = vmatmul.mubr.msk.bf16.vlgmr.msra.gmra.mrb[240].mxu0 %vm497_vm3, %v7784_v38  ;;  %v3891_v24 = vrot.slane %v3889_v37, 1  ;;  %v3901_v37 = vshll.u32 %v7509_v29, 16 }
 0x204   : > { %5884 = vmatmul.mubr.msk.bf16.gmra.mrb[240].mxu1 %vm497_vm3, %v3073_v18  ;;  %5968 = vmatpush3.bf16.msra.mxu0 %v3594_v33  ;;  %v3075_v16 = vsel %vm1654_vm8, %v3072_v21, %v3074_v34  ;;  %v3898_v21 = vshrl.u32 %v7509_v29, 16 }
 0x205   : > { %5887 = vmatprep.mubr.msk.bf16.mxu1 %vm6314_vm1, %v8698_v39  ;;  %5913 = vmatprep.mubr.msk.bf16.mxu0 %vm6314_vm1, %v8698_v39  ;;  %v3895_v33 = vor.u32 %v3894_v15, %v3891_v24 }
 0x206   : > { %v2085_v26 = vpop.f32.mrb[136].mxu0  ;;  %6027 = vmatprep.subr.bf16.mxu0 %v8698_v39 }
 0x207   : > { %v1916_v22 = vpop.f32.mrb[136].mxu1  ;;  %v7810_v62 = vadd.f32 %v2085_v26, %v1950_v3  ;;  %v5679_v7 = vpop.f32.mrb[137].mxu0 }
 0x208   : > { %v1952_v52 = vadd.f32 %v1916_v22, %v7661_v49  ;;  %v5653_v36 = vpop.f32.mrb[137].mxu1  ;;  %v2088_v23 = vpop.f32.mrb[138].mxu0  ;;  %v7823_v49 = vsel %vm726_vm4, %v3720_v60, %v8694_v9  ;;  %v3900_v22 = vrot.slane %v3898_v21, 1  ;;  %v3903_v7 = vrot.slane %v3901_v37, 2 }
 0x209   : > { %v1919_v0 = vpop.f32.mrb[138].mxu1  ;;  %v7813_v18 = vadd.f32 %v2088_v23, %v1951_v2  ;;  %v5680_v55 = vpop.f32.mrb[139].mxu0  ;;  %v7826_v2 = vsel %vm1021_vm5, %v3886_v63, %v3895_v33  ;;  %v7861_v21 = vcombine.low %v7468_v17, %v7471_v47  ;;  %v3080_v17 = vrot.slane %v7682_v35, 3 }
 0x20a   : > { %v1953_v40 = vadd.f32 %v1919_v0, %v7670_v44  ;;  %v5654_v3 = vpop.f32.mrb[139].mxu1  ;;  %v3076_v44 = vrot.slane %v7146_v58, 3 }
 0x20b   : > { %5914 = vmatmul.mubr.msk.bf16.gmra.mrb[244].mxu0 %vm497_vm3, %v7563_v41 }
 0x20c   : > { %5888 = vmatmul.mubr.msk.bf16.gmra.mrb[244].mxu1 %vm497_vm3, %v3075_v16  ;;  %5917 = vmatprep.mubr.msk.bf16.mxu0 %vm6314_vm1, %v8698_v39  ;;  %v3077_v58 = vsel %vm1654_vm8, %v3074_v34, %v3076_v44  ;;  %v7842_v16 = vor.u32 %v3903_v7, %v3900_v22 }
 0x20d   : > { %5891 = vmatprep.mubr.msk.bf16.mxu1 %vm6314_vm1, %v8698_v39 }
 0x20e   : > { %v2093_v28 = vpop.f32.mrb[140].mxu0 }
 0x20f   : > { %v1924_v60 = vpop.f32.mrb[140].mxu1  ;;  %v7836_v26 = vadd.f32 %v2093_v28, %v1952_v52  ;;  %v5683_v63 = vpop.f32.mrb[141].mxu0  ;;  %v7849_v52 = vsel %vm1021_vm5, %v3895_v33, %v7842_v16 }
 0x210   : > { %v1954_v24 = vadd.f32 %v1924_v60, %v7688_v57  ;;  %v5657_v15 = vpop.f32.mrb[141].mxu1  ;;  %v2096_v36 = vpop.f32.mrb[142].mxu0  ;;  %v3078_v57 = vrot.slane %v7176_v48, 3 }
 0x211   : > { %v1927_v23 = vpop.f32.mrb[142].mxu1  ;;  %v7839_v0 = vadd.f32 %v2096_v36, %v1953_v40  ;;  %v5684_v55 = vpop.f32.mrb[143].mxu0 }
 0x212   : > { %v1955_v3 = vadd.f32 %v1927_v23, %v7693_v20  ;;  %v5658_v9 = vpop.f32.mrb[143].mxu1  ;;  %v3079_v7 = vsel %vm1654_vm8, %v3076_v44, %v3078_v57  ;;  %v4043_v44 = vrot.slane %v7447_v51, 2 }
 0x213   : > { %5918 = vmatmul.mubr.msk.bf16.gmra.mrb[248].mxu0 %vm497_vm3, %v7586_v1 }
 0x214   : > { %5892 = vmatmul.mubr.msk.bf16.gmra.mrb[248].mxu1 %vm497_vm3, %v3077_v58  ;;  %5921 = vmatprep.mubr.msk.bf16.mxu0 %vm6314_vm1, %v8698_v39 }
 0x215   : > { %5895 = vmatprep.mubr.msk.bf16.mxu1 %vm6314_vm1, %v8698_v39 }
 0x216   : > { %v2101_v34 = vpop.f32.mrb[144].mxu0 }
 0x217   : > { %v1932_v20 = vpop.f32.mrb[144].mxu1  ;;  %v7857_v9 = vadd.f32 %v2101_v34, %v1954_v24  ;;  %v5687_v40 = vpop.f32.mrb[145].mxu0 }
 0x218   : > { %v1956_v33 = vadd.f32 %v1932_v20, %v7709_v8  ;;  %v5661_v37 = vpop.f32.mrb[145].mxu1  ;;  %v2104_v28 = vpop.f32.mrb[146].mxu0  ;;  %v4042_v8 = vrot.slane %v7415_v10, 2 }
 0x219   : > { %v1935_v60 = vpop.f32.mrb[146].mxu1  ;;  %v7864_v63 = vadd.f32 %v2104_v28, %v1955_v3  ;;  %v5688_v22 = vpop.f32.mrb[147].mxu0  ;;  %v3081_v3 = vsel %vm1654_vm8, %v3078_v57, %v3080_v17 }
 0x21a   : > { %v1957_v48 = vadd.f32 %v1935_v60, %v7716_v32  ;;  %v5662_v15 = vpop.f32.mrb[147].mxu1  ;;  %v7880_v32 = vcombine.low %v7477_v25, %v7480_v12  ;;  %v7891_v51 = vsel %vm1211_vm6, %v4042_v8, %v4043_v44  ;;  %v3378_v25 = vshll.u32 %v7784_v38, 16 }
 0x21b   : > { %5922 = vmatmul.mubr.msk.bf16.gmra.mrb[252].mxu0 %vm497_vm3, %v7861_v21  ;;  %v4045_v8 = vrot.slane %v7487_v61, 2  ;;  %v8707_v61 = vshll.u32 %v7563_v41, 16 }
 0x21c   : > { %5896 = vmatmul.mubr.msk.bf16.gmra.mrb[252].mxu1 %vm497_vm3, %v3079_v7  ;;  %5925 = vmatprep.mubr.msk.bf16.mxu0 %vm6314_vm1, %v8698_v39  ;;  %v3376_v7 = vshrl.u32 %v7784_v38, 16 }
 0x21d   : > { %5899 = vmatprep.mubr.msk.bf16.mxu1 %vm6314_vm1, %v8698_v39 }
 0x21e   : > { %v2109_v47 = vpop.f32.mrb[148].mxu0 }
 0x21f   : > { %v1940_v24 = vpop.f32.mrb[148].mxu1  ;;  %v7882_v36 = vadd.f32 %v2109_v47, %v1956_v33  ;;  %v5691_v23 = vpop.f32.mrb[149].mxu0 }
 0x220   : > { %v1958_v55 = vadd.f32 %v1940_v24, %v7727_v31  ;;  %v2112_v58 = vpop.f32.mrb[150].mxu0  ;;  %v5665_v35 = vpop.f32.mrb[149].mxu1  ;;  %v7901_v31 = vcombine.low %v7483_v13, %v7494_v59  ;;  %v7912_v13 = vsel %vm1211_vm6, %v4043_v44, %v4045_v8 }
 0x221   : > { %v7886_v34 = vadd.f32 %v2112_v58, %v1957_v48  ;;  %v5692_v20 = vpop.f32.mrb[151].mxu0  ;;  %v1943_v10 = vpop.f32.mrb[150].mxu1  ;;  %v3380_v48 = vrot.slane %v3378_v25, 1 }
 0x222   : > { %v5666_v40 = vpop.f32.mrb[151].mxu1 }
 0x223   : > { %5926 = vmatmul.mubr.msk.bf16.gmra.mrb[0].mxu0 %vm497_vm3, %v7880_v32  ;;  %v3381_v59 = vor.u32 %v3380_v48, %v3376_v7 }
 0x224   : > { %5900 = vmatmul.mubr.msk.bf16.gmra.mrb[0].mxu1 %vm497_vm3, %v3081_v3  ;;  %5929 = vmatprep.mubr.msk.bf16.mxu0 %vm6314_vm1, %v8698_v39  ;;  %v8708_v3 = vld [vmem:[#allocation2_spill] sm:$0xff] }
 0x225   : > { %5903 = vmatprep.mubr.msk.bf16.mxu1 %vm6314_vm1, %v8698_v39  ;;  %v5064_v44 = vcombine.low %v8708_v3, %v8708_v3  ;;  %v3396_v3 = vshll.u32 %v7861_v21, 16 }
 0x226   : > { %v2117_v12 = vpop.f32.mrb[152].mxu0 }
 0x227   : > { %v7903_v57 = vadd.f32 %v2117_v12, %v1958_v55  ;;  %v2216_v33 = vpop.f32.mrb[152].mxu1  ;;  %v5695_v37 = vpop.f32.mrb[153].mxu0 }
 0x228   : > { %v2270_v28 = vadd.f32 %v2216_v33, %v7749_v53  ;;  %v5701_v60 = vpop.f32.mrb[153].mxu1  ;;  %v2120_v22 = vpop.f32.mrb[154].mxu0  ;;  %v3384_v53 = vrot.slane %v8707_v61, 1 }
 0x229   : > { %v2219_v15 = vpop.f32.mrb[154].mxu1  ;;  %v5696_v47 = vpop.f32.mrb[155].mxu0 }
 0x22a   : > { %v2271_v24 = vadd.f32 %v2219_v15, %v7755_v14  ;;  %v5702_v23 = vpop.f32.mrb[155].mxu1  ;;  %v3385_v37 = vsel %vm441_vm2, %v3381_v59, %v3384_v53  ;;  %v3560_v15 = vrot.slane %v7563_v41, 1  ;;  %v8710_v47 = vshll.u32 %v7586_v1, 16 }
 0x22b   : > { %5930 = vmatmul.mubr.msk.bf16.gmra.mrb[4].mxu0 %vm497_vm3, %v7901_v31 }
 0x22c   : > { %5904 = vmatmul.mubr.msk.bf16.gmra.mrb[4].mxu1 %vm497_vm3, %v3080_v17  ;;  %5933 = vmatprep.mubr.msk.bf16.mxu0 %vm6314_vm1, %v8698_v39  ;;  %v5097_v17 = vld [vmem:[%s8674_s3 + $0x54] sm:$0xf] }
 0x22d   : > { %5939 = vmatprep.mubr.msk.bf16.mxu1 %vm6314_vm1, %v8698_v39  ;;  %v3748_v7 = vsel %vm519_vm0, %v5097_v17, 0 }
 0x22e   : > { %v2370_v14 = vpop.f32.mrb[156].mxu0 }
 0x22f   : > { %v2224_v55 = vpop.f32.mrb[156].mxu1  ;;  %v7921_v58 = vadd.f32 %v2370_v14, %v2270_v28  ;;  %v5731_v35 = vpop.f32.mrb[157].mxu0  ;;  %v4047_v28 = vrot.slane %v7501_v45, 2  ;;  %v8709_v45 = vshrl.u32 %v7563_v41, 16 }
 0x230   : > { %v2272_v20 = vadd.f32 %v2224_v55, %v7781_v6  ;;  %v5705_v10 = vpop.f32.mrb[157].mxu1  ;;  %v2373_v40 = vpop.f32.mrb[158].mxu0  ;;  %v3559_v6 = vrot.slane %v7784_v38, 1  ;;  %v5105_v38 = vld [vmem:[%s8674_s3 + $0x58] sm:$0xf] }
 0x231   : > { %v2227_v25 = vpop.f32.mrb[158].mxu1  ;;  %v7929_v12 = vadd.f32 %v2373_v40, %v2271_v24  ;;  %v5732_v33 = vpop.f32.mrb[159].mxu0  ;;  %v7937_v48 = vsel %vm1211_vm6, %v4045_v8, %v4047_v28  ;;  %v3391_v8 = vrot.slane %v8710_v47, 1 }
 0x232   : > { %v2273_v60 = vadd.f32 %v2227_v25, %v7788_v43  ;;  %v5706_v22 = vpop.f32.mrb[159].mxu1  ;;  %v3388_v43 = vor.u32 %v8709_v45, %v3384_v53  ;;  %v3561_v53 = vsel %vm726_vm4, %v3559_v6, %v3560_v15  ;;  %v3937_v25 = vsel %vm519_vm0, %v5105_v38, 0 }
 0x233   : > { %5934 = vmatmul.mubr.msk.bf16.gmra.mrb[8].mxu0 %vm497_vm3, %v5064_v44  ;;  %v3562_v6 = vrot.slane %v7586_v1, 1 }
 0x234   : > { %5940 = vmatmul.mubr.msk.bf16.vlgmr.msra.gmra.mrb[8].mxu1 %vm497_vm3, %v3385_v37  ;;  %5969 = vmatprep.mubr.msk.bf16.mxu0 %vm6314_vm1, %v8698_v39  ;;  %v3392_v40 = vsel %vm441_vm2, %v3388_v43, %v3391_v8 }
 0x235   : > { %5998 = vmatpush3.bf16.msra.mxu1 %v3748_v7  ;;  %5943 = vmatprep.mubr.msk.bf16.mxu1 %vm6314_vm1, %v8698_v39  ;;  %v3398_v7 = vrot.slane %v3396_v3, 1  ;;  %v3563_v38 = vsel %vm726_vm4, %v3560_v15, %v3562_v6  ;;  %v3564_v15 = vrot.slane %v7861_v21, 1 }
 0x236   : > { %v2378_v24 = vpop.f32.mrb[160].mxu0  ;;  %6057 = vmatprep.subr.bf16.mxu1 %v8698_v39 }
 0x237   : > { %v2232_v23 = vpop.f32.mrb[160].mxu1  ;;  %v7954_v59 = vadd.f32 %v2378_v24, %v2272_v20  ;;  %v5735_v61 = vpop.f32.mrb[161].mxu0  ;;  %v4049_v20 = vrot.slane %v7505_v56, 2 }
 0x238   : > { %v2274_v14 = vadd.f32 %v2232_v23, %v7810_v62  ;;  %v5709_v55 = vpop.f32.mrb[161].mxu1  ;;  %v2381_v35 = vpop.f32.mrb[162].mxu0 }
 0x239   : > { %v2235_v44 = vpop.f32.mrb[162].mxu1  ;;  %v7959_v17 = vadd.f32 %v2381_v35, %v2273_v60  ;;  %v5736_v10 = vpop.f32.mrb[163].mxu0  ;;  %v7967_v62 = vsel %vm1211_vm6, %v4047_v28, %v4049_v20  ;;  %v8711_v60 = vshrl.u32 %v7586_v1, 16  ;;  %v3400_v35 = vshrl.u32 %v7861_v21, 16 }
 0x23a   : > { %v2275_v33 = vadd.f32 %v2235_v44, %v7813_v18  ;;  %v5710_v37 = vpop.f32.mrb[163].mxu1 }
 0x23b   : > { %5970 = vmatmul.mubr.msk.bf16.vlgmr.msra.gmra.mrb[12].mxu0 %vm497_vm3, %v3561_v53  ;;  %v3395_v22 = vor.u32 %v8711_v60, %v3391_v8  ;;  %v3403_v53 = vshll.u32 %v7880_v32, 16 }
 0x23c   : > { %5944 = vmatmul.mubr.msk.bf16.gmra.mrb[12].mxu1 %vm497_vm3, %v3392_v40  ;;  %6028 = vmatpush3.bf16.msra.mxu0 %v3937_v25 }
 0x23d   : > { %5947 = vmatprep.mubr.msk.bf16.mxu1 %vm6314_vm1, %v8698_v39  ;;  %5973 = vmatprep.mubr.msk.bf16.mxu0 %vm6314_vm1, %v8698_v39  ;;  %v3399_v24 = vsel %vm441_vm2, %v3395_v22, %v3398_v7  ;;  %v3405_v40 = vrot.slane %v3403_v53, 1 }
 0x23e   : > { %v2386_v56 = vpop.f32.mrb[164].mxu0  ;;  %6087 = vmatprep.subr.bf16.mxu0 %v8698_v39 }
 0x23f   : > { %v2240_v18 = vpop.f32.mrb[164].mxu1  ;;  %v7980_v28 = vadd.f32 %v2386_v56, %v2274_v14  ;;  %v5739_v45 = vpop.f32.mrb[165].mxu0  ;;  %v4051_v14 = vrot.slane %v7509_v29, 2 }
 0x240   : > { %v2276_v43 = vadd.f32 %v2240_v18, %v7836_v26  ;;  %v5713_v47 = vpop.f32.mrb[165].mxu1  ;;  %v2389_v8 = vpop.f32.mrb[166].mxu0  ;;  %v3565_v18 = vsel %vm726_vm4, %v3562_v6, %v3564_v15  ;;  %v3566_v6 = vrot.slane %v7880_v32, 1 }
 0x241   : > { %v2243_v23 = vpop.f32.mrb[166].mxu1  ;;  %v7985_v61 = vadd.f32 %v2389_v8, %v2275_v33  ;;  %v5740_v55 = vpop.f32.mrb[167].mxu0  ;;  %v7995_v26 = vsel %vm1211_vm6, %v4049_v20, %v4051_v14 }
 0x242   : > { %v2277_v44 = vadd.f32 %v2243_v23, %v7839_v0  ;;  %v5714_v10 = vpop.f32.mrb[167].mxu1  ;;  %v3402_v0 = vor.u32 %v3400_v35, %v3398_v7  ;;  %v6272_v55 = vld [vmem:[%s7394_s16 + $0x30] sm:$0xf] }
 0x243   : > { %5974 = vmatmul.mubr.msk.bf16.gmra.mrb[16].mxu0 %vm497_vm3, %v3563_v38  ;;  %v8695_v38 = vshll.u32 %v7901_v31, 16 }
 0x244   : > { %5948 = vmatmul.mubr.msk.bf16.gmra.mrb[16].mxu1 %vm497_vm3, %v3399_v24  ;;  %5977 = vmatprep.mubr.msk.bf16.mxu0 %vm6314_vm1, %v8698_v39  ;;  %v3406_v8 = vsel %vm441_vm2, %v3402_v0, %v3405_v40  ;;  %v3407_v24 = vshrl.u32 %v7880_v32, 16 }
 0x245   : > { %5951 = vmatprep.mubr.msk.bf16.mxu1 %vm6314_vm1, %v8698_v39  ;;  %v3412_v10 = vrot.slane %v8695_v38, 1 }
 0x246   : > { %v2394_v25 = vpop.f32.mrb[168].mxu0 }
 0x247   : > { %v2248_v20 = vpop.f32.mrb[168].mxu1  ;;  %v8007_v33 = vadd.f32 %v2394_v25, %v2276_v43  ;;  %v5743_v37 = vpop.f32.mrb[169].mxu0  ;;  %v8017_v43 = vld [vmem:[%s7394_s16 + $0x34] sm:$0xf] }
 0x248   : > { %v2278_v60 = vadd.f32 %v2248_v20, %v7857_v9  ;;  %v5717_v22 = vpop.f32.mrb[169].mxu1  ;;  %v2397_v56 = vpop.f32.mrb[170].mxu0 }
 0x249   : > { %v2251_v45 = vpop.f32.mrb[170].mxu1  ;;  %v8011_v47 = vadd.f32 %v2397_v56, %v2277_v44  ;;  %v5744_v7 = vpop.f32.mrb[171].mxu0  ;;  %v8027_v44 = vcombine.low %v6272_v55, %v8017_v43  ;;  %v8696_v55 = vshrl.u32 %v7901_v31, 16 }
 0x24a   : > { %v2279_v23 = vadd.f32 %v2251_v45, %v7864_v63  ;;  %v5718_v9 = vpop.f32.mrb[171].mxu1  ;;  %v3409_v63 = vor.u32 %v3407_v24, %v3405_v40  ;;  %v3567_v45 = vsel %vm726_vm4, %v3564_v15, %v3566_v6 }
 0x24b   : > { %5978 = vmatmul.mubr.msk.bf16.gmra.mrb[20].mxu0 %vm497_vm3, %v3565_v18  ;;  %v3418_v38 = vshll.u32 %v8027_v44, 16  ;;  %v3416_v15 = vor.u32 %v8696_v55, %v3412_v10 }
 0x24c   : > { %5952 = vmatmul.mubr.msk.bf16.gmra.mrb[20].mxu1 %vm497_vm3, %v3406_v8  ;;  %5981 = vmatprep.mubr.msk.bf16.mxu0 %vm6314_vm1, %v8698_v39  ;;  %v3413_v40 = vsel %vm441_vm2, %v3409_v63, %v3412_v10 }
 0x24d   : > { %5955 = vmatprep.mubr.msk.bf16.mxu1 %vm6314_vm1, %v8698_v39 }
 0x24e   : > { %v2402_v0 = vpop.f32.mrb[172].mxu0 }
 0x24f   : > { %v2256_v25 = vpop.f32.mrb[172].mxu1  ;;  %v8035_v20 = vadd.f32 %v2402_v0, %v2278_v60  ;;  %v5747_v37 = vpop.f32.mrb[173].mxu0 }
 0x250   : > { %v2280_v22 = vadd.f32 %v2256_v25, %v7882_v36  ;;  %v5721_v56 = vpop.f32.mrb[173].mxu1  ;;  %v2405_v18 = vpop.f32.mrb[174].mxu0  ;;  %v3568_v36 = vrot.slane %v7901_v31, 1 }
 0x251   : > { %v2259_v7 = vpop.f32.mrb[174].mxu1  ;;  %v8039_v8 = vadd.f32 %v2405_v18, %v2279_v23  ;;  %v5748_v9 = vpop.f32.mrb[175].mxu0  ;;  %v3420_v23 = vrot.slane %v3418_v38, 1 }
 0x252   : > { %v2281_v60 = vadd.f32 %v2259_v7, %v7886_v34  ;;  %v5722_v0 = vpop.f32.mrb[175].mxu1  ;;  %v3569_v7 = vsel %vm726_vm4, %v3566_v6, %v3568_v36  ;;  %v3570_v6 = vrot.slane %v8027_v44, 1 }
 0x253   : > { %5982 = vmatmul.mubr.msk.bf16.gmra.mrb[24].mxu0 %vm497_vm3, %v3567_v45  ;;  %v3421_v10 = vsel %vm441_vm2, %v3416_v15, %v3420_v23 }
 0x254   : > { %5956 = vmatmul.mubr.msk.bf16.gmra.mrb[24].mxu1 %vm497_vm3, %v3413_v40  ;;  %5985 = vmatprep.mubr.msk.bf16.mxu0 %vm6314_vm1, %v8698_v39 }
 0x255   : > { %5959 = vmatprep.mubr.msk.bf16.mxu1 %vm6314_vm1, %v8698_v39 }
 0x256   : > { %v2410_v34 = vpop.f32.mrb[176].mxu0 }
 0x257   : > { %v2264_v63 = vpop.f32.mrb[176].mxu1  ;;  %v8056_v25 = vadd.f32 %v2410_v34, %v2280_v22  ;;  %v5751_v37 = vpop.f32.mrb[177].mxu0  ;;  %v8712_v22 = vor.u32 %v7578_v50, %v7574_v11 }
 0x258   : > { %v2282_v56 = vadd.f32 %v2264_v63, %v7903_v57  ;;  %v2413_v18 = vpop.f32.mrb[178].mxu0  ;;  %v5725_v45 = vpop.f32.mrb[177].mxu1  ;;  %v3422_v57 = vshrl.u32 %v8027_v44, 16 }
 0x259   : > { %v8060_v9 = vadd.f32 %v2413_v18, %v2281_v60  ;;  %v5752_v40 = vpop.f32.mrb[179].mxu0  ;;  %v2267_v0 = vpop.f32.mrb[178].mxu1  ;;  %v8069_v34 = vsel %vm1494_vm7, %v8712_v22, %v7618_v19  ;;  %v3571_v45 = vsel %vm726_vm4, %v3568_v36, %v3570_v6 }
 0x25a   : > { %v5726_v55 = vpop.f32.mrb[179].mxu1  ;;  %v3424_v50 = vor.u32 %v3422_v57, %v3420_v23 }
 0x25b   : > { %5986 = vmatmul.mubr.msk.bf16.gmra.mrb[28].mxu0 %vm497_vm3, %v3569_v7 }
 0x25c   : > { %5960 = vmatmul.mubr.msk.bf16.gmra.mrb[28].mxu1 %vm497_vm3, %v3421_v10  ;;  %5989 = vmatprep.mubr.msk.bf16.mxu0 %vm6314_vm1, %v8698_v39 }
 0x25d   : > { %5963 = vmatprep.mubr.msk.bf16.mxu1 %vm6314_vm1, %v8698_v39 }
 0x25e   : > { %v2418_v55 = vpop.f32.mrb[180].mxu0 }
 0x25f   : > { %v8078_v60 = vadd.f32 %v2418_v55, %v2282_v56  ;;  %v2559_v15 = vpop.f32.mrb[180].mxu1  ;;  %v5755_v11 = vpop.f32.mrb[181].mxu0 }
 0x260   : > { %v2613_v63 = vadd.f32 %v2559_v15, %v7921_v58  ;;  %v5761_v37 = vpop.f32.mrb[181].mxu1  ;;  %v2421_v18 = vpop.f32.mrb[182].mxu0 }
 0x261   : > { %v2562_v7 = vpop.f32.mrb[182].mxu1  ;;  %v5756_v40 = vpop.f32.mrb[183].mxu0 }
 0x262   : > { %v2614_v0 = vadd.f32 %v2562_v7, %v7929_v12  ;;  %v5762_v10 = vpop.f32.mrb[183].mxu1  ;;  %v5113_v12 = vld [vmem:[%s8674_s3 + $0x5c] sm:$0xf] }
 0x263   : > { %5990 = vmatmul.mubr.msk.bf16.gmra.mrb[32].mxu0 %vm497_vm3, %v3571_v45  ;;  %v4077_v7 = vsel %vm519_vm0, %v5113_v12, 0 }
 0x264   : > { %5964 = vmatmul.mubr.msk.bf16.gmra.mrb[32].mxu1 %vm497_vm3, %v3424_v50  ;;  %5993 = vmatprep.mubr.msk.bf16.mxu0 %vm6314_vm1, %v8698_v39 }
 0x265   : > { %5999 = vmatprep.mubr.msk.bf16.mxu1 %vm6314_vm1, %v8698_v39 }
 0x266   : > { %v2699_v58 = vpop.f32.mrb[184].mxu0 }
 0x267   : > { %v2567_v23 = vpop.f32.mrb[184].mxu1  ;;  %v8091_v56 = vadd.f32 %v2699_v58, %v2613_v63  ;;  %v5791_v36 = vpop.f32.mrb[185].mxu0 }
 0x268   : > { %v2615_v22 = vadd.f32 %v2567_v23, %v7954_v59  ;;  %v5765_v55 = vpop.f32.mrb[185].mxu1  ;;  %v2702_v15 = vpop.f32.mrb[186].mxu0 }
 0x269   : > { %v2570_v11 = vpop.f32.mrb[186].mxu1  ;;  %v8097_v50 = vadd.f32 %v2702_v15, %v2614_v0  ;;  %v5792_v37 = vpop.f32.mrb[187].mxu0 }
 0x26a   : > { %v2616_v18 = vadd.f32 %v2570_v11, %v7959_v17  ;;  %v5766_v45 = vpop.f32.mrb[187].mxu1  ;;  %v5122_v17 = vld [vmem:[%s8674_s3 + $0x60] sm:$0xf] }
 0x26b   : > { %5994 = vmatmul.mubr.msk.bf16.gmra.mrb[36].mxu0 %vm497_vm3, %v3570_v6  ;;  %v4219_v12 = vsel %vm519_vm0, %v5122_v17, 0 }
 0x26c   : > { %6000 = vmatmul.mubr.msk.bf16.vlgmr.msra.gmra.mrb[36].mxu1 %vm497_vm3, %v7720_v27  ;;  %6029 = vmatprep.mubr.msk.bf16.mxu0 %vm6314_vm1, %v8698_v39 }
 0x26d   : > { %6058 = vmatpush3.bf16.msra.mxu1 %v4077_v7  ;;  %6003 = vmatprep.mubr.msk.bf16.mxu1 %vm6314_vm1, %v8698_v39 }
 0x26e   : > { %v2707_v59 = vpop.f32.mrb[188].mxu0  ;;  %6117 = vmatprep.subr.bf16.mxu1 %v8698_v39 }
 0x26f   : > { %v2575_v63 = vpop.f32.mrb[188].mxu1  ;;  %v8112_v40 = vadd.f32 %v2707_v59, %v2615_v22  ;;  %v5795_v6 = vpop.f32.mrb[189].mxu0 }
 0x270   : > { %v2617_v27 = vadd.f32 %v2575_v63, %v7980_v28  ;;  %v5769_v0 = vpop.f32.mrb[189].mxu1  ;;  %v2710_v10 = vpop.f32.mrb[190].mxu0 }
 0x271   : > { %v2578_v58 = vpop.f32.mrb[190].mxu1  ;;  %v8115_v23 = vadd.f32 %v2710_v10, %v2616_v18  ;;  %v5796_v36 = vpop.f32.mrb[191].mxu0 }
 0x272   : > { %v2618_v55 = vadd.f32 %v2578_v58, %v7985_v61  ;;  %v5770_v15 = vpop.f32.mrb[191].mxu1 }
 0x273   : > { %6030 = vmatmul.mubr.msk.bf16.vlgmr.msra.gmra.mrb[40].mxu0 %vm497_vm3, %v7738_v54 }
 0x274   : > { %6004 = vmatmul.mubr.msk.bf16.gmra.mrb[40].mxu1 %vm497_vm3, %v7735_v46  ;;  %6088 = vmatpush3.bf16.msra.mxu0 %v4219_v12 }
 0x275   : > { %6007 = vmatprep.mubr.msk.bf16.mxu1 %vm6314_vm1, %v8698_v39  ;;  %6033 = vmatprep.mubr.msk.bf16.mxu0 %vm6314_vm1, %v8698_v39 }
 0x276   : > { %v2715_v28 = vpop.f32.mrb[192].mxu0  ;;  %6147 = vmatprep.subr.bf16.mxu0 %v8698_v39 }
 0x277   : > { %v2583_v22 = vpop.f32.mrb[192].mxu1  ;;  %v8128_v11 = vadd.f32 %v2715_v28, %v2617_v27  ;;  %v5799_v61 = vpop.f32.mrb[193].mxu0 }
 0x278   : > { %v2619_v37 = vadd.f32 %v2583_v22, %v8007_v33  ;;  %v5773_v54 = vpop.f32.mrb[193].mxu1  ;;  %v2718_v18 = vpop.f32.mrb[194].mxu0 }
 0x279   : > { %v2586_v45 = vpop.f32.mrb[194].mxu1  ;;  %v8131_v46 = vadd.f32 %v2718_v18, %v2618_v55  ;;  %v5800_v7 = vpop.f32.mrb[195].mxu0  ;;  %v8157_v55 = vld [vmem:[%s7394_s16 + $0x38] sm:$0xf] }
 0x27a   : > { %v2620_v59 = vadd.f32 %v2586_v45, %v8011_v47  ;;  %v5774_v17 = vpop.f32.mrb[195].mxu1  ;;  %v8166_v18 = vcombine.low %v8017_v43, %v8157_v55 }
 0x27b   : > { %6034 = vmatmul.mubr.msk.bf16.gmra.mrb[44].mxu0 %vm497_vm3, %v7766_v5 }
 0x27c   : > { %6008 = vmatmul.mubr.msk.bf16.gmra.mrb[44].mxu1 %vm497_vm3, %v7763_v30  ;;  %6037 = vmatprep.mubr.msk.bf16.mxu0 %vm6314_vm1, %v8698_v39  ;;  %v3724_v43 = vrot.slane %v8166_v18, 1 }
 0x27d   : > { %6011 = vmatprep.mubr.msk.bf16.mxu1 %vm6314_vm1, %v8698_v39 }
 0x27e   : > { %v2723_v33 = vpop.f32.mrb[196].mxu0 }
 0x27f   : > { %v2591_v63 = vpop.f32.mrb[196].mxu1  ;;  %v8142_v6 = vadd.f32 %v2723_v33, %v2619_v37  ;;  %v5803_v27 = vpop.f32.mrb[197].mxu0 }
 0x280   : > { %v2621_v47 = vadd.f32 %v2591_v63, %v8035_v20  ;;  %v5777_v0 = vpop.f32.mrb[197].mxu1  ;;  %v2726_v10 = vpop.f32.mrb[198].mxu0 }
 0x281   : > { %v2594_v5 = vpop.f32.mrb[198].mxu1  ;;  %v8145_v58 = vadd.f32 %v2726_v10, %v2620_v59  ;;  %v5804_v30 = vpop.f32.mrb[199].mxu0  ;;  %v3910_v59 = vshll.u32 %v8166_v18, 16 }
 0x282   : > { %v2622_v36 = vadd.f32 %v2594_v5, %v8039_v8  ;;  %v5778_v12 = vpop.f32.mrb[199].mxu1 }
 0x283   : > { %6038 = vmatmul.mubr.msk.bf16.gmra.mrb[48].mxu0 %vm497_vm3, %v7799_v42  ;;  %v3912_v0 = vrot.slane %v3910_v59, 2 }
 0x284   : > { %6012 = vmatmul.mubr.msk.bf16.gmra.mrb[48].mxu1 %vm497_vm3, %v7796_v4  ;;  %6041 = vmatprep.mubr.msk.bf16.mxu0 %vm6314_vm1, %v8698_v39 }
 0x285   : > { %6015 = vmatprep.mubr.msk.bf16.mxu1 %vm6314_vm1, %v8698_v39 }
 0x286   : > { %v2731_v20 = vpop.f32.mrb[200].mxu0 }
 0x287   : > { %v2599_v15 = vpop.f32.mrb[200].mxu1  ;;  %v8159_v28 = vadd.f32 %v2731_v20, %v2621_v47  ;;  %v5807_v8 = vpop.f32.mrb[201].mxu0 }
 0x288   : > { %v2623_v22 = vadd.f32 %v2599_v15, %v8056_v25  ;;  %v5781_v61 = vpop.f32.mrb[201].mxu1  ;;  %v2734_v42 = vpop.f32.mrb[202].mxu0  ;;  %v3907_v25 = vshrl.u32 %v8166_v18, 16 }
 0x289   : > { %v2602_v37 = vpop.f32.mrb[202].mxu1  ;;  %v8162_v54 = vadd.f32 %v2734_v42, %v2622_v36  ;;  %v5808_v4 = vpop.f32.mrb[203].mxu0  ;;  %v8713_v36 = vrot.slane %v7509_v29, 1 }
 0x28a   : > { %v2624_v45 = vadd.f32 %v2602_v37, %v8060_v9  ;;  %v5782_v7 = vpop.f32.mrb[203].mxu1  ;;  %v3909_v47 = vrot.slane %v3907_v25, 1 }
 0x28b   : > { %6042 = vmatmul.mubr.msk.bf16.gmra.mrb[52].mxu0 %vm497_vm3, %v7826_v2  ;;  %v3725_v12 = vsel %vm726_vm4, %v8713_v36, %v3724_v43  ;;  %v4185_v36 = vrot.slane %v7586_v1, 2 }
 0x28c   : > { %6016 = vmatmul.mubr.msk.bf16.gmra.mrb[52].mxu1 %vm497_vm3, %v7823_v49  ;;  %6045 = vmatprep.mubr.msk.bf16.mxu0 %vm6314_vm1, %v8698_v39 }
 0x28d   : > { %6019 = vmatprep.mubr.msk.bf16.mxu1 %vm6314_vm1, %v8698_v39 }
 0x28e   : > { %v2739_v9 = vpop.f32.mrb[204].mxu0 }
 0x28f   : > { %v2607_v17 = vpop.f32.mrb[204].mxu1  ;;  %v8180_v33 = vadd.f32 %v2739_v9, %v2623_v22  ;;  %v5811_v2 = vpop.f32.mrb[205].mxu0 }
 0x290   : > { %v2625_v63 = vadd.f32 %v2607_v17, %v8078_v60  ;;  %v2742_v49 = vpop.f32.mrb[206].mxu0  ;;  %v5785_v27 = vpop.f32.mrb[205].mxu1  ;;  %v3913_v60 = vor.u32 %v3912_v0, %v3909_v47 }
 0x291   : > { %v8183_v10 = vadd.f32 %v2742_v49, %v2624_v45  ;;  %v5812_v5 = vpop.f32.mrb[207].mxu0  ;;  %v2610_v30 = vpop.f32.mrb[206].mxu1 }
 0x292   : > { %v5786_v20 = vpop.f32.mrb[207].mxu1 }
 0x293   : > { %6046 = vmatmul.mubr.msk.bf16.gmra.mrb[56].mxu0 %vm497_vm3, %v7849_v52  ;;  %v3914_v52 = vsel %vm1021_vm5, %v7842_v16, %v3913_v60 }
 0x294   : > { %6020 = vmatmul.mubr.msk.bf16.gmra.mrb[56].mxu1 %vm497_vm3, %v3725_v12  ;;  %6049 = vmatprep.mubr.msk.bf16.mxu0 %vm6314_vm1, %v8698_v39  ;;  %v5138_v12 = vld [vmem:[%s8674_s3 + $0x68] sm:$0xf] }
 0x295   : > { %6023 = vmatprep.mubr.msk.bf16.mxu1 %vm6314_vm1, %v8698_v39 }
 0x296   : > { %v2747_v15 = vpop.f32.mrb[208].mxu0 }
 0x297   : > { %v8195_v8 = vadd.f32 %v2747_v15, %v2625_v63  ;;  %v2841_v22 = vpop.f32.mrb[208].mxu1  ;;  %v5815_v61 = vpop.f32.mrb[209].mxu0 }
 0x298   : > { %v2895_v42 = vadd.f32 %v2841_v22, %v8091_v56  ;;  %v5821_v37 = vpop.f32.mrb[209].mxu1  ;;  %v2750_v4 = vpop.f32.mrb[210].mxu0 }
 0x299   : > { %v2844_v45 = vpop.f32.mrb[210].mxu1  ;;  %v5816_v7 = vpop.f32.mrb[211].mxu0 }
 0x29a   : > { %v2896_v25 = vadd.f32 %v2844_v45, %v8097_v50  ;;  %v5822_v59 = vpop.f32.mrb[211].mxu1  ;;  %v5130_v50 = vld [vmem:[%s8674_s3 + $0x64] sm:$0xf]  ;;  %v4518_v45 = vsel %vm519_vm0, %v5138_v12, 0 }
 0x29b   : > { %6050 = vmatmul.mubr.msk.bf16.gmra.mrb[60].mxu0 %vm497_vm3, %v3914_v52  ;;  %v4378_v30 = vsel %vm519_vm0, %v5130_v50, 0 }
 0x29c   : > { %6024 = vmatmul.mubr.msk.bf16.gmra.mrb[60].mxu1 %vm497_vm3, %v3724_v43  ;;  %6053 = vmatprep.mubr.msk.bf16.mxu0 %vm6314_vm1, %v8698_v39 }
 0x29d   : > { %6059 = vmatprep.mubr.msk.bf16.mxu1 %vm6314_vm1, %v8698_v39 }
 0x29e   : > { %v3000_v56 = vpop.f32.mrb[212].mxu0 }
 0x29f   : > { %v2849_v9 = vpop.f32.mrb[212].mxu1  ;;  %v8207_v17 = vadd.f32 %v3000_v56, %v2895_v42  ;;  %v5851_v16 = vpop.f32.mrb[213].mxu0 }
 0x2a0   : > { %v2897_v2 = vadd.f32 %v2849_v9, %v8112_v40  ;;  %v5825_v63 = vpop.f32.mrb[213].mxu1  ;;  %v3003_v49 = vpop.f32.mrb[214].mxu0  ;;  %v4184_v40 = vrot.slane %v7563_v41, 2 }
 0x2a1   : > { %v2852_v43 = vpop.f32.mrb[214].mxu1  ;;  %v8213_v27 = vadd.f32 %v3003_v49, %v2896_v25  ;;  %v5852_v47 = vpop.f32.mrb[215].mxu0 }
 0x2a2   : > { %v2898_v0 = vadd.f32 %v2852_v43, %v8115_v23  ;;  %v5826_v5 = vpop.f32.mrb[215].mxu1  ;;  %v4186_v42 = vsel %vm1211_vm6, %v4184_v40, %v4185_v36 }
 0x2a3   : > { %6054 = vmatmul.mubr.msk.bf16.gmra.mrb[64].mxu0 %vm497_vm3, %v3913_v60 }
 0x2a4   : > { %6060 = vmatmul.mubr.msk.bf16.vlgmr.msra.gmra.mrb[64].mxu1 %vm497_vm3, %v7891_v51  ;;  %6089 = vmatprep.mubr.msk.bf16.mxu0 %vm6314_vm1, %v8698_v39 }
 0x2a5   : > { %6118 = vmatpush3.bf16.msra.mxu1 %v4378_v30  ;;  %6063 = vmatprep.mubr.msk.bf16.mxu1 %vm6314_vm1, %v8698_v39 }
 0x2a6   : > { %v3008_v23 = vpop.f32.mrb[216].mxu0 }
 0x2a7   : > { %v2857_v20 = vpop.f32.mrb[216].mxu1  ;;  %v8229_v60 = vadd.f32 %v3008_v23, %v2897_v2  ;;  %v5855_v51 = vpop.f32.mrb[217].mxu0 }
 0x2a8   : > { %v2899_v15 = vadd.f32 %v2857_v20, %v8128_v11  ;;  %v5829_v22 = vpop.f32.mrb[217].mxu1  ;;  %v3011_v61 = vpop.f32.mrb[218].mxu0  ;;  %v4187_v11 = vrot.slane %v7861_v21, 2 }
 0x2a9   : > { %v2860_v37 = vpop.f32.mrb[218].mxu1  ;;  %v8233_v4 = vadd.f32 %v3011_v61, %v2898_v0  ;;  %v5856_v52 = vpop.f32.mrb[219].mxu0 }
 0x2aa   : > { %v2900_v7 = vadd.f32 %v2860_v37, %v8131_v46  ;;  %v5830_v25 = vpop.f32.mrb[219].mxu1 }
 0x2ab   : > { %6090 = vmatmul.mubr.msk.bf16.vlgmr.msra.gmra.mrb[68].mxu0 %vm497_vm3, %v4186_v42 }
 0x2ac   : > { %6064 = vmatmul.mubr.msk.bf16.gmra.mrb[68].mxu1 %vm497_vm3, %v7912_v13  ;;  %6148 = vmatpush3.bf16.msra.mxu0 %v4518_v45  ;;  %v4188_v13 = vsel %vm1211_vm6, %v4185_v36, %v4187_v11 }
 0x2ad   : > { %6067 = vmatprep.mubr.msk.bf16.mxu1 %vm6314_vm1, %v8698_v39  ;;  %6093 = vmatprep.mubr.msk.bf16.mxu0 %vm6314_vm1, %v8698_v39 }
 0x2ae   : > { %v3016_v59 = vpop.f32.mrb[220].mxu0 }
 0x2af   : > { %v2865_v56 = vpop.f32.mrb[220].mxu1  ;;  %v8245_v9 = vadd.f32 %v3016_v59, %v2899_v15  ;;  %v5859_v46 = vpop.f32.mrb[221].mxu0 }
 0x2b0   : > { %v2901_v16 = vadd.f32 %v2865_v56, %v8142_v6  ;;  %v5833_v50 = vpop.f32.mrb[221].mxu1  ;;  %v3019_v2 = vpop.f32.mrb[222].mxu0  ;;  %v4189_v6 = vrot.slane %v7880_v32, 2 }
 0x2b1   : > { %v2868_v63 = vpop.f32.mrb[222].mxu1  ;;  %v8249_v49 = vadd.f32 %v3019_v2, %v2900_v7  ;;  %v5860_v43 = vpop.f32.mrb[223].mxu0  ;;  %v4053_v50 = vrot.slane %v8166_v18, 2  ;;  %v3222_v2 = vld [vmem:[%s7394_s16 + $0x3c] sm:$0x7]  ;;  %s6181_s16 = smul.u32 104, %s8727_s25 }
 0x2b2   : > { %v2902_v47 = vadd.f32 %v2868_v63, %v8145_v58  ;;  %v5834_v0 = vpop.f32.mrb[223].mxu1  ;;  %v4190_v20 = vsel %vm1211_vm6, %v4187_v11, %v4189_v6 }
 0x2b3   : > { %6094 = vmatmul.mubr.msk.bf16.gmra.mrb[72].mxu0 %vm497_vm3, %v4188_v13  ;;  %v4054_v18 = vsel %vm1211_vm6, %v4051_v14, %v4053_v50  ;;  %s394_s10 = sadd.s32 %s6181_s16, %s6180_s23 }
 0x2b4   : > { %6068 = vmatmul.mubr.msk.bf16.gmra.mrb[72].mxu1 %vm497_vm3, %v7937_v48  ;;  %6097 = vmatprep.mubr.msk.bf16.mxu0 %vm6314_vm1, %v8698_v39  ;;  %s4882_s11 = sshll.u32 %s394_s10, 3 }
 0x2b5   : > { %6071 = vmatprep.mubr.msk.bf16.mxu1 %vm6314_vm1, %v8698_v39  ;;  %s8583_s19 = scalar_lea.vmem %s8678_s7, %s4882_s11 }
 0x2b6   : > { %v3024_v5 = vpop.f32.mrb[224].mxu0 }
 0x2b7   : > { %v2873_v30 = vpop.f32.mrb[224].mxu1  ;;  %v8260_v40 = vadd.f32 %v3024_v5, %v2901_v16  ;;  %v5863_v36 = vpop.f32.mrb[225].mxu0  ;;  %v8297_v5 = vcombine.low %v8157_v55, %v3222_v2 }
 0x2b8   : > { %v2903_v58 = vadd.f32 %v2873_v30, %v8159_v28  ;;  %v5837_v23 = vpop.f32.mrb[225].mxu1  ;;  %v3027_v12 = vpop.f32.mrb[226].mxu0  ;;  %v4191_v28 = vrot.slane %v7901_v31, 2 }
 0x2b9   : > { %v2876_v48 = vpop.f32.mrb[226].mxu1  ;;  %v8264_v51 = vadd.f32 %v3027_v12, %v2902_v47  ;;  %v5864_v15 = vpop.f32.mrb[227].mxu0 }
 0x2ba   : > { %v2904_v22 = vadd.f32 %v2876_v48, %v8162_v54  ;;  %v5838_v61 = vpop.f32.mrb[227].mxu1 }
 0x2bb   : > { %6098 = vmatmul.mubr.msk.bf16.gmra.mrb[76].mxu0 %vm497_vm3, %v4190_v20 }
 0x2bc   : > { %6072 = vmatmul.mubr.msk.bf16.gmra.mrb[76].mxu1 %vm497_vm3, %v7967_v62  ;;  %6101 = vmatprep.mubr.msk.bf16.mxu0 %vm6314_vm1, %v8698_v39  ;;  %v4192_v62 = vsel %vm1211_vm6, %v4189_v6, %v4191_v28 }
 0x2bd   : > { %6075 = vmatprep.mubr.msk.bf16.mxu1 %vm6314_vm1, %v8698_v39 }
 0x2be   : > { %v3032_v42 = vpop.f32.mrb[228].mxu0 }
 0x2bf   : > { %v2881_v37 = vpop.f32.mrb[228].mxu1  ;;  %v8275_v52 = vadd.f32 %v3032_v42, %v2903_v58  ;;  %v5867_v45 = vpop.f32.mrb[229].mxu0 }
 0x2c0   : > { %v2905_v54 = vadd.f32 %v2881_v37, %v8180_v33  ;;  %v5841_v7 = vpop.f32.mrb[229].mxu1  ;;  %v3035_v25 = vpop.f32.mrb[230].mxu0  ;;  %v4193_v33 = vrot.slane %v8027_v44, 2 }
 0x2c1   : > { %v2884_v11 = vpop.f32.mrb[230].mxu1  ;;  %v8279_v59 = vadd.f32 %v3035_v25, %v2904_v22  ;;  %v5868_v56 = vpop.f32.mrb[231].mxu0 }
 0x2c2   : > { %v2906_v46 = vadd.f32 %v2884_v11, %v8183_v10  ;;  %v5842_v16 = vpop.f32.mrb[231].mxu1  ;;  %v4194_v6 = vsel %vm1211_vm6, %v4191_v28, %v4193_v33 }
 0x2c3   : > { %6102 = vmatmul.mubr.msk.bf16.gmra.mrb[80].mxu0 %vm497_vm3, %v4192_v62  ;;  %v4331_v16 = vrot.slane %v3400_v35, 2 }
 0x2c4   : > { %6076 = vmatmul.mubr.msk.bf16.gmra.mrb[80].mxu1 %vm497_vm3, %v7995_v26  ;;  %6105 = vmatprep.mubr.msk.bf16.mxu0 %vm6314_vm1, %v8698_v39 }
 0x2c5   : > { %6079 = vmatprep.mubr.msk.bf16.mxu1 %vm6314_vm1, %v8698_v39 }
 0x2c6   : > { %v3040_v13 = vpop.f32.mrb[232].mxu0 }
 0x2c7   : > { %v2889_v63 = vpop.f32.mrb[232].mxu1  ;;  %v8292_v10 = vadd.f32 %v3040_v13, %v2905_v54  ;;  %v5871_v43 = vpop.f32.mrb[233].mxu0  ;;  %v4484_v13 = vrot.slane %v7586_v1, 3 }
 0x2c8   : > { %v2907_v47 = vadd.f32 %v2889_v63, %v8195_v8  ;;  %v3043_v0 = vpop.f32.mrb[234].mxu0  ;;  %v5845_v26 = vpop.f32.mrb[233].mxu1  ;;  %v4195_v8 = vrot.slane %v8297_v5, 2 }
 0x2c9   : > { %v8299_v30 = vadd.f32 %v3043_v0, %v2906_v46  ;;  %v5872_v36 = vpop.f32.mrb[235].mxu0  ;;  %v2892_v58 = vpop.f32.mrb[234].mxu1 }
 0x2ca   : > { %v5846_v23 = vpop.f32.mrb[235].mxu1  ;;  %v4196_v22 = vsel %vm1211_vm6, %v4193_v33, %v4195_v8  ;;  %v4332_v33 = vrot.slane %v3396_v3, 3  ;;  %v4335_v58 = vrot.slane %v3407_v24, 2 }
 0x2cb   : > { %6106 = vmatmul.mubr.msk.bf16.gmra.mrb[84].mxu0 %vm497_vm3, %v4194_v6 }
 0x2cc   : > { %6080 = vmatmul.mubr.msk.bf16.gmra.mrb[84].mxu1 %vm497_vm3, %v4054_v18  ;;  %6109 = vmatprep.mubr.msk.bf16.mxu0 %vm6314_vm1, %v8698_v39  ;;  %v4333_v35 = vor.u32 %v4332_v33, %v4331_v16  ;;  %v4336_v18 = vrot.slane %v3403_v53, 3 }
 0x2cd   : > { %6083 = vmatprep.mubr.msk.bf16.mxu1 %vm6314_vm1, %v8698_v39 }
 0x2ce   : > { %v3048_v55 = vpop.f32.mrb[236].mxu0  ;;  %v4334_v1 = vsel %vm1494_vm7, %v7618_v19, %v4333_v35  ;;  %v4337_v19 = vor.u32 %v4336_v18, %v4335_v58 }
 0x2cf   : > { %v8311_v12 = vadd.f32 %v3048_v55, %v2907_v47  ;;  %v3140_v20 = vpop.f32.mrb[236].mxu1  ;;  %v5875_v29 = vpop.f32.mrb[237].mxu0 }
 0x2d0   : > { %v3194_v14 = vadd.f32 %v3140_v20, %v8207_v17  ;;  %v5881_v48 = vpop.f32.mrb[237].mxu1  ;;  %v3051_v15 = vpop.f32.mrb[238].mxu0 }
 0x2d1   : > { %v3143_v61 = vpop.f32.mrb[238].mxu1  ;;  %v5876_v28 = vpop.f32.mrb[239].mxu0 }
 0x2d2   : > { %v3195_v42 = vadd.f32 %v3143_v61, %v8213_v27  ;;  %v5882_v37 = vpop.f32.mrb[239].mxu1  ;;  %v8714_v28 = vshrl.u32 %v7901_v31, 16 }
 0x2d3   : > { %6110 = vmatmul.mubr.msk.bf16.gmra.mrb[88].mxu0 %vm497_vm3, %v4196_v22  ;;  %v8715_v37 = vshll.u32 %v7901_v31, 16 }
 0x2d4   : > { %6084 = vmatmul.mubr.msk.bf16.gmra.mrb[88].mxu1 %vm497_vm3, %v4053_v50  ;;  %6113 = vmatprep.mubr.msk.bf16.mxu0 %vm6314_vm1, %v8698_v39 }
 0x2d5   : > { %6119 = vmatprep.mubr.msk.bf16.mxu1 %vm6314_vm1, %v8698_v39 }
 0x2d6   : > { %v3306_v17 = vpop.f32.mrb[240].mxu0 }
 0x2d7   : > { %v3148_v45 = vpop.f32.mrb[240].mxu1  ;;  %v8322_v54 = vadd.f32 %v3306_v17, %v3194_v14  ;;  %v5911_v7 = vpop.f32.mrb[241].mxu0  ;;  %v4340_v17 = vrot.slane %v8715_v37, 3 }
 0x2d8   : > { %v3196_v25 = vadd.f32 %v3148_v45, %v8229_v60  ;;  %v5885_v62 = vpop.f32.mrb[241].mxu1  ;;  %v3309_v27 = vpop.f32.mrb[242].mxu0  ;;  %v4483_v60 = vrot.slane %v7563_v41, 3 }
 0x2d9   : > { %v3151_v11 = vpop.f32.mrb[242].mxu1  ;;  %v8325_v56 = vadd.f32 %v3309_v27, %v3195_v42  ;;  %v5912_v46 = vpop.f32.mrb[243].mxu0  ;;  %v4339_v42 = vrot.slane %v8714_v28, 2 }
 0x2da   : > { %v3197_v50 = vadd.f32 %v3151_v11, %v8233_v4  ;;  %v5886_v2 = vpop.f32.mrb[243].mxu1  ;;  %v4485_v26 = vsel %vm1654_vm8, %v4483_v60, %v4484_v13 }
 0x2db   : > { %6114 = vmatmul.mubr.msk.bf16.gmra.mrb[92].mxu0 %vm497_vm3, %v4195_v8  ;;  %v4486_v8 = vrot.slane %v7861_v21, 3  ;;  %v4338_v21 = vsel %vm1494_vm7, %v4333_v35, %v4337_v19  ;;  %v4343_v35 = vrot.slane %v3422_v57, 2  ;;  %v4348_v57 = vshrl.u32 %v8297_v5, 16 }
 0x2dc   : > { %6120 = vmatmul.mubr.msk.bf16.vlgmr.msra.gmra.mrb[92].mxu1 %vm497_vm3, %v8069_v34  ;;  %6149 = vmatprep.mubr.msk.bf16.mxu0 %vm6314_vm1, %v8698_v39 }
 0x2dd   : > { %6123 = vmatprep.mubr.msk.bf16.mxu1 %vm6314_vm1, %v8698_v39  ;;  %v4487_v48 = vsel %vm1654_vm8, %v4484_v13, %v4486_v8 }
 0x2de   : > { %v3314_v3 = vpop.f32.mrb[244].mxu0 }
 0x2df   : > { %v3156_v63 = vpop.f32.mrb[244].mxu1  ;;  %v8341_v4 = vadd.f32 %v3314_v3, %v3196_v25  ;;  %v5915_v43 = vpop.f32.mrb[245].mxu0  ;;  %v4341_v25 = vor.u32 %v4340_v17, %v4339_v42  ;;  %v4344_v3 = vrot.slane %v3418_v38, 3  ;;  %v4351_v38 = vshll.u32 %v8297_v5, 16 }
 0x2e0   : > { %v3198_v47 = vadd.f32 %v3156_v63, %v8245_v9  ;;  %v5889_v0 = vpop.f32.mrb[245].mxu1  ;;  %v3317_v34 = vpop.f32.mrb[246].mxu0 }
 0x2e1   : > { %v3159_v6 = vpop.f32.mrb[246].mxu1  ;;  %v8345_v36 = vadd.f32 %v3317_v34, %v3197_v50  ;;  %v5916_v41 = vpop.f32.mrb[247].mxu0 }
 0x2e2   : > { %v3199_v23 = vadd.f32 %v3159_v6, %v8249_v49  ;;  %v5890_v9 = vpop.f32.mrb[247].mxu1 }
 0x2e3   : > { %6150 = vmatmul.mubr.msk.bf16.vlgmr.msra.gmra.mrb[96].mxu0 %vm497_vm3, %v4485_v26 }
 0x2e4   : > { %6124 = vmatmul.mubr.msk.bf16.gmra.mrb[96].mxu1 %vm497_vm3, %v4334_v1  ;;  %6153 = vmatprep.mubr.msk.bf16.mxu0 %vm6314_vm1, %v8698_v39 }
 0x2e5   : > { %6127 = vmatprep.mubr.msk.bf16.mxu1 %vm6314_vm1, %v8698_v39 }
 0x2e6   : > { %v3322_v24 = vpop.f32.mrb[248].mxu0 }
 0x2e7   : > { %v3164_v55 = vpop.f32.mrb[248].mxu1  ;;  %v8361_v20 = vadd.f32 %v3322_v24, %v3198_v47  ;;  %v5919_v53 = vpop.f32.mrb[249].mxu0  ;;  %v4345_v47 = vor.u32 %v4344_v3, %v4343_v35 }
 0x2e8   : > { %v3200_v49 = vadd.f32 %v3164_v55, %v8260_v40  ;;  %v5893_v29 = vpop.f32.mrb[249].mxu1  ;;  %v3325_v14 = vpop.f32.mrb[250].mxu0  ;;  %v4488_v40 = vrot.slane %v7880_v32, 3  ;;  %v4342_v32 = vsel %vm1494_vm7, %v4337_v19, %v4341_v25  ;;  %v4353_v19 = vrot.slane %v4351_v38, 3 }
 0x2e9   : > { %v3167_v15 = vpop.f32.mrb[250].mxu1  ;;  %v8365_v22 = vadd.f32 %v3325_v14, %v3199_v23  ;;  %v5920_v61 = vpop.f32.mrb[251].mxu0  ;;  %v4346_v9 = vsel %vm1494_vm7, %v4341_v25, %v4345_v47 }
 0x2ea   : > { %v3201_v45 = vadd.f32 %v3167_v15, %v8264_v51  ;;  %v5894_v7 = vpop.f32.mrb[251].mxu1  ;;  %v4489_v50 = vsel %vm1654_vm8, %v4486_v8, %v4488_v40  ;;  %v4350_v8 = vrot.slane %v4348_v57, 2 }
 0x2eb   : > { %6154 = vmatmul.mubr.msk.bf16.gmra.mrb[100].mxu0 %vm497_vm3, %v4487_v48 }
 0x2ec   : > { %6128 = vmatmul.mubr.msk.bf16.gmra.mrb[100].mxu1 %vm497_vm3, %v4338_v21  ;;  %6157 = vmatprep.mubr.msk.bf16.mxu0 %vm6314_vm1, %v8698_v39  ;;  %v4354_v53 = vor.u32 %v4353_v19, %v4350_v8 }
 0x2ed   : > { %6131 = vmatprep.mubr.msk.bf16.mxu1 %vm6314_vm1, %v8698_v39 }
 0x2ee   : > { %v3330_v62 = vpop.f32.mrb[252].mxu0 }
 0x2ef   : > { %v3172_v27 = vpop.f32.mrb[252].mxu1  ;;  %v8380_v11 = vadd.f32 %v3330_v62, %v3200_v49  ;;  %v5923_v46 = vpop.f32.mrb[253].mxu0 }
 0x2f0   : > { %v3202_v51 = vadd.f32 %v3172_v27, %v8275_v52  ;;  %v5897_v16 = vpop.f32.mrb[253].mxu1  ;;  %v3333_v33 = vpop.f32.mrb[254].mxu0  ;;  %v4490_v52 = vrot.slane %v7901_v31, 3 }
 0x2f1   : > { %v3175_v2 = vpop.f32.mrb[254].mxu1  ;;  %v8384_v60 = vadd.f32 %v3333_v33, %v3201_v45  ;;  %v5924_v13 = vpop.f32.mrb[255].mxu0 }
 0x2f2   : > { %v3203_v63 = vadd.f32 %v3175_v2, %v8279_v59  ;;  %v5898_v43 = vpop.f32.mrb[255].mxu1  ;;  %v4491_v58 = vsel %vm1654_vm8, %v4488_v40, %v4490_v52 }
 0x2f3   : > { %6158 = vmatmul.mubr.msk.bf16.gmra.mrb[104].mxu0 %vm497_vm3, %v4489_v50 }
 0x2f4   : > { %6132 = vmatmul.mubr.msk.bf16.gmra.mrb[104].mxu1 %vm497_vm3, %v4342_v32  ;;  %6161 = vmatprep.mubr.msk.bf16.mxu0 %vm6314_vm1, %v8698_v39 }
 0x2f5   : > { %6135 = vmatprep.mubr.msk.bf16.mxu1 %vm6314_vm1, %v8698_v39 }
 0x2f6   : > { %v3338_v0 = vpop.f32.mrb[0].mxu0 }
 0x2f7   : > { %v3180_v59 = vpop.f32.mrb[0].mxu1  ;;  %v8401_v34 = vadd.f32 %v3338_v0, %v3202_v51  ;;  %v5927_v26 = vpop.f32.mrb[1].mxu0 }
 0x2f8   : > { %v3204_v6 = vadd.f32 %v3180_v59, %v8292_v10  ;;  %v5901_v41 = vpop.f32.mrb[1].mxu1  ;;  %v3341_v1 = vpop.f32.mrb[2].mxu0  ;;  %v4492_v10 = vrot.slane %v8027_v44, 3  ;;  %v4355_v44 = vsel %vm1494_vm7, %v4345_v47, %v4354_v53 }
 0x2f9   : > { %v3183_v31 = vpop.f32.mrb[2].mxu1  ;;  %v8405_v18 = vadd.f32 %v3341_v1, %v3203_v63  ;;  %v5928_v23 = vpop.f32.mrb[3].mxu0 }
 0x2fa   : > { %v3205_v24 = vadd.f32 %v3183_v31, %v8299_v30  ;;  %v5902_v55 = vpop.f32.mrb[3].mxu1  ;;  %v4493_v21 = vsel %vm1654_vm8, %v4490_v52, %v4492_v10 }
 0x2fb   : > { %6162 = vmatmul.mubr.msk.bf16.gmra.mrb[108].mxu0 %vm497_vm3, %v4491_v58 }
 0x2fc   : > { %6136 = vmatmul.mubr.msk.bf16.gmra.mrb[108].mxu1 %vm497_vm3, %v4346_v9  ;;  %6165 = vmatprep.mubr.msk.bf16.mxu0 %vm6314_vm1, %v8698_v39 }
 0x2fd   : > { %6139 = vmatprep.mubr.msk.bf16.mxu1 %vm6314_vm1, %v8698_v39 }
 0x2fe   : > { %v3346_v49 = vpop.f32.mrb[4].mxu0 }
 0x2ff   : > { %v3188_v29 = vpop.f32.mrb[4].mxu1  ;;  %v8416_v14 = vadd.f32 %v3346_v49, %v3204_v6  ;;  %v5931_v48 = vpop.f32.mrb[5].mxu0 }
 0x300   : > { %v3206_v30 = vadd.f32 %v3188_v29, %v8311_v12  ;;  %v3349_v15 = vpop.f32.mrb[6].mxu0  ;;  %v5905_v61 = vpop.f32.mrb[5].mxu1  ;;  %v4494_v12 = vrot.slane %v8297_v5, 3 }
 0x301   : > { %v8420_v28 = vadd.f32 %v3349_v15, %v3205_v24  ;;  %v5932_v42 = vpop.f32.mrb[7].mxu0  ;;  %v3191_v37 = vpop.f32.mrb[6].mxu1 }
 0x302   : > { %v5906_v17 = vpop.f32.mrb[7].mxu1  ;;  %v4495_v51 = vsel %vm1654_vm8, %v4492_v10, %v4494_v12 }
 0x303   : > { %6166 = vmatmul.mubr.msk.bf16.gmra.mrb[112].mxu0 %vm497_vm3, %v4493_v21 }
 0x304   : > { %6140 = vmatmul.mubr.msk.bf16.gmra.mrb[112].mxu1 %vm497_vm3, %v4355_v44  ;;  %6169 = vmatprep.mubr.msk.bf16.mxu0 %vm6314_vm1, %v8698_v39 }
 0x305   : > { %6143 = vmatprep.mubr.msk.bf16.mxu1 %vm6314_vm1, %v8698_v39 }
 0x306   : > { %v3354_v45 = vpop.f32.mrb[8].mxu0 }
 0x307   : > { %v8430_v7 = vadd.f32 %v3354_v45, %v3206_v30  ;;  %v3483_v40 = vpop.f32.mrb[8].mxu1  ;;  %v5935_v25 = vpop.f32.mrb[9].mxu0 }
 0x308   : > { %v3537_v62 = vadd.f32 %v3483_v40, %v8322_v54  ;;  %v5941_v27 = vpop.f32.mrb[9].mxu1  ;;  %v3357_v46 = vpop.f32.mrb[10].mxu0 }
 0x309   : > { %v3486_v16 = vpop.f32.mrb[10].mxu1  ;;  %v5936_v33 = vpop.f32.mrb[11].mxu0 }
 0x30a   : > { %v3538_v50 = vadd.f32 %v3486_v16, %v8325_v56  ;;  %v5942_v2 = vpop.f32.mrb[11].mxu1 }
 0x30b   : > { %6170 = vmatmul.mubr.msk.bf16.gmra.mrb[116].mxu0 %vm497_vm3, %v4495_v51 }
 0x30c   : > { %6144 = vmatmul.mubr.msk.bf16.gmra.mrb[116].mxu1 %vm497_vm3, %v4354_v53  ;;  %6173 = vmatprep.mubr.msk.bf16.mxu0 %vm6314_vm1, %v8698_v39 }
 0x30e   : > { %v3630_v5 = vpop.f32.mrb[12].mxu0 }
 0x30f   : > { %v3491_v13 = vpop.f32.mrb[12].mxu1  ;;  %v8439_v32 = vadd.f32 %v3630_v5, %v3537_v62  ;;  %v5971_v54 = vpop.f32.mrb[13].mxu0 }
 0x310   : > { %v3539_v35 = vadd.f32 %v3491_v13, %v8341_v4  ;;  %v5945_v3 = vpop.f32.mrb[13].mxu1  ;;  %v3633_v63 = vpop.f32.mrb[14].mxu0 }
 0x311   : > { %v3494_v43 = vpop.f32.mrb[14].mxu1  ;;  %v8442_v52 = vadd.f32 %v3633_v63, %v3538_v50  ;;  %v5972_v56 = vpop.f32.mrb[15].mxu0 }
 0x312   : > { %v3540_v47 = vadd.f32 %v3494_v43, %v8345_v36  ;;  %v5946_v57 = vpop.f32.mrb[15].mxu1 }
 0x313   : > { %6174 = vmatmul.mubr.msk.bf16.gmra.mrb[120].mxu0 %vm497_vm3, %v4494_v12 }
 0x316   : > { %v3638_v38 = vpop.f32.mrb[16].mxu0 }
 0x317   : > { %v3499_v39 = vpop.f32.mrb[16].mxu1  ;;  %v8446_v0 = vadd.f32 %v3638_v38, %v3539_v35  ;;  %v5975_v59 = vpop.f32.mrb[17].mxu0 }
 0x318   : > { %v3541_v26 = vadd.f32 %v3499_v39, %v8361_v20  ;;  %v5949_v6 = vpop.f32.mrb[17].mxu1  ;;  %v3641_v4 = vpop.f32.mrb[18].mxu0 }
 0x319   : > { %v3502_v41 = vpop.f32.mrb[18].mxu1  ;;  %v8449_v1 = vadd.f32 %v3641_v4, %v3540_v47  ;;  %v5976_v58 = vpop.f32.mrb[19].mxu0 }
 0x31a   : > { %v3542_v31 = vadd.f32 %v3502_v41, %v8365_v22  ;;  %v5950_v23 = vpop.f32.mrb[19].mxu1 }
 0x31e   : > { %v3646_v36 = vpop.f32.mrb[20].mxu0 }
 0x31f   : > { %v3507_v9 = vpop.f32.mrb[20].mxu1  ;;  %v8452_v8 = vadd.f32 %v3646_v36, %v3541_v26  ;;  %v5979_v19 = vpop.f32.mrb[21].mxu0 }
 0x320   : > { %v3543_v24 = vadd.f32 %v3507_v9, %v8380_v11  ;;  %v5953_v55 = vpop.f32.mrb[21].mxu1  ;;  %v3649_v10 = vpop.f32.mrb[22].mxu0 }
 0x321   : > { %v3510_v53 = vpop.f32.mrb[22].mxu1  ;;  %v8455_v20 = vadd.f32 %v3649_v10, %v3542_v31  ;;  %v5980_v49 = vpop.f32.mrb[23].mxu0 }
 0x322   : > { %v3544_v29 = vadd.f32 %v3510_v53, %v8384_v60  ;;  %v5954_v48 = vpop.f32.mrb[23].mxu1 }
 0x326   : > { %v3654_v30 = vpop.f32.mrb[24].mxu0 }
 0x327   : > { %v3515_v15 = vpop.f32.mrb[24].mxu1  ;;  %v8458_v22 = vadd.f32 %v3654_v30, %v3543_v24  ;;  %v5983_v61 = vpop.f32.mrb[25].mxu0 }
 0x328   : > { %v3545_v21 = vadd.f32 %v3515_v15, %v8401_v34  ;;  %v5957_v42 = vpop.f32.mrb[25].mxu1  ;;  %v3657_v37 = vpop.f32.mrb[26].mxu0 }
 0x329   : > { %v3518_v44 = vpop.f32.mrb[26].mxu1  ;;  %v8461_v11 = vadd.f32 %v3657_v37, %v3544_v29  ;;  %v5984_v17 = vpop.f32.mrb[27].mxu0 }
 0x32a   : > { %v3546_v12 = vadd.f32 %v3518_v44, %v8405_v18  ;;  %v5958_v45 = vpop.f32.mrb[27].mxu1 }
 0x32e   : > { %v3662_v40 = vpop.f32.mrb[28].mxu0 }
 0x32f   : > { %v3523_v25 = vpop.f32.mrb[28].mxu1  ;;  %v8464_v60 = vadd.f32 %v3662_v40, %v3545_v21  ;;  %v5987_v62 = vpop.f32.mrb[29].mxu0 }
 0x330   : > { %v3547_v27 = vadd.f32 %v3523_v25, %v8416_v14  ;;  %v5961_v46 = vpop.f32.mrb[29].mxu1  ;;  %v3665_v51 = vpop.f32.mrb[30].mxu0 }
 0x331   : > { %v3526_v16 = vpop.f32.mrb[30].mxu1  ;;  %v8467_v34 = vadd.f32 %v3665_v51, %v3546_v12  ;;  %v5988_v33 = vpop.f32.mrb[31].mxu0 }
 0x332   : > { %v3548_v50 = vadd.f32 %v3526_v16, %v8420_v28  ;;  %v5962_v2 = vpop.f32.mrb[31].mxu1 }
 0x336   : > { %v3670_v5 = vpop.f32.mrb[32].mxu0 }
 0x337   : > { %v3531_v13 = vpop.f32.mrb[32].mxu1  ;;  %v8470_v18 = vadd.f32 %v3670_v5, %v3547_v27  ;;  %v5991_v54 = vpop.f32.mrb[33].mxu0 }
 0x338   : > { %v3549_v35 = vadd.f32 %v3531_v13, %v8430_v7  ;;  %v3673_v3 = vpop.f32.mrb[34].mxu0  ;;  %v5965_v63 = vpop.f32.mrb[33].mxu1 }
 0x339   : > { %v8473_v43 = vadd.f32 %v3673_v3, %v3548_v50  ;;  %v5992_v14 = vpop.f32.mrb[35].mxu0  ;;  %v3534_v56 = vpop.f32.mrb[34].mxu1 }
 0x33a   : > { %v5966_v47 = vpop.f32.mrb[35].mxu1 }
 0x33e   : > { %v3678_v57 = vpop.f32.mrb[36].mxu0 }
 0x33f   : > { %v8475_v38 = vadd.f32 %v3678_v57, %v3549_v35  ;;  %v3784_v39 = vpop.f32.mrb[36].mxu1  ;;  %v5995_v28 = vpop.f32.mrb[37].mxu0 }
 0x340   : > { %v3838_v59 = vadd.f32 %v3784_v39, %v8439_v32  ;;  %v6001_v26 = vpop.f32.mrb[37].mxu1  ;;  %v3681_v6 = vpop.f32.mrb[38].mxu0 }
 0x341   : > { %v3787_v4 = vpop.f32.mrb[38].mxu1  ;;  %v5996_v41 = vpop.f32.mrb[39].mxu0 }
 0x342   : > { %v3839_v7 = vadd.f32 %v3787_v4, %v8442_v52  ;;  %v6002_v58 = vpop.f32.mrb[39].mxu1 }
 0x346   : > { %v3973_v31 = vpop.f32.mrb[40].mxu0 }
 0x347   : > { %v3792_v23 = vpop.f32.mrb[40].mxu1  ;;  %v8479_v36 = vadd.f32 %v3973_v31, %v3838_v59  ;;  %v6031_v9 = vpop.f32.mrb[41].mxu0 }
 0x348   : > { %v3840_v19 = vadd.f32 %v3792_v23, %v8446_v0  ;;  %v6005_v24 = vpop.f32.mrb[41].mxu1  ;;  %v3976_v55 = vpop.f32.mrb[42].mxu0 }
 0x349   : > { %v3795_v10 = vpop.f32.mrb[42].mxu1  ;;  %v8482_v53 = vadd.f32 %v3976_v55, %v3839_v7  ;;  %v6032_v32 = vpop.f32.mrb[43].mxu0 }
 0x34a   : > { %v3841_v49 = vadd.f32 %v3795_v10, %v8449_v1  ;;  %v6006_v29 = vpop.f32.mrb[43].mxu1 }
 0x34e   : > { %v3981_v48 = vpop.f32.mrb[44].mxu0 }
 0x34f   : > { %v3800_v30 = vpop.f32.mrb[44].mxu1  ;;  %v8485_v52 = vadd.f32 %v3981_v48, %v3840_v19  ;;  %v6035_v15 = vpop.f32.mrb[45].mxu0 }
 0x350   : > { %v3842_v61 = vadd.f32 %v3800_v30, %v8452_v8  ;;  %v6009_v21 = vpop.f32.mrb[45].mxu1  ;;  %v3984_v42 = vpop.f32.mrb[46].mxu0 }
 0x351   : > { %v3803_v37 = vpop.f32.mrb[46].mxu1  ;;  %v8488_v0 = vadd.f32 %v3984_v42, %v3841_v49  ;;  %v6036_v44 = vpop.f32.mrb[47].mxu0 }
 0x352   : > { %v3843_v17 = vadd.f32 %v3803_v37, %v8455_v20  ;;  %v6010_v12 = vpop.f32.mrb[47].mxu1 }
 0x356   : > { %v3989_v45 = vpop.f32.mrb[48].mxu0 }
 0x357   : > { %v3808_v40 = vpop.f32.mrb[48].mxu1  ;;  %v8491_v1 = vadd.f32 %v3989_v45, %v3842_v61  ;;  %v6039_v25 = vpop.f32.mrb[49].mxu0 }
 0x358   : > { %v3844_v62 = vadd.f32 %v3808_v40, %v8458_v22  ;;  %v6013_v27 = vpop.f32.mrb[49].mxu1  ;;  %v3992_v46 = vpop.f32.mrb[50].mxu0 }
 0x359   : > { %v3811_v51 = vpop.f32.mrb[50].mxu1  ;;  %v8494_v8 = vadd.f32 %v3992_v46, %v3843_v17  ;;  %v6040_v16 = vpop.f32.mrb[51].mxu0 }
 0x35a   : > { %v3845_v33 = vadd.f32 %v3811_v51, %v8461_v11  ;;  %v6014_v50 = vpop.f32.mrb[51].mxu1 }
 0x35e   : > { %v3997_v2 = vpop.f32.mrb[52].mxu0 }
 0x35f   : > { %v3816_v5 = vpop.f32.mrb[52].mxu1  ;;  %v8497_v20 = vadd.f32 %v3997_v2, %v3844_v62  ;;  %v6043_v13 = vpop.f32.mrb[53].mxu0 }
 0x360   : > { %v3846_v54 = vadd.f32 %v3816_v5, %v8464_v60  ;;  %v6017_v35 = vpop.f32.mrb[53].mxu1  ;;  %v4000_v3 = vpop.f32.mrb[54].mxu0 }
 0x361   : > { %v3819_v63 = vpop.f32.mrb[54].mxu1  ;;  %v8500_v22 = vadd.f32 %v4000_v3, %v3845_v33  ;;  %v6044_v14 = vpop.f32.mrb[55].mxu0 }
 0x362   : > { %v3847_v56 = vadd.f32 %v3819_v63, %v8467_v34  ;;  %v6018_v47 = vpop.f32.mrb[55].mxu1 }
 0x366   : > { %v4005_v57 = vpop.f32.mrb[56].mxu0 }
 0x367   : > { %v3824_v39 = vpop.f32.mrb[56].mxu1  ;;  %v8503_v11 = vadd.f32 %v4005_v57, %v3846_v54  ;;  %v6047_v28 = vpop.f32.mrb[57].mxu0 }
 0x368   : > { %v3848_v59 = vadd.f32 %v3824_v39, %v8470_v18  ;;  %v6021_v26 = vpop.f32.mrb[57].mxu1  ;;  %v4008_v6 = vpop.f32.mrb[58].mxu0 }
 0x369   : > { %v3827_v4 = vpop.f32.mrb[58].mxu1  ;;  %v8506_v60 = vadd.f32 %v4008_v6, %v3847_v56  ;;  %v6048_v41 = vpop.f32.mrb[59].mxu0 }
 0x36a   : > { %v3849_v7 = vadd.f32 %v3827_v4, %v8473_v43  ;;  %v6022_v58 = vpop.f32.mrb[59].mxu1 }
 0x36e   : > { %v4013_v31 = vpop.f32.mrb[60].mxu0 }
 0x36f   : > { %v3832_v23 = vpop.f32.mrb[60].mxu1  ;;  %v8509_v34 = vadd.f32 %v4013_v31, %v3848_v59  ;;  %v6051_v9 = vpop.f32.mrb[61].mxu0 }
 0x370   : > { %v3850_v19 = vadd.f32 %v3832_v23, %v8475_v38  ;;  %v4016_v24 = vpop.f32.mrb[62].mxu0  ;;  %v6025_v55 = vpop.f32.mrb[61].mxu1 }
 0x371   : > { %v8512_v10 = vadd.f32 %v4016_v24, %v3849_v7  ;;  %v6052_v18 = vpop.f32.mrb[63].mxu0  ;;  %v3835_v32 = vpop.f32.mrb[62].mxu1 }
 0x372   : > { %v6026_v49 = vpop.f32.mrb[63].mxu1 }
 0x376   : > { %v4021_v29 = vpop.f32.mrb[64].mxu0 }
 0x377   : > { %v8514_v48 = vadd.f32 %v4021_v29, %v3850_v19  ;;  %v4113_v30 = vpop.f32.mrb[64].mxu1  ;;  %v6055_v43 = vpop.f32.mrb[65].mxu0 }
 0x378   : > { %v4167_v15 = vadd.f32 %v4113_v30, %v8479_v36  ;;  %v6061_v61 = vpop.f32.mrb[65].mxu1  ;;  %v4024_v21 = vpop.f32.mrb[66].mxu0 }
 0x379   : > { %v4116_v42 = vpop.f32.mrb[66].mxu1  ;;  %v6056_v37 = vpop.f32.mrb[67].mxu0 }
 0x37a   : > { %v4168_v38 = vadd.f32 %v4116_v42, %v8482_v53  ;;  %v6062_v44 = vpop.f32.mrb[67].mxu1 }
 0x37e   : > { %v4255_v17 = vpop.f32.mrb[68].mxu0 }
 0x37f   : > { %v4121_v12 = vpop.f32.mrb[68].mxu1  ;;  %v8518_v45 = vadd.f32 %v4255_v17, %v4167_v15  ;;  %v6091_v40 = vpop.f32.mrb[69].mxu0 }
 0x380   : > { %v4169_v25 = vadd.f32 %v4121_v12, %v8485_v52  ;;  %v6065_v62 = vpop.f32.mrb[69].mxu1  ;;  %v4258_v27 = vpop.f32.mrb[70].mxu0 }
 0x381   : > { %v4124_v46 = vpop.f32.mrb[70].mxu1  ;;  %v8521_v51 = vadd.f32 %v4258_v27, %v4168_v38  ;;  %v6092_v36 = vpop.f32.mrb[71].mxu0 }
 0x382   : > { %v4170_v16 = vadd.f32 %v4124_v46, %v8488_v0  ;;  %v6066_v33 = vpop.f32.mrb[71].mxu1 }
 0x386   : > { %v4263_v50 = vpop.f32.mrb[72].mxu0 }
 0x387   : > { %v4129_v2 = vpop.f32.mrb[72].mxu1  ;;  %v8524_v53 = vadd.f32 %v4263_v50, %v4169_v25  ;;  %v6095_v5 = vpop.f32.mrb[73].mxu0 }
 0x388   : > { %v4171_v13 = vadd.f32 %v4129_v2, %v8491_v1  ;;  %v6069_v54 = vpop.f32.mrb[73].mxu1  ;;  %v4266_v35 = vpop.f32.mrb[74].mxu0 }
 0x389   : > { %v4132_v3 = vpop.f32.mrb[74].mxu1  ;;  %v8527_v52 = vadd.f32 %v4266_v35, %v4170_v16  ;;  %v6096_v63 = vpop.f32.mrb[75].mxu0 }
 0x38a   : > { %v4172_v14 = vadd.f32 %v4132_v3, %v8494_v8  ;;  %v6070_v56 = vpop.f32.mrb[75].mxu1 }
 0x38b   : > { %v8563_v56 = vld [vmem:[%s8675_s4] ss:$0 sm:$0xff] }
 0x38e   : > { %v4271_v47 = vpop.f32.mrb[76].mxu0 }
 0x38f   : > { %v4137_v57 = vpop.f32.mrb[76].mxu1  ;;  %v8530_v0 = vadd.f32 %v4271_v47, %v4171_v13  ;;  %v6099_v39 = vpop.f32.mrb[77].mxu0 }
 0x390   : > { %v4173_v28 = vadd.f32 %v4137_v57, %v8497_v20  ;;  %v6073_v59 = vpop.f32.mrb[77].mxu1  ;;  %v4274_v26 = vpop.f32.mrb[78].mxu0 }
 0x391   : > { %v4140_v6 = vpop.f32.mrb[78].mxu1  ;;  %v8533_v1 = vadd.f32 %v4274_v26, %v4172_v14  ;;  %v6100_v4 = vpop.f32.mrb[79].mxu0 }
 0x392   : > { %v4174_v41 = vadd.f32 %v4140_v6, %v8500_v22  ;;  %v6074_v7 = vpop.f32.mrb[79].mxu1 }
 0x396   : > { %v4279_v58 = vpop.f32.mrb[80].mxu0 }
 0x397   : > { %v4145_v31 = vpop.f32.mrb[80].mxu1  ;;  %v8536_v8 = vadd.f32 %v4279_v58, %v4173_v28  ;;  %v6103_v23 = vpop.f32.mrb[81].mxu0 }
 0x398   : > { %v4175_v9 = vadd.f32 %v4145_v31, %v8503_v11  ;;  %v6077_v19 = vpop.f32.mrb[81].mxu1  ;;  %v4282_v24 = vpop.f32.mrb[82].mxu0  ;;  %v8571_v31 = vld [vmem:[%s8676_s5] ss:$0 sm:$0xff] }
 0x399   : > { %v4148_v55 = vpop.f32.mrb[82].mxu1  ;;  %v8539_v20 = vadd.f32 %v4282_v24, %v4174_v41  ;;  %v6104_v18 = vpop.f32.mrb[83].mxu0 }
 0x39a   : > { %v4176_v32 = vadd.f32 %v4148_v55, %v8506_v60  ;;  %v6078_v49 = vpop.f32.mrb[83].mxu1 }
 0x39e   : > { %v4287_v29 = vpop.f32.mrb[84].mxu0 }
 0x39f   : > { %v4153_v30 = vpop.f32.mrb[84].mxu1  ;;  %v8542_v22 = vadd.f32 %v4287_v29, %v4175_v9  ;;  %v6107_v43 = vpop.f32.mrb[85].mxu0  ;;  %v8577_v9 = vld [vmem:[%s8677_s6] ss:$0 sm:$0xff] }
 0x3a0   : > { %v4177_v15 = vadd.f32 %v4153_v30, %v8509_v34  ;;  %v6081_v61 = vpop.f32.mrb[85].mxu1  ;;  %v4290_v21 = vpop.f32.mrb[86].mxu0 }
 0x3a1   : > { %v4156_v42 = vpop.f32.mrb[86].mxu1  ;;  %v8545_v11 = vadd.f32 %v4290_v21, %v4176_v32  ;;  %v6108_v37 = vpop.f32.mrb[87].mxu0 }
 0x3a2   : > { %v4178_v38 = vadd.f32 %v4156_v42, %v8512_v10  ;;  %v6082_v44 = vpop.f32.mrb[87].mxu1 }
 0x3a6   : > { %v4295_v17 = vpop.f32.mrb[88].mxu0 }
 0x3a7   : > { %v4161_v60 = vpop.f32.mrb[88].mxu1  ;;  %v8548_v12 = vadd.f32 %v4295_v17, %v4177_v15  ;;  %v6111_v40 = vpop.f32.mrb[89].mxu0 }
 0x3a8   : > { %v4179_v25 = vadd.f32 %v4161_v60, %v8514_v48  ;;  %v4298_v62 = vpop.f32.mrb[90].mxu0  ;;  %v6085_v34 = vpop.f32.mrb[89].mxu1 }
 0x3a9   : > { %v8551_v27 = vadd.f32 %v4298_v62, %v4178_v38  ;;  %v6112_v46 = vpop.f32.mrb[91].mxu0  ;;  %v4164_v36 = vpop.f32.mrb[90].mxu1 }
 0x3aa   : > { %v6086_v16 = vpop.f32.mrb[91].mxu1 }
 0x3ae   : > { %v4303_v33 = vpop.f32.mrb[92].mxu0 }
 0x3af   : > { %v8554_v10 = vadd.f32 %v4303_v33, %v4179_v25  ;;  %v4414_v50 = vpop.f32.mrb[92].mxu1  ;;  %v6115_v2 = vpop.f32.mrb[93].mxu0 }
 0x3b0   : > { %v4468_v5 = vadd.f32 %v4414_v50, %v8518_v45  ;;  %v6121_v13 = vpop.f32.mrb[93].mxu1  ;;  %v4306_v54 = vpop.f32.mrb[94].mxu0 }
 0x3b1   : > { %v4417_v48 = vpop.f32.mrb[94].mxu1  ;;  %v6116_v35 = vpop.f32.mrb[95].mxu0 }
 0x3b2   : > { %v4469_v3 = vadd.f32 %v4417_v48, %v8521_v51  ;;  %v6122_v63 = vpop.f32.mrb[95].mxu1 }
 0x3b6   : > { %v4554_v14 = vpop.f32.mrb[96].mxu0 }
 0x3b7   : > { %v4422_v47 = vpop.f32.mrb[96].mxu1  ;;  %v4608_v57 = vadd.f32 %v4554_v14, %v4468_v5  ;;  %v6151_v39 = vpop.f32.mrb[97].mxu0 }
 0x3b8   : > { %v4470_v45 = vadd.f32 %v4422_v47, %v8524_v53  ;;  %v6125_v28 = vpop.f32.mrb[97].mxu1  ;;  %v4557_v59 = vpop.f32.mrb[98].mxu0 }
 0x3b9   : > { %v4628_v26 = vadd.f32 %v8563_v56, %v4608_v57  ;;  %v4425_v51 = vpop.f32.mrb[98].mxu1  ;;  %v4609_v6 = vadd.f32 %v4557_v59, %v4469_v3  ;;  %v6152_v4 = vpop.f32.mrb[99].mxu0 }
 0x3ba   : > { %v4471_v41 = vadd.f32 %v4425_v51, %v8527_v52  ;;  %v6126_v7 = vpop.f32.mrb[99].mxu1 }
 0x3bb   : > { %vm4641_vm9 = vcmp.ge.f32.partialorder %v4628_v26, 0.0  ;;  %v4654_v58 = vmul.f32 0.2, %v4628_v26  ;;  %v4629_v53 = vadd.f32 %v8563_v56, %v4609_v6 }
 0x3bd   : > { %v4667_v23 = vsel %vm4641_vm9, %v4628_v26, %v4654_v58  ;;  %vm4642_vm10 = vcmp.ge.f32.partialorder %v4629_v53, 0.0  ;;  %v4655_v19 = vmul.f32 0.2, %v4629_v53 }
 0x3be   : > { %v4687_v52 = vmul.f32 %v8571_v31, %v4667_v23  ;;  %v4562_v24 = vpop.f32.mrb[100].mxu0 }
 0x3bf   : > { %v4668_v55 = vsel %vm4642_vm10, %v4629_v53, %v4655_v19  ;;  %v4430_v18 = vpop.f32.mrb[100].mxu1  ;;  %v4610_v32 = vadd.f32 %v4562_v24, %v4470_v45  ;;  %v6155_v49 = vpop.f32.mrb[101].mxu0 }
 0x3c0   : > { %v4707_v29 = vadd.f32 %v8577_v9, %v4687_v52  ;;  %v4688_v30 = vmul.f32 %v8571_v31, %v4668_v55  ;;  %v4472_v43 = vadd.f32 %v4430_v18, %v8530_v0  ;;  %v6129_v15 = vpop.f32.mrb[101].mxu1  ;;  %v4565_v61 = vpop.f32.mrb[102].mxu0 }
 0x3c1   : > { %v4630_v21 = vadd.f32 %v8563_v56, %v4610_v32  ;;  %v4433_v42 = vpop.f32.mrb[102].mxu1  ;;  %v4611_v37 = vadd.f32 %v4565_v61, %v4471_v41  ;;  %v6156_v38 = vpop.f32.mrb[103].mxu0 }
 0x3c2   : > { %4721 = vst.msk [vmem:[%s8583_s19] sm:$0xff] %vm4720_vm11, %v4707_v29  ;;  %v4708_v44 = vadd.f32 %v8577_v9, %v4688_v30  ;;  %v4473_v17 = vadd.f32 %v4433_v42, %v8533_v1  ;;  %v6130_v60 = vpop.f32.mrb[103].mxu1 }
 0x3c3   : > { %vm4643_vm12 = vcmp.ge.f32.partialorder %v4630_v21, 0.0  ;;  %v4656_v40 = vmul.f32 0.2, %v4630_v21  ;;  %v4631_v25 = vadd.f32 %v8563_v56, %v4611_v37 }
 0x3c4   : > { %4722 = vst.msk [vmem:[%s8583_s19 + $0x8] sm:$0xff] %vm4720_vm11, %v4708_v44 }
 0x3c5   : > { %v4669_v0 = vsel %vm4643_vm12, %v4630_v21, %v4656_v40  ;;  %vm4644_vm13 = vcmp.ge.f32.partialorder %v4631_v25, 0.0  ;;  %v4657_v62 = vmul.f32 0.2, %v4631_v25 }
 0x3c6   : > { %v4689_v34 = vmul.f32 %v8571_v31, %v4669_v0  ;;  %v4570_v46 = vpop.f32.mrb[104].mxu0 }
 0x3c7   : > { %v4670_v36 = vsel %vm4644_vm13, %v4631_v25, %v4657_v62  ;;  %v4438_v16 = vpop.f32.mrb[104].mxu1  ;;  %v4612_v33 = vadd.f32 %v4570_v46, %v4472_v43  ;;  %v6159_v50 = vpop.f32.mrb[105].mxu0 }
 0x3c8   : > { %v4709_v1 = vadd.f32 %v8577_v9, %v4689_v34  ;;  %v4690_v2 = vmul.f32 %v8571_v31, %v4670_v36  ;;  %v4474_v5 = vadd.f32 %v4438_v16, %v8536_v8  ;;  %v6133_v13 = vpop.f32.mrb[105].mxu1  ;;  %v4573_v54 = vpop.f32.mrb[106].mxu0 }
 0x3c9   : > { %v4632_v48 = vadd.f32 %v8563_v56, %v4612_v33  ;;  %v4441_v35 = vpop.f32.mrb[106].mxu1  ;;  %v4613_v3 = vadd.f32 %v4573_v54, %v4473_v17  ;;  %v6160_v63 = vpop.f32.mrb[107].mxu0 }
 0x3ca   : > { %4723 = vst.msk [vmem:[%s8583_s19 + $0x10] sm:$0xff] %vm4720_vm11, %v4709_v1  ;;  %v4710_v14 = vadd.f32 %v8577_v9, %v4690_v2  ;;  %v4475_v47 = vadd.f32 %v4441_v35, %v8539_v20  ;;  %v6134_v57 = vpop.f32.mrb[107].mxu1 }
 0x3cb   : > { %vm4645_vm14 = vcmp.ge.f32.partialorder %v4632_v48, 0.0  ;;  %v4658_v39 = vmul.f32 0.2, %v4632_v48  ;;  %v4633_v45 = vadd.f32 %v8563_v56, %v4613_v3 }
 0x3cc   : > { %4724 = vst.msk [vmem:[%s8583_s19 + $0x18] sm:$0xff] %vm4720_vm11, %v4710_v14 }
 0x3cd   : > { %v4671_v8 = vsel %vm4645_vm14, %v4632_v48, %v4658_v39  ;;  %vm4646_vm15 = vcmp.ge.f32.partialorder %v4633_v45, 0.0  ;;  %v4659_v28 = vmul.f32 0.2, %v4633_v45 }
 0x3ce   : > { %v4691_v59 = vmul.f32 %v8571_v31, %v4671_v8  ;;  %v4578_v26 = vpop.f32.mrb[108].mxu0 }
 0x3cf   : > { %v4672_v51 = vsel %vm4646_vm15, %v4633_v45, %v4659_v28  ;;  %v4446_v6 = vpop.f32.mrb[108].mxu1  ;;  %v4614_v4 = vadd.f32 %v4578_v26, %v4474_v5  ;;  %v6163_v41 = vpop.f32.mrb[109].mxu0 }
 0x3d0   : > { %v4711_v20 = vadd.f32 %v8577_v9, %v4691_v59  ;;  %v4692_v7 = vmul.f32 %v8571_v31, %v4672_v51  ;;  %v4476_v58 = vadd.f32 %v4446_v6, %v8542_v22  ;;  %v6137_v53 = vpop.f32.mrb[109].mxu1  ;;  %v4581_v23 = vpop.f32.mrb[110].mxu0 }
 0x3d1   : > { %v4634_v19 = vadd.f32 %v8563_v56, %v4614_v4  ;;  %v4449_v52 = vpop.f32.mrb[110].mxu1  ;;  %v4615_v24 = vadd.f32 %v4581_v23, %v4475_v47  ;;  %v6164_v55 = vpop.f32.mrb[111].mxu0 }
 0x3d2   : > { %4725 = vst.msk [vmem:[%s8583_s19 + $0x20] sm:$0xff] %vm4720_vm11, %v4711_v20  ;;  %v4712_v18 = vadd.f32 %v8577_v9, %v4692_v7  ;;  %v4477_v32 = vadd.f32 %v4449_v52, %v8545_v11  ;;  %v6138_v49 = vpop.f32.mrb[111].mxu1 }
 0x3d3   : > { %vm4647_vm0 = vcmp.ge.f32.partialorder %v4634_v19, 0.0  ;;  %v4660_v29 = vmul.f32 0.2, %v4634_v19  ;;  %v4635_v30 = vadd.f32 %v8563_v56, %v4615_v24 }
 0x3d4   : > { %4726 = vst.msk [vmem:[%s8583_s19 + $0x28] sm:$0xff] %vm4720_vm11, %v4712_v18 }
 0x3d5   : > { %v4673_v22 = vsel %vm4647_vm0, %v4634_v19, %v4660_v29  ;;  %vm4648_vm1 = vcmp.ge.f32.partialorder %v4635_v30, 0.0  ;;  %v4661_v43 = vmul.f32 0.2, %v4635_v30 }
 0x3d6   : > { %v4693_v15 = vmul.f32 %v8571_v31, %v4673_v22  ;;  %v4586_v61 = vpop.f32.mrb[112].mxu0 }
 0x3d7   : > { %v4674_v21 = vsel %vm4648_vm1, %v4635_v30, %v4661_v43  ;;  %v4454_v42 = vpop.f32.mrb[112].mxu1  ;;  %v4616_v37 = vadd.f32 %v4586_v61, %v4476_v58  ;;  %v6167_v38 = vpop.f32.mrb[113].mxu0 }
 0x3d8   : > { %v4713_v11 = vadd.f32 %v8577_v9, %v4693_v15  ;;  %v4694_v44 = vmul.f32 %v8571_v31, %v4674_v21  ;;  %v4478_v17 = vadd.f32 %v4454_v42, %v8548_v12  ;;  %v6141_v60 = vpop.f32.mrb[113].mxu1  ;;  %v4589_v40 = vpop.f32.mrb[114].mxu0 }
 0x3d9   : > { %v4636_v25 = vadd.f32 %v8563_v56, %v4616_v37  ;;  %v4457_v0 = vpop.f32.mrb[114].mxu1  ;;  %v4617_v62 = vadd.f32 %v4589_v40, %v4477_v32  ;;  %v6168_v34 = vpop.f32.mrb[115].mxu0 }
 0x3da   : > { %4727 = vst.msk [vmem:[%s8583_s19 + $0x30] sm:$0xff] %vm4720_vm11, %v4713_v11  ;;  %v4714_v46 = vadd.f32 %v8577_v9, %v4694_v44  ;;  %v4479_v36 = vadd.f32 %v4457_v0, %v8551_v27  ;;  %v6142_v16 = vpop.f32.mrb[115].mxu1 }
 0x3db   : > { %vm4649_vm2 = vcmp.ge.f32.partialorder %v4636_v25, 0.0  ;;  %v4662_v33 = vmul.f32 0.2, %v4636_v25  ;;  %v4637_v50 = vadd.f32 %v8563_v56, %v4617_v62 }
 0x3dc   : > { %4728 = vst.msk [vmem:[%s8583_s19 + $0x38] sm:$0xff] %vm4720_vm11, %v4714_v46 }
 0x3dd   : > { %v4675_v12 = vsel %vm4649_vm2, %v4636_v25, %v4662_v33  ;;  %vm4650_vm3 = vcmp.ge.f32.partialorder %v4637_v50, 0.0  ;;  %v4663_v1 = vmul.f32 0.2, %v4637_v50 }
 0x3de   : > { %v4695_v2 = vmul.f32 %v8571_v31, %v4675_v12  ;;  %v4594_v5 = vpop.f32.mrb[116].mxu0 }
 0x3df   : > { %v4676_v13 = vsel %vm4650_vm3, %v4637_v50, %v4663_v1  ;;  %v4462_v54 = vpop.f32.mrb[116].mxu1  ;;  %v4618_v48 = vadd.f32 %v4594_v5, %v4478_v17  ;;  %v6171_v35 = vpop.f32.mrb[117].mxu0 }
 0x3e0   : > { %v4715_v27 = vadd.f32 %v8577_v9, %v4695_v2  ;;  %v4696_v3 = vmul.f32 %v8571_v31, %v4676_v13  ;;  %v4480_v63 = vadd.f32 %v4462_v54, %v8554_v10  ;;  %v4597_v14 = vpop.f32.mrb[118].mxu0  ;;  %v6145_v47 = vpop.f32.mrb[117].mxu1 }
 0x3e1   : > { %v4638_v57 = vadd.f32 %v8563_v56, %v4618_v48  ;;  %v4619_v39 = vadd.f32 %v4597_v14, %v4479_v36  ;;  %v6172_v45 = vpop.f32.mrb[119].mxu0  ;;  %v4465_v8 = vpop.f32.mrb[118].mxu1 }
 0x3e2   : > { %4729 = vst.msk [vmem:[%s8583_s19 + $0x40] sm:$0xff] %vm4720_vm11, %v4715_v27  ;;  %v4716_v28 = vadd.f32 %v8577_v9, %v4696_v3  ;;  %v6146_v59 = vpop.f32.mrb[119].mxu1 }
 0x3e3   : > { %vm4651_vm4 = vcmp.ge.f32.partialorder %v4638_v57, 0.0  ;;  %v4664_v26 = vmul.f32 0.2, %v4638_v57  ;;  %v4639_v51 = vadd.f32 %v8563_v56, %v4619_v39 }
 0x3e4   : > { %4730 = vst.msk [vmem:[%s8583_s19 + $0x48] sm:$0xff] %vm4720_vm11, %v4716_v28 }
 0x3e5   : > { %v4677_v10 = vsel %vm4651_vm4, %v4638_v57, %v4664_v26  ;;  %vm4652_vm5 = vcmp.ge.f32.partialorder %v4639_v51, 0.0  ;;  %v4665_v6 = vmul.f32 0.2, %v4639_v51 }
 0x3e6   : > { %v4697_v4 = vmul.f32 %v8571_v31, %v4677_v10  ;;  %v4602_v41 = vpop.f32.mrb[120].mxu0 }
 0x3e7   : > { %v4678_v20 = vsel %vm4652_vm5, %v4639_v51, %v4665_v6  ;;  %v4620_v7 = vadd.f32 %v4602_v41, %v4480_v63  ;;  %v6175_v58 = vpop.f32.mrb[121].mxu0 }
 0x3e8   : > { %v4717_v53 = vadd.f32 %v8577_v9, %v4697_v4  ;;  %v4698_v23 = vmul.f32 %v8571_v31, %v4678_v20  ;;  %v4605_v19 = vpop.f32.mrb[122].mxu0 }
 0x3e9   : > { %v4640_v52 = vadd.f32 %v8563_v56, %v4620_v7  ;;  %v6176_v24 = vpop.f32.mrb[123].mxu0 }
 0x3ea   : > { %4731 = vst.msk [vmem:[%s8583_s19 + $0x50] sm:$0xff] %vm4720_vm11, %v4717_v53  ;;  %v4718_v55 = vadd.f32 %v8577_v9, %v4698_v23 }
 0x3eb   : > { %vm4653_vm6 = vcmp.ge.f32.partialorder %v4640_v52, 0.0  ;;  %v4666_v18 = vmul.f32 0.2, %v4640_v52 }
 0x3ec   : > { %4732 = vst.msk [vmem:[%s8583_s19 + $0x58] sm:$0xff] %vm4720_vm11, %v4718_v55 }
 0x3ed   : > { %v4679_v32 = vsel %vm4653_vm6, %v4640_v52, %v4666_v18 }
 0x3ee   : > { %v4699_v49 = vmul.f32 %v8571_v31, %v4679_v32 }
 0x3f0   : > { %v4719_v29 = vadd.f32 %v8577_v9, %v4699_v49 }
 0x3f2   : > { %4733 = vst.msk [vmem:[%s8583_s19 + $0x60] sm:$0xff] %vm4720_vm11, %v4719_v29 }
 0x3f3 PF: > { %s17_s28 = sadd.s32 1, %s6311_s28   ;;  %s8716_s24 = smov %s6303_s26 }
 0x3f4   : > { %p14_p10 = scmp.ge.s32.totalorder %s17_s28, 18   ;;  %s8717_s25 = smov %s6307_s27 }
 0x3f5   : > { %s8718_s26 = smov %s8721_s29  ;;  %s8719_s27 = smov %s8725_s30 }
 0x3f6   :  { %16 = sbr.rel (!%p14_p10) target bundleno = 3 (0x3), region = 110 }

// kernel: conv3_forward.2
= control target key start
LH: loop header
LB: loop body
LE: loop exit
PB: predicated region body
PF: predicated region fallthrough
CT: control target
= control target key end

     0   :  { %s6547_s27 = smov 0   ;;  %s6549_s28 = smov 0   ;;  %s8859_s0 = inlined_call_operand.vmem [shape: bf16[2,10,126,8], index: 0, kind: input, shape index: {}, may-alias: {0,1,2}]   ;;  %s8860_s1 = inlined_call_operand.vmem [shape: bf16[2,10,126,8], index: 1, kind: input, shape index: {}, may-alias: {0,1,2}]   ;;  %s8861_s2 = inlined_call_operand.vmem [shape: bf16[2,10,126,8], index: 2, kind: input, shape index: {}, may-alias: {0,1,2}]   ;;  %s8862_s3 = inlined_call_operand.vmem [shape: bf16[27,8,128], index: 3, kind: input, shape index: {}]   ;;  %s8863_s4 = inlined_call_operand.vmem [shape: f32[1,128], index: 4, kind: input, shape index: {}]   ;;  %s8864_s5 = inlined_call_operand.vmem [shape: f32[1,128], index: 5, kind: input, shape index: {}]   ;;  %s8865_s6 = inlined_call_operand.vmem [shape: f32[104,1], index: 6, kind: input, shape index: {}]   ;;  %s8866_s7 = inlined_call_operand.vmem [shape: f32[2,8,8,128], index: 7, kind: output, shape index: {0}]   ;;  %s8867_s8 = inlined_call_operand.vmem [shape: f32[2,8,8,128], index: 8, kind: output, shape index: {1}]  }
   0x1   :  { %s6551_s29 = smov 0   ;;  %s6553_s30 = smov 0  }
   0x2   :  { %s6555_s9 = smov 0  }
   0x3 LB: > { %s28_s10 = sadd.s32 1, %s6489_s29  ;;  %s31_s11 = sadd.s32 1, %s6493_s30  ;;  %s6497_s9 = sphi %s6555_s9, %s19_s9   ;;  %s6493_s30 = sphi %s6553_s30, %s8908_s30   ;;  %s6489_s29 = sphi %s6551_s29, %s8907_s29   ;;  %s6485_s28 = sphi %s6549_s28, %s8906_s28   ;;  %s6481_s27 = sphi %s6547_s27, %s8905_s27  }
   0x4   : > { %p29_p0 = scmp.ge.s32.totalorder %s28_s10, 8  ;;  %p5058_p1 = scmp.ge.s32.totalorder %s6497_s9, 1 }
   0x5   : > { %p327_p2 = scmp.lt.s32.totalorder %s6497_s9, 17 }
   0x6   : > { %s8910_s10 = smov (%p29_p0, %s28_s10), 0  ;;  %s8912_s11 = smov (!%p29_p0, %s31_s11), %s6493_s30 }
   0x7   : > { %p328_p3 = pnand %p5058_p1, %p327_p2  ;;  %p33_p4 = scmp.ge.s32.totalorder %s8912_s11, 2 }
   0x9   : > { %s8914_s11 = smov (%p33_p4, %s8912_s11), 0  ;;  %331 = sbr.rel (%p328_p3) target bundleno = 1015 (0x3f7), region = 48 }
  0x10   : > { %v5077_v0 = vld [vmem:[%s8862_s3 + $0x4] sm:$0xf]  ;;  %vm565_vm0 = vcmask 1043456   ;;  %p396_p5 = scmp.lt.s32.totalorder %s6485_s28, 1  ;;  %v8876_v1 = vmov 0.0   ;;  %p398_p6 = scmp.lt.s32.totalorder %s6481_s27, 9 }
  0x11   : > { %5552 = vmatprep.subr.bf16.mxu0 %v8876_v1  ;;  %6362 = vmatprep.subr.bf16.mxu1 %v8876_v1  ;;  %v567_v2 = vsel %vm565_vm0, %v5077_v0, 0  ;;  %vm6500_vm1 = vmmov 0   ;;  %vm487_vm2 = vsmask.f32 7424  ;;  %vm543_vm3 = vcmask 64512   ;;  %s405_s13 = sadd.s32 1, %s6481_s27 }
  0x12   : > { %5553 = vmatpush3.bf16.msra.mxu0 %v567_v2  ;;  %6363 = vmatpush3.bf16.msra.mxu1 %v567_v2  ;;  %s8916_s28 = smov (!%p396_p5, %s6485_s28), 1  ;;  %v5092_v29 = vld [vmem:[%s8862_s3 + $0x8] sm:$0xf]  ;;  %v483_v30 = vld [vmem:[%s8862_s3] sm:$0xf]  ;;  %vm772_vm4 = vcmask 1046528  }
  0x13   : > { %5554 = vmatprep.mubr.msk.bf16.mxu0 %vm6500_vm1, %v8876_v1  ;;  %5570 = vmatprep.mubr.msk.bf16.mxu1 %vm6500_vm1, %v8876_v1  ;;  %s399_s14 = scalar_select %p398_p6, %s6481_s27, 9  ;;  %v808_v41 = vsel %vm565_vm0, %v5092_v29, 0  ;;  %v673_v44 = vsel %vm565_vm0, %v483_v30, 0  ;;  %vm1067_vm5 = vsmask.f32 6400  ;;  %vm1257_vm6 = vcmask 1045504  }
  0x14   : > { %5612 = vmatprep.subr.bf16.mxu0 %v8876_v1  ;;  %s6595_s15 = smul.u32 160, %s8916_s28  ;;  %5582 = vmatprep.subr.bf16.mxu1 %v8876_v1  ;;  %vm1540_vm7 = vsmask.f32 5376  ;;  %vm1700_vm8 = vcmask 1044480   ;;  %p408_p7 = scmp.lt.s32.totalorder %s405_s13, 9 }
  0x15   : > { %s5059_s16 = sshll.u32 %s399_s14, 4  ;;  %p429_p9 = scmp.lt.s32.totalorder %s6481_s27, 7 }
  0x16   : > { %s402_s17 = sadd.s32 %s6595_s15, %s5059_s16  ;;  %s8918_s13 = smov (!%p408_p7, %s405_s13), 9 }
  0x17   : > { %s5060_s18 = sshll.u32 %s402_s17, 2  ;;  %s5061_s14 = sshll.u32 %s8918_s13, 4 }
  0x18   : > { %s6602_s21 = scalar_lea.vmem %s8859_s0, %s5060_s18  ;;  %s412_s16 = sadd.s32 %s6595_s15, %s5061_s14 }
  0x19   : > { %v444_v3 = vld [vmem:[%s6602_s21] sm:$0xf]  ;;  %v445_v4 = vld [vmem:[%s6602_s21 + $0x4] sm:$0xf]  ;;  %v446_v5 = vld [vmem:[%s6602_s21 + $0x8] sm:$0xf] }
  0x1a   : > { %v447_v6 = vld [vmem:[%s6602_s21 + $0xc] sm:$0xf]  ;;  %v6608_v7 = vcombine.low %v444_v3, %v445_v4  ;;  %v6610_v8 = vcombine.low %v445_v4, %v446_v5  ;;  %v6613_v9 = vld [vmem:[%s6602_s21 + $0x20] sm:$0xf]  ;;  %v6616_v10 = vld [vmem:[%s6602_s21 + $0x24] sm:$0xf] }
  0x1b   : > { %v6618_v11 = vcombine.low %v446_v5, %v447_v6  ;;  %v6621_v12 = vld [vmem:[%s6602_s21 + $0x28] sm:$0xf]  ;;  %v6624_v13 = vld [vmem:[%s6602_s21 + $0x2c] sm:$0xf]  ;;  %v6628_v14 = vcombine.low %v6613_v9, %v6616_v10  ;;  %v448_v15 = vld [vmem:[%s6602_s21 + $0x10] sm:$0xf] }
  0x1c   : > { %v489_v16 = vshrl.u32 %v6608_v7, 16  ;;  %v491_v17 = vshll.u32 %v6608_v7, 16  ;;  %v6635_v18 = vcombine.low %v6621_v12, %v6624_v13  ;;  %v449_v19 = vld [vmem:[%s6602_s21 + $0x14] sm:$0xf]  ;;  %v6639_v20 = vld [vmem:[%s6602_s21 + $0x30] sm:$0xf]  ;;  %v6641_v21 = vcombine.low %v447_v6, %v448_v15 }
  0x1d   : > { %v496_v22 = vshll.u32 %v6618_v11, 16  ;;  %v520_v23 = vshll.u32 %v6628_v14, 16  ;;  %v524_v24 = vshrl.u32 %v6628_v14, 16  ;;  %v6646_v25 = vcombine.low %v448_v15, %v449_v19  ;;  %v6649_v26 = vld [vmem:[%s6602_s21 + $0x34] sm:$0xf]  ;;  %s5062_s17 = sshll.u32 %s412_s16, 2 }
  0x1e   : > { %v493_v27 = vrot.slane %v491_v17, 1  ;;  %v528_v28 = vshll.u32 %v6635_v18, 16  ;;  %v6660_v31 = vcombine.low %v6639_v20, %v6649_v26  ;;  %v450_v34 = vld [vmem:[%s6602_s21 + $0x18] sm:$0xf]  ;;  %v451_v35 = vld [vmem:[%s6602_s21 + $0x1c] sm:$0xf]  ;;  %s7175_s20 = scalar_lea.vmem %s8860_s1, %s5062_s17 }
  0x1f   : > { %v498_v32 = vrot.slane %v496_v22, 1  ;;  %v522_v33 = vrot.slane %v520_v23, 1  ;;  %v500_v38 = vshrl.u32 %v6618_v11, 16  ;;  %v504_v39 = vshll.u32 %v6646_v25, 16  ;;  %s416_s14 = sadd.s32 2, %s6481_s27  ;;  %s8922_s27 = smov (!%p429_p9, %s6481_s27), 7 }
  0x20   : > { %v494_v36 = vor.u32 %v493_v27, %v489_v16  ;;  %v530_v37 = vrot.slane %v528_v28, 1  ;;  %v532_v42 = vshrl.u32 %v6635_v18, 16  ;;  %v536_v45 = vshll.u32 %v6660_v31, 16  ;;  %p419_p8 = scmp.lt.s32.totalorder %s416_s14, 9 }
  0x21   : > { %v526_v40 = vor.u32 %v524_v24, %v522_v33  ;;  %v6679_v46 = vcombine.low %v450_v34, %v451_v35  ;;  %v508_v48 = vshrl.u32 %v6646_v25, 16  ;;  %v502_v49 = vor.u32 %v500_v38, %v498_v32 }
  0x22   : > { %v499_v43 = vsel %vm487_vm2, %v494_v36, %v498_v32  ;;  %v506_v50 = vrot.slane %v504_v39, 1  ;;  %v534_v53 = vor.u32 %v532_v42, %v530_v37  ;;  %v538_v54 = vrot.slane %v536_v45, 1  ;;  %s8920_s14 = smov (!%p419_p8, %s416_s14), 9 }
  0x23   : > { %5555 = vmatmul.mubr.msk.bf16.vlgmr.msra.gmra.mrb[0].mxu0 %vm543_vm3, %v499_v43  ;;  %v531_v47 = vsel %vm487_vm2, %v526_v40, %v530_v37  ;;  %v512_v51 = vshll.u32 %v6679_v46, 16  ;;  %v516_v52 = vshrl.u32 %v6679_v46, 16  ;;  %v540_v55 = vshrl.u32 %v6660_v31, 16  ;;  %s5063_s16 = sshll.u32 %s8920_s14, 4 }
  0x24   : > { %5571 = vmatmul.mubr.msk.bf16.vlgmr.msra.gmra.mrb[0].mxu1 %vm543_vm3, %v531_v47  ;;  %5613 = vmatpush3.bf16.msra.mxu0 %v808_v41  ;;  %v510_v56 = vor.u32 %v508_v48, %v506_v50  ;;  %v507_v58 = vsel %vm487_vm2, %v502_v49, %v506_v50  ;;  %v539_v60 = vsel %vm487_vm2, %v534_v53, %v538_v54  ;;  %v927_v62 = vrot.slane %v6610_v8, 1  ;;  %v6754_v53 = vld [vmem:[%s6602_s21 + $0x38] sm:$0xf]  ;;  %s423_s17 = sadd.s32 %s6595_s15, %s5063_s16 }
  0x25   : > { %5583 = vmatpush3.bf16.msra.mxu1 %v673_v44  ;;  %5558 = vmatprep.mubr.msk.bf16.mxu0 %vm6500_vm1, %v8876_v1  ;;  %v514_v57 = vrot.slane %v512_v51, 1  ;;  %v542_v61 = vor.u32 %v540_v55, %v538_v54  ;;  %v928_v0 = vrot.slane %v6641_v21, 1  ;;  %v6715_v2 = vcombine.low %v449_v19, %v450_v34  ;;  %s5064_s18 = sshll.u32 %s423_s17, 2  ;;  %s5065_s17 = sshll.u32 %s8916_s28, 3 }
  0x26   : > { %5574 = vmatprep.mubr.msk.bf16.mxu1 %vm6500_vm1, %v8876_v1  ;;  %5642 = vmatprep.subr.bf16.mxu1 %v8876_v1  ;;  %v1069_v3 = vshrl.u32 %v6610_v8, 16  ;;  %v1072_v5 = vshll.u32 %v6610_v8, 16  ;;  %v1077_v6 = vshrl.u32 %v6641_v21, 16  ;;  %v1080_v15 = vshll.u32 %v6641_v21, 16  ;;  %s7586_s24 = scalar_lea.vmem %s8861_s2, %s5064_s18  ;;  %s432_s18 = sadd.s32 %s5065_s17, %s8922_s27 }
  0x27   : > { %5672 = vmatprep.subr.bf16.mxu0 %v8876_v1  ;;  %v518_v59 = vor.u32 %v516_v52, %v514_v57  ;;  %v515_v63 = vsel %vm487_vm2, %v510_v56, %v514_v57  ;;  %v6729_v16 = vsel %vm772_vm4, %v927_v62, %v928_v0  ;;  %v930_v17 = vrot.slane %v6715_v2, 1  ;;  %s5066_s15 = sshll.u32 %s432_s18, 3 }
  0x28   : > { %v1071_v19 = vrot.slane %v1069_v3, 1  ;;  %v6733_v27 = vcombine.low %v451_v35, %v6613_v9  ;;  %v1074_v29 = vrot.slane %v1072_v5, 2  ;;  %v1079_v30 = vrot.slane %v1077_v6, 1  ;;  %s434_s22 = scalar_lea.vmem %s8866_s7, %s5066_s15 }
  0x29   : > { %v6720_v4 = vsel %vm487_vm2, %v518_v59, %v522_v33  ;;  %v1082_v32 = vrot.slane %v1080_v15, 2  ;;  %v1086_v33 = vshrl.u32 %v6715_v2, 16  ;;  %v6739_v34 = vsel %vm772_vm4, %v928_v0, %v930_v17 }
  0x2a   : > { %v932_v36 = vrot.slane %v6733_v27, 1  ;;  %v1089_v37 = vshll.u32 %v6715_v2, 16  ;;  %v6745_v9 = vcombine.low %v6616_v10, %v6621_v12  ;;  %v1075_v35 = vor.u32 %v1074_v29, %v1071_v19 }
  0x2b   : > { %5559 = vmatmul.mubr.msk.bf16.gmra.mrb[4].mxu0 %vm543_vm3, %v507_v58  ;;  %v1083_v40 = vor.u32 %v1082_v32, %v1079_v30  ;;  %v1088_v41 = vrot.slane %v1086_v33, 1  ;;  %v1095_v43 = vshrl.u32 %v6733_v27, 16  ;;  %v1098_v50 = vshll.u32 %v6733_v27, 16 }
  0x2c   : > { %5575 = vmatmul.mubr.msk.bf16.gmra.mrb[4].mxu1 %vm543_vm3, %v539_v60  ;;  %5562 = vmatprep.mubr.msk.bf16.mxu0 %vm6500_vm1, %v8876_v1  ;;  %v6749_v44 = vsel %vm772_vm4, %v930_v17, %v932_v36  ;;  %v1091_v47 = vrot.slane %v1089_v37, 2  ;;  %v934_v49 = vrot.slane %v6745_v9, 1  ;;  %v6761_v12 = vcombine.low %v6624_v13, %v6639_v20 }
  0x2d   : > { %5578 = vmatprep.mubr.msk.bf16.mxu1 %vm6500_vm1, %v8876_v1  ;;  %v6757_v54 = vsel %vm1067_vm5, %v1075_v35, %v1083_v40  ;;  %v1097_v10 = vrot.slane %v1095_v43, 1  ;;  %v1104_v56 = vshrl.u32 %v6745_v9, 16  ;;  %v1100_v59 = vrot.slane %v1098_v50, 2 }
  0x2e   : > { %v1092_v57 = vor.u32 %v1091_v47, %v1088_v41  ;;  %v6765_v58 = vsel %vm772_vm4, %v932_v36, %v934_v49  ;;  %v1107_v60 = vshll.u32 %v6745_v9, 16  ;;  %v936_v62 = vrot.slane %v6761_v12, 1  ;;  %v5107_v36 = vld [vmem:[%s8862_s3 + $0xc] sm:$0xf] }
  0x2f   : > { %v1106_v0 = vrot.slane %v1104_v56, 1  ;;  %v6772_v3 = vcombine.low %v6649_v26, %v6754_v53  ;;  %v1113_v13 = vshrl.u32 %v6761_v12, 16  ;;  %v1101_v6 = vor.u32 %v1100_v59, %v1097_v10 }
  0x30   : > { %v6779_v5 = vsel %vm1067_vm5, %v1083_v40, %v1092_v57  ;;  %v1109_v15 = vrot.slane %v1107_v60, 2  ;;  %v6785_v26 = vsel %vm772_vm4, %v934_v49, %v936_v62  ;;  %v1258_v40 = vrot.slane %v6610_v8, 2 }
  0x31   : > { %v938_v17 = vrot.slane %v6772_v3, 1  ;;  %v1115_v19 = vrot.slane %v1113_v13, 1  ;;  %v6790_v29 = vsel %vm1067_vm5, %v1092_v57, %v1101_v6  ;;  %v1125_v33 = vshll.u32 %v6772_v3, 16 }
  0x32   : > { %v1110_v30 = vor.u32 %v1109_v15, %v1106_v0  ;;  %v1259_v49 = vrot.slane %v6641_v21, 2  ;;  %v1261_v50 = vrot.slane %v6715_v2, 2  ;;  %v962_v10 = vsel %vm565_vm0, %v5107_v36, 0  ;;  %v5115_v0 = vld [vmem:[%s8862_s3 + $0x10] sm:$0xf] }
  0x33   : > { %5563 = vmatmul.mubr.msk.bf16.gmra.mrb[8].mxu0 %vm543_vm3, %v515_v63  ;;  %v1116_v63 = vshll.u32 %v6761_v12, 16  ;;  %v6799_v37 = vsel %vm772_vm4, %v936_v62, %v938_v17  ;;  %v1127_v47 = vrot.slane %v1125_v33, 2  ;;  %v1263_v21 = vrot.slane %v6733_v27, 2 }
  0x34   : > { %5579 = vmatmul.mubr.msk.bf16.gmra.mrb[8].mxu1 %vm543_vm3, %v542_v61  ;;  %5566 = vmatprep.mubr.msk.bf16.mxu0 %vm6500_vm1, %v8876_v1  ;;  %v1122_v61 = vshrl.u32 %v6772_v3, 16  ;;  %v6803_v41 = vsel %vm1067_vm5, %v1101_v6, %v1110_v30  ;;  %v6814_v59 = vsel %vm1257_vm6, %v1258_v40, %v1259_v49  ;;  %v6819_v8 = vsel %vm1257_vm6, %v1259_v49, %v1261_v50 }
  0x35   : > { %5584 = vmatprep.mubr.msk.bf16.mxu1 %vm6500_vm1, %v8876_v1  ;;  %v1118_v32 = vrot.slane %v1116_v63, 2  ;;  %v773_v2 = vrot.slane %v6608_v7, 1  ;;  %v774_v60 = vrot.slane %v6618_v11, 1  ;;  %v1265_v27 = vrot.slane %v6745_v9, 2 }
  0x36   : > { %v1124_v35 = vrot.slane %v1122_v61, 1  ;;  %v1152_v6 = vsel %vm565_vm0, %v5115_v0, 0  ;;  %v776_v9 = vrot.slane %v6646_v25, 1  ;;  %v1267_v15 = vrot.slane %v6761_v12, 2 }
  0x37   : > { %v1119_v43 = vor.u32 %v1118_v32, %v1115_v19  ;;  %v775_v13 = vsel %vm772_vm4, %v773_v2, %v774_v60  ;;  %v778_v61 = vrot.slane %v6679_v46, 1  ;;  %v1269_v12 = vrot.slane %v6772_v3, 2 }
  0x38   : > { %v6811_v57 = vor.u32 %v1127_v47, %v1124_v35  ;;  %v6858_v63 = vsel %vm1257_vm6, %v1265_v27, %v1267_v15  ;;  %v777_v19 = vsel %vm772_vm4, %v774_v60, %v776_v9  ;;  %v780_v33 = vrot.slane %v6628_v14, 1 }
  0x39   : > { %v6809_v56 = vsel %vm1067_vm5, %v1110_v30, %v1119_v43  ;;  %v6873_v30 = vsel %vm1257_vm6, %v1267_v15, %v1269_v12  ;;  %v779_v32 = vsel %vm772_vm4, %v776_v9, %v778_v61  ;;  %v782_v35 = vrot.slane %v6635_v18, 1 }
  0x3a   : > { %v6830_v62 = vsel %vm1067_vm5, %v1119_v43, %v6811_v57  ;;  %v781_v36 = vsel %vm772_vm4, %v778_v61, %v780_v33  ;;  %v1542_v40 = vrot.slane %v496_v22, 3  ;;  %v1541_v43 = vrot.slane %v500_v38, 2 }
  0x3b   : > { %5567 = vmatmul.mubr.msk.bf16.gmra.mrb[12].mxu0 %vm543_vm3, %v6720_v4  ;;  %v6835_v4 = vsel %vm1257_vm6, %v1261_v50, %v1263_v21  ;;  %v1545_v47 = vrot.slane %v504_v39, 3  ;;  %v1544_v49 = vrot.slane %v508_v48, 2  ;;  %v783_v50 = vsel %vm772_vm4, %v780_v33, %v782_v35 }
  0x3c   : > { %5585 = vmatmul.mubr.msk.bf16.vlgmr.msra.gmra.mrb[12].mxu1 %vm543_vm3, %v6608_v7  ;;  %5614 = vmatprep.mubr.msk.bf16.mxu0 %vm6500_vm1, %v8876_v1  ;;  %v6843_v7 = vsel %vm1257_vm6, %v1263_v21, %v1265_v27  ;;  %v784_v38 = vrot.slane %v6660_v31, 1  ;;  %v1548_v39 = vrot.slane %v516_v52, 2  ;;  %v1549_v48 = vrot.slane %v512_v51, 3  ;;  %v5132_v52 = vld [vmem:[%s8862_s3 + $0x18] sm:$0xf] }
  0x3d   : > { %5643 = vmatpush3.bf16.msra.mxu1 %v962_v10  ;;  %5588 = vmatprep.mubr.msk.bf16.mxu1 %vm6500_vm1, %v8876_v1  ;;  %v1543_v10 = vor.u32 %v1542_v40, %v1541_v43  ;;  %v1546_v21 = vor.u32 %v1545_v47, %v1544_v49  ;;  %v5075_v60 = vcombine.low %v6639_v20, %v6639_v20  ;;  %v5123_v20 = vld [vmem:[%s8862_s3 + $0x14] sm:$0xf]  ;;  %v1701_v3 = vrot.slane %v6618_v11, 3 }
  0x3e   : > { %5702 = vmatprep.subr.bf16.mxu1 %v8876_v1  ;;  %v6917_v2 = vor.u32 %v1549_v48, %v1548_v39  ;;  %v785_v27 = vsel %vm772_vm4, %v782_v35, %v784_v38  ;;  %v1293_v51 = vsel %vm565_vm0, %v5123_v20, 0  ;;  %v1702_v15 = vrot.slane %v6646_v25, 3 }
  0x3f   : > { %v6904_v22 = vsel %vm1540_vm7, %v1543_v10, %v1546_v21  ;;  %v1706_v33 = vrot.slane %v6628_v14, 3  ;;  %v1560_v10 = vrot.slane %v540_v55, 2 }
  0x40   : > { %v6924_v0 = vsel %vm1540_vm7, %v1546_v21, %v6917_v2  ;;  %v1561_v21 = vrot.slane %v536_v45, 3 }
  0x42   : > { %v1562_v39 = vor.u32 %v1561_v21, %v1560_v10 }
  0x43   : > { %5615 = vmatmul.mubr.msk.bf16.vlgmr.msra.gmra.mrb[16].mxu0 %vm543_vm3, %v775_v13  ;;  %v1435_v13 = vsel %vm565_vm0, %v5132_v52, 0 }
  0x44   : > { %5589 = vmatmul.mubr.msk.bf16.gmra.mrb[16].mxu1 %vm543_vm3, %v6618_v11  ;;  %5673 = vmatpush3.bf16.msra.mxu0 %v1152_v6 }
  0x45   : > { %5592 = vmatprep.mubr.msk.bf16.mxu1 %vm6500_vm1, %v8876_v1  ;;  %5618 = vmatprep.mubr.msk.bf16.mxu0 %vm6500_vm1, %v8876_v1 }
  0x46   : > { %5732 = vmatprep.subr.bf16.mxu0 %v8876_v1 }
  0x4b   : > { %5619 = vmatmul.mubr.msk.bf16.gmra.mrb[20].mxu0 %vm543_vm3, %v777_v19  ;;  %v1703_v19 = vsel %vm1700_vm8, %v1701_v3, %v1702_v15 }
  0x4c   : > { %5593 = vmatmul.mubr.msk.bf16.gmra.mrb[20].mxu1 %vm543_vm3, %v6646_v25  ;;  %5622 = vmatprep.mubr.msk.bf16.mxu0 %vm6500_vm1, %v8876_v1 }
  0x4d   : > { %5596 = vmatprep.mubr.msk.bf16.mxu1 %vm6500_vm1, %v8876_v1 }
  0x53   : > { %5623 = vmatmul.mubr.msk.bf16.gmra.mrb[24].mxu0 %vm543_vm3, %v779_v32  ;;  %v1556_v32 = vrot.slane %v532_v42, 2 }
  0x54   : > { %5597 = vmatmul.mubr.msk.bf16.gmra.mrb[24].mxu1 %vm543_vm3, %v6679_v46  ;;  %5626 = vmatprep.mubr.msk.bf16.mxu0 %vm6500_vm1, %v8876_v1 }
  0x55   : > { %5600 = vmatprep.mubr.msk.bf16.mxu1 %vm6500_vm1, %v8876_v1 }
  0x5b   : > { %5627 = vmatmul.mubr.msk.bf16.gmra.mrb[28].mxu0 %vm543_vm3, %v781_v36 }
  0x5c   : > { %5601 = vmatmul.mubr.msk.bf16.gmra.mrb[28].mxu1 %vm543_vm3, %v6628_v14  ;;  %5630 = vmatprep.mubr.msk.bf16.mxu0 %vm6500_vm1, %v8876_v1 }
  0x5d   : > { %5604 = vmatprep.mubr.msk.bf16.mxu1 %vm6500_vm1, %v8876_v1 }
  0x63   : > { %5631 = vmatmul.mubr.msk.bf16.gmra.mrb[32].mxu0 %vm543_vm3, %v783_v50 }
  0x64   : > { %5605 = vmatmul.mubr.msk.bf16.gmra.mrb[32].mxu1 %vm543_vm3, %v6635_v18  ;;  %5634 = vmatprep.mubr.msk.bf16.mxu0 %vm6500_vm1, %v8876_v1 }
  0x65   : > { %5608 = vmatprep.mubr.msk.bf16.mxu1 %vm6500_vm1, %v8876_v1 }
  0x6b   : > { %5635 = vmatmul.mubr.msk.bf16.gmra.mrb[36].mxu0 %vm543_vm3, %v785_v27 }
  0x6c   : > { %5609 = vmatmul.mubr.msk.bf16.gmra.mrb[36].mxu1 %vm543_vm3, %v5075_v60  ;;  %5638 = vmatprep.mubr.msk.bf16.mxu0 %vm6500_vm1, %v8876_v1 }
  0x6d   : > { %5644 = vmatprep.mubr.msk.bf16.mxu1 %vm6500_vm1, %v8876_v1 }
  0x73   : > { %5639 = vmatmul.mubr.msk.bf16.gmra.mrb[40].mxu0 %vm543_vm3, %v784_v38  ;;  %v1708_v38 = vrot.slane %v6635_v18, 3 }
  0x74   : > { %5645 = vmatmul.mubr.msk.bf16.vlgmr.msra.gmra.mrb[40].mxu1 %vm543_vm3, %v6729_v16  ;;  %5674 = vmatprep.mubr.msk.bf16.mxu0 %vm6500_vm1, %v8876_v1  ;;  %v5140_v16 = vld [vmem:[%s8862_s3 + $0x1c] sm:$0xf] }
  0x75   : > { %5703 = vmatpush3.bf16.msra.mxu1 %v1293_v51  ;;  %5648 = vmatprep.mubr.msk.bf16.mxu1 %vm6500_vm1, %v8876_v1 }
  0x76   : > { %5762 = vmatprep.subr.bf16.mxu1 %v8876_v1 }
  0x7b   : > { %5675 = vmatmul.mubr.msk.bf16.vlgmr.msra.gmra.mrb[44].mxu0 %vm543_vm3, %v6757_v54  ;;  %v1401_v54 = vrot.slane %v6646_v25, 2  ;;  %v1553_v25 = vrot.slane %v520_v23, 3 }
  0x7c   : > { %5649 = vmatmul.mubr.msk.bf16.gmra.mrb[44].mxu1 %vm543_vm3, %v6739_v34  ;;  %5733 = vmatpush3.bf16.msra.mxu0 %v1435_v13  ;;  %v1595_v34 = vsel %vm565_vm0, %v5140_v16, 0 }
  0x7d   : > { %5652 = vmatprep.mubr.msk.bf16.mxu1 %vm6500_vm1, %v8876_v1  ;;  %5678 = vmatprep.mubr.msk.bf16.mxu0 %vm6500_vm1, %v8876_v1 }
  0x7e   : > { %5792 = vmatprep.subr.bf16.mxu0 %v8876_v1 }
  0x83   : > { %5679 = vmatmul.mubr.msk.bf16.gmra.mrb[48].mxu0 %vm543_vm3, %v6779_v5 }
  0x84   : > { %5653 = vmatmul.mubr.msk.bf16.gmra.mrb[48].mxu1 %vm543_vm3, %v6749_v44  ;;  %5682 = vmatprep.mubr.msk.bf16.mxu0 %vm6500_vm1, %v8876_v1  ;;  %v1400_v44 = vrot.slane %v6618_v11, 2  ;;  %v1552_v11 = vrot.slane %v524_v24, 2 }
  0x85   : > { %5656 = vmatprep.mubr.msk.bf16.mxu1 %vm6500_vm1, %v8876_v1 }
  0x86   : > { %v1402_v5 = vsel %vm1257_vm6, %v1400_v44, %v1401_v54  ;;  %v1710_v44 = vrot.slane %v6660_v31, 3 }
  0x8b   : > { %5683 = vmatmul.mubr.msk.bf16.gmra.mrb[52].mxu0 %vm543_vm3, %v6790_v29 }
  0x8c   : > { %5657 = vmatmul.mubr.msk.bf16.gmra.mrb[52].mxu1 %vm543_vm3, %v6765_v58  ;;  %5686 = vmatprep.mubr.msk.bf16.mxu0 %vm6500_vm1, %v8876_v1  ;;  %v5148_v58 = vld [vmem:[%s8862_s3 + $0x20] sm:$0xf] }
  0x8d   : > { %5660 = vmatprep.mubr.msk.bf16.mxu1 %vm6500_vm1, %v8876_v1 }
  0x93   : > { %5687 = vmatmul.mubr.msk.bf16.gmra.mrb[56].mxu0 %vm543_vm3, %v6803_v41 }
  0x94   : > { %5661 = vmatmul.mubr.msk.bf16.gmra.mrb[56].mxu1 %vm543_vm3, %v6785_v26  ;;  %5690 = vmatprep.mubr.msk.bf16.mxu0 %vm6500_vm1, %v8876_v1  ;;  %v1736_v26 = vsel %vm565_vm0, %v5148_v58, 0 }
  0x95   : > { %5664 = vmatprep.mubr.msk.bf16.mxu1 %vm6500_vm1, %v8876_v1 }
  0x9b   : > { %5691 = vmatmul.mubr.msk.bf16.gmra.mrb[60].mxu0 %vm543_vm3, %v6809_v56  ;;  %v1407_v56 = vrot.slane %v6635_v18, 2  ;;  %v1709_v18 = vsel %vm1700_vm8, %v1706_v33, %v1708_v38 }
  0x9c   : > { %5665 = vmatmul.mubr.msk.bf16.gmra.mrb[60].mxu1 %vm543_vm3, %v6799_v37  ;;  %5694 = vmatprep.mubr.msk.bf16.mxu0 %vm6500_vm1, %v8876_v1  ;;  %v1405_v37 = vrot.slane %v6628_v14, 2 }
  0x9d   : > { %5668 = vmatprep.mubr.msk.bf16.mxu1 %vm6500_vm1, %v8876_v1 }
  0xa3   : > { %5695 = vmatmul.mubr.msk.bf16.gmra.mrb[64].mxu0 %vm543_vm3, %v6830_v62 }
  0xa4   : > { %5669 = vmatmul.mubr.msk.bf16.gmra.mrb[64].mxu1 %vm543_vm3, %v938_v17  ;;  %5698 = vmatprep.mubr.msk.bf16.mxu0 %vm6500_vm1, %v8876_v1  ;;  %v1403_v17 = vrot.slane %v6679_v46, 2 }
  0xa5   : > { %5704 = vmatprep.mubr.msk.bf16.mxu1 %vm6500_vm1, %v8876_v1 }
  0xa6   : > { %v1404_v29 = vsel %vm1257_vm6, %v1401_v54, %v1403_v17  ;;  %v1406_v41 = vsel %vm1257_vm6, %v1403_v17, %v1405_v37 }
  0xab   : > { %5699 = vmatmul.mubr.msk.bf16.gmra.mrb[68].mxu0 %vm543_vm3, %v6811_v57  ;;  %v1408_v57 = vsel %vm1257_vm6, %v1405_v37, %v1407_v56  ;;  %v1711_v37 = vsel %vm1700_vm8, %v1708_v38, %v1710_v44  ;;  %v7226_v38 = vld [vmem:[%s7175_s20 + $0x10] sm:$0xf] }
  0xac   : > { %5705 = vmatmul.mubr.msk.bf16.vlgmr.msra.gmra.mrb[68].mxu1 %vm543_vm3, %v6814_v59  ;;  %5734 = vmatprep.mubr.msk.bf16.mxu0 %vm6500_vm1, %v8876_v1  ;;  %v1409_v59 = vrot.slane %v6660_v31, 2 }
  0xad   : > { %5763 = vmatpush3.bf16.msra.mxu1 %v1595_v34  ;;  %5708 = vmatprep.mubr.msk.bf16.mxu1 %vm6500_vm1, %v8876_v1 }
  0xae   : > { %5822 = vmatprep.subr.bf16.mxu1 %v8876_v1  ;;  %v1410_v62 = vsel %vm1257_vm6, %v1407_v56, %v1409_v59 }
  0xb3   : > { %5735 = vmatmul.mubr.msk.bf16.vlgmr.msra.gmra.mrb[72].mxu0 %vm543_vm3, %v1402_v5 }
  0xb4   : > { %5709 = vmatmul.mubr.msk.bf16.gmra.mrb[72].mxu1 %vm543_vm3, %v6819_v8  ;;  %5793 = vmatpush3.bf16.msra.mxu0 %v1736_v26  ;;  %v459_v8 = vld [vmem:[%s6602_s21 + $0x3c] sm:$0x7]  ;;  %s442_s21 = scalar_lea.vmem %s8867_s8, %s5066_s15 }
  0xb5   : > { %5712 = vmatprep.mubr.msk.bf16.mxu1 %vm6500_vm1, %v8876_v1  ;;  %5738 = vmatprep.mubr.msk.bf16.mxu0 %vm6500_vm1, %v8876_v1 }
  0xb6   : > { %5852 = vmatprep.subr.bf16.mxu0 %v8876_v1 }
  0xbb   : > { %5739 = vmatmul.mubr.msk.bf16.gmra.mrb[76].mxu0 %vm543_vm3, %v1404_v29 }
  0xbc   : > { %5713 = vmatmul.mubr.msk.bf16.gmra.mrb[76].mxu1 %vm543_vm3, %v6835_v4  ;;  %5742 = vmatprep.mubr.msk.bf16.mxu0 %vm6500_vm1, %v8876_v1  ;;  %v7057_v4 = vcombine.low %v6754_v53, %v459_v8  ;;  %v5163_v53 = vld [vmem:[%s8862_s3 + $0x24] sm:$0xf]  ;;  %v1839_v8 = vld [vmem:[%s7175_s20] sm:$0xf] }
  0xbd   : > { %5716 = vmatprep.mubr.msk.bf16.mxu1 %vm6500_vm1, %v8876_v1  ;;  %v1902_v9 = vsel %vm565_vm0, %v5163_v53, 0 }
  0xbe   : > { %v1565_v55 = vshrl.u32 %v7057_v4, 16  ;;  %v1568_v45 = vshll.u32 %v7057_v4, 16 }
  0xc0   : > { %v1567_v13 = vrot.slane %v1565_v55, 2  ;;  %v1570_v16 = vrot.slane %v1568_v45, 3 }
  0xc2   : > { %v1571_v54 = vor.u32 %v1570_v16, %v1567_v13 }
  0xc3   : > { %5743 = vmatmul.mubr.msk.bf16.gmra.mrb[80].mxu0 %vm543_vm3, %v1406_v41 }
  0xc4   : > { %5717 = vmatmul.mubr.msk.bf16.gmra.mrb[80].mxu1 %vm543_vm3, %v6843_v7  ;;  %5746 = vmatprep.mubr.msk.bf16.mxu0 %vm6500_vm1, %v8876_v1  ;;  %v1411_v7 = vrot.slane %v7057_v4, 2 }
  0xc5   : > { %5720 = vmatprep.mubr.msk.bf16.mxu1 %vm6500_vm1, %v8876_v1 }
  0xc6   : > { %v1412_v6 = vsel %vm1257_vm6, %v1409_v59, %v1411_v7  ;;  %v1712_v59 = vrot.slane %v7057_v4, 3 }
  0xc8   : > { %v1713_v4 = vsel %vm1700_vm8, %v1710_v44, %v1712_v59 }
  0xcb   : > { %5747 = vmatmul.mubr.msk.bf16.gmra.mrb[84].mxu0 %vm543_vm3, %v1408_v57  ;;  %v1572_v57 = vsel %vm1540_vm7, %v1562_v39, %v1571_v54 }
  0xcc   : > { %5721 = vmatmul.mubr.msk.bf16.gmra.mrb[84].mxu1 %vm543_vm3, %v6858_v63  ;;  %5750 = vmatprep.mubr.msk.bf16.mxu0 %vm6500_vm1, %v8876_v1  ;;  %v5172_v63 = vld [vmem:[%s8862_s3 + $0x28] sm:$0xf] }
  0xcd   : > { %5724 = vmatprep.mubr.msk.bf16.mxu1 %vm6500_vm1, %v8876_v1  ;;  %v2079_v61 = vsel %vm565_vm0, %v5172_v63, 0 }
  0xd3   : > { %5751 = vmatmul.mubr.msk.bf16.gmra.mrb[88].mxu0 %vm543_vm3, %v1410_v62  ;;  %v7184_v62 = vld [vmem:[%s7175_s20 + $0x4] sm:$0xf] }
  0xd4   : > { %5725 = vmatmul.mubr.msk.bf16.gmra.mrb[88].mxu1 %vm543_vm3, %v6873_v30  ;;  %5754 = vmatprep.mubr.msk.bf16.mxu0 %vm6500_vm1, %v8876_v1  ;;  %v1554_v30 = vor.u32 %v1553_v25, %v1552_v11 }
  0xd5   : > { %5728 = vmatprep.mubr.msk.bf16.mxu1 %vm6500_vm1, %v8876_v1 }
  0xd6   : > { %v1555_v24 = vsel %vm1540_vm7, %v6917_v2, %v1554_v30 }
  0xdb   : > { %5755 = vmatmul.mubr.msk.bf16.gmra.mrb[92].mxu0 %vm543_vm3, %v1412_v6 }
  0xdc   : > { %5729 = vmatmul.mubr.msk.bf16.gmra.mrb[92].mxu1 %vm543_vm3, %v1269_v12  ;;  %5758 = vmatprep.mubr.msk.bf16.mxu0 %vm6500_vm1, %v8876_v1  ;;  %v1704_v12 = vrot.slane %v6679_v46, 3  ;;  %v1557_v46 = vrot.slane %v528_v28, 3 }
  0xdd   : > { %5764 = vmatprep.mubr.msk.bf16.mxu1 %vm6500_vm1, %v8876_v1 }
  0xde   : > { %v1705_v23 = vsel %vm1700_vm8, %v1702_v15, %v1704_v12  ;;  %v1558_v36 = vor.u32 %v1557_v46, %v1556_v32  ;;  %v1707_v47 = vsel %vm1700_vm8, %v1704_v12, %v1706_v33 }
  0xe0   : > { %v1559_v14 = vsel %vm1540_vm7, %v1554_v30, %v1558_v36  ;;  %v1563_v52 = vsel %vm1540_vm7, %v1558_v36, %v1562_v39  ;;  %v7229_v39 = vld [vmem:[%s7175_s20 + $0x14] sm:$0xf] }
  0xe3   : > { %5759 = vmatmul.mubr.msk.bf16.gmra.mrb[96].mxu0 %vm543_vm3, %v1411_v7 }
  0xe4   : > { %5765 = vmatmul.mubr.msk.bf16.vlgmr.msra.gmra.mrb[96].mxu1 %vm543_vm3, %v6904_v22  ;;  %5794 = vmatprep.mubr.msk.bf16.mxu0 %vm6500_vm1, %v8876_v1 }
  0xe5   : > { %5823 = vmatpush3.bf16.msra.mxu1 %v1902_v9  ;;  %5768 = vmatprep.mubr.msk.bf16.mxu1 %vm6500_vm1, %v8876_v1  ;;  %v7191_v9 = vcombine.low %v1839_v8, %v7184_v62  ;;  %v7263_v8 = vld [vmem:[%s7175_s20 + $0x1c] sm:$0xf] }
  0xe6   : > { %5882 = vmatprep.subr.bf16.mxu1 %v8876_v1 }
  0xe7   : > { %v2008_v46 = vshrl.u32 %v7191_v9, 16 }
  0xeb   : > { %5795 = vmatmul.mubr.msk.bf16.vlgmr.msra.gmra.mrb[100].mxu0 %vm543_vm3, %v1703_v19  ;;  %v7198_v19 = vld [vmem:[%s7175_s20 + $0x8] sm:$0xf] }
  0xec   : > { %5769 = vmatmul.mubr.msk.bf16.gmra.mrb[100].mxu1 %vm543_vm3, %v6924_v0  ;;  %5853 = vmatpush3.bf16.msra.mxu0 %v2079_v61  ;;  %v7201_v61 = vld [vmem:[%s7175_s20 + $0xc] sm:$0xf] }
  0xed   : > { %5772 = vmatprep.mubr.msk.bf16.mxu1 %vm6500_vm1, %v8876_v1  ;;  %5798 = vmatprep.mubr.msk.bf16.mxu0 %vm6500_vm1, %v8876_v1 }
  0xee   : > { %5912 = vmatprep.subr.bf16.mxu0 %v8876_v1 }
  0xf3   : > { %5799 = vmatmul.mubr.msk.bf16.gmra.mrb[104].mxu0 %vm543_vm3, %v1705_v23  ;;  %v7207_v23 = vcombine.low %v7198_v19, %v7201_v61 }
  0xf4   : > { %5773 = vmatmul.mubr.msk.bf16.gmra.mrb[104].mxu1 %vm543_vm3, %v1555_v24  ;;  %5802 = vmatprep.mubr.msk.bf16.mxu0 %vm6500_vm1, %v8876_v1  ;;  %v2010_v24 = vshll.u32 %v7191_v9, 16 }
  0xf5   : > { %5776 = vmatprep.mubr.msk.bf16.mxu1 %vm6500_vm1, %v8876_v1 }
  0xf6   : > { %v7123_v35 = vpop.f32.mrb[0].mxu0 }
  0xf7   : > { %v5556_v42 = vpop.f32.mrb[1].mxu0  ;;  %v7125_v40 = vpop.f32.mrb[0].mxu1 }
  0xf8   : > { %v7127_v28 = vpop.f32.mrb[2].mxu0  ;;  %v5572_v43 = vpop.f32.mrb[1].mxu1  ;;  %v5180_v42 = vld [vmem:[%s8862_s3 + $0x2c] sm:$0xf] }
  0xf9   : > { %v5557_v49 = vpop.f32.mrb[3].mxu0  ;;  %v7130_v50 = vpop.f32.mrb[2].mxu1  ;;  %v2014_v43 = vshll.u32 %v7207_v23, 16 }
  0xfa   : > { %v5573_v22 = vpop.f32.mrb[3].mxu1 }
  0xfb   : > { %5803 = vmatmul.mubr.msk.bf16.gmra.mrb[108].mxu0 %vm543_vm3, %v1707_v47 }
  0xfc   : > { %5777 = vmatmul.mubr.msk.bf16.gmra.mrb[108].mxu1 %vm543_vm3, %v1559_v14  ;;  %5806 = vmatprep.mubr.msk.bf16.mxu0 %vm6500_vm1, %v8876_v1 }
  0xfd   : > { %5780 = vmatprep.mubr.msk.bf16.mxu1 %vm6500_vm1, %v8876_v1 }
  0xfe   : > { %v7146_v48 = vpop.f32.mrb[4].mxu0 }
  0xff   : > { %v5560_v2 = vpop.f32.mrb[5].mxu0  ;;  %v7148_v60 = vpop.f32.mrb[4].mxu1 }
 0x100   : > { %v7150_v27 = vpop.f32.mrb[6].mxu0  ;;  %v5576_v0 = vpop.f32.mrb[5].mxu1  ;;  %v2226_v2 = vsel %vm565_vm0, %v5180_v42, 0 }
 0x101   : > { %v5561_v20 = vpop.f32.mrb[7].mxu0  ;;  %v7153_v51 = vpop.f32.mrb[6].mxu1 }
 0x102   : > { %v5577_v34 = vpop.f32.mrb[7].mxu1 }
 0x103   : > { %5807 = vmatmul.mubr.msk.bf16.gmra.mrb[112].mxu0 %vm543_vm3, %v1709_v18  ;;  %v7242_v18 = vcombine.low %v7226_v38, %v7229_v39 }
 0x104   : > { %5781 = vmatmul.mubr.msk.bf16.gmra.mrb[112].mxu1 %vm543_vm3, %v1563_v52  ;;  %5810 = vmatprep.mubr.msk.bf16.mxu0 %vm6500_vm1, %v8876_v1 }
 0x105   : > { %5784 = vmatprep.mubr.msk.bf16.mxu1 %vm6500_vm1, %v8876_v1 }
 0x106   : > { %v7164_v58 = vpop.f32.mrb[8].mxu0 }
 0x107   : > { %v5564_v5 = vpop.f32.mrb[9].mxu0  ;;  %v7166_v26 = vpop.f32.mrb[8].mxu1 }
 0x108   : > { %v7168_v17 = vpop.f32.mrb[10].mxu0  ;;  %v5580_v29 = vpop.f32.mrb[9].mxu1 }
 0x109   : > { %v5565_v41 = vpop.f32.mrb[11].mxu0  ;;  %v654_v56 = vpop.f32.mrb[10].mxu1 }
 0x10a   : > { %v5581_v31 = vpop.f32.mrb[11].mxu1  ;;  %v2021_v41 = vshll.u32 %v7242_v18, 16 }
 0x10b   : > { %5811 = vmatmul.mubr.msk.bf16.gmra.mrb[116].mxu0 %vm543_vm3, %v1711_v37  ;;  %v2018_v37 = vshrl.u32 %v7207_v23, 16 }
 0x10c   : > { %5785 = vmatmul.mubr.msk.bf16.gmra.mrb[116].mxu1 %vm543_vm3, %v1572_v57  ;;  %5814 = vmatprep.mubr.msk.bf16.mxu0 %vm6500_vm1, %v8876_v1 }
 0x10d   : > { %5788 = vmatprep.mubr.msk.bf16.mxu1 %vm6500_vm1, %v8876_v1 }
 0x10e   : > { %v7188_v7 = vpop.f32.mrb[12].mxu0 }
 0x10f   : > { %v709_v6 = vpop.f32.mrb[12].mxu1  ;;  %v5568_v53 = vpop.f32.mrb[13].mxu0 }
 0x110   : > { %v710_v3 = vadd.f32 %v709_v6, %v7123_v35  ;;  %v5586_v15 = vpop.f32.mrb[13].mxu1  ;;  %v7194_v63 = vpop.f32.mrb[14].mxu0 }
 0x111   : > { %v712_v11 = vpop.f32.mrb[14].mxu1  ;;  %v5569_v25 = vpop.f32.mrb[15].mxu0 }
 0x112   : > { %v713_v12 = vadd.f32 %v712_v11, %v7127_v28  ;;  %v5587_v30 = vpop.f32.mrb[15].mxu1  ;;  %v2012_v28 = vrot.slane %v2010_v24, 1 }
 0x113   : > { %5815 = vmatmul.mubr.msk.bf16.gmra.mrb[120].mxu0 %vm543_vm3, %v1713_v4 }
 0x114   : > { %5789 = vmatmul.mubr.msk.bf16.gmra.mrb[120].mxu1 %vm543_vm3, %v1571_v54  ;;  %5818 = vmatprep.mubr.msk.bf16.mxu0 %vm6500_vm1, %v8876_v1  ;;  %v2013_v0 = vor.u32 %v2012_v28, %v2008_v46  ;;  %v2025_v46 = vshrl.u32 %v7242_v18, 16 }
 0x115   : > { %5824 = vmatprep.mubr.msk.bf16.mxu1 %vm6500_vm1, %v8876_v1 }
 0x116   : > { %v844_v32 = vpop.f32.mrb[16].mxu0 }
 0x117   : > { %v717_v33 = vpop.f32.mrb[16].mxu1  ;;  %v7216_v36 = vadd.f32 %v844_v32, %v710_v3  ;;  %v5616_v35 = vpop.f32.mrb[17].mxu0  ;;  %v2023_v3 = vrot.slane %v2021_v41, 1 }
 0x118   : > { %v718_v47 = vadd.f32 %v717_v33, %v7146_v48  ;;  %v5590_v49 = vpop.f32.mrb[17].mxu1  ;;  %v847_v14 = vpop.f32.mrb[18].mxu0  ;;  %v2016_v48 = vrot.slane %v2014_v43, 1 }
 0x119   : > { %v720_v10 = vpop.f32.mrb[18].mxu1  ;;  %v7223_v21 = vadd.f32 %v847_v14, %v713_v12  ;;  %v5617_v22 = vpop.f32.mrb[19].mxu0  ;;  %v7294_v49 = vld [vmem:[%s7175_s20 + $0x24] sm:$0xf] }
 0x11a   : > { %v721_v55 = vadd.f32 %v720_v10, %v7150_v27  ;;  %v5591_v45 = vpop.f32.mrb[19].mxu1  ;;  %v5195_v27 = vld [vmem:[%s8862_s3 + $0x30] sm:$0xf]  ;;  %v2017_v34 = vsel %vm487_vm2, %v2013_v0, %v2016_v48 }
 0x11b   : > { %5819 = vmatmul.mubr.msk.bf16.gmra.mrb[124].mxu0 %vm543_vm3, %v1712_v59  ;;  %v2380_v29 = vsel %vm565_vm0, %v5195_v27, 0  ;;  %v7260_v59 = vld [vmem:[%s7175_s20 + $0x18] sm:$0xf] }
 0x11c   : > { %5825 = vmatmul.mubr.msk.bf16.vlgmr.msra.gmra.mrb[124].mxu1 %vm543_vm3, %v7191_v9  ;;  %5854 = vmatprep.mubr.msk.bf16.mxu0 %vm6500_vm1, %v8876_v1  ;;  %v7275_v15 = vcombine.low %v7260_v59, %v7263_v8 }
 0x11d   : > { %5883 = vmatpush3.bf16.msra.mxu1 %v2226_v2  ;;  %5828 = vmatprep.mubr.msk.bf16.mxu1 %vm6500_vm1, %v8876_v1 }
 0x11e   : > { %v852_v20 = vpop.f32.mrb[20].mxu0  ;;  %5942 = vmatprep.subr.bf16.mxu1 %v8876_v1  ;;  %v8874_v33 = vshll.u32 %v7275_v15, 16 }
 0x11f   : > { %v725_v52 = vpop.f32.mrb[20].mxu1  ;;  %v7250_v13 = vadd.f32 %v852_v20, %v718_v47  ;;  %v5620_v16 = vpop.f32.mrb[21].mxu0  ;;  %v7291_v47 = vld [vmem:[%s7175_s20 + $0x20] sm:$0xf] }
 0x120   : > { %v726_v44 = vadd.f32 %v725_v52, %v7164_v58  ;;  %v5594_v54 = vpop.f32.mrb[21].mxu1  ;;  %v855_v5 = vpop.f32.mrb[22].mxu0  ;;  %v2020_v58 = vor.u32 %v2018_v37, %v2016_v48  ;;  %v2030_v22 = vrot.slane %v8874_v33, 1  ;;  %v8875_v16 = vshrl.u32 %v7275_v15, 16 }
 0x121   : > { %v728_v56 = vpop.f32.mrb[22].mxu1  ;;  %v7257_v57 = vadd.f32 %v855_v5, %v721_v55  ;;  %v5621_v31 = vpop.f32.mrb[23].mxu0  ;;  %v7308_v55 = vcombine.low %v7291_v47, %v7294_v49 }
 0x122   : > { %v729_v6 = vadd.f32 %v728_v56, %v7168_v17  ;;  %v5595_v53 = vpop.f32.mrb[23].mxu1  ;;  %v2024_v32 = vsel %vm487_vm2, %v2020_v58, %v2023_v3  ;;  %v7324_v56 = vld [vmem:[%s7175_s20 + $0x2c] sm:$0xf] }
 0x123   : > { %5855 = vmatmul.mubr.msk.bf16.vlgmr.msra.gmra.mrb[128].mxu0 %vm543_vm3, %v2017_v34  ;;  %v8872_v34 = vshll.u32 %v7308_v55, 16 }
 0x124   : > { %5829 = vmatmul.mubr.msk.bf16.gmra.mrb[128].mxu1 %vm543_vm3, %v7207_v23  ;;  %5913 = vmatpush3.bf16.msra.mxu0 %v2380_v29  ;;  %v7321_v29 = vld [vmem:[%s7175_s20 + $0x28] sm:$0xf] }
 0x125   : > { %5832 = vmatprep.mubr.msk.bf16.mxu1 %vm6500_vm1, %v8876_v1  ;;  %5858 = vmatprep.mubr.msk.bf16.mxu0 %vm6500_vm1, %v8876_v1  ;;  %v2037_v53 = vrot.slane %v8872_v34, 1  ;;  %v7338_v58 = vcombine.low %v7321_v29, %v7324_v56 }
 0x126   : > { %v860_v17 = vpop.f32.mrb[24].mxu0  ;;  %5972 = vmatprep.subr.bf16.mxu0 %v8876_v1 }
 0x127   : > { %v733_v4 = vpop.f32.mrb[24].mxu1  ;;  %v7282_v11 = vadd.f32 %v860_v17, %v726_v44  ;;  %v5624_v25 = vpop.f32.mrb[25].mxu0 }
 0x128   : > { %v734_v12 = vadd.f32 %v733_v4, %v7188_v7  ;;  %v5598_v30 = vpop.f32.mrb[25].mxu1  ;;  %v863_v24 = vpop.f32.mrb[26].mxu0  ;;  %v2027_v7 = vor.u32 %v2025_v46, %v2023_v3 }
 0x129   : > { %v736_v35 = vpop.f32.mrb[26].mxu1  ;;  %v7288_v42 = vadd.f32 %v863_v24, %v729_v6  ;;  %v5625_v28 = vpop.f32.mrb[27].mxu0 }
 0x12a   : > { %v737_v14 = vadd.f32 %v736_v35, %v7194_v63  ;;  %v5599_v10 = vpop.f32.mrb[27].mxu1  ;;  %v2031_v52 = vsel %vm487_vm2, %v2027_v7, %v2030_v22  ;;  %v8870_v35 = vshll.u32 %v7338_v58, 16  ;;  %v7351_v7 = vld [vmem:[%s7175_s20 + $0x30] sm:$0xf] }
 0x12b   : > { %5859 = vmatmul.mubr.msk.bf16.gmra.mrb[132].mxu0 %vm543_vm3, %v2024_v32  ;;  %v8873_v32 = vshrl.u32 %v7308_v55, 16 }
 0x12c   : > { %5833 = vmatmul.mubr.msk.bf16.gmra.mrb[132].mxu1 %vm543_vm3, %v7242_v18  ;;  %5862 = vmatprep.mubr.msk.bf16.mxu0 %vm6500_vm1, %v8876_v1 }
 0x12d   : > { %5836 = vmatprep.mubr.msk.bf16.mxu1 %vm6500_vm1, %v8876_v1 }
 0x12e   : > { %v868_v63 = vpop.f32.mrb[28].mxu0 }
 0x12f   : > { %v741_v45 = vpop.f32.mrb[28].mxu1  ;;  %v7312_v2 = vadd.f32 %v868_v63, %v734_v12  ;;  %v5628_v0 = vpop.f32.mrb[29].mxu0 }
 0x130   : > { %v742_v48 = vadd.f32 %v741_v45, %v7125_v40  ;;  %v5602_v27 = vpop.f32.mrb[29].mxu1  ;;  %v871_v20 = vpop.f32.mrb[30].mxu0  ;;  %v2034_v40 = vor.u32 %v8875_v16, %v2030_v22  ;;  %v7354_v22 = vld [vmem:[%s7175_s20 + $0x34] sm:$0xf]  ;;  %v2044_v0 = vrot.slane %v8870_v35, 1 }
 0x131   : > { %v744_v44 = vpop.f32.mrb[30].mxu1  ;;  %v7318_v54 = vadd.f32 %v871_v20, %v737_v14  ;;  %v5629_v5 = vpop.f32.mrb[31].mxu0 }
 0x132   : > { %v745_v31 = vadd.f32 %v744_v44, %v7130_v50  ;;  %v5603_v6 = vpop.f32.mrb[31].mxu1  ;;  %v2038_v24 = vsel %vm487_vm2, %v2034_v40, %v2037_v53  ;;  %v8871_v40 = vshrl.u32 %v7338_v58, 16 }
 0x133   : > { %5863 = vmatmul.mubr.msk.bf16.gmra.mrb[136].mxu0 %vm543_vm3, %v2031_v52 }
 0x134   : > { %5837 = vmatmul.mubr.msk.bf16.gmra.mrb[136].mxu1 %vm543_vm3, %v7275_v15  ;;  %5866 = vmatprep.mubr.msk.bf16.mxu0 %vm6500_vm1, %v8876_v1 }
 0x135   : > { %5840 = vmatprep.mubr.msk.bf16.mxu1 %vm6500_vm1, %v8876_v1 }
 0x136   : > { %v876_v50 = vpop.f32.mrb[32].mxu0 }
 0x137   : > { %v749_v3 = vpop.f32.mrb[32].mxu1  ;;  %v7342_v17 = vadd.f32 %v876_v50, %v742_v48  ;;  %v5632_v4 = vpop.f32.mrb[33].mxu0  ;;  %v7368_v48 = vcombine.low %v7351_v7, %v7354_v22 }
 0x138   : > { %v750_v25 = vadd.f32 %v749_v3, %v7148_v60  ;;  %v5606_v12 = vpop.f32.mrb[33].mxu1  ;;  %v879_v30 = vpop.f32.mrb[34].mxu0  ;;  %v2041_v60 = vor.u32 %v8873_v32, %v2037_v53 }
 0x139   : > { %v752_v28 = vpop.f32.mrb[34].mxu1  ;;  %v7348_v14 = vadd.f32 %v879_v30, %v745_v31  ;;  %v5633_v10 = vpop.f32.mrb[35].mxu0  ;;  %v8868_v53 = vshll.u32 %v7368_v48, 16  ;;  %v2956_v30 = vrot.slane %v2018_v37, 2 }
 0x13a   : > { %v753_v63 = vadd.f32 %v752_v28, %v7153_v51  ;;  %v5607_v45 = vpop.f32.mrb[35].mxu1  ;;  %v2045_v6 = vsel %vm487_vm2, %v2041_v60, %v2044_v0  ;;  %v2959_v28 = vrot.slane %v2025_v46, 2 }
 0x13b   : > { %5867 = vmatmul.mubr.msk.bf16.gmra.mrb[140].mxu0 %vm543_vm3, %v2038_v24  ;;  %v2960_v24 = vrot.slane %v2021_v41, 3  ;;  %v5162_v41 = vcombine.low %v7351_v7, %v7351_v7 }
 0x13c   : > { %5841 = vmatmul.mubr.msk.bf16.gmra.mrb[140].mxu1 %vm543_vm3, %v7308_v55  ;;  %5870 = vmatprep.mubr.msk.bf16.mxu0 %vm6500_vm1, %v8876_v1 }
 0x13d   : > { %5844 = vmatprep.mubr.msk.bf16.mxu1 %vm6500_vm1, %v8876_v1 }
 0x13e   : > { %v884_v51 = vpop.f32.mrb[36].mxu0 }
 0x13f   : > { %v757_v27 = vpop.f32.mrb[36].mxu1  ;;  %v7372_v20 = vadd.f32 %v884_v51, %v750_v25  ;;  %v5636_v52 = vpop.f32.mrb[37].mxu0  ;;  %v2052_v25 = vrot.slane %v8868_v53, 1 }
 0x140   : > { %v758_v44 = vadd.f32 %v757_v27, %v7166_v26  ;;  %v887_v5 = vpop.f32.mrb[38].mxu0  ;;  %v5610_v31 = vpop.f32.mrb[37].mxu1  ;;  %v2048_v26 = vor.u32 %v8871_v40, %v2044_v0  ;;  %v2957_v0 = vrot.slane %v2014_v43, 3  ;;  %v8869_v43 = vshrl.u32 %v7368_v48, 16 }
 0x141   : > { %v7378_v50 = vadd.f32 %v887_v5, %v753_v63  ;;  %v5637_v3 = vpop.f32.mrb[39].mxu0  ;;  %v760_v4 = vpop.f32.mrb[38].mxu1 }
 0x142   : > { %v5611_v12 = vpop.f32.mrb[39].mxu1  ;;  %v2053_v46 = vsel %vm487_vm2, %v2048_v26, %v2052_v25  ;;  %v2958_v31 = vor.u32 %v2957_v0, %v2956_v30  ;;  %v2191_v4 = vrot.slane %v7191_v9, 1  ;;  %v7434_v9 = vcombine.low %v7201_v61, %v7226_v38 }
 0x143   : > { %5871 = vmatmul.mubr.msk.bf16.gmra.mrb[144].mxu0 %vm543_vm3, %v2045_v6  ;;  %v7405_v6 = vor.u32 %v2960_v24, %v2959_v28  ;;  %v2056_v28 = vor.u32 %v8869_v43, %v2052_v25  ;;  %v2194_v38 = vrot.slane %v7242_v18, 1 }
 0x144   : > { %5845 = vmatmul.mubr.msk.bf16.gmra.mrb[144].mxu1 %vm543_vm3, %v7338_v58  ;;  %5874 = vmatprep.mubr.msk.bf16.mxu0 %vm6500_vm1, %v8876_v1  ;;  %v2346_v61 = vrot.slane %v7434_v9, 1 }
 0x145   : > { %5848 = vmatprep.mubr.msk.bf16.mxu1 %vm6500_vm1, %v8876_v1 }
 0x146   : > { %v892_v10 = vpop.f32.mrb[40].mxu0 }
 0x147   : > { %v7397_v63 = vadd.f32 %v892_v10, %v758_v44  ;;  %v998_v45 = vpop.f32.mrb[40].mxu1  ;;  %v5640_v60 = vpop.f32.mrb[41].mxu0  ;;  %v5203_v10 = vld [vmem:[%s8862_s3 + $0x34] sm:$0xf] }
 0x148   : > { %v1052_v51 = vadd.f32 %v998_v45, %v7216_v36  ;;  %v5646_v37 = vpop.f32.mrb[41].mxu1  ;;  %v895_v27 = vpop.f32.mrb[42].mxu0  ;;  %v7412_v36 = vsel %vm1540_vm7, %v2958_v31, %v7405_v6  ;;  %v7430_v45 = vcombine.low %v7184_v62, %v7198_v19  ;;  %v2569_v62 = vsel %vm565_vm0, %v5203_v10, 0 }
 0x149   : > { %v1001_v52 = vpop.f32.mrb[42].mxu1  ;;  %v5641_v5 = vpop.f32.mrb[43].mxu0 }
 0x14a   : > { %v1053_v44 = vadd.f32 %v1001_v52, %v7223_v21  ;;  %v5647_v3 = vpop.f32.mrb[43].mxu1  ;;  %v2192_v21 = vrot.slane %v7207_v23, 1  ;;  %v2345_v19 = vrot.slane %v7430_v45, 1 }
 0x14b   : > { %5875 = vmatmul.mubr.msk.bf16.gmra.mrb[148].mxu0 %vm543_vm3, %v2053_v46 }
 0x14c   : > { %5849 = vmatmul.mubr.msk.bf16.gmra.mrb[148].mxu1 %vm543_vm3, %v5162_v41  ;;  %5878 = vmatprep.mubr.msk.bf16.mxu0 %vm6500_vm1, %v8876_v1  ;;  %v2193_v41 = vsel %vm772_vm4, %v2191_v4, %v2192_v21 }
 0x14d   : > { %5884 = vmatprep.mubr.msk.bf16.mxu1 %vm6500_vm1, %v8876_v1 }
 0x14e   : > { %v1188_v12 = vpop.f32.mrb[44].mxu0 }
 0x14f   : > { %v1006_v26 = vpop.f32.mrb[44].mxu1  ;;  %v7421_v30 = vadd.f32 %v1188_v12, %v1052_v51  ;;  %v5676_v24 = vpop.f32.mrb[45].mxu0 }
 0x150   : > { %v1054_v60 = vadd.f32 %v1006_v26, %v7250_v13  ;;  %v5650_v0 = vpop.f32.mrb[45].mxu1  ;;  %v1191_v51 = vpop.f32.mrb[46].mxu0  ;;  %v2347_v26 = vsel %vm772_vm4, %v2345_v19, %v2346_v61  ;;  %v7461_v24 = vcombine.low %v7229_v39, %v7260_v59  ;;  %v2196_v39 = vrot.slane %v7275_v15, 1 }
 0x151   : > { %v1009_v37 = vpop.f32.mrb[46].mxu1  ;;  %v7437_v27 = vadd.f32 %v1191_v51, %v1053_v44  ;;  %v5677_v25 = vpop.f32.mrb[47].mxu0  ;;  %v2195_v51 = vsel %vm772_vm4, %v2192_v21, %v2194_v38 }
 0x152   : > { %v1055_v46 = vadd.f32 %v1009_v37, %v7257_v57  ;;  %v5651_v52 = vpop.f32.mrb[47].mxu1  ;;  %v5211_v57 = vld [vmem:[%s8862_s3 + $0x38] sm:$0xf] }
 0x153   : > { %5879 = vmatmul.mubr.msk.bf16.gmra.mrb[152].mxu0 %vm543_vm3, %v2056_v28 }
 0x154   : > { %5885 = vmatmul.mubr.msk.bf16.vlgmr.msra.gmra.mrb[152].mxu1 %vm543_vm3, %v2193_v41  ;;  %5914 = vmatprep.mubr.msk.bf16.mxu0 %vm6500_vm1, %v8876_v1 }
 0x155   : > { %5943 = vmatpush3.bf16.msra.mxu1 %v2569_v62  ;;  %5888 = vmatprep.mubr.msk.bf16.mxu1 %vm6500_vm1, %v8876_v1 }
 0x156   : > { %v1196_v13 = vpop.f32.mrb[48].mxu0  ;;  %6002 = vmatprep.subr.bf16.mxu1 %v8876_v1 }
 0x157   : > { %v1014_v5 = vpop.f32.mrb[48].mxu1  ;;  %v7455_v31 = vadd.f32 %v1196_v13, %v1054_v60  ;;  %v5680_v44 = vpop.f32.mrb[49].mxu0  ;;  %v2709_v60 = vsel %vm565_vm0, %v5211_v57, 0  ;;  %v7483_v13 = vcombine.low %v7263_v8, %v7291_v47  ;;  %v2198_v8 = vrot.slane %v7308_v55, 1 }
 0x158   : > { %v1056_v3 = vadd.f32 %v1014_v5, %v7282_v11  ;;  %v5654_v4 = vpop.f32.mrb[49].mxu1  ;;  %v1199_v12 = vpop.f32.mrb[50].mxu0  ;;  %v2348_v11 = vrot.slane %v7461_v24, 1 }
 0x159   : > { %v1017_v28 = vpop.f32.mrb[50].mxu1  ;;  %v7463_v10 = vadd.f32 %v1199_v12, %v1055_v46  ;;  %v5681_v0 = vpop.f32.mrb[51].mxu0  ;;  %v2197_v4 = vsel %vm772_vm4, %v2194_v38, %v2196_v39 }
 0x15a   : > { %v1057_v37 = vadd.f32 %v1017_v28, %v7288_v42  ;;  %v5655_v25 = vpop.f32.mrb[51].mxu1  ;;  %v2349_v19 = vsel %vm772_vm4, %v2346_v61, %v2348_v11 }
 0x15b   : > { %5915 = vmatmul.mubr.msk.bf16.vlgmr.msra.gmra.mrb[156].mxu0 %vm543_vm3, %v2347_v26 }
 0x15c   : > { %5889 = vmatmul.mubr.msk.bf16.gmra.mrb[156].mxu1 %vm543_vm3, %v2195_v51  ;;  %5973 = vmatpush3.bf16.msra.mxu0 %v2709_v60  ;;  %v7503_v60 = vcombine.low %v7294_v49, %v7321_v29  ;;  %v2200_v49 = vrot.slane %v7338_v58, 1 }
 0x15d   : > { %5892 = vmatprep.mubr.msk.bf16.mxu1 %vm6500_vm1, %v8876_v1  ;;  %5918 = vmatprep.mubr.msk.bf16.mxu0 %vm6500_vm1, %v8876_v1 }
 0x15e   : > { %v1204_v59 = vpop.f32.mrb[52].mxu0  ;;  %6032 = vmatprep.subr.bf16.mxu0 %v8876_v1 }
 0x15f   : > { %v1022_v42 = vpop.f32.mrb[52].mxu1  ;;  %v7477_v21 = vadd.f32 %v1204_v59, %v1056_v3  ;;  %v5684_v41 = vpop.f32.mrb[53].mxu0 }
 0x160   : > { %v1058_v46 = vadd.f32 %v1022_v42, %v7312_v2  ;;  %v5658_v52 = vpop.f32.mrb[53].mxu1  ;;  %v1207_v62 = vpop.f32.mrb[54].mxu0  ;;  %v2350_v2 = vrot.slane %v7483_v13, 1  ;;  %v2199_v42 = vsel %vm772_vm4, %v2196_v39, %v2198_v8 }
 0x161   : > { %v1025_v57 = vpop.f32.mrb[54].mxu1  ;;  %v7485_v5 = vadd.f32 %v1207_v62, %v1057_v37  ;;  %v5685_v44 = vpop.f32.mrb[55].mxu0  ;;  %v7521_v52 = vcombine.low %v7324_v56, %v7351_v7  ;;  %v7535_v7 = vld [vmem:[%s7175_s20 + $0x38] sm:$0xf] }
 0x162   : > { %v1059_v3 = vadd.f32 %v1025_v57, %v7318_v54  ;;  %v5659_v12 = vpop.f32.mrb[55].mxu1  ;;  %v2351_v51 = vsel %vm772_vm4, %v2348_v11, %v2350_v2 }
 0x163   : > { %5919 = vmatmul.mubr.msk.bf16.gmra.mrb[160].mxu0 %vm543_vm3, %v2349_v19  ;;  %v2354_v56 = vrot.slane %v7521_v52, 1 }
 0x164   : > { %5893 = vmatmul.mubr.msk.bf16.gmra.mrb[160].mxu1 %vm543_vm3, %v2197_v4  ;;  %5922 = vmatprep.mubr.msk.bf16.mxu0 %vm6500_vm1, %v8876_v1 }
 0x165   : > { %5896 = vmatprep.mubr.msk.bf16.mxu1 %vm6500_vm1, %v8876_v1 }
 0x166   : > { %v1212_v47 = vpop.f32.mrb[56].mxu0 }
 0x167   : > { %v1030_v61 = vpop.f32.mrb[56].mxu1  ;;  %v7497_v38 = vadd.f32 %v1212_v47, %v1058_v46  ;;  %v5688_v54 = vpop.f32.mrb[57].mxu0  ;;  %v2201_v47 = vsel %vm772_vm4, %v2198_v8, %v2200_v49 }
 0x168   : > { %v1060_v26 = vadd.f32 %v1030_v61, %v7342_v17  ;;  %v5662_v28 = vpop.f32.mrb[57].mxu1  ;;  %v1215_v0 = vpop.f32.mrb[58].mxu0  ;;  %v2352_v17 = vrot.slane %v7503_v60, 1 }
 0x169   : > { %v1033_v37 = vpop.f32.mrb[58].mxu1  ;;  %v7505_v25 = vadd.f32 %v1215_v0, %v1059_v3  ;;  %v5689_v59 = vpop.f32.mrb[59].mxu0  ;;  %v7544_v28 = vcombine.low %v7354_v22, %v7535_v7 }
 0x16a   : > { %v1061_v41 = vadd.f32 %v1033_v37, %v7348_v14  ;;  %v5663_v46 = vpop.f32.mrb[59].mxu1  ;;  %v2353_v44 = vsel %vm772_vm4, %v2350_v2, %v2352_v17  ;;  %v2355_v59 = vsel %vm772_vm4, %v2352_v17, %v2354_v56  ;;  %v2489_v17 = vshll.u32 %v7430_v45, 16 }
 0x16b   : > { %5923 = vmatmul.mubr.msk.bf16.gmra.mrb[164].mxu0 %vm543_vm3, %v2351_v51  ;;  %v2356_v22 = vrot.slane %v7544_v28, 1 }
 0x16c   : > { %5897 = vmatmul.mubr.msk.bf16.gmra.mrb[164].mxu1 %vm543_vm3, %v2199_v42  ;;  %5926 = vmatprep.mubr.msk.bf16.mxu0 %vm6500_vm1, %v8876_v1 }
 0x16d   : > { %5900 = vmatprep.mubr.msk.bf16.mxu1 %vm6500_vm1, %v8876_v1 }
 0x16e   : > { %v1220_v29 = vpop.f32.mrb[60].mxu0 }
 0x16f   : > { %v1038_v11 = vpop.f32.mrb[60].mxu1  ;;  %v7517_v39 = vadd.f32 %v1220_v29, %v1060_v26  ;;  %v5692_v14 = vpop.f32.mrb[61].mxu0 }
 0x170   : > { %v1062_v62 = vadd.f32 %v1038_v11, %v7372_v20  ;;  %v5666_v19 = vpop.f32.mrb[61].mxu1  ;;  %v1223_v57 = vpop.f32.mrb[62].mxu0  ;;  %v2202_v20 = vrot.slane %v7368_v48, 1  ;;  %v2497_v14 = vshll.u32 %v7434_v9, 16 }
 0x171   : > { %v1041_v4 = vpop.f32.mrb[62].mxu1  ;;  %v7525_v3 = vadd.f32 %v1223_v57, %v1061_v41  ;;  %v5693_v12 = vpop.f32.mrb[63].mxu0 }
 0x172   : > { %v1063_v61 = vadd.f32 %v1041_v4, %v7378_v50  ;;  %v5667_v54 = vpop.f32.mrb[63].mxu1  ;;  %v2203_v29 = vsel %vm772_vm4, %v2200_v49, %v2202_v20  ;;  %v2494_v49 = vshrl.u32 %v7434_v9, 16 }
 0x173   : > { %5927 = vmatmul.mubr.msk.bf16.gmra.mrb[168].mxu0 %vm543_vm3, %v2353_v44 }
 0x174   : > { %5901 = vmatmul.mubr.msk.bf16.gmra.mrb[168].mxu1 %vm543_vm3, %v2201_v47  ;;  %5930 = vmatprep.mubr.msk.bf16.mxu0 %vm6500_vm1, %v8876_v1 }
 0x175   : > { %5904 = vmatprep.mubr.msk.bf16.mxu1 %vm6500_vm1, %v8876_v1 }
 0x176   : > { %v1228_v2 = vpop.f32.mrb[64].mxu0 }
 0x177   : > { %v1046_v50 = vpop.f32.mrb[64].mxu1  ;;  %v7540_v8 = vadd.f32 %v1228_v2, %v1062_v62  ;;  %v5696_v26 = vpop.f32.mrb[65].mxu0 }
 0x178   : > { %v1064_v0 = vadd.f32 %v1046_v50, %v7397_v63  ;;  %v1231_v51 = vpop.f32.mrb[66].mxu0  ;;  %v5670_v37 = vpop.f32.mrb[65].mxu1  ;;  %v2486_v63 = vshrl.u32 %v7430_v45, 16  ;;  %v2491_v26 = vrot.slane %v2489_v17, 2 }
 0x179   : > { %v7549_v42 = vadd.f32 %v1231_v51, %v1063_v61  ;;  %v5697_v41 = vpop.f32.mrb[67].mxu0  ;;  %v1049_v46 = vpop.f32.mrb[66].mxu1  ;;  %v2357_v61 = vsel %vm772_vm4, %v2354_v56, %v2356_v22  ;;  %v2496_v51 = vrot.slane %v2494_v49, 1  ;;  %v2499_v37 = vrot.slane %v2497_v14, 2 }
 0x17a   : > { %v5671_v11 = vpop.f32.mrb[67].mxu1  ;;  %v2488_v50 = vrot.slane %v2486_v63, 1  ;;  %v2506_v56 = vshll.u32 %v7461_v24, 16 }
 0x17b   : > { %5931 = vmatmul.mubr.msk.bf16.gmra.mrb[172].mxu0 %vm543_vm3, %v2355_v59  ;;  %v2500_v46 = vor.u32 %v2499_v37, %v2496_v51  ;;  %v2674_v51 = vrot.slane %v7430_v45, 2  ;;  %v2675_v37 = vrot.slane %v7434_v9, 2 }
 0x17c   : > { %5905 = vmatmul.mubr.msk.bf16.gmra.mrb[172].mxu1 %vm543_vm3, %v2203_v29  ;;  %5934 = vmatprep.mubr.msk.bf16.mxu0 %vm6500_vm1, %v8876_v1  ;;  %v2492_v41 = vor.u32 %v2491_v26, %v2488_v50  ;;  %v7598_v50 = vld [vmem:[%s7586_s24 + $0x8] sm:$0xf] }
 0x17d   : > { %5908 = vmatprep.mubr.msk.bf16.mxu1 %vm6500_vm1, %v8876_v1 }
 0x17e   : > { %v1236_v62 = vpop.f32.mrb[68].mxu0 }
 0x17f   : > { %v7563_v19 = vadd.f32 %v1236_v62, %v1064_v0  ;;  %v1329_v57 = vpop.f32.mrb[68].mxu1  ;;  %v5700_v44 = vpop.f32.mrb[69].mxu0 }
 0x180   : > { %v1383_v4 = vadd.f32 %v1329_v57, %v7421_v30  ;;  %v5706_v12 = vpop.f32.mrb[69].mxu1  ;;  %v1239_v47 = vpop.f32.mrb[70].mxu0  ;;  %v2503_v30 = vshrl.u32 %v7461_v24, 16  ;;  %v2508_v57 = vrot.slane %v2506_v56, 2 }
 0x181   : > { %v1332_v54 = vpop.f32.mrb[70].mxu1  ;;  %v5701_v2 = vpop.f32.mrb[71].mxu0  ;;  %v2501_v47 = vsel %vm1067_vm5, %v2492_v41, %v2500_v46 }
 0x182   : > { %v1384_v59 = vadd.f32 %v1332_v54, %v7437_v27  ;;  %v5707_v0 = vpop.f32.mrb[71].mxu1  ;;  %v2505_v62 = vrot.slane %v2503_v30, 1  ;;  %v7595_v2 = vld [vmem:[%s7586_s24 + $0x4] sm:$0xf]  ;;  %v5228_v30 = vld [vmem:[%s8862_s3 + $0x40] sm:$0xf] }
 0x183   : > { %5935 = vmatmul.mubr.msk.bf16.gmra.mrb[176].mxu0 %vm543_vm3, %v2357_v61 }
 0x184   : > { %5909 = vmatmul.mubr.msk.bf16.gmra.mrb[176].mxu1 %vm543_vm3, %v2202_v20  ;;  %5938 = vmatprep.mubr.msk.bf16.mxu0 %vm6500_vm1, %v8876_v1  ;;  %v5220_v20 = vld [vmem:[%s8862_s3 + $0x3c] sm:$0xf]  ;;  %v2509_v26 = vor.u32 %v2508_v57, %v2505_v62  ;;  %v3010_v57 = vsel %vm565_vm0, %v5228_v30, 0 }
 0x185   : > { %5944 = vmatprep.mubr.msk.bf16.mxu1 %vm6500_vm1, %v8876_v1  ;;  %v2851_v54 = vsel %vm565_vm0, %v5220_v20, 0  ;;  %v2676_v20 = vsel %vm1257_vm6, %v2674_v51, %v2675_v37 }
 0x186   : > { %v1471_v27 = vpop.f32.mrb[72].mxu0 }
 0x187   : > { %v1337_v29 = vpop.f32.mrb[72].mxu1  ;;  %v7577_v11 = vadd.f32 %v1471_v27, %v1383_v4  ;;  %v5736_v63 = vpop.f32.mrb[73].mxu0 }
 0x188   : > { %v1385_v17 = vadd.f32 %v1337_v29, %v7455_v31  ;;  %v5710_v49 = vpop.f32.mrb[73].mxu1  ;;  %v1474_v14 = vpop.f32.mrb[74].mxu0  ;;  %v2510_v63 = vsel %vm1067_vm5, %v2500_v46, %v2509_v26  ;;  %v2677_v46 = vrot.slane %v7461_v24, 2 }
 0x189   : > { %v1340_v44 = vpop.f32.mrb[74].mxu1  ;;  %v7588_v4 = vadd.f32 %v1474_v14, %v1384_v59  ;;  %v5737_v12 = vpop.f32.mrb[75].mxu0  ;;  %v2515_v59 = vshll.u32 %v7483_v13, 16 }
 0x18a   : > { %v1386_v61 = vadd.f32 %v1340_v44, %v7463_v10  ;;  %v5711_v31 = vpop.f32.mrb[75].mxu1  ;;  %v7607_v10 = vcombine.low %v7595_v2, %v7598_v50 }
 0x18b   : > { %5939 = vmatmul.mubr.msk.bf16.gmra.mrb[180].mxu0 %vm543_vm3, %v2356_v22  ;;  %v2512_v22 = vshrl.u32 %v7483_v13, 16  ;;  %v7631_v31 = vld [vmem:[%s7586_s24 + $0x10] sm:$0xf] }
 0x18c   : > { %5945 = vmatmul.mubr.msk.bf16.vlgmr.msra.gmra.mrb[180].mxu1 %vm543_vm3, %v2501_v47  ;;  %5974 = vmatprep.mubr.msk.bf16.mxu0 %vm6500_vm1, %v8876_v1 }
 0x18d   : > { %6003 = vmatpush3.bf16.msra.mxu1 %v2851_v54  ;;  %5948 = vmatprep.mubr.msk.bf16.mxu1 %vm6500_vm1, %v8876_v1  ;;  %v2514_v44 = vrot.slane %v2512_v22, 1  ;;  %v2524_v54 = vshll.u32 %v7503_v60, 16 }
 0x18e   : > { %v1479_v0 = vpop.f32.mrb[76].mxu0  ;;  %6062 = vmatprep.subr.bf16.mxu1 %v8876_v1 }
 0x18f   : > { %v1345_v45 = vpop.f32.mrb[76].mxu1  ;;  %v7617_v9 = vadd.f32 %v1479_v0, %v1385_v17  ;;  %v5740_v56 = vpop.f32.mrb[77].mxu0  ;;  %v2517_v17 = vrot.slane %v2515_v59, 2 }
 0x190   : > { %v1387_v41 = vadd.f32 %v1345_v45, %v7477_v21  ;;  %v5714_v27 = vpop.f32.mrb[77].mxu1  ;;  %v1482_v29 = vpop.f32.mrb[78].mxu0  ;;  %v7628_v21 = vld [vmem:[%s7586_s24 + $0xc] sm:$0xf] }
 0x191   : > { %v1348_v49 = vpop.f32.mrb[78].mxu1  ;;  %v7622_v14 = vadd.f32 %v1482_v29, %v1386_v61  ;;  %v5741_v62 = vpop.f32.mrb[79].mxu0  ;;  %v2521_v61 = vshrl.u32 %v7503_v60, 16  ;;  %v7639_v51 = vcombine.low %v7628_v21, %v7631_v31  ;;  %v2678_v27 = vsel %vm1257_vm6, %v2675_v37, %v2677_v46  ;;  %v7657_v37 = vld [vmem:[%s7586_s24 + $0x14] sm:$0xf] }
 0x192   : > { %v1388_v12 = vadd.f32 %v1348_v49, %v7485_v5  ;;  %v5715_v47 = vpop.f32.mrb[79].mxu1  ;;  %v2518_v5 = vor.u32 %v2517_v17, %v2514_v44  ;;  %v7660_v17 = vld [vmem:[%s7586_s24 + $0x18] sm:$0xf] }
 0x193   : > { %5975 = vmatmul.mubr.msk.bf16.vlgmr.msra.gmra.mrb[184].mxu0 %vm543_vm3, %v2676_v20  ;;  %v2523_v29 = vrot.slane %v2521_v61, 1  ;;  %v7663_v47 = vld [vmem:[%s7586_s24 + $0x1c] sm:$0xf]  ;;  %v7679_v61 = vcombine.low %v7657_v37, %v7660_v17 }
 0x194   : > { %5949 = vmatmul.mubr.msk.bf16.gmra.mrb[184].mxu1 %vm543_vm3, %v2510_v63  ;;  %6033 = vmatpush3.bf16.msra.mxu0 %v3010_v57  ;;  %v2526_v63 = vrot.slane %v2524_v54, 2  ;;  %v2519_v62 = vsel %vm1067_vm5, %v2509_v26, %v2518_v5  ;;  %v2530_v54 = vshrl.u32 %v7521_v52, 16 }
 0x195   : > { %5952 = vmatprep.mubr.msk.bf16.mxu1 %vm6500_vm1, %v8876_v1  ;;  %5978 = vmatprep.mubr.msk.bf16.mxu0 %vm6500_vm1, %v8876_v1 }
 0x196   : > { %v1487_v22 = vpop.f32.mrb[80].mxu0  ;;  %6092 = vmatprep.subr.bf16.mxu0 %v8876_v1  ;;  %v2527_v26 = vor.u32 %v2526_v63, %v2523_v29  ;;  %v2532_v33 = vrot.slane %v2530_v54, 1 }
 0x197   : > { %v1353_v59 = vpop.f32.mrb[80].mxu1  ;;  %v7646_v24 = vadd.f32 %v1487_v22, %v1387_v41  ;;  %v5744_v0 = vpop.f32.mrb[81].mxu0  ;;  %v2533_v22 = vshll.u32 %v7521_v52, 16 }
 0x198   : > { %v1389_v30 = vadd.f32 %v1353_v59, %v7497_v38  ;;  %v5718_v45 = vpop.f32.mrb[81].mxu1  ;;  %v1490_v56 = vpop.f32.mrb[82].mxu0  ;;  %v2679_v38 = vrot.slane %v7483_v13, 2  ;;  %v7675_v13 = vld [vmem:[%s7586_s24 + $0x28] sm:$0xf]  ;;  %v2528_v32 = vsel %vm1067_vm5, %v2518_v5, %v2527_v26  ;;  %v2542_v5 = vshll.u32 %v7544_v28, 16 }
 0x199   : > { %v1356_v20 = vpop.f32.mrb[82].mxu1  ;;  %v7650_v49 = vadd.f32 %v1490_v56, %v1388_v12  ;;  %v5745_v41 = vpop.f32.mrb[83].mxu0  ;;  %v7672_v12 = vld [vmem:[%s7586_s24 + $0x24] sm:$0xf]  ;;  %v7686_v59 = vld [vmem:[%s7586_s24 + $0x2c] sm:$0xf] }
 0x19a   : > { %v1390_v57 = vadd.f32 %v1356_v20, %v7505_v25  ;;  %v5719_v44 = vpop.f32.mrb[83].mxu1  ;;  %v7669_v25 = vld [vmem:[%s7586_s24 + $0x20] sm:$0xf]  ;;  %v7689_v0 = vld [vmem:[%s7586_s24 + $0x30] sm:$0xf]  ;;  %v7697_v56 = vcombine.low %v7672_v12, %v7675_v13  ;;  %v2680_v43 = vsel %vm1257_vm6, %v2677_v46, %v2679_v38  ;;  %v2535_v16 = vrot.slane %v2533_v22, 2 }
 0x19b   : > { %5979 = vmatmul.mubr.msk.bf16.gmra.mrb[188].mxu0 %vm543_vm3, %v2678_v27  ;;  %8886 = vst [vmem:[#allocation2_spill] sm:$0xff] %v7689_v0  ;;  %v7693_v45 = vcombine.low %v7663_v47, %v7669_v25  ;;  %v7701_v29 = vcombine.low %v7686_v59, %v7689_v0  ;;  %v2681_v46 = vrot.slane %v7503_v60, 2 }
 0x19c   : > { %5953 = vmatmul.mubr.msk.bf16.gmra.mrb[188].mxu1 %vm543_vm3, %v2519_v62  ;;  %5982 = vmatprep.mubr.msk.bf16.mxu0 %vm6500_vm1, %v8876_v1 }
 0x19d   : > { %5956 = vmatprep.mubr.msk.bf16.mxu1 %vm6500_vm1, %v8876_v1  ;;  %v2682_v22 = vsel %vm1257_vm6, %v2679_v38, %v2681_v46 }
 0x19e   : > { %v1495_v27 = vpop.f32.mrb[84].mxu0 }
 0x19f   : > { %v1361_v63 = vpop.f32.mrb[84].mxu1  ;;  %v7703_v20 = vadd.f32 %v1495_v27, %v1389_v30  ;;  %v5748_v41 = vpop.f32.mrb[85].mxu0 }
 0x1a0   : > { %v1391_v62 = vadd.f32 %v1361_v63, %v7517_v39  ;;  %v5722_v44 = vpop.f32.mrb[85].mxu1  ;;  %v1498_v53 = vpop.f32.mrb[86].mxu0  ;;  %v8887_v39 = vmov 0.0   ;;  %v2544_v63 = vrot.slane %v2542_v5, 2 }
 0x1a1   : > { %v1364_v35 = vpop.f32.mrb[86].mxu1  ;;  %v7707_v40 = vadd.f32 %v1498_v53, %v1390_v57  ;;  %v5749_v34 = vpop.f32.mrb[87].mxu0  ;;  %v2539_v53 = vshrl.u32 %v7544_v28, 16 }
 0x1a2   : > { %v1392_v1 = vadd.f32 %v1364_v35, %v7525_v3  ;;  %v5723_v0 = vpop.f32.mrb[87].mxu1  ;;  %v2536_v34 = vor.u32 %v2535_v16, %v2532_v33 }
 0x1a3   : > { %5983 = vmatmul.mubr.msk.bf16.gmra.mrb[192].mxu0 %vm543_vm3, %v2680_v43  ;;  %v2541_v16 = vrot.slane %v2539_v53, 1 }
 0x1a4   : > { %5957 = vmatmul.mubr.msk.bf16.gmra.mrb[192].mxu1 %vm543_vm3, %v2528_v32  ;;  %5986 = vmatprep.mubr.msk.bf16.mxu0 %vm6500_vm1, %v8887_v39  ;;  %v2537_v33 = vsel %vm1067_vm5, %v2527_v26, %v2536_v34 }
 0x1a5   : > { %5960 = vmatprep.mubr.msk.bf16.mxu1 %vm6500_vm1, %v8887_v39 }
 0x1a6   : > { %v1503_v30 = vpop.f32.mrb[88].mxu0 }
 0x1a7   : > { %v1369_v35 = vpop.f32.mrb[88].mxu1  ;;  %v7720_v3 = vadd.f32 %v1503_v30, %v1391_v62  ;;  %v5752_v43 = vpop.f32.mrb[89].mxu0 }
 0x1a8   : > { %v1393_v32 = vadd.f32 %v1369_v35, %v7540_v8  ;;  %v5726_v57 = vpop.f32.mrb[89].mxu1  ;;  %v1506_v54 = vpop.f32.mrb[90].mxu0  ;;  %v2683_v8 = vrot.slane %v7521_v52, 2 }
 0x1a9   : > { %v1372_v60 = vpop.f32.mrb[90].mxu1  ;;  %v7724_v0 = vadd.f32 %v1506_v54, %v1392_v1  ;;  %v5753_v27 = vpop.f32.mrb[91].mxu0  ;;  %v2545_v1 = vor.u32 %v2544_v63, %v2541_v16 }
 0x1aa   : > { %v1394_v41 = vadd.f32 %v1372_v60, %v7549_v42  ;;  %v5727_v44 = vpop.f32.mrb[91].mxu1  ;;  %v2684_v35 = vsel %vm1257_vm6, %v2681_v46, %v2683_v8 }
 0x1ab   : > { %5987 = vmatmul.mubr.msk.bf16.gmra.mrb[196].mxu0 %vm543_vm3, %v2682_v22  ;;  %v2546_v52 = vsel %vm1067_vm5, %v2536_v34, %v2545_v1 }
 0x1ac   : > { %5961 = vmatmul.mubr.msk.bf16.gmra.mrb[196].mxu1 %vm543_vm3, %v2537_v33  ;;  %5990 = vmatprep.mubr.msk.bf16.mxu0 %vm6500_vm1, %v8887_v39 }
 0x1ad   : > { %5964 = vmatprep.mubr.msk.bf16.mxu1 %vm6500_vm1, %v8887_v39 }
 0x1ae   : > { %v1511_v38 = vpop.f32.mrb[92].mxu0 }
 0x1af   : > { %v1377_v26 = vpop.f32.mrb[92].mxu1  ;;  %v7735_v62 = vadd.f32 %v1511_v38, %v1393_v32  ;;  %v5756_v53 = vpop.f32.mrb[93].mxu0 }
 0x1b0   : > { %v1395_v42 = vadd.f32 %v1377_v26, %v7563_v19  ;;  %v1514_v5 = vpop.f32.mrb[94].mxu0  ;;  %v5730_v30 = vpop.f32.mrb[93].mxu1  ;;  %v2685_v19 = vrot.slane %v7544_v28, 2 }
 0x1b1   : > { %v7739_v43 = vadd.f32 %v1514_v5, %v1394_v41  ;;  %v5757_v57 = vpop.f32.mrb[95].mxu0  ;;  %v1380_v54 = vpop.f32.mrb[94].mxu1  ;;  %v7755_v41 = vcombine.low %v7598_v50, %v7628_v21  ;;  %v2817_v21 = vrot.slane %v7242_v18, 2 }
 0x1b2   : > { %v5731_v22 = vpop.f32.mrb[95].mxu1  ;;  %v2686_v63 = vsel %vm1257_vm6, %v2683_v8, %v2685_v19  ;;  %v5236_v57 = vld [vmem:[%s8862_s3 + $0x44] sm:$0xf] }
 0x1b3   : > { %5991 = vmatmul.mubr.msk.bf16.gmra.mrb[200].mxu0 %vm543_vm3, %v2684_v35  ;;  %v8882_v53 = vshll.u32 %v7755_v41, 16 }
 0x1b4   : > { %5965 = vmatmul.mubr.msk.bf16.gmra.mrb[200].mxu1 %vm543_vm3, %v2546_v52  ;;  %5994 = vmatprep.mubr.msk.bf16.mxu0 %vm6500_vm1, %v8887_v39 }
 0x1b5   : > { %5968 = vmatprep.mubr.msk.bf16.mxu1 %vm6500_vm1, %v8887_v39  ;;  %v7770_v50 = vrot.slane %v8882_v53, 3 }
 0x1b6   : > { %v1519_v46 = vpop.f32.mrb[96].mxu0 }
 0x1b7   : > { %v1631_v32 = vpop.f32.mrb[96].mxu1  ;;  %v5760_v60 = vpop.f32.mrb[97].mxu0  ;;  %v7749_v27 = vadd.f32 %v1519_v46, %v1395_v42  ;;  %v8881_v42 = vshrl.u32 %v7755_v41, 16 }
 0x1b8   : > { %v1685_v34 = vadd.f32 %v1631_v32, %v7577_v11  ;;  %v5766_v33 = vpop.f32.mrb[97].mxu1  ;;  %v1522_v16 = vpop.f32.mrb[98].mxu0 }
 0x1b9   : > { %v1634_v44 = vpop.f32.mrb[98].mxu1  ;;  %v5761_v28 = vpop.f32.mrb[99].mxu0  ;;  %v7766_v11 = vrot.slane %v8881_v42, 2 }
 0x1ba   : > { %v1686_v38 = vadd.f32 %v1634_v44, %v7588_v4  ;;  %v5767_v26 = vpop.f32.mrb[99].mxu1  ;;  %v2816_v4 = vrot.slane %v7207_v23, 2  ;;  %v3150_v44 = vsel %vm565_vm0, %v5236_v57, 0 }
 0x1bb   : > { %5995 = vmatmul.mubr.msk.bf16.gmra.mrb[204].mxu0 %vm543_vm3, %v2686_v63  ;;  %v5251_v26 = vld [vmem:[%s8862_s3 + $0x48] sm:$0xf] }
 0x1bc   : > { %5969 = vmatmul.mubr.msk.bf16.gmra.mrb[204].mxu1 %vm543_vm3, %v2545_v1  ;;  %5998 = vmatprep.mubr.msk.bf16.mxu0 %vm6500_vm1, %v8887_v39  ;;  %v7778_v1 = vcombine.low %v7631_v31, %v7657_v37  ;;  %v2818_v37 = vsel %vm1257_vm6, %v2816_v4, %v2817_v21 }
 0x1bd   : > { %6004 = vmatprep.mubr.msk.bf16.mxu1 %vm6500_vm1, %v8887_v39 }
 0x1be   : > { %v1772_v8 = vpop.f32.mrb[100].mxu0  ;;  %v8880_v32 = vshll.u32 %v7778_v1, 16 }
 0x1bf   : > { %v1639_v30 = vpop.f32.mrb[100].mxu1  ;;  %v5796_v35 = vpop.f32.mrb[101].mxu0  ;;  %v7785_v54 = vadd.f32 %v1772_v8, %v1685_v34 }
 0x1c0   : > { %v1687_v52 = vadd.f32 %v1639_v30, %v7617_v9  ;;  %v5770_v22 = vpop.f32.mrb[101].mxu1  ;;  %v1775_v46 = vpop.f32.mrb[102].mxu0  ;;  %v4374_v34 = vrot.slane %v8880_v32, 3  ;;  %v8879_v9 = vshrl.u32 %v7778_v1, 16 }
 0x1c1   : > { %v1642_v60 = vpop.f32.mrb[102].mxu1  ;;  %v5797_v31 = vpop.f32.mrb[103].mxu0  ;;  %v7790_v33 = vadd.f32 %v1775_v46, %v1686_v38  ;;  %v8888_v46 = vshrl.u32 %v7275_v15, 16 }
 0x1c2   : > { %v1688_v16 = vadd.f32 %v1642_v60, %v7622_v14  ;;  %v5771_v63 = vpop.f32.mrb[103].mxu1  ;;  %v4373_v28 = vrot.slane %v8879_v9, 2  ;;  %v2819_v14 = vrot.slane %v7275_v15, 2  ;;  %v8889_v31 = vshll.u32 %v7275_v15, 16 }
 0x1c3   : > { %5999 = vmatmul.mubr.msk.bf16.gmra.mrb[208].mxu0 %vm543_vm3, %v2685_v19  ;;  %v2963_v60 = vrot.slane %v8888_v46, 2  ;;  %v3911_v9 = vshll.u32 %v7639_v51, 16 }
 0x1c4   : > { %6005 = vmatmul.mubr.msk.bf16.vlgmr.msra.gmra.mrb[208].mxu1 %vm543_vm3, %v2818_v37  ;;  %6034 = vmatprep.mubr.msk.bf16.mxu0 %vm6500_vm1, %v8887_v39  ;;  %v7810_v19 = vor.u32 %v4374_v34, %v4373_v28  ;;  %v2964_v37 = vrot.slane %v8889_v31, 3  ;;  %v2820_v5 = vsel %vm1257_vm6, %v2817_v21, %v2819_v14  ;;  %v3316_v34 = vsel %vm565_vm0, %v5251_v26, 0 }
 0x1c5   : > { %6063 = vmatpush3.bf16.msra.mxu1 %v3150_v44  ;;  %6008 = vmatprep.mubr.msk.bf16.mxu1 %vm6500_vm1, %v8887_v39  ;;  %v2821_v21 = vrot.slane %v7308_v55, 2 }
 0x1c6   : > { %v1780_v38 = vpop.f32.mrb[104].mxu0  ;;  %6122 = vmatprep.subr.bf16.mxu1 %v8887_v39 }
 0x1c7   : > { %v1647_v4 = vpop.f32.mrb[104].mxu1  ;;  %v5800_v8 = vpop.f32.mrb[105].mxu0  ;;  %v7812_v30 = vadd.f32 %v1780_v38, %v1687_v52 }
 0x1c8   : > { %v1689_v35 = vadd.f32 %v1647_v4, %v7646_v24  ;;  %v5774_v57 = vpop.f32.mrb[105].mxu1  ;;  %v1783_v22 = vpop.f32.mrb[106].mxu0  ;;  %v2965_v24 = vor.u32 %v2964_v37, %v2963_v60  ;;  %v8891_v60 = vshll.u32 %v7308_v55, 16 }
 0x1c9   : > { %v1650_v63 = vpop.f32.mrb[106].mxu1  ;;  %v5801_v44 = vpop.f32.mrb[107].mxu0  ;;  %v7821_v28 = vadd.f32 %v1783_v22, %v1688_v16  ;;  %v8890_v22 = vshrl.u32 %v7308_v55, 16 }
 0x1ca   : > { %v1690_v52 = vadd.f32 %v1650_v63, %v7650_v49  ;;  %v5775_v38 = vpop.f32.mrb[107].mxu1  ;;  %v2966_v57 = vsel %vm1540_vm7, %v7405_v6, %v2965_v24  ;;  %v2968_v31 = vrot.slane %v8891_v60, 3  ;;  %v2822_v44 = vsel %vm1257_vm6, %v2819_v14, %v2821_v21 }
 0x1cb   : > { %6035 = vmatmul.mubr.msk.bf16.vlgmr.msra.gmra.mrb[212].mxu0 %vm543_vm3, %v7412_v36  ;;  %v2967_v46 = vrot.slane %v8890_v22, 2  ;;  %v2823_v38 = vrot.slane %v7338_v58, 2 }
 0x1cc   : > { %6009 = vmatmul.mubr.msk.bf16.gmra.mrb[212].mxu1 %vm543_vm3, %v2820_v5  ;;  %6093 = vmatpush3.bf16.msra.mxu0 %v3316_v34 }
 0x1cd   : > { %6012 = vmatprep.mubr.msk.bf16.mxu1 %vm6500_vm1, %v8887_v39  ;;  %6038 = vmatprep.mubr.msk.bf16.mxu0 %vm6500_vm1, %v8887_v39  ;;  %v2969_v6 = vor.u32 %v2968_v31, %v2967_v46  ;;  %v8893_v46 = vshll.u32 %v7338_v58, 16 }
 0x1ce   : > { %v1788_v16 = vpop.f32.mrb[108].mxu0  ;;  %6152 = vmatprep.subr.bf16.mxu0 %v8887_v39 }
 0x1cf   : > { %v1655_v49 = vpop.f32.mrb[108].mxu1  ;;  %v5804_v26 = vpop.f32.mrb[109].mxu0  ;;  %v7833_v4 = vadd.f32 %v1788_v16, %v1689_v35  ;;  %v2972_v60 = vrot.slane %v8893_v46, 3 }
 0x1d0   : > { %v1691_v36 = vadd.f32 %v1655_v49, %v7703_v20  ;;  %v5778_v5 = vpop.f32.mrb[109].mxu1  ;;  %v1791_v8 = vpop.f32.mrb[110].mxu0 }
 0x1d1   : > { %v1658_v37 = vpop.f32.mrb[110].mxu1  ;;  %v5805_v63 = vpop.f32.mrb[111].mxu0  ;;  %v7843_v34 = vadd.f32 %v1791_v8, %v1690_v52  ;;  %v2970_v8 = vsel %vm1540_vm7, %v2965_v24, %v2969_v6 }
 0x1d2   : > { %v1692_v35 = vadd.f32 %v1658_v37, %v7707_v40  ;;  %v5779_v20 = vpop.f32.mrb[111].mxu1  ;;  %v2824_v63 = vsel %vm1257_vm6, %v2821_v21, %v2823_v38 }
 0x1d3   : > { %6039 = vmatmul.mubr.msk.bf16.gmra.mrb[216].mxu0 %vm543_vm3, %v2966_v57  ;;  %v8892_v57 = vshrl.u32 %v7338_v58, 16 }
 0x1d4   : > { %6013 = vmatmul.mubr.msk.bf16.gmra.mrb[216].mxu1 %vm543_vm3, %v2822_v44  ;;  %6042 = vmatprep.mubr.msk.bf16.mxu0 %vm6500_vm1, %v8887_v39 }
 0x1d5   : > { %6016 = vmatprep.mubr.msk.bf16.mxu1 %vm6500_vm1, %v8887_v39  ;;  %v2971_v22 = vrot.slane %v8892_v57, 2 }
 0x1d6   : > { %v1796_v16 = vpop.f32.mrb[112].mxu0 }
 0x1d7   : > { %v1663_v14 = vpop.f32.mrb[112].mxu1  ;;  %v5808_v52 = vpop.f32.mrb[113].mxu0  ;;  %v7853_v49 = vadd.f32 %v1796_v16, %v1691_v36  ;;  %v2973_v24 = vor.u32 %v2972_v60, %v2971_v22  ;;  %v2825_v16 = vrot.slane %v7368_v48, 2 }
 0x1d8   : > { %v1693_v40 = vadd.f32 %v1663_v14, %v7720_v3  ;;  %v5782_v26 = vpop.f32.mrb[113].mxu1  ;;  %v1799_v5 = vpop.f32.mrb[114].mxu0  ;;  %v1854_v3 = vld [vmem:[%s7175_s20 + $0x3c] sm:$0x7]  ;;  %v8894_v52 = vshrl.u32 %v7368_v48, 16 }
 0x1d9   : > { %v1666_v31 = vpop.f32.mrb[114].mxu1  ;;  %v5809_v37 = vpop.f32.mrb[115].mxu0  ;;  %v7862_v44 = vadd.f32 %v1799_v5, %v1692_v35  ;;  %v7874_v35 = vcombine.low %v7535_v7, %v1854_v3  ;;  %v8895_v5 = vshll.u32 %v7368_v48, 16  ;;  %v2826_v7 = vsel %vm1257_vm6, %v2823_v38, %v2825_v16 }
 0x1da   : > { %v1694_v36 = vadd.f32 %v1666_v31, %v7724_v0  ;;  %v5783_v20 = vpop.f32.mrb[115].mxu1  ;;  %v2975_v26 = vrot.slane %v8894_v52, 2  ;;  %v2974_v31 = vsel %vm1540_vm7, %v2969_v6, %v2973_v24 }
 0x1db   : > { %6043 = vmatmul.mubr.msk.bf16.gmra.mrb[220].mxu0 %vm543_vm3, %v2970_v8  ;;  %v2976_v8 = vrot.slane %v8895_v5, 3  ;;  %v2827_v52 = vrot.slane %v7874_v35, 2  ;;  %v2983_v6 = vshll.u32 %v7874_v35, 16  ;;  %v3760_v5 = vrot.slane %v7639_v51, 1 }
 0x1dc   : > { %6017 = vmatmul.mubr.msk.bf16.gmra.mrb[220].mxu1 %vm543_vm3, %v2824_v63  ;;  %6046 = vmatprep.mubr.msk.bf16.mxu0 %vm6500_vm1, %v8887_v39 }
 0x1dd   : > { %6020 = vmatprep.mubr.msk.bf16.mxu1 %vm6500_vm1, %v8887_v39 }
 0x1de   : > { %v1804_v21 = vpop.f32.mrb[116].mxu0 }
 0x1df   : > { %v1671_v0 = vpop.f32.mrb[116].mxu1  ;;  %v5812_v14 = vpop.f32.mrb[117].mxu0  ;;  %v7880_v57 = vadd.f32 %v1804_v21, %v1693_v40  ;;  %v2977_v40 = vor.u32 %v2976_v8, %v2975_v26  ;;  %v3759_v26 = vrot.slane %v7607_v10, 1 }
 0x1e0   : > { %v1695_v22 = vadd.f32 %v1671_v0, %v7735_v62  ;;  %v5786_v46 = vpop.f32.mrb[117].mxu1  ;;  %v1807_v60 = vpop.f32.mrb[118].mxu0  ;;  %v2980_v62 = vshrl.u32 %v7874_v35, 16 }
 0x1e1   : > { %v1674_v37 = vpop.f32.mrb[118].mxu1  ;;  %v5813_v63 = vpop.f32.mrb[119].mxu0  ;;  %v7885_v20 = vadd.f32 %v1807_v60, %v1694_v36  ;;  %v2978_v0 = vsel %vm1540_vm7, %v2973_v24, %v2977_v40  ;;  %v3908_v24 = vshrl.u32 %v7639_v51, 16 }
 0x1e2   : > { %v1696_v3 = vadd.f32 %v1674_v37, %v7739_v43  ;;  %v5787_v14 = vpop.f32.mrb[119].mxu1  ;;  %v2828_v43 = vsel %vm1257_vm6, %v2825_v16, %v2827_v52  ;;  %v2982_v37 = vrot.slane %v2980_v62, 2  ;;  %v2985_v63 = vrot.slane %v2983_v6, 3 }
 0x1e3   : > { %6047 = vmatmul.mubr.msk.bf16.gmra.mrb[224].mxu0 %vm543_vm3, %v2974_v31 }
 0x1e4   : > { %6021 = vmatmul.mubr.msk.bf16.gmra.mrb[224].mxu1 %vm543_vm3, %v2826_v7  ;;  %6050 = vmatprep.mubr.msk.bf16.mxu0 %vm6500_vm1, %v8887_v39  ;;  %v3900_v7 = vshrl.u32 %v7607_v10, 16  ;;  %v2986_v62 = vor.u32 %v2985_v63, %v2982_v37  ;;  %v3762_v63 = vrot.slane %v7679_v61, 1 }
 0x1e5   : > { %6024 = vmatprep.mubr.msk.bf16.mxu1 %vm6500_vm1, %v8887_v39 }
 0x1e6   : > { %v1812_v38 = vpop.f32.mrb[120].mxu0  ;;  %v3902_v6 = vrot.slane %v3900_v7, 1 }
 0x1e7   : > { %v1679_v36 = vpop.f32.mrb[120].mxu1  ;;  %v5816_v21 = vpop.f32.mrb[121].mxu0  ;;  %v7901_v8 = vadd.f32 %v1812_v38, %v1695_v22 }
 0x1e8   : > { %v1697_v46 = vadd.f32 %v1679_v36, %v7749_v27  ;;  %v1815_v60 = vpop.f32.mrb[122].mxu0  ;;  %v5790_v31 = vpop.f32.mrb[121].mxu1  ;;  %v3903_v21 = vshll.u32 %v7607_v10, 16  ;;  %v7912_v27 = vsel %vm772_vm4, %v3759_v26, %v3760_v5  ;;  %v3910_v36 = vrot.slane %v3908_v24, 1 }
 0x1e9   : > { %v5817_v14 = vpop.f32.mrb[123].mxu0  ;;  %v1682_v16 = vpop.f32.mrb[122].mxu1  ;;  %v7908_v32 = vadd.f32 %v1815_v60, %v1696_v3  ;;  %v3913_v3 = vrot.slane %v3911_v9, 2 }
 0x1ea   : > { %v5791_v22 = vpop.f32.mrb[123].mxu1  ;;  %v3905_v38 = vrot.slane %v3903_v21, 2 }
 0x1eb   : > { %6051 = vmatmul.mubr.msk.bf16.gmra.mrb[228].mxu0 %vm543_vm3, %v2978_v0  ;;  %v2987_v22 = vsel %vm1540_vm7, %v2977_v40, %v2986_v62  ;;  %v3914_v7 = vor.u32 %v3913_v3, %v3910_v36  ;;  %v3115_v40 = vrot.slane %v7207_v23, 3 }
 0x1ec   : > { %6025 = vmatmul.mubr.msk.bf16.gmra.mrb[228].mxu1 %vm543_vm3, %v2828_v43  ;;  %6054 = vmatprep.mubr.msk.bf16.mxu0 %vm6500_vm1, %v8887_v39  ;;  %v3906_v53 = vor.u32 %v3905_v38, %v3902_v6 }
 0x1ed   : > { %6028 = vmatprep.mubr.msk.bf16.mxu1 %vm6500_vm1, %v8887_v39 }
 0x1ee   : > { %v1820_v60 = vpop.f32.mrb[124].mxu0 }
 0x1ef   : > { %v7919_v31 = vadd.f32 %v1820_v60, %v1697_v46  ;;  %v1938_v0 = vpop.f32.mrb[124].mxu1  ;;  %v5820_v14 = vpop.f32.mrb[125].mxu0  ;;  %v7927_v46 = vsel %vm772_vm4, %v3760_v5, %v3762_v63  ;;  %v3920_v5 = vshll.u32 %v7679_v61, 16 }
 0x1f0   : > { %v1992_v26 = vadd.f32 %v1938_v0, %v7785_v54  ;;  %v5826_v16 = vpop.f32.mrb[125].mxu1  ;;  %v1823_v43 = vpop.f32.mrb[126].mxu0  ;;  %v7930_v54 = vsel %vm1067_vm5, %v3906_v53, %v3914_v7 }
 0x1f1   : > { %v1941_v42 = vpop.f32.mrb[126].mxu1  ;;  %v5821_v37 = vpop.f32.mrb[127].mxu0  ;;  %v3922_v3 = vrot.slane %v3920_v5, 2 }
 0x1f2   : > { %v1993_v21 = vadd.f32 %v1941_v42, %v7790_v33  ;;  %v5827_v9 = vpop.f32.mrb[127].mxu1  ;;  %v3116_v42 = vrot.slane %v7242_v18, 3  ;;  %v3917_v33 = vshrl.u32 %v7679_v61, 16 }
 0x1f3   : > { %6055 = vmatmul.mubr.msk.bf16.gmra.mrb[232].mxu0 %vm543_vm3, %v2987_v22 }
 0x1f4   : > { %6029 = vmatmul.mubr.msk.bf16.gmra.mrb[232].mxu1 %vm543_vm3, %v2827_v52  ;;  %6058 = vmatprep.mubr.msk.bf16.mxu0 %vm6500_vm1, %v8887_v39  ;;  %v5260_v52 = vld [vmem:[%s8862_s3 + $0x4c] sm:$0xf]  ;;  %v3919_v36 = vrot.slane %v3917_v33, 1  ;;  %v3117_v43 = vsel %vm1700_vm8, %v3115_v40, %v3116_v42  ;;  %v3253_v40 = vld [vmem:[%s7586_s24] sm:$0xf] }
 0x1f5   : > { %6064 = vmatprep.mubr.msk.bf16.mxu1 %vm6500_vm1, %v8887_v39  ;;  %v3493_v33 = vsel %vm565_vm0, %v5260_v52, 0 }
 0x1f6   : > { %v2115_v24 = vpop.f32.mrb[128].mxu0  ;;  %v3923_v22 = vor.u32 %v3922_v3, %v3919_v36 }
 0x1f7   : > { %v1946_v6 = vpop.f32.mrb[128].mxu1  ;;  %v7941_v53 = vadd.f32 %v2115_v24, %v1992_v26  ;;  %v5856_v38 = vpop.f32.mrb[129].mxu0  ;;  %v3764_v26 = vrot.slane %v7693_v45, 1 }
 0x1f8   : > { %v1994_v60 = vadd.f32 %v1946_v6, %v7812_v30  ;;  %v5830_v23 = vpop.f32.mrb[129].mxu1  ;;  %v2118_v0 = vpop.f32.mrb[130].mxu0  ;;  %v7958_v5 = vsel %vm1067_vm5, %v3914_v7, %v3923_v22  ;;  %v5268_v7 = vld [vmem:[%s8862_s3 + $0x50] sm:$0xf]  ;;  %v7976_v38 = vcombine.low %v3253_v40, %v7595_v2 }
 0x1f9   : > { %v1949_v18 = vpop.f32.mrb[130].mxu1  ;;  %v7947_v14 = vadd.f32 %v2118_v0, %v1993_v21  ;;  %v5857_v16 = vpop.f32.mrb[131].mxu0  ;;  %v7955_v30 = vsel %vm772_vm4, %v3762_v63, %v3764_v26  ;;  %v3118_v21 = vrot.slane %v7275_v15, 3 }
 0x1fa   : > { %v1995_v37 = vadd.f32 %v1949_v18, %v7821_v28  ;;  %v5831_v9 = vpop.f32.mrb[131].mxu1  ;;  %v3926_v28 = vshrl.u32 %v7693_v45, 16 }
 0x1fb   : > { %6059 = vmatmul.mubr.msk.bf16.gmra.mrb[236].mxu0 %vm543_vm3, %v2986_v62  ;;  %v3929_v62 = vshll.u32 %v7693_v45, 16  ;;  %v3119_v18 = vsel %vm1700_vm8, %v3116_v42, %v3118_v21 }
 0x1fc   : > { %6065 = vmatmul.mubr.msk.bf16.vlgmr.msra.gmra.mrb[236].mxu1 %vm543_vm3, %v3117_v43  ;;  %6094 = vmatprep.mubr.msk.bf16.mxu0 %vm6500_vm1, %v8887_v39  ;;  %v3928_v52 = vrot.slane %v3926_v28, 1  ;;  %v3938_v28 = vshll.u32 %v7697_v56, 16 }
 0x1fd   : > { %6123 = vmatpush3.bf16.msra.mxu1 %v3493_v33  ;;  %6068 = vmatprep.mubr.msk.bf16.mxu1 %vm6500_vm1, %v8887_v39  ;;  %v3931_v36 = vrot.slane %v3929_v62, 2  ;;  %v3640_v33 = vsel %vm565_vm0, %v5268_v7, 0 }
 0x1fe   : > { %v2123_v63 = vpop.f32.mrb[132].mxu0  ;;  %6182 = vmatprep.subr.bf16.mxu1 %v8887_v39 }
 0x1ff   : > { %v1954_v24 = vpop.f32.mrb[132].mxu1  ;;  %v7973_v6 = vadd.f32 %v2123_v63, %v1994_v60  ;;  %v5860_v15 = vpop.f32.mrb[133].mxu0  ;;  %v3766_v60 = vrot.slane %v7697_v56, 1  ;;  %v3932_v63 = vor.u32 %v3931_v36, %v3928_v52 }
 0x200   : > { %v1996_v3 = vadd.f32 %v1954_v24, %v7833_v4  ;;  %v5834_v23 = vpop.f32.mrb[133].mxu1  ;;  %v2126_v0 = vpop.f32.mrb[134].mxu0  ;;  %v3940_v15 = vrot.slane %v3938_v28, 2 }
 0x201   : > { %v1957_v16 = vpop.f32.mrb[134].mxu1  ;;  %v7980_v43 = vadd.f32 %v2126_v0, %v1995_v37  ;;  %v5861_v9 = vpop.f32.mrb[135].mxu0  ;;  %v7988_v4 = vsel %vm772_vm4, %v3764_v26, %v3766_v60  ;;  %v7991_v42 = vsel %vm1067_vm5, %v3923_v22, %v3932_v63  ;;  %v3935_v37 = vshrl.u32 %v7697_v56, 16 }
 0x202   : > { %v1997_v2 = vadd.f32 %v1957_v16, %v7843_v34  ;;  %v5835_v40 = vpop.f32.mrb[135].mxu1  ;;  %v3120_v34 = vrot.slane %v7308_v55, 3  ;;  %v8883_v9 = vrot.slane %v7701_v29, 1 }
 0x203   : > { %6095 = vmatmul.mubr.msk.bf16.vlgmr.msra.gmra.mrb[240].mxu0 %vm543_vm3, %v7976_v38  ;;  %v3937_v24 = vrot.slane %v3935_v37, 1  ;;  %v3947_v37 = vshll.u32 %v7701_v29, 16 }
 0x204   : > { %6069 = vmatmul.mubr.msk.bf16.gmra.mrb[240].mxu1 %vm543_vm3, %v3119_v18  ;;  %6153 = vmatpush3.bf16.msra.mxu0 %v3640_v33  ;;  %v3121_v16 = vsel %vm1700_vm8, %v3118_v21, %v3120_v34  ;;  %v3944_v21 = vshrl.u32 %v7701_v29, 16 }
 0x205   : > { %6072 = vmatprep.mubr.msk.bf16.mxu1 %vm6500_vm1, %v8887_v39  ;;  %6098 = vmatprep.mubr.msk.bf16.mxu0 %vm6500_vm1, %v8887_v39  ;;  %v3941_v33 = vor.u32 %v3940_v15, %v3937_v24 }
 0x206   : > { %v2131_v26 = vpop.f32.mrb[136].mxu0  ;;  %6212 = vmatprep.subr.bf16.mxu0 %v8887_v39 }
 0x207   : > { %v1962_v22 = vpop.f32.mrb[136].mxu1  ;;  %v8002_v62 = vadd.f32 %v2131_v26, %v1996_v3  ;;  %v5864_v7 = vpop.f32.mrb[137].mxu0 }
 0x208   : > { %v1998_v52 = vadd.f32 %v1962_v22, %v7853_v49  ;;  %v5838_v36 = vpop.f32.mrb[137].mxu1  ;;  %v2134_v23 = vpop.f32.mrb[138].mxu0  ;;  %v8015_v49 = vsel %vm772_vm4, %v3766_v60, %v8883_v9  ;;  %v3946_v22 = vrot.slane %v3944_v21, 1  ;;  %v3949_v7 = vrot.slane %v3947_v37, 2 }
 0x209   : > { %v1965_v0 = vpop.f32.mrb[138].mxu1  ;;  %v8005_v18 = vadd.f32 %v2134_v23, %v1997_v2  ;;  %v5865_v55 = vpop.f32.mrb[139].mxu0  ;;  %v8018_v2 = vsel %vm1067_vm5, %v3932_v63, %v3941_v33  ;;  %v8053_v21 = vcombine.low %v7660_v17, %v7663_v47  ;;  %v3126_v17 = vrot.slane %v7874_v35, 3 }
 0x20a   : > { %v1999_v40 = vadd.f32 %v1965_v0, %v7862_v44  ;;  %v5839_v3 = vpop.f32.mrb[139].mxu1  ;;  %v3122_v44 = vrot.slane %v7338_v58, 3 }
 0x20b   : > { %6099 = vmatmul.mubr.msk.bf16.gmra.mrb[244].mxu0 %vm543_vm3, %v7755_v41 }
 0x20c   : > { %6073 = vmatmul.mubr.msk.bf16.gmra.mrb[244].mxu1 %vm543_vm3, %v3121_v16  ;;  %6102 = vmatprep.mubr.msk.bf16.mxu0 %vm6500_vm1, %v8887_v39  ;;  %v3123_v58 = vsel %vm1700_vm8, %v3120_v34, %v3122_v44  ;;  %v8034_v16 = vor.u32 %v3949_v7, %v3946_v22 }
 0x20d   : > { %6076 = vmatprep.mubr.msk.bf16.mxu1 %vm6500_vm1, %v8887_v39 }
 0x20e   : > { %v2139_v28 = vpop.f32.mrb[140].mxu0 }
 0x20f   : > { %v1970_v60 = vpop.f32.mrb[140].mxu1  ;;  %v8028_v26 = vadd.f32 %v2139_v28, %v1998_v52  ;;  %v5868_v63 = vpop.f32.mrb[141].mxu0  ;;  %v8041_v52 = vsel %vm1067_vm5, %v3941_v33, %v8034_v16 }
 0x210   : > { %v2000_v24 = vadd.f32 %v1970_v60, %v7880_v57  ;;  %v5842_v15 = vpop.f32.mrb[141].mxu1  ;;  %v2142_v36 = vpop.f32.mrb[142].mxu0  ;;  %v3124_v57 = vrot.slane %v7368_v48, 3 }
 0x211   : > { %v1973_v23 = vpop.f32.mrb[142].mxu1  ;;  %v8031_v0 = vadd.f32 %v2142_v36, %v1999_v40  ;;  %v5869_v55 = vpop.f32.mrb[143].mxu0 }
 0x212   : > { %v2001_v3 = vadd.f32 %v1973_v23, %v7885_v20  ;;  %v5843_v9 = vpop.f32.mrb[143].mxu1  ;;  %v3125_v7 = vsel %vm1700_vm8, %v3122_v44, %v3124_v57  ;;  %v4089_v44 = vrot.slane %v7639_v51, 2 }
 0x213   : > { %6103 = vmatmul.mubr.msk.bf16.gmra.mrb[248].mxu0 %vm543_vm3, %v7778_v1 }
 0x214   : > { %6077 = vmatmul.mubr.msk.bf16.gmra.mrb[248].mxu1 %vm543_vm3, %v3123_v58  ;;  %6106 = vmatprep.mubr.msk.bf16.mxu0 %vm6500_vm1, %v8887_v39 }
 0x215   : > { %6080 = vmatprep.mubr.msk.bf16.mxu1 %vm6500_vm1, %v8887_v39 }
 0x216   : > { %v2147_v34 = vpop.f32.mrb[144].mxu0 }
 0x217   : > { %v1978_v20 = vpop.f32.mrb[144].mxu1  ;;  %v8049_v9 = vadd.f32 %v2147_v34, %v2000_v24  ;;  %v5872_v40 = vpop.f32.mrb[145].mxu0 }
 0x218   : > { %v2002_v33 = vadd.f32 %v1978_v20, %v7901_v8  ;;  %v5846_v37 = vpop.f32.mrb[145].mxu1  ;;  %v2150_v28 = vpop.f32.mrb[146].mxu0  ;;  %v4088_v8 = vrot.slane %v7607_v10, 2 }
 0x219   : > { %v1981_v60 = vpop.f32.mrb[146].mxu1  ;;  %v8056_v63 = vadd.f32 %v2150_v28, %v2001_v3  ;;  %v5873_v22 = vpop.f32.mrb[147].mxu0  ;;  %v3127_v3 = vsel %vm1700_vm8, %v3124_v57, %v3126_v17 }
 0x21a   : > { %v2003_v48 = vadd.f32 %v1981_v60, %v7908_v32  ;;  %v5847_v15 = vpop.f32.mrb[147].mxu1  ;;  %v8072_v32 = vcombine.low %v7669_v25, %v7672_v12  ;;  %v8083_v51 = vsel %vm1257_vm6, %v4088_v8, %v4089_v44  ;;  %v3424_v25 = vshll.u32 %v7976_v38, 16 }
 0x21b   : > { %6107 = vmatmul.mubr.msk.bf16.gmra.mrb[252].mxu0 %vm543_vm3, %v8053_v21  ;;  %v4091_v8 = vrot.slane %v7679_v61, 2  ;;  %v8896_v61 = vshll.u32 %v7755_v41, 16 }
 0x21c   : > { %6081 = vmatmul.mubr.msk.bf16.gmra.mrb[252].mxu1 %vm543_vm3, %v3125_v7  ;;  %6110 = vmatprep.mubr.msk.bf16.mxu0 %vm6500_vm1, %v8887_v39  ;;  %v3422_v7 = vshrl.u32 %v7976_v38, 16 }
 0x21d   : > { %6084 = vmatprep.mubr.msk.bf16.mxu1 %vm6500_vm1, %v8887_v39 }
 0x21e   : > { %v2155_v47 = vpop.f32.mrb[148].mxu0 }
 0x21f   : > { %v1986_v24 = vpop.f32.mrb[148].mxu1  ;;  %v8074_v36 = vadd.f32 %v2155_v47, %v2002_v33  ;;  %v5876_v23 = vpop.f32.mrb[149].mxu0 }
 0x220   : > { %v2004_v55 = vadd.f32 %v1986_v24, %v7919_v31  ;;  %v2158_v58 = vpop.f32.mrb[150].mxu0  ;;  %v5850_v35 = vpop.f32.mrb[149].mxu1  ;;  %v8093_v31 = vcombine.low %v7675_v13, %v7686_v59  ;;  %v8104_v13 = vsel %vm1257_vm6, %v4089_v44, %v4091_v8 }
 0x221   : > { %v8078_v34 = vadd.f32 %v2158_v58, %v2003_v48  ;;  %v5877_v20 = vpop.f32.mrb[151].mxu0  ;;  %v1989_v10 = vpop.f32.mrb[150].mxu1  ;;  %v3426_v48 = vrot.slane %v3424_v25, 1 }
 0x222   : > { %v5851_v40 = vpop.f32.mrb[151].mxu1 }
 0x223   : > { %6111 = vmatmul.mubr.msk.bf16.gmra.mrb[0].mxu0 %vm543_vm3, %v8072_v32  ;;  %v3427_v59 = vor.u32 %v3426_v48, %v3422_v7 }
 0x224   : > { %6085 = vmatmul.mubr.msk.bf16.gmra.mrb[0].mxu1 %vm543_vm3, %v3127_v3  ;;  %6114 = vmatprep.mubr.msk.bf16.mxu0 %vm6500_vm1, %v8887_v39  ;;  %v8897_v3 = vld [vmem:[#allocation2_spill] sm:$0xff] }
 0x225   : > { %6088 = vmatprep.mubr.msk.bf16.mxu1 %vm6500_vm1, %v8887_v39  ;;  %v5250_v44 = vcombine.low %v8897_v3, %v8897_v3  ;;  %v3442_v3 = vshll.u32 %v8053_v21, 16 }
 0x226   : > { %v2163_v12 = vpop.f32.mrb[152].mxu0 }
 0x227   : > { %v8095_v57 = vadd.f32 %v2163_v12, %v2004_v55  ;;  %v2262_v33 = vpop.f32.mrb[152].mxu1  ;;  %v5880_v37 = vpop.f32.mrb[153].mxu0 }
 0x228   : > { %v2316_v28 = vadd.f32 %v2262_v33, %v7941_v53  ;;  %v5886_v60 = vpop.f32.mrb[153].mxu1  ;;  %v2166_v22 = vpop.f32.mrb[154].mxu0  ;;  %v3430_v53 = vrot.slane %v8896_v61, 1 }
 0x229   : > { %v2265_v15 = vpop.f32.mrb[154].mxu1  ;;  %v5881_v47 = vpop.f32.mrb[155].mxu0 }
 0x22a   : > { %v2317_v24 = vadd.f32 %v2265_v15, %v7947_v14  ;;  %v5887_v23 = vpop.f32.mrb[155].mxu1  ;;  %v3431_v37 = vsel %vm487_vm2, %v3427_v59, %v3430_v53  ;;  %v3606_v15 = vrot.slane %v7755_v41, 1  ;;  %v8899_v47 = vshll.u32 %v7778_v1, 16 }
 0x22b   : > { %6115 = vmatmul.mubr.msk.bf16.gmra.mrb[4].mxu0 %vm543_vm3, %v8093_v31 }
 0x22c   : > { %6089 = vmatmul.mubr.msk.bf16.gmra.mrb[4].mxu1 %vm543_vm3, %v3126_v17  ;;  %6118 = vmatprep.mubr.msk.bf16.mxu0 %vm6500_vm1, %v8887_v39  ;;  %v5283_v17 = vld [vmem:[%s8862_s3 + $0x54] sm:$0xf] }
 0x22d   : > { %6124 = vmatprep.mubr.msk.bf16.mxu1 %vm6500_vm1, %v8887_v39  ;;  %v3794_v7 = vsel %vm565_vm0, %v5283_v17, 0 }
 0x22e   : > { %v2416_v14 = vpop.f32.mrb[156].mxu0 }
 0x22f   : > { %v2270_v55 = vpop.f32.mrb[156].mxu1  ;;  %v8113_v58 = vadd.f32 %v2416_v14, %v2316_v28  ;;  %v5916_v35 = vpop.f32.mrb[157].mxu0  ;;  %v4093_v28 = vrot.slane %v7693_v45, 2  ;;  %v8898_v45 = vshrl.u32 %v7755_v41, 16 }
 0x230   : > { %v2318_v20 = vadd.f32 %v2270_v55, %v7973_v6  ;;  %v5890_v10 = vpop.f32.mrb[157].mxu1  ;;  %v2419_v40 = vpop.f32.mrb[158].mxu0  ;;  %v3605_v6 = vrot.slane %v7976_v38, 1  ;;  %v5291_v38 = vld [vmem:[%s8862_s3 + $0x58] sm:$0xf] }
 0x231   : > { %v2273_v25 = vpop.f32.mrb[158].mxu1  ;;  %v8121_v12 = vadd.f32 %v2419_v40, %v2317_v24  ;;  %v5917_v33 = vpop.f32.mrb[159].mxu0  ;;  %v8129_v48 = vsel %vm1257_vm6, %v4091_v8, %v4093_v28  ;;  %v3437_v8 = vrot.slane %v8899_v47, 1 }
 0x232   : > { %v2319_v60 = vadd.f32 %v2273_v25, %v7980_v43  ;;  %v5891_v22 = vpop.f32.mrb[159].mxu1  ;;  %v3434_v43 = vor.u32 %v8898_v45, %v3430_v53  ;;  %v3607_v53 = vsel %vm772_vm4, %v3605_v6, %v3606_v15  ;;  %v3983_v25 = vsel %vm565_vm0, %v5291_v38, 0 }
 0x233   : > { %6119 = vmatmul.mubr.msk.bf16.gmra.mrb[8].mxu0 %vm543_vm3, %v5250_v44  ;;  %v3608_v6 = vrot.slane %v7778_v1, 1 }
 0x234   : > { %6125 = vmatmul.mubr.msk.bf16.vlgmr.msra.gmra.mrb[8].mxu1 %vm543_vm3, %v3431_v37  ;;  %6154 = vmatprep.mubr.msk.bf16.mxu0 %vm6500_vm1, %v8887_v39  ;;  %v3438_v40 = vsel %vm487_vm2, %v3434_v43, %v3437_v8 }
 0x235   : > { %6183 = vmatpush3.bf16.msra.mxu1 %v3794_v7  ;;  %6128 = vmatprep.mubr.msk.bf16.mxu1 %vm6500_vm1, %v8887_v39  ;;  %v3444_v7 = vrot.slane %v3442_v3, 1  ;;  %v3609_v38 = vsel %vm772_vm4, %v3606_v15, %v3608_v6  ;;  %v3610_v15 = vrot.slane %v8053_v21, 1 }
 0x236   : > { %v2424_v24 = vpop.f32.mrb[160].mxu0  ;;  %6242 = vmatprep.subr.bf16.mxu1 %v8887_v39 }
 0x237   : > { %v2278_v23 = vpop.f32.mrb[160].mxu1  ;;  %v8146_v59 = vadd.f32 %v2424_v24, %v2318_v20  ;;  %v5920_v61 = vpop.f32.mrb[161].mxu0  ;;  %v4095_v20 = vrot.slane %v7697_v56, 2 }
 0x238   : > { %v2320_v14 = vadd.f32 %v2278_v23, %v8002_v62  ;;  %v5894_v55 = vpop.f32.mrb[161].mxu1  ;;  %v2427_v35 = vpop.f32.mrb[162].mxu0 }
 0x239   : > { %v2281_v44 = vpop.f32.mrb[162].mxu1  ;;  %v8151_v17 = vadd.f32 %v2427_v35, %v2319_v60  ;;  %v5921_v10 = vpop.f32.mrb[163].mxu0  ;;  %v8159_v62 = vsel %vm1257_vm6, %v4093_v28, %v4095_v20  ;;  %v8900_v60 = vshrl.u32 %v7778_v1, 16  ;;  %v3446_v35 = vshrl.u32 %v8053_v21, 16 }
 0x23a   : > { %v2321_v33 = vadd.f32 %v2281_v44, %v8005_v18  ;;  %v5895_v37 = vpop.f32.mrb[163].mxu1 }
 0x23b   : > { %6155 = vmatmul.mubr.msk.bf16.vlgmr.msra.gmra.mrb[12].mxu0 %vm543_vm3, %v3607_v53  ;;  %v3441_v22 = vor.u32 %v8900_v60, %v3437_v8  ;;  %v3449_v53 = vshll.u32 %v8072_v32, 16 }
 0x23c   : > { %6129 = vmatmul.mubr.msk.bf16.gmra.mrb[12].mxu1 %vm543_vm3, %v3438_v40  ;;  %6213 = vmatpush3.bf16.msra.mxu0 %v3983_v25 }
 0x23d   : > { %6132 = vmatprep.mubr.msk.bf16.mxu1 %vm6500_vm1, %v8887_v39  ;;  %6158 = vmatprep.mubr.msk.bf16.mxu0 %vm6500_vm1, %v8887_v39  ;;  %v3445_v24 = vsel %vm487_vm2, %v3441_v22, %v3444_v7  ;;  %v3451_v40 = vrot.slane %v3449_v53, 1 }
 0x23e   : > { %v2432_v56 = vpop.f32.mrb[164].mxu0  ;;  %6272 = vmatprep.subr.bf16.mxu0 %v8887_v39 }
 0x23f   : > { %v2286_v18 = vpop.f32.mrb[164].mxu1  ;;  %v8172_v28 = vadd.f32 %v2432_v56, %v2320_v14  ;;  %v5924_v45 = vpop.f32.mrb[165].mxu0  ;;  %v4097_v14 = vrot.slane %v7701_v29, 2 }
 0x240   : > { %v2322_v43 = vadd.f32 %v2286_v18, %v8028_v26  ;;  %v5898_v47 = vpop.f32.mrb[165].mxu1  ;;  %v2435_v8 = vpop.f32.mrb[166].mxu0  ;;  %v3611_v18 = vsel %vm772_vm4, %v3608_v6, %v3610_v15  ;;  %v3612_v6 = vrot.slane %v8072_v32, 1 }
 0x241   : > { %v2289_v23 = vpop.f32.mrb[166].mxu1  ;;  %v8177_v61 = vadd.f32 %v2435_v8, %v2321_v33  ;;  %v5925_v55 = vpop.f32.mrb[167].mxu0  ;;  %v8187_v26 = vsel %vm1257_vm6, %v4095_v20, %v4097_v14 }
 0x242   : > { %v2323_v44 = vadd.f32 %v2289_v23, %v8031_v0  ;;  %v5899_v10 = vpop.f32.mrb[167].mxu1  ;;  %v3448_v0 = vor.u32 %v3446_v35, %v3444_v7  ;;  %v6458_v55 = vld [vmem:[%s7586_s24 + $0x30] sm:$0xf] }
 0x243   : > { %6159 = vmatmul.mubr.msk.bf16.gmra.mrb[16].mxu0 %vm543_vm3, %v3609_v38  ;;  %v8884_v38 = vshll.u32 %v8093_v31, 16 }
 0x244   : > { %6133 = vmatmul.mubr.msk.bf16.gmra.mrb[16].mxu1 %vm543_vm3, %v3445_v24  ;;  %6162 = vmatprep.mubr.msk.bf16.mxu0 %vm6500_vm1, %v8887_v39  ;;  %v3452_v8 = vsel %vm487_vm2, %v3448_v0, %v3451_v40  ;;  %v3453_v24 = vshrl.u32 %v8072_v32, 16 }
 0x245   : > { %6136 = vmatprep.mubr.msk.bf16.mxu1 %vm6500_vm1, %v8887_v39  ;;  %v3458_v10 = vrot.slane %v8884_v38, 1 }
 0x246   : > { %v2440_v25 = vpop.f32.mrb[168].mxu0 }
 0x247   : > { %v2294_v20 = vpop.f32.mrb[168].mxu1  ;;  %v8199_v33 = vadd.f32 %v2440_v25, %v2322_v43  ;;  %v5928_v37 = vpop.f32.mrb[169].mxu0  ;;  %v8209_v43 = vld [vmem:[%s7586_s24 + $0x34] sm:$0xf] }
 0x248   : > { %v2324_v60 = vadd.f32 %v2294_v20, %v8049_v9  ;;  %v5902_v22 = vpop.f32.mrb[169].mxu1  ;;  %v2443_v56 = vpop.f32.mrb[170].mxu0 }
 0x249   : > { %v2297_v45 = vpop.f32.mrb[170].mxu1  ;;  %v8203_v47 = vadd.f32 %v2443_v56, %v2323_v44  ;;  %v5929_v7 = vpop.f32.mrb[171].mxu0  ;;  %v8219_v44 = vcombine.low %v6458_v55, %v8209_v43  ;;  %v8885_v55 = vshrl.u32 %v8093_v31, 16 }
 0x24a   : > { %v2325_v23 = vadd.f32 %v2297_v45, %v8056_v63  ;;  %v5903_v9 = vpop.f32.mrb[171].mxu1  ;;  %v3455_v63 = vor.u32 %v3453_v24, %v3451_v40  ;;  %v3613_v45 = vsel %vm772_vm4, %v3610_v15, %v3612_v6 }
 0x24b   : > { %6163 = vmatmul.mubr.msk.bf16.gmra.mrb[20].mxu0 %vm543_vm3, %v3611_v18  ;;  %v3464_v38 = vshll.u32 %v8219_v44, 16  ;;  %v3462_v15 = vor.u32 %v8885_v55, %v3458_v10 }
 0x24c   : > { %6137 = vmatmul.mubr.msk.bf16.gmra.mrb[20].mxu1 %vm543_vm3, %v3452_v8  ;;  %6166 = vmatprep.mubr.msk.bf16.mxu0 %vm6500_vm1, %v8887_v39  ;;  %v3459_v40 = vsel %vm487_vm2, %v3455_v63, %v3458_v10 }
 0x24d   : > { %6140 = vmatprep.mubr.msk.bf16.mxu1 %vm6500_vm1, %v8887_v39 }
 0x24e   : > { %v2448_v0 = vpop.f32.mrb[172].mxu0 }
 0x24f   : > { %v2302_v25 = vpop.f32.mrb[172].mxu1  ;;  %v8227_v20 = vadd.f32 %v2448_v0, %v2324_v60  ;;  %v5932_v37 = vpop.f32.mrb[173].mxu0 }
 0x250   : > { %v2326_v22 = vadd.f32 %v2302_v25, %v8074_v36  ;;  %v5906_v56 = vpop.f32.mrb[173].mxu1  ;;  %v2451_v18 = vpop.f32.mrb[174].mxu0  ;;  %v3614_v36 = vrot.slane %v8093_v31, 1 }
 0x251   : > { %v2305_v7 = vpop.f32.mrb[174].mxu1  ;;  %v8231_v8 = vadd.f32 %v2451_v18, %v2325_v23  ;;  %v5933_v9 = vpop.f32.mrb[175].mxu0  ;;  %v3466_v23 = vrot.slane %v3464_v38, 1 }
 0x252   : > { %v2327_v60 = vadd.f32 %v2305_v7, %v8078_v34  ;;  %v5907_v0 = vpop.f32.mrb[175].mxu1  ;;  %v3615_v7 = vsel %vm772_vm4, %v3612_v6, %v3614_v36  ;;  %v3616_v6 = vrot.slane %v8219_v44, 1 }
 0x253   : > { %6167 = vmatmul.mubr.msk.bf16.gmra.mrb[24].mxu0 %vm543_vm3, %v3613_v45  ;;  %v3467_v10 = vsel %vm487_vm2, %v3462_v15, %v3466_v23 }
 0x254   : > { %6141 = vmatmul.mubr.msk.bf16.gmra.mrb[24].mxu1 %vm543_vm3, %v3459_v40  ;;  %6170 = vmatprep.mubr.msk.bf16.mxu0 %vm6500_vm1, %v8887_v39 }
 0x255   : > { %6144 = vmatprep.mubr.msk.bf16.mxu1 %vm6500_vm1, %v8887_v39 }
 0x256   : > { %v2456_v34 = vpop.f32.mrb[176].mxu0 }
 0x257   : > { %v2310_v63 = vpop.f32.mrb[176].mxu1  ;;  %v8248_v25 = vadd.f32 %v2456_v34, %v2326_v22  ;;  %v5936_v37 = vpop.f32.mrb[177].mxu0  ;;  %v8901_v22 = vor.u32 %v7770_v50, %v7766_v11 }
 0x258   : > { %v2328_v56 = vadd.f32 %v2310_v63, %v8095_v57  ;;  %v2459_v18 = vpop.f32.mrb[178].mxu0  ;;  %v5910_v45 = vpop.f32.mrb[177].mxu1  ;;  %v3468_v57 = vshrl.u32 %v8219_v44, 16 }
 0x259   : > { %v8252_v9 = vadd.f32 %v2459_v18, %v2327_v60  ;;  %v5937_v40 = vpop.f32.mrb[179].mxu0  ;;  %v2313_v0 = vpop.f32.mrb[178].mxu1  ;;  %v8261_v34 = vsel %vm1540_vm7, %v8901_v22, %v7810_v19  ;;  %v3617_v45 = vsel %vm772_vm4, %v3614_v36, %v3616_v6 }
 0x25a   : > { %v5911_v55 = vpop.f32.mrb[179].mxu1  ;;  %v3470_v50 = vor.u32 %v3468_v57, %v3466_v23 }
 0x25b   : > { %6171 = vmatmul.mubr.msk.bf16.gmra.mrb[28].mxu0 %vm543_vm3, %v3615_v7 }
 0x25c   : > { %6145 = vmatmul.mubr.msk.bf16.gmra.mrb[28].mxu1 %vm543_vm3, %v3467_v10  ;;  %6174 = vmatprep.mubr.msk.bf16.mxu0 %vm6500_vm1, %v8887_v39 }
 0x25d   : > { %6148 = vmatprep.mubr.msk.bf16.mxu1 %vm6500_vm1, %v8887_v39 }
 0x25e   : > { %v2464_v55 = vpop.f32.mrb[180].mxu0 }
 0x25f   : > { %v8270_v60 = vadd.f32 %v2464_v55, %v2328_v56  ;;  %v2605_v15 = vpop.f32.mrb[180].mxu1  ;;  %v5940_v11 = vpop.f32.mrb[181].mxu0 }
 0x260   : > { %v2659_v63 = vadd.f32 %v2605_v15, %v8113_v58  ;;  %v5946_v37 = vpop.f32.mrb[181].mxu1  ;;  %v2467_v18 = vpop.f32.mrb[182].mxu0 }
 0x261   : > { %v2608_v7 = vpop.f32.mrb[182].mxu1  ;;  %v5941_v40 = vpop.f32.mrb[183].mxu0 }
 0x262   : > { %v2660_v0 = vadd.f32 %v2608_v7, %v8121_v12  ;;  %v5947_v10 = vpop.f32.mrb[183].mxu1  ;;  %v5299_v12 = vld [vmem:[%s8862_s3 + $0x5c] sm:$0xf] }
 0x263   : > { %6175 = vmatmul.mubr.msk.bf16.gmra.mrb[32].mxu0 %vm543_vm3, %v3617_v45  ;;  %v4123_v7 = vsel %vm565_vm0, %v5299_v12, 0 }
 0x264   : > { %6149 = vmatmul.mubr.msk.bf16.gmra.mrb[32].mxu1 %vm543_vm3, %v3470_v50  ;;  %6178 = vmatprep.mubr.msk.bf16.mxu0 %vm6500_vm1, %v8887_v39 }
 0x265   : > { %6184 = vmatprep.mubr.msk.bf16.mxu1 %vm6500_vm1, %v8887_v39 }
 0x266   : > { %v2745_v58 = vpop.f32.mrb[184].mxu0 }
 0x267   : > { %v2613_v23 = vpop.f32.mrb[184].mxu1  ;;  %v8283_v56 = vadd.f32 %v2745_v58, %v2659_v63  ;;  %v5976_v36 = vpop.f32.mrb[185].mxu0 }
 0x268   : > { %v2661_v22 = vadd.f32 %v2613_v23, %v8146_v59  ;;  %v5950_v55 = vpop.f32.mrb[185].mxu1  ;;  %v2748_v15 = vpop.f32.mrb[186].mxu0 }
 0x269   : > { %v2616_v11 = vpop.f32.mrb[186].mxu1  ;;  %v8289_v50 = vadd.f32 %v2748_v15, %v2660_v0  ;;  %v5977_v37 = vpop.f32.mrb[187].mxu0 }
 0x26a   : > { %v2662_v18 = vadd.f32 %v2616_v11, %v8151_v17  ;;  %v5951_v45 = vpop.f32.mrb[187].mxu1  ;;  %v5308_v17 = vld [vmem:[%s8862_s3 + $0x60] sm:$0xf] }
 0x26b   : > { %6179 = vmatmul.mubr.msk.bf16.gmra.mrb[36].mxu0 %vm543_vm3, %v3616_v6  ;;  %v4265_v12 = vsel %vm565_vm0, %v5308_v17, 0 }
 0x26c   : > { %6185 = vmatmul.mubr.msk.bf16.vlgmr.msra.gmra.mrb[36].mxu1 %vm543_vm3, %v7912_v27  ;;  %6214 = vmatprep.mubr.msk.bf16.mxu0 %vm6500_vm1, %v8887_v39 }
 0x26d   : > { %6243 = vmatpush3.bf16.msra.mxu1 %v4123_v7  ;;  %6188 = vmatprep.mubr.msk.bf16.mxu1 %vm6500_vm1, %v8887_v39 }
 0x26e   : > { %v2753_v59 = vpop.f32.mrb[188].mxu0  ;;  %6302 = vmatprep.subr.bf16.mxu1 %v8887_v39 }
 0x26f   : > { %v2621_v63 = vpop.f32.mrb[188].mxu1  ;;  %v8304_v40 = vadd.f32 %v2753_v59, %v2661_v22  ;;  %v5980_v6 = vpop.f32.mrb[189].mxu0 }
 0x270   : > { %v2663_v27 = vadd.f32 %v2621_v63, %v8172_v28  ;;  %v5954_v0 = vpop.f32.mrb[189].mxu1  ;;  %v2756_v10 = vpop.f32.mrb[190].mxu0 }
 0x271   : > { %v2624_v58 = vpop.f32.mrb[190].mxu1  ;;  %v8307_v23 = vadd.f32 %v2756_v10, %v2662_v18  ;;  %v5981_v36 = vpop.f32.mrb[191].mxu0 }
 0x272   : > { %v2664_v55 = vadd.f32 %v2624_v58, %v8177_v61  ;;  %v5955_v15 = vpop.f32.mrb[191].mxu1 }
 0x273   : > { %6215 = vmatmul.mubr.msk.bf16.vlgmr.msra.gmra.mrb[40].mxu0 %vm543_vm3, %v7930_v54 }
 0x274   : > { %6189 = vmatmul.mubr.msk.bf16.gmra.mrb[40].mxu1 %vm543_vm3, %v7927_v46  ;;  %6273 = vmatpush3.bf16.msra.mxu0 %v4265_v12 }
 0x275   : > { %6192 = vmatprep.mubr.msk.bf16.mxu1 %vm6500_vm1, %v8887_v39  ;;  %6218 = vmatprep.mubr.msk.bf16.mxu0 %vm6500_vm1, %v8887_v39 }
 0x276   : > { %v2761_v28 = vpop.f32.mrb[192].mxu0  ;;  %6332 = vmatprep.subr.bf16.mxu0 %v8887_v39 }
 0x277   : > { %v2629_v22 = vpop.f32.mrb[192].mxu1  ;;  %v8320_v11 = vadd.f32 %v2761_v28, %v2663_v27  ;;  %v5984_v61 = vpop.f32.mrb[193].mxu0 }
 0x278   : > { %v2665_v37 = vadd.f32 %v2629_v22, %v8199_v33  ;;  %v5958_v54 = vpop.f32.mrb[193].mxu1  ;;  %v2764_v18 = vpop.f32.mrb[194].mxu0 }
 0x279   : > { %v2632_v45 = vpop.f32.mrb[194].mxu1  ;;  %v8323_v46 = vadd.f32 %v2764_v18, %v2664_v55  ;;  %v5985_v7 = vpop.f32.mrb[195].mxu0  ;;  %v8349_v55 = vld [vmem:[%s7586_s24 + $0x38] sm:$0xf] }
 0x27a   : > { %v2666_v59 = vadd.f32 %v2632_v45, %v8203_v47  ;;  %v5959_v17 = vpop.f32.mrb[195].mxu1  ;;  %v8358_v18 = vcombine.low %v8209_v43, %v8349_v55 }
 0x27b   : > { %6219 = vmatmul.mubr.msk.bf16.gmra.mrb[44].mxu0 %vm543_vm3, %v7958_v5 }
 0x27c   : > { %6193 = vmatmul.mubr.msk.bf16.gmra.mrb[44].mxu1 %vm543_vm3, %v7955_v30  ;;  %6222 = vmatprep.mubr.msk.bf16.mxu0 %vm6500_vm1, %v8887_v39  ;;  %v3770_v43 = vrot.slane %v8358_v18, 1 }
 0x27d   : > { %6196 = vmatprep.mubr.msk.bf16.mxu1 %vm6500_vm1, %v8887_v39 }
 0x27e   : > { %v2769_v33 = vpop.f32.mrb[196].mxu0 }
 0x27f   : > { %v2637_v63 = vpop.f32.mrb[196].mxu1  ;;  %v8334_v6 = vadd.f32 %v2769_v33, %v2665_v37  ;;  %v5988_v27 = vpop.f32.mrb[197].mxu0 }
 0x280   : > { %v2667_v47 = vadd.f32 %v2637_v63, %v8227_v20  ;;  %v5962_v0 = vpop.f32.mrb[197].mxu1  ;;  %v2772_v10 = vpop.f32.mrb[198].mxu0 }
 0x281   : > { %v2640_v5 = vpop.f32.mrb[198].mxu1  ;;  %v8337_v58 = vadd.f32 %v2772_v10, %v2666_v59  ;;  %v5989_v30 = vpop.f32.mrb[199].mxu0  ;;  %v3956_v59 = vshll.u32 %v8358_v18, 16 }
 0x282   : > { %v2668_v36 = vadd.f32 %v2640_v5, %v8231_v8  ;;  %v5963_v12 = vpop.f32.mrb[199].mxu1 }
 0x283   : > { %6223 = vmatmul.mubr.msk.bf16.gmra.mrb[48].mxu0 %vm543_vm3, %v7991_v42  ;;  %v3958_v0 = vrot.slane %v3956_v59, 2 }
 0x284   : > { %6197 = vmatmul.mubr.msk.bf16.gmra.mrb[48].mxu1 %vm543_vm3, %v7988_v4  ;;  %6226 = vmatprep.mubr.msk.bf16.mxu0 %vm6500_vm1, %v8887_v39 }
 0x285   : > { %6200 = vmatprep.mubr.msk.bf16.mxu1 %vm6500_vm1, %v8887_v39 }
 0x286   : > { %v2777_v20 = vpop.f32.mrb[200].mxu0 }
 0x287   : > { %v2645_v15 = vpop.f32.mrb[200].mxu1  ;;  %v8351_v28 = vadd.f32 %v2777_v20, %v2667_v47  ;;  %v5992_v8 = vpop.f32.mrb[201].mxu0 }
 0x288   : > { %v2669_v22 = vadd.f32 %v2645_v15, %v8248_v25  ;;  %v5966_v61 = vpop.f32.mrb[201].mxu1  ;;  %v2780_v42 = vpop.f32.mrb[202].mxu0  ;;  %v3953_v25 = vshrl.u32 %v8358_v18, 16 }
 0x289   : > { %v2648_v37 = vpop.f32.mrb[202].mxu1  ;;  %v8354_v54 = vadd.f32 %v2780_v42, %v2668_v36  ;;  %v5993_v4 = vpop.f32.mrb[203].mxu0  ;;  %v8902_v36 = vrot.slane %v7701_v29, 1 }
 0x28a   : > { %v2670_v45 = vadd.f32 %v2648_v37, %v8252_v9  ;;  %v5967_v7 = vpop.f32.mrb[203].mxu1  ;;  %v3955_v47 = vrot.slane %v3953_v25, 1 }
 0x28b   : > { %6227 = vmatmul.mubr.msk.bf16.gmra.mrb[52].mxu0 %vm543_vm3, %v8018_v2  ;;  %v3771_v12 = vsel %vm772_vm4, %v8902_v36, %v3770_v43  ;;  %v4231_v36 = vrot.slane %v7778_v1, 2 }
 0x28c   : > { %6201 = vmatmul.mubr.msk.bf16.gmra.mrb[52].mxu1 %vm543_vm3, %v8015_v49  ;;  %6230 = vmatprep.mubr.msk.bf16.mxu0 %vm6500_vm1, %v8887_v39 }
 0x28d   : > { %6204 = vmatprep.mubr.msk.bf16.mxu1 %vm6500_vm1, %v8887_v39 }
 0x28e   : > { %v2785_v9 = vpop.f32.mrb[204].mxu0 }
 0x28f   : > { %v2653_v17 = vpop.f32.mrb[204].mxu1  ;;  %v8372_v33 = vadd.f32 %v2785_v9, %v2669_v22  ;;  %v5996_v2 = vpop.f32.mrb[205].mxu0 }
 0x290   : > { %v2671_v63 = vadd.f32 %v2653_v17, %v8270_v60  ;;  %v2788_v49 = vpop.f32.mrb[206].mxu0  ;;  %v5970_v27 = vpop.f32.mrb[205].mxu1  ;;  %v3959_v60 = vor.u32 %v3958_v0, %v3955_v47 }
 0x291   : > { %v8375_v10 = vadd.f32 %v2788_v49, %v2670_v45  ;;  %v5997_v5 = vpop.f32.mrb[207].mxu0  ;;  %v2656_v30 = vpop.f32.mrb[206].mxu1 }
 0x292   : > { %v5971_v20 = vpop.f32.mrb[207].mxu1 }
 0x293   : > { %6231 = vmatmul.mubr.msk.bf16.gmra.mrb[56].mxu0 %vm543_vm3, %v8041_v52  ;;  %v3960_v52 = vsel %vm1067_vm5, %v8034_v16, %v3959_v60 }
 0x294   : > { %6205 = vmatmul.mubr.msk.bf16.gmra.mrb[56].mxu1 %vm543_vm3, %v3771_v12  ;;  %6234 = vmatprep.mubr.msk.bf16.mxu0 %vm6500_vm1, %v8887_v39  ;;  %v5324_v12 = vld [vmem:[%s8862_s3 + $0x68] sm:$0xf] }
 0x295   : > { %6208 = vmatprep.mubr.msk.bf16.mxu1 %vm6500_vm1, %v8887_v39 }
 0x296   : > { %v2793_v15 = vpop.f32.mrb[208].mxu0 }
 0x297   : > { %v8387_v8 = vadd.f32 %v2793_v15, %v2671_v63  ;;  %v2887_v22 = vpop.f32.mrb[208].mxu1  ;;  %v6000_v61 = vpop.f32.mrb[209].mxu0 }
 0x298   : > { %v2941_v42 = vadd.f32 %v2887_v22, %v8283_v56  ;;  %v6006_v37 = vpop.f32.mrb[209].mxu1  ;;  %v2796_v4 = vpop.f32.mrb[210].mxu0 }
 0x299   : > { %v2890_v45 = vpop.f32.mrb[210].mxu1  ;;  %v6001_v7 = vpop.f32.mrb[211].mxu0 }
 0x29a   : > { %v2942_v25 = vadd.f32 %v2890_v45, %v8289_v50  ;;  %v6007_v59 = vpop.f32.mrb[211].mxu1  ;;  %v5316_v50 = vld [vmem:[%s8862_s3 + $0x64] sm:$0xf]  ;;  %v4564_v45 = vsel %vm565_vm0, %v5324_v12, 0 }
 0x29b   : > { %6235 = vmatmul.mubr.msk.bf16.gmra.mrb[60].mxu0 %vm543_vm3, %v3960_v52  ;;  %v4424_v30 = vsel %vm565_vm0, %v5316_v50, 0 }
 0x29c   : > { %6209 = vmatmul.mubr.msk.bf16.gmra.mrb[60].mxu1 %vm543_vm3, %v3770_v43  ;;  %6238 = vmatprep.mubr.msk.bf16.mxu0 %vm6500_vm1, %v8887_v39 }
 0x29d   : > { %6244 = vmatprep.mubr.msk.bf16.mxu1 %vm6500_vm1, %v8887_v39 }
 0x29e   : > { %v3046_v56 = vpop.f32.mrb[212].mxu0 }
 0x29f   : > { %v2895_v9 = vpop.f32.mrb[212].mxu1  ;;  %v8399_v17 = vadd.f32 %v3046_v56, %v2941_v42  ;;  %v6036_v16 = vpop.f32.mrb[213].mxu0 }
 0x2a0   : > { %v2943_v2 = vadd.f32 %v2895_v9, %v8304_v40  ;;  %v6010_v63 = vpop.f32.mrb[213].mxu1  ;;  %v3049_v49 = vpop.f32.mrb[214].mxu0  ;;  %v4230_v40 = vrot.slane %v7755_v41, 2 }
 0x2a1   : > { %v2898_v43 = vpop.f32.mrb[214].mxu1  ;;  %v8405_v27 = vadd.f32 %v3049_v49, %v2942_v25  ;;  %v6037_v47 = vpop.f32.mrb[215].mxu0 }
 0x2a2   : > { %v2944_v0 = vadd.f32 %v2898_v43, %v8307_v23  ;;  %v6011_v5 = vpop.f32.mrb[215].mxu1  ;;  %v4232_v42 = vsel %vm1257_vm6, %v4230_v40, %v4231_v36 }
 0x2a3   : > { %6239 = vmatmul.mubr.msk.bf16.gmra.mrb[64].mxu0 %vm543_vm3, %v3959_v60 }
 0x2a4   : > { %6245 = vmatmul.mubr.msk.bf16.vlgmr.msra.gmra.mrb[64].mxu1 %vm543_vm3, %v8083_v51  ;;  %6274 = vmatprep.mubr.msk.bf16.mxu0 %vm6500_vm1, %v8887_v39 }
 0x2a5   : > { %6303 = vmatpush3.bf16.msra.mxu1 %v4424_v30  ;;  %6248 = vmatprep.mubr.msk.bf16.mxu1 %vm6500_vm1, %v8887_v39 }
 0x2a6   : > { %v3054_v23 = vpop.f32.mrb[216].mxu0 }
 0x2a7   : > { %v2903_v20 = vpop.f32.mrb[216].mxu1  ;;  %v8421_v60 = vadd.f32 %v3054_v23, %v2943_v2  ;;  %v6040_v51 = vpop.f32.mrb[217].mxu0 }
 0x2a8   : > { %v2945_v15 = vadd.f32 %v2903_v20, %v8320_v11  ;;  %v6014_v22 = vpop.f32.mrb[217].mxu1  ;;  %v3057_v61 = vpop.f32.mrb[218].mxu0  ;;  %v4233_v11 = vrot.slane %v8053_v21, 2 }
 0x2a9   : > { %v2906_v37 = vpop.f32.mrb[218].mxu1  ;;  %v8425_v4 = vadd.f32 %v3057_v61, %v2944_v0  ;;  %v6041_v52 = vpop.f32.mrb[219].mxu0 }
 0x2aa   : > { %v2946_v7 = vadd.f32 %v2906_v37, %v8323_v46  ;;  %v6015_v25 = vpop.f32.mrb[219].mxu1  ;;  %v6501_v37 = vmov 0  }
 0x2ab   : > { %6275 = vmatmul.mubr.msk.bf16.vlgmr.msra.gmra.mrb[68].mxu0 %vm543_vm3, %v4232_v42  ;;  %v4746_v42 = vld [vmem:[%s8865_s6] sm:$0xff]  ;;  %6408 = vset.pattern.permute.xlu0 %v6501_v37 }
 0x2ac   : > { %6249 = vmatmul.mubr.msk.bf16.gmra.mrb[68].mxu1 %vm543_vm3, %v8104_v13  ;;  %6333 = vmatpush3.bf16.msra.mxu0 %v4564_v45  ;;  %v4234_v13 = vsel %vm1257_vm6, %v4231_v36, %v4233_v11 }
 0x2ad   : > { %6252 = vmatprep.mubr.msk.bf16.mxu1 %vm6500_vm1, %v8887_v39  ;;  %6278 = vmatprep.mubr.msk.bf16.mxu0 %vm6500_vm1, %v8887_v39 }
 0x2ae   : > { %v3062_v59 = vpop.f32.mrb[220].mxu0  ;;  %4761 = vperm.xlu0 %6408, %v4746_v42   ;;  %6409 = vset.pattern.permute.xlu1 %v6501_v37  ;;  %v4754_v42 = vld [vmem:[%s8865_s6 + $0x40] sm:$0xff] }
 0x2af   : > { %v2911_v56 = vpop.f32.mrb[220].mxu1  ;;  %v8437_v9 = vadd.f32 %v3062_v59, %v2945_v15  ;;  %v6044_v46 = vpop.f32.mrb[221].mxu0 }
 0x2b0   : > { %v2947_v16 = vadd.f32 %v2911_v56, %v8334_v6  ;;  %v6018_v50 = vpop.f32.mrb[221].mxu1  ;;  %v3065_v2 = vpop.f32.mrb[222].mxu0  ;;  %v4235_v6 = vrot.slane %v8072_v32, 2 }
 0x2b1   : > { %v2914_v63 = vpop.f32.mrb[222].mxu1  ;;  %v8441_v49 = vadd.f32 %v3065_v2, %v2946_v7  ;;  %v6045_v43 = vpop.f32.mrb[223].mxu0 }
 0x2b2   : > { %v2948_v47 = vadd.f32 %v2914_v63, %v8337_v58  ;;  %v6019_v0 = vpop.f32.mrb[223].mxu1  ;;  %v4236_v20 = vsel %vm1257_vm6, %v4233_v11, %v4235_v6  ;;  %v4750_v63 = vld [vmem:[%s8865_s6 + $0x20] sm:$0xff]  ;;  %v4099_v43 = vrot.slane %v8358_v18, 2 }
 0x2b3   : > { %6279 = vmatmul.mubr.msk.bf16.gmra.mrb[72].mxu0 %vm543_vm3, %v4234_v13  ;;  %v4747_v13 = vld [vmem:[%s8865_s6 + $0x8] sm:$0xff] }
 0x2b4   : > { %6253 = vmatmul.mubr.msk.bf16.gmra.mrb[72].mxu1 %vm543_vm3, %v8129_v48  ;;  %6282 = vmatprep.mubr.msk.bf16.mxu0 %vm6500_vm1, %v8887_v39 }
 0x2b5   : > { %6256 = vmatprep.mubr.msk.bf16.mxu1 %vm6500_vm1, %v8887_v39  ;;  %4766 = vperm.xlu0 %6408, %v4747_v13   ;;  %v4758_v13 = vld [vmem:[%s8865_s6 + $0x60] sm:$0xff] }
 0x2b6   : > { %v3070_v5 = vpop.f32.mrb[224].mxu0 }
 0x2b7   : > { %v2919_v30 = vpop.f32.mrb[224].mxu1  ;;  %v8452_v40 = vadd.f32 %v3070_v5, %v2947_v16  ;;  %v6048_v36 = vpop.f32.mrb[225].mxu0 }
 0x2b8   : > { %v2949_v58 = vadd.f32 %v2919_v30, %v8351_v28  ;;  %v6022_v23 = vpop.f32.mrb[225].mxu1  ;;  %v3073_v12 = vpop.f32.mrb[226].mxu0  ;;  %v4237_v28 = vrot.slane %v8093_v31, 2 }
 0x2b9   : > { %v2922_v48 = vpop.f32.mrb[226].mxu1  ;;  %v8456_v51 = vadd.f32 %v3073_v12, %v2948_v47  ;;  %v6049_v15 = vpop.f32.mrb[227].mxu0  ;;  %v3268_v47 = vld [vmem:[%s7586_s24 + $0x3c] sm:$0x7]  ;;  %4781 = vperm.xlu0 %6408, %v4750_v63  }
 0x2ba   : > { %v2950_v22 = vadd.f32 %v2922_v48, %v8354_v54  ;;  %v6023_v61 = vpop.f32.mrb[227].mxu1  ;;  %v8501_v12 = vcombine.low %v8349_v55, %v3268_v47  ;;  %v4100_v15 = vsel %vm1257_vm6, %v4097_v14, %v4099_v43  ;;  %v4751_v14 = vld [vmem:[%s8865_s6 + $0x28] sm:$0xff] }
 0x2bb   : > { %6283 = vmatmul.mubr.msk.bf16.gmra.mrb[76].mxu0 %vm543_vm3, %v4236_v20  ;;  %v4752_v61 = vld [vmem:[%s8865_s6 + $0x30] sm:$0xff] }
 0x2bc   : > { %6257 = vmatmul.mubr.msk.bf16.gmra.mrb[76].mxu1 %vm543_vm3, %v8159_v62  ;;  %6286 = vmatprep.mubr.msk.bf16.mxu0 %vm6500_vm1, %v8887_v39  ;;  %v4238_v62 = vsel %vm1257_vm6, %v4235_v6, %v4237_v28  ;;  %v4241_v29 = vrot.slane %v8501_v12, 2 }
 0x2bd   : > { %6260 = vmatprep.mubr.msk.bf16.mxu1 %vm6500_vm1, %v8887_v39  ;;  %4791 = vperm.xlu0 %6408, %v4752_v61  }
 0x2be   : > { %v3078_v54 = vpop.f32.mrb[228].mxu0 }
 0x2bf   : > { %v2927_v52 = vpop.f32.mrb[228].mxu1  ;;  %v8470_v45 = vadd.f32 %v3078_v54, %v2949_v58  ;;  %v6052_v7 = vpop.f32.mrb[229].mxu0 }
 0x2c0   : > { %v2951_v25 = vadd.f32 %v2927_v52, %v8372_v33  ;;  %v6026_v11 = vpop.f32.mrb[229].mxu1  ;;  %v3081_v59 = vpop.f32.mrb[230].mxu0  ;;  %v4748_v33 = vld [vmem:[%s8865_s6 + $0x10] sm:$0xff] }
 0x2c1   : > { %v2930_v56 = vpop.f32.mrb[230].mxu1  ;;  %v8474_v46 = vadd.f32 %v3081_v59, %v2950_v22  ;;  %v6053_v16 = vpop.f32.mrb[231].mxu0  ;;  %4771 = vperm.xlu1 %6409, %v4748_v33   ;;  %4801 = vperm.xlu0 %6408, %v4754_v42  }
 0x2c2   : > { %v2952_v50 = vadd.f32 %v2930_v56, %v8375_v10  ;;  %v6027_v2 = vpop.f32.mrb[231].mxu1  ;;  %v4239_v10 = vrot.slane %v8219_v44, 2 }
 0x2c3   : > { %6287 = vmatmul.mubr.msk.bf16.gmra.mrb[80].mxu0 %vm543_vm3, %v4238_v62  ;;  %v4756_v2 = vld [vmem:[%s8865_s6 + $0x50] sm:$0xff] }
 0x2c4   : > { %6261 = vmatmul.mubr.msk.bf16.gmra.mrb[80].mxu1 %vm543_vm3, %v8187_v26  ;;  %6290 = vmatprep.mubr.msk.bf16.mxu0 %vm6500_vm1, %v8887_v39  ;;  %v4240_v23 = vsel %vm1257_vm6, %v4237_v28, %v4239_v10  ;;  %v4242_v11 = vsel %vm1257_vm6, %v4239_v10, %v4241_v29 }
 0x2c5   : > { %6264 = vmatprep.mubr.msk.bf16.mxu1 %vm6500_vm1, %v8887_v39  ;;  %4811 = vperm.xlu0 %6408, %v4756_v2  }
 0x2c6   : > { %v3086_v0 = vpop.f32.mrb[232].mxu0 }
 0x2c7   : > { %v2935_v6 = vpop.f32.mrb[232].mxu1  ;;  %v8496_v5 = vadd.f32 %v3086_v0, %v2951_v25  ;;  %v6056_v26 = vpop.f32.mrb[233].mxu0 }
 0x2c8   : > { %v2953_v30 = vadd.f32 %v2935_v6, %v8387_v8  ;;  %v3089_v36 = vpop.f32.mrb[234].mxu0  ;;  %v6030_v58 = vpop.f32.mrb[233].mxu1  ;;  %v4749_v8 = vld [vmem:[%s8865_s6 + $0x18] sm:$0xff] }
 0x2c9   : > { %v8503_v20 = vadd.f32 %v3089_v36, %v2952_v50  ;;  %v6057_v18 = vpop.f32.mrb[235].mxu0  ;;  %v2938_v48 = vpop.f32.mrb[234].mxu1  ;;  %4776 = vperm.xlu1 %6409, %v4749_v8   ;;  %v4753_v50 = vld [vmem:[%s8865_s6 + $0x38] sm:$0xff]  ;;  %v4377_v36 = vrot.slane %v3446_v35, 2  ;;  %v4378_v58 = vrot.slane %v3442_v3, 3  ;;  %4821 = vperm.xlu0 %6408, %v4758_v13   ;;  %v4529_v35 = vrot.slane %v7755_v41, 3 }
 0x2ca   : > { %v6031_v22 = vpop.f32.mrb[235].mxu1  ;;  %v4530_v3 = vrot.slane %v7778_v1, 3  ;;  %v8904_v13 = vshll.u32 %v8093_v31, 16 }
 0x2cb   : > { %6291 = vmatmul.mubr.msk.bf16.gmra.mrb[84].mxu0 %vm543_vm3, %v4240_v23 }
 0x2cc   : > { %6265 = vmatmul.mubr.msk.bf16.gmra.mrb[84].mxu1 %vm543_vm3, %v4100_v15  ;;  %6294 = vmatprep.mubr.msk.bf16.mxu0 %vm6500_vm1, %v8887_v39 }
 0x2cd   : > { %6268 = vmatprep.mubr.msk.bf16.mxu1 %vm6500_vm1, %v8887_v39  ;;  %4786 = vperm.xlu1 %6409, %v4751_v14   ;;  %v4531_v14 = vsel %vm1700_vm8, %v4529_v35, %v4530_v3 }
 0x2ce   : > { %v3094_v55 = vpop.f32.mrb[236].mxu0 }
 0x2cf   : > { %v8527_v37 = vadd.f32 %v3094_v55, %v2953_v30  ;;  %v3186_v28 = vpop.f32.mrb[236].mxu1  ;;  %v6060_v54 = vpop.f32.mrb[237].mxu0 }
 0x2d0   : > { %v3240_v52 = vadd.f32 %v3186_v28, %v8399_v17  ;;  %v6066_v7 = vpop.f32.mrb[237].mxu1  ;;  %v3097_v25 = vpop.f32.mrb[238].mxu0  ;;  %v4755_v17 = vld [vmem:[%s8865_s6 + $0x48] sm:$0xff]  ;;  %v4381_v28 = vrot.slane %v3453_v24, 2  ;;  %v4382_v54 = vrot.slane %v3449_v53, 3 }
 0x2d1   : > { %v3189_v59 = vpop.f32.mrb[238].mxu1  ;;  %v6061_v62 = vpop.f32.mrb[239].mxu0  ;;  %4796 = vperm.xlu1 %6409, %v4753_v50   ;;  %v4532_v7 = vrot.slane %v8053_v21, 3 }
 0x2d2   : > { %v3241_v56 = vadd.f32 %v3189_v59, %v8405_v27  ;;  %v6067_v16 = vpop.f32.mrb[239].mxu1 }
 0x2d3   : > { %6295 = vmatmul.mubr.msk.bf16.gmra.mrb[88].mxu0 %vm543_vm3, %v4242_v11 }
 0x2d4   : > { %6269 = vmatmul.mubr.msk.bf16.gmra.mrb[88].mxu1 %vm543_vm3, %v4099_v43  ;;  %6298 = vmatprep.mubr.msk.bf16.mxu0 %vm6500_vm1, %v8887_v39 }
 0x2d5   : > { %6304 = vmatprep.mubr.msk.bf16.mxu1 %vm6500_vm1, %v8887_v39  ;;  %4806 = vperm.xlu1 %6409, %v4755_v17   ;;  %v8903_v17 = vshrl.u32 %v8093_v31, 16 }
 0x2d6   : > { %v3352_v27 = vpop.f32.mrb[240].mxu0 }
 0x2d7   : > { %v3194_v33 = vpop.f32.mrb[240].mxu1  ;;  %v8550_v10 = vadd.f32 %v3352_v27, %v3240_v52  ;;  %v6096_v63 = vpop.f32.mrb[241].mxu0  ;;  %v4385_v27 = vrot.slane %v8903_v17, 2 }
 0x2d8   : > { %v3242_v43 = vadd.f32 %v3194_v33, %v8421_v60  ;;  %v6070_v47 = vpop.f32.mrb[241].mxu1  ;;  %v3355_v0 = vpop.f32.mrb[242].mxu0  ;;  %v4757_v60 = vld [vmem:[%s8865_s6 + $0x58] sm:$0xff]  ;;  %v4386_v33 = vrot.slane %v8904_v13, 3 }
 0x2d9   : > { %v3197_v6 = vpop.f32.mrb[242].mxu1  ;;  %v8553_v26 = vadd.f32 %v3355_v0, %v3241_v56  ;;  %v6097_v30 = vpop.f32.mrb[243].mxu0  ;;  %4816 = vperm.xlu1 %6409, %v4757_v60   ;;  %v4533_v56 = vsel %vm1700_vm8, %v4530_v3, %v4532_v7 }
 0x2da   : > { %v3243_v23 = vadd.f32 %v3197_v6, %v8425_v4  ;;  %v6071_v18 = vpop.f32.mrb[243].mxu1  ;;  %v4379_v4 = vor.u32 %v4378_v58, %v4377_v36  ;;  %v4387_v47 = vor.u32 %v4386_v33, %v4385_v27 }
 0x2db   : > { %6299 = vmatmul.mubr.msk.bf16.gmra.mrb[92].mxu0 %vm543_vm3, %v4241_v29 }
 0x2dc   : > { %6305 = vmatmul.mubr.msk.bf16.vlgmr.msra.gmra.mrb[92].mxu1 %vm543_vm3, %v8261_v34  ;;  %6334 = vmatprep.mubr.msk.bf16.mxu0 %vm6500_vm1, %v8887_v39  ;;  %v4380_v1 = vsel %vm1540_vm7, %v7810_v19, %v4379_v4  ;;  %v4383_v19 = vor.u32 %v4382_v54, %v4381_v28 }
 0x2dd   : > { %6308 = vmatprep.mubr.msk.bf16.mxu1 %vm6500_vm1, %v8887_v39 }
 0x2de   : > { %v3360_v48 = vpop.f32.mrb[244].mxu0  ;;  %v4384_v21 = vsel %vm1540_vm7, %v4379_v4, %v4383_v19  ;;  %v4389_v4 = vrot.slane %v3468_v57, 2  ;;  %v4394_v57 = vshrl.u32 %v8501_v12, 16 }
 0x2df   : > { %v3202_v15 = vpop.f32.mrb[244].mxu1  ;;  %v8572_v22 = vadd.f32 %v3360_v48, %v3242_v43  ;;  %v6100_v8 = vpop.f32.mrb[245].mxu0  ;;  %v4390_v48 = vrot.slane %v3464_v38, 3  ;;  %v4397_v38 = vshll.u32 %v8501_v12, 16 }
 0x2e0   : > { %v3244_v61 = vadd.f32 %v3202_v15, %v8437_v9  ;;  %v6074_v29 = vpop.f32.mrb[245].mxu1  ;;  %v3363_v34 = vpop.f32.mrb[246].mxu0 }
 0x2e1   : > { %v3205_v55 = vpop.f32.mrb[246].mxu1  ;;  %v8576_v42 = vadd.f32 %v3363_v34, %v3243_v23  ;;  %v6101_v41 = vpop.f32.mrb[247].mxu0 }
 0x2e2   : > { %v3245_v52 = vadd.f32 %v3205_v55, %v8441_v49  ;;  %v6075_v9 = vpop.f32.mrb[247].mxu1 }
 0x2e3   : > { %6335 = vmatmul.mubr.msk.bf16.vlgmr.msra.gmra.mrb[96].mxu0 %vm543_vm3, %v4531_v14 }
 0x2e4   : > { %6309 = vmatmul.mubr.msk.bf16.gmra.mrb[96].mxu1 %vm543_vm3, %v4380_v1  ;;  %6338 = vmatprep.mubr.msk.bf16.mxu0 %vm6500_vm1, %v8887_v39 }
 0x2e5   : > { %6312 = vmatprep.mubr.msk.bf16.mxu1 %vm6500_vm1, %v8887_v39 }
 0x2e6   : > { %v3368_v24 = vpop.f32.mrb[248].mxu0 }
 0x2e7   : > { %v3210_v25 = vpop.f32.mrb[248].mxu1  ;;  %v8592_v11 = vadd.f32 %v3368_v24, %v3244_v61  ;;  %v6104_v53 = vpop.f32.mrb[249].mxu0  ;;  %v4391_v61 = vor.u32 %v4390_v48, %v4389_v4 }
 0x2e8   : > { %v3246_v49 = vadd.f32 %v3210_v25, %v8452_v40  ;;  %v6078_v59 = vpop.f32.mrb[249].mxu1  ;;  %v3371_v62 = vpop.f32.mrb[250].mxu0  ;;  %v4534_v40 = vrot.slane %v8072_v32, 3  ;;  %v4388_v32 = vsel %vm1540_vm7, %v4383_v19, %v4387_v47  ;;  %v4399_v19 = vrot.slane %v4397_v38, 3 }
 0x2e9   : > { %v3213_v16 = vpop.f32.mrb[250].mxu1  ;;  %v8596_v50 = vadd.f32 %v3371_v62, %v3245_v52  ;;  %v6105_v2 = vpop.f32.mrb[251].mxu0  ;;  %v4392_v9 = vsel %vm1540_vm7, %v4387_v47, %v4391_v61 }
 0x2ea   : > { %v3247_v63 = vadd.f32 %v3213_v16, %v8456_v51  ;;  %v6079_v43 = vpop.f32.mrb[251].mxu1  ;;  %v4535_v18 = vsel %vm1700_vm8, %v4532_v7, %v4534_v40  ;;  %v4396_v7 = vrot.slane %v4394_v57, 2 }
 0x2eb   : > { %6339 = vmatmul.mubr.msk.bf16.gmra.mrb[100].mxu0 %vm543_vm3, %v4533_v56 }
 0x2ec   : > { %6313 = vmatmul.mubr.msk.bf16.gmra.mrb[100].mxu1 %vm543_vm3, %v4384_v21  ;;  %6342 = vmatprep.mubr.msk.bf16.mxu0 %vm6500_vm1, %v8887_v39  ;;  %v4400_v53 = vor.u32 %v4399_v19, %v4396_v7 }
 0x2ed   : > { %6316 = vmatprep.mubr.msk.bf16.mxu1 %vm6500_vm1, %v8887_v39 }
 0x2ee   : > { %v3376_v0 = vpop.f32.mrb[252].mxu0 }
 0x2ef   : > { %v3218_v6 = vpop.f32.mrb[252].mxu1  ;;  %v8611_v30 = vadd.f32 %v3376_v0, %v3246_v49  ;;  %v6108_v36 = vpop.f32.mrb[253].mxu0 }
 0x2f0   : > { %v3248_v51 = vadd.f32 %v3218_v6, %v8470_v45  ;;  %v6082_v58 = vpop.f32.mrb[253].mxu1  ;;  %v3379_v23 = vpop.f32.mrb[254].mxu0  ;;  %v4536_v45 = vrot.slane %v8093_v31, 3 }
 0x2f1   : > { %v3221_v60 = vpop.f32.mrb[254].mxu1  ;;  %v8615_v35 = vadd.f32 %v3379_v23, %v3247_v63  ;;  %v6109_v3 = vpop.f32.mrb[255].mxu0 }
 0x2f2   : > { %v3249_v15 = vadd.f32 %v3221_v60, %v8474_v46  ;;  %v6083_v8 = vpop.f32.mrb[255].mxu1  ;;  %v4537_v28 = vsel %vm1700_vm8, %v4534_v40, %v4536_v45 }
 0x2f3   : > { %6343 = vmatmul.mubr.msk.bf16.gmra.mrb[104].mxu0 %vm543_vm3, %v4535_v18 }
 0x2f4   : > { %6317 = vmatmul.mubr.msk.bf16.gmra.mrb[104].mxu1 %vm543_vm3, %v4388_v32  ;;  %6346 = vmatprep.mubr.msk.bf16.mxu0 %vm6500_vm1, %v8887_v39 }
 0x2f5   : > { %6320 = vmatprep.mubr.msk.bf16.mxu1 %vm6500_vm1, %v8887_v39 }
 0x2f6   : > { %v3384_v29 = vpop.f32.mrb[0].mxu0 }
 0x2f7   : > { %v3226_v46 = vpop.f32.mrb[0].mxu1  ;;  %v8632_v34 = vadd.f32 %v3384_v29, %v3248_v51  ;;  %v6112_v14 = vpop.f32.mrb[1].mxu0 }
 0x2f8   : > { %v3250_v55 = vadd.f32 %v3226_v46, %v8496_v5  ;;  %v6086_v41 = vpop.f32.mrb[1].mxu1  ;;  %v3387_v1 = vpop.f32.mrb[2].mxu0  ;;  %v4538_v5 = vrot.slane %v8219_v44, 3  ;;  %v4401_v44 = vsel %vm1540_vm7, %v4391_v61, %v4400_v53 }
 0x2f9   : > { %v3229_v31 = vpop.f32.mrb[2].mxu1  ;;  %v8636_v54 = vadd.f32 %v3387_v1, %v3249_v15  ;;  %v6113_v52 = vpop.f32.mrb[3].mxu0 }
 0x2fa   : > { %v3251_v24 = vadd.f32 %v3229_v31, %v8503_v20  ;;  %v6087_v25 = vpop.f32.mrb[3].mxu1  ;;  %v4539_v21 = vsel %vm1700_vm8, %v4536_v45, %v4538_v5 }
 0x2fb   : > { %6347 = vmatmul.mubr.msk.bf16.gmra.mrb[108].mxu0 %vm543_vm3, %v4537_v28 }
 0x2fc   : > { %6321 = vmatmul.mubr.msk.bf16.gmra.mrb[108].mxu1 %vm543_vm3, %v4392_v9  ;;  %6350 = vmatprep.mubr.msk.bf16.mxu0 %vm6500_vm1, %v8887_v39 }
 0x2fd   : > { %6324 = vmatprep.mubr.msk.bf16.mxu1 %vm6500_vm1, %v8887_v39 }
 0x2fe   : > { %v3392_v49 = vpop.f32.mrb[4].mxu0 }
 0x2ff   : > { %v3234_v59 = vpop.f32.mrb[4].mxu1  ;;  %v8647_v62 = vadd.f32 %v3392_v49, %v3250_v55  ;;  %v6116_v56 = vpop.f32.mrb[5].mxu0 }
 0x300   : > { %v3252_v20 = vadd.f32 %v3234_v59, %v8527_v37  ;;  %v3395_v16 = vpop.f32.mrb[6].mxu0  ;;  %v6090_v2 = vpop.f32.mrb[5].mxu1  ;;  %v4540_v37 = vrot.slane %v8501_v12, 3 }
 0x301   : > { %v8651_v17 = vadd.f32 %v3395_v16, %v3251_v24  ;;  %v6117_v27 = vpop.f32.mrb[7].mxu0  ;;  %v3237_v13 = vpop.f32.mrb[6].mxu1 }
 0x302   : > { %v6091_v33 = vpop.f32.mrb[7].mxu1  ;;  %v4541_v51 = vsel %vm1700_vm8, %v4538_v5, %v4540_v37 }
 0x303   : > { %6351 = vmatmul.mubr.msk.bf16.gmra.mrb[112].mxu0 %vm543_vm3, %v4539_v21 }
 0x304   : > { %6325 = vmatmul.mubr.msk.bf16.gmra.mrb[112].mxu1 %vm543_vm3, %v4401_v44  ;;  %6354 = vmatprep.mubr.msk.bf16.mxu0 %vm6500_vm1, %v8887_v39 }
 0x305   : > { %6328 = vmatprep.mubr.msk.bf16.mxu1 %vm6500_vm1, %v8887_v39 }
 0x306   : > { %v3400_v63 = vpop.f32.mrb[8].mxu0 }
 0x307   : > { %v8661_v43 = vadd.f32 %v3400_v63, %v3252_v20  ;;  %v3529_v40 = vpop.f32.mrb[8].mxu1  ;;  %v6120_v47 = vpop.f32.mrb[9].mxu0 }
 0x308   : > { %v3583_v0 = vadd.f32 %v3529_v40, %v8550_v10  ;;  %v6126_v6 = vpop.f32.mrb[9].mxu1  ;;  %v3403_v36 = vpop.f32.mrb[10].mxu0 }
 0x309   : > { %v3532_v58 = vpop.f32.mrb[10].mxu1  ;;  %v6121_v23 = vpop.f32.mrb[11].mxu0 }
 0x30a   : > { %v3584_v18 = vadd.f32 %v3532_v58, %v8553_v26  ;;  %v6127_v60 = vpop.f32.mrb[11].mxu1 }
 0x30b   : > { %6355 = vmatmul.mubr.msk.bf16.gmra.mrb[116].mxu0 %vm543_vm3, %v4541_v51 }
 0x30c   : > { %6329 = vmatmul.mubr.msk.bf16.gmra.mrb[116].mxu1 %vm543_vm3, %v4400_v53  ;;  %6358 = vmatprep.mubr.msk.bf16.mxu0 %vm6500_vm1, %v8887_v39 }
 0x30e   : > { %v3676_v12 = vpop.f32.mrb[12].mxu0 }
 0x30f   : > { %v3537_v3 = vpop.f32.mrb[12].mxu1  ;;  %v8670_v32 = vadd.f32 %v3676_v12, %v3583_v0  ;;  %v6156_v10 = vpop.f32.mrb[13].mxu0 }
 0x310   : > { %v3585_v4 = vadd.f32 %v3537_v3, %v8572_v22  ;;  %v6130_v48 = vpop.f32.mrb[13].mxu1  ;;  %v3679_v15 = vpop.f32.mrb[14].mxu0 }
 0x311   : > { %v3540_v8 = vpop.f32.mrb[14].mxu1  ;;  %v8673_v45 = vadd.f32 %v3679_v15, %v3584_v18  ;;  %v6157_v26 = vpop.f32.mrb[15].mxu0 }
 0x312   : > { %v3586_v61 = vadd.f32 %v3540_v8, %v8576_v42  ;;  %v6131_v57 = vpop.f32.mrb[15].mxu1 }
 0x313   : > { %6359 = vmatmul.mubr.msk.bf16.gmra.mrb[120].mxu0 %vm543_vm3, %v4540_v37 }
 0x316   : > { %v3684_v38 = vpop.f32.mrb[16].mxu0 }
 0x317   : > { %v3545_v39 = vpop.f32.mrb[16].mxu1  ;;  %v8677_v29 = vadd.f32 %v3684_v38, %v3585_v4  ;;  %v6160_v46 = vpop.f32.mrb[17].mxu0 }
 0x318   : > { %v3587_v14 = vadd.f32 %v3545_v39, %v8592_v11  ;;  %v6134_v55 = vpop.f32.mrb[17].mxu1  ;;  %v3687_v22 = vpop.f32.mrb[18].mxu0 }
 0x319   : > { %v3548_v41 = vpop.f32.mrb[18].mxu1  ;;  %v8680_v1 = vadd.f32 %v3687_v22, %v3586_v61  ;;  %v6161_v28 = vpop.f32.mrb[19].mxu0 }
 0x31a   : > { %v3588_v31 = vadd.f32 %v3548_v41, %v8596_v50  ;;  %v6135_v52 = vpop.f32.mrb[19].mxu1 }
 0x31e   : > { %v3692_v42 = vpop.f32.mrb[20].mxu0 }
 0x31f   : > { %v3553_v9 = vpop.f32.mrb[20].mxu1  ;;  %v8683_v7 = vadd.f32 %v3692_v42, %v3587_v14  ;;  %v6164_v19 = vpop.f32.mrb[21].mxu0 }
 0x320   : > { %v3589_v24 = vadd.f32 %v3553_v9, %v8611_v30  ;;  %v6138_v25 = vpop.f32.mrb[21].mxu1  ;;  %v3695_v5 = vpop.f32.mrb[22].mxu0 }
 0x321   : > { %v3556_v53 = vpop.f32.mrb[22].mxu1  ;;  %v8686_v11 = vadd.f32 %v3695_v5, %v3588_v31  ;;  %v6165_v49 = vpop.f32.mrb[23].mxu0 }
 0x322   : > { %v3590_v59 = vadd.f32 %v3556_v53, %v8615_v35  ;;  %v6139_v56 = vpop.f32.mrb[23].mxu1 }
 0x326   : > { %v3700_v20 = vpop.f32.mrb[24].mxu0 }
 0x327   : > { %v3561_v16 = vpop.f32.mrb[24].mxu1  ;;  %v8689_v50 = vadd.f32 %v3700_v20, %v3589_v24  ;;  %v6168_v2 = vpop.f32.mrb[25].mxu0 }
 0x328   : > { %v3591_v21 = vadd.f32 %v3561_v16, %v8632_v34  ;;  %v6142_v27 = vpop.f32.mrb[25].mxu1  ;;  %v3703_v13 = vpop.f32.mrb[26].mxu0 }
 0x329   : > { %v3564_v44 = vpop.f32.mrb[26].mxu1  ;;  %v8692_v30 = vadd.f32 %v3703_v13, %v3590_v59  ;;  %v6169_v33 = vpop.f32.mrb[27].mxu0 }
 0x32a   : > { %v3592_v37 = vadd.f32 %v3564_v44, %v8636_v54  ;;  %v6143_v63 = vpop.f32.mrb[27].mxu1 }
 0x32e   : > { %v3708_v40 = vpop.f32.mrb[28].mxu0 }
 0x32f   : > { %v3569_v47 = vpop.f32.mrb[28].mxu1  ;;  %v8695_v35 = vadd.f32 %v3708_v40, %v3591_v21  ;;  %v6172_v0 = vpop.f32.mrb[29].mxu0 }
 0x330   : > { %v3593_v6 = vadd.f32 %v3569_v47, %v8647_v62  ;;  %v6146_v36 = vpop.f32.mrb[29].mxu1  ;;  %v3711_v51 = vpop.f32.mrb[30].mxu0 }
 0x331   : > { %v3572_v58 = vpop.f32.mrb[30].mxu1  ;;  %v8698_v34 = vadd.f32 %v3711_v51, %v3592_v37  ;;  %v6173_v23 = vpop.f32.mrb[31].mxu0 }
 0x332   : > { %v3594_v18 = vadd.f32 %v3572_v58, %v8651_v17  ;;  %v6147_v60 = vpop.f32.mrb[31].mxu1 }
 0x336   : > { %v3716_v12 = vpop.f32.mrb[32].mxu0 }
 0x337   : > { %v3577_v3 = vpop.f32.mrb[32].mxu1  ;;  %v8701_v54 = vadd.f32 %v3716_v12, %v3593_v6  ;;  %v6176_v10 = vpop.f32.mrb[33].mxu0 }
 0x338   : > { %v3595_v4 = vadd.f32 %v3577_v3, %v8661_v43  ;;  %v3719_v48 = vpop.f32.mrb[34].mxu0  ;;  %v6150_v15 = vpop.f32.mrb[33].mxu1 }
 0x339   : > { %v8704_v8 = vadd.f32 %v3719_v48, %v3594_v18  ;;  %v6177_v62 = vpop.f32.mrb[35].mxu0  ;;  %v3580_v26 = vpop.f32.mrb[34].mxu1 }
 0x33a   : > { %v6151_v61 = vpop.f32.mrb[35].mxu1 }
 0x33e   : > { %v3724_v57 = vpop.f32.mrb[36].mxu0 }
 0x33f   : > { %v8706_v38 = vadd.f32 %v3724_v57, %v3595_v4  ;;  %v3830_v39 = vpop.f32.mrb[36].mxu1  ;;  %v6180_v17 = vpop.f32.mrb[37].mxu0 }
 0x340   : > { %v3884_v46 = vadd.f32 %v3830_v39, %v8670_v32  ;;  %v6186_v14 = vpop.f32.mrb[37].mxu1  ;;  %v3727_v55 = vpop.f32.mrb[38].mxu0 }
 0x341   : > { %v3833_v22 = vpop.f32.mrb[38].mxu1  ;;  %v6181_v41 = vpop.f32.mrb[39].mxu0 }
 0x342   : > { %v3885_v43 = vadd.f32 %v3833_v22, %v8673_v45  ;;  %v6187_v28 = vpop.f32.mrb[39].mxu1 }
 0x346   : > { %v4019_v31 = vpop.f32.mrb[40].mxu0 }
 0x347   : > { %v3838_v52 = vpop.f32.mrb[40].mxu1  ;;  %v8710_v42 = vadd.f32 %v4019_v31, %v3884_v46  ;;  %v6216_v9 = vpop.f32.mrb[41].mxu0 }
 0x348   : > { %v3886_v19 = vadd.f32 %v3838_v52, %v8677_v29  ;;  %v6190_v24 = vpop.f32.mrb[41].mxu1  ;;  %v4022_v25 = vpop.f32.mrb[42].mxu0 }
 0x349   : > { %v3841_v5 = vpop.f32.mrb[42].mxu1  ;;  %v8713_v53 = vadd.f32 %v4022_v25, %v3885_v43  ;;  %v6217_v32 = vpop.f32.mrb[43].mxu0 }
 0x34a   : > { %v3887_v49 = vadd.f32 %v3841_v5, %v8680_v1  ;;  %v6191_v59 = vpop.f32.mrb[43].mxu1 }
 0x34e   : > { %v4027_v56 = vpop.f32.mrb[44].mxu0 }
 0x34f   : > { %v3846_v20 = vpop.f32.mrb[44].mxu1  ;;  %v8716_v45 = vadd.f32 %v4027_v56, %v3886_v19  ;;  %v6220_v16 = vpop.f32.mrb[45].mxu0 }
 0x350   : > { %v3888_v2 = vadd.f32 %v3846_v20, %v8683_v7  ;;  %v6194_v21 = vpop.f32.mrb[45].mxu1  ;;  %v4030_v27 = vpop.f32.mrb[46].mxu0 }
 0x351   : > { %v3849_v13 = vpop.f32.mrb[46].mxu1  ;;  %v8719_v29 = vadd.f32 %v4030_v27, %v3887_v49  ;;  %v6221_v44 = vpop.f32.mrb[47].mxu0 }
 0x352   : > { %v3889_v33 = vadd.f32 %v3849_v13, %v8686_v11  ;;  %v6195_v37 = vpop.f32.mrb[47].mxu1 }
 0x356   : > { %v4035_v63 = vpop.f32.mrb[48].mxu0 }
 0x357   : > { %v3854_v40 = vpop.f32.mrb[48].mxu1  ;;  %v8722_v1 = vadd.f32 %v4035_v63, %v3888_v2  ;;  %v6224_v47 = vpop.f32.mrb[49].mxu0 }
 0x358   : > { %v3890_v0 = vadd.f32 %v3854_v40, %v8689_v50  ;;  %v6198_v6 = vpop.f32.mrb[49].mxu1  ;;  %v4038_v36 = vpop.f32.mrb[50].mxu0 }
 0x359   : > { %v3857_v51 = vpop.f32.mrb[50].mxu1  ;;  %v8725_v7 = vadd.f32 %v4038_v36, %v3889_v33  ;;  %v6225_v58 = vpop.f32.mrb[51].mxu0 }
 0x35a   : > { %v3891_v23 = vadd.f32 %v3857_v51, %v8692_v30  ;;  %v6199_v18 = vpop.f32.mrb[51].mxu1 }
 0x35e   : > { %v4043_v60 = vpop.f32.mrb[52].mxu0 }
 0x35f   : > { %v3862_v12 = vpop.f32.mrb[52].mxu1  ;;  %v8728_v11 = vadd.f32 %v4043_v60, %v3890_v0  ;;  %v6228_v3 = vpop.f32.mrb[53].mxu0 }
 0x360   : > { %v3892_v10 = vadd.f32 %v3862_v12, %v8695_v35  ;;  %v6202_v4 = vpop.f32.mrb[53].mxu1  ;;  %v4046_v48 = vpop.f32.mrb[54].mxu0 }
 0x361   : > { %v3865_v15 = vpop.f32.mrb[54].mxu1  ;;  %v8731_v50 = vadd.f32 %v4046_v48, %v3891_v23  ;;  %v6229_v62 = vpop.f32.mrb[55].mxu0 }
 0x362   : > { %v3893_v26 = vadd.f32 %v3865_v15, %v8698_v34  ;;  %v6203_v61 = vpop.f32.mrb[55].mxu1 }
 0x366   : > { %v4051_v57 = vpop.f32.mrb[56].mxu0 }
 0x367   : > { %v3870_v39 = vpop.f32.mrb[56].mxu1  ;;  %v8734_v30 = vadd.f32 %v4051_v57, %v3892_v10  ;;  %v6232_v17 = vpop.f32.mrb[57].mxu0 }
 0x368   : > { %v3894_v46 = vadd.f32 %v3870_v39, %v8701_v54  ;;  %v6206_v14 = vpop.f32.mrb[57].mxu1  ;;  %v4054_v55 = vpop.f32.mrb[58].mxu0 }
 0x369   : > { %v3873_v22 = vpop.f32.mrb[58].mxu1  ;;  %v8737_v35 = vadd.f32 %v4054_v55, %v3893_v26  ;;  %v6233_v41 = vpop.f32.mrb[59].mxu0 }
 0x36a   : > { %v3895_v43 = vadd.f32 %v3873_v22, %v8704_v8  ;;  %v6207_v28 = vpop.f32.mrb[59].mxu1 }
 0x36e   : > { %v4059_v31 = vpop.f32.mrb[60].mxu0 }
 0x36f   : > { %v3878_v52 = vpop.f32.mrb[60].mxu1  ;;  %v8740_v34 = vadd.f32 %v4059_v31, %v3894_v46  ;;  %v6236_v9 = vpop.f32.mrb[61].mxu0 }
 0x370   : > { %v3896_v19 = vadd.f32 %v3878_v52, %v8706_v38  ;;  %v4062_v24 = vpop.f32.mrb[62].mxu0  ;;  %v6210_v25 = vpop.f32.mrb[61].mxu1 }
 0x371   : > { %v8743_v5 = vadd.f32 %v4062_v24, %v3895_v43  ;;  %v6237_v54 = vpop.f32.mrb[63].mxu0  ;;  %v3881_v32 = vpop.f32.mrb[62].mxu1 }
 0x372   : > { %v6211_v49 = vpop.f32.mrb[63].mxu1 }
 0x376   : > { %v4067_v59 = vpop.f32.mrb[64].mxu0 }
 0x377   : > { %v8745_v56 = vadd.f32 %v4067_v59, %v3896_v19  ;;  %v4159_v20 = vpop.f32.mrb[64].mxu1  ;;  %v6240_v8 = vpop.f32.mrb[65].mxu0 }
 0x378   : > { %v4213_v16 = vadd.f32 %v4159_v20, %v8710_v42  ;;  %v6246_v2 = vpop.f32.mrb[65].mxu1  ;;  %v4070_v21 = vpop.f32.mrb[66].mxu0 }
 0x379   : > { %v4162_v27 = vpop.f32.mrb[66].mxu1  ;;  %v6241_v13 = vpop.f32.mrb[67].mxu0 }
 0x37a   : > { %v4214_v38 = vadd.f32 %v4162_v27, %v8713_v53  ;;  %v6247_v44 = vpop.f32.mrb[67].mxu1 }
 0x37e   : > { %v4301_v33 = vpop.f32.mrb[68].mxu0 }
 0x37f   : > { %v4167_v37 = vpop.f32.mrb[68].mxu1  ;;  %v8749_v63 = vadd.f32 %v4301_v33, %v4213_v16  ;;  %v6276_v40 = vpop.f32.mrb[69].mxu0 }
 0x380   : > { %v4215_v47 = vadd.f32 %v4167_v37, %v8716_v45  ;;  %v6250_v0 = vpop.f32.mrb[69].mxu1  ;;  %v4304_v6 = vpop.f32.mrb[70].mxu0 }
 0x381   : > { %v4170_v36 = vpop.f32.mrb[70].mxu1  ;;  %v8752_v51 = vadd.f32 %v4304_v6, %v4214_v38  ;;  %v6277_v42 = vpop.f32.mrb[71].mxu0 }
 0x382   : > { %v4216_v58 = vadd.f32 %v4170_v36, %v8719_v29  ;;  %v6251_v23 = vpop.f32.mrb[71].mxu1 }
 0x386   : > { %v4309_v18 = vpop.f32.mrb[72].mxu0 }
 0x387   : > { %v4175_v60 = vpop.f32.mrb[72].mxu1  ;;  %v8755_v53 = vadd.f32 %v4309_v18, %v4215_v47  ;;  %v6280_v12 = vpop.f32.mrb[73].mxu0 }
 0x388   : > { %v4217_v3 = vadd.f32 %v4175_v60, %v8722_v1  ;;  %v6254_v10 = vpop.f32.mrb[73].mxu1  ;;  %v4312_v4 = vpop.f32.mrb[74].mxu0 }
 0x389   : > { %v4178_v48 = vpop.f32.mrb[74].mxu1  ;;  %v8758_v45 = vadd.f32 %v4312_v4, %v4216_v58  ;;  %v6281_v15 = vpop.f32.mrb[75].mxu0 }
 0x38a   : > { %v4218_v62 = vadd.f32 %v4178_v48, %v8725_v7  ;;  %v6255_v26 = vpop.f32.mrb[75].mxu1 }
 0x38b   : > { %v8791_v26 = vld [vmem:[%s8863_s4] ss:$0 sm:$0xff] }
 0x38e   : > { %v4317_v61 = vpop.f32.mrb[76].mxu0 }
 0x38f   : > { %v4183_v57 = vpop.f32.mrb[76].mxu1  ;;  %v8761_v29 = vadd.f32 %v4317_v61, %v4217_v3  ;;  %v6284_v39 = vpop.f32.mrb[77].mxu0 }
 0x390   : > { %v4219_v17 = vadd.f32 %v4183_v57, %v8728_v11  ;;  %v6258_v46 = vpop.f32.mrb[77].mxu1  ;;  %v4320_v14 = vpop.f32.mrb[78].mxu0 }
 0x391   : > { %v4186_v55 = vpop.f32.mrb[78].mxu1  ;;  %v8764_v1 = vadd.f32 %v4320_v14, %v4218_v62  ;;  %v6285_v22 = vpop.f32.mrb[79].mxu0 }
 0x392   : > { %v4220_v41 = vadd.f32 %v4186_v55, %v8731_v50  ;;  %v6259_v43 = vpop.f32.mrb[79].mxu1  ;;  %v4762_v61 = vpop.permute.xlu0 %4761 }
 0x396   : > { %v4325_v28 = vpop.f32.mrb[80].mxu0 }
 0x397   : > { %v4191_v31 = vpop.f32.mrb[80].mxu1  ;;  %v8767_v7 = vadd.f32 %v4325_v28, %v4219_v17  ;;  %v6288_v52 = vpop.f32.mrb[81].mxu0 }
 0x398   : > { %v4221_v9 = vadd.f32 %v4191_v31, %v8734_v30  ;;  %v6262_v19 = vpop.f32.mrb[81].mxu1  ;;  %v4328_v24 = vpop.f32.mrb[82].mxu0 }
 0x399   : > { %v4194_v25 = vpop.f32.mrb[82].mxu1  ;;  %v8770_v11 = vadd.f32 %v4328_v24, %v4220_v41  ;;  %v6289_v54 = vpop.f32.mrb[83].mxu0 }
 0x39a   : > { %v4222_v32 = vadd.f32 %v4194_v25, %v8737_v35  ;;  %v6263_v49 = vpop.f32.mrb[83].mxu1  ;;  %v4767_v24 = vpop.permute.xlu0 %4766 }
 0x39e   : > { %v4333_v59 = vpop.f32.mrb[84].mxu0 }
 0x39f   : > { %v4199_v20 = vpop.f32.mrb[84].mxu1  ;;  %v8773_v50 = vadd.f32 %v4333_v59, %v4221_v9  ;;  %v6292_v8 = vpop.f32.mrb[85].mxu0  ;;  %v8800_v9 = vld [vmem:[%s8864_s5] ss:$0 sm:$0xff] }
 0x3a0   : > { %v4223_v16 = vadd.f32 %v4199_v20, %v8740_v34  ;;  %v6266_v2 = vpop.f32.mrb[85].mxu1  ;;  %v4336_v21 = vpop.f32.mrb[86].mxu0 }
 0x3a1   : > { %v4202_v27 = vpop.f32.mrb[86].mxu1  ;;  %v8776_v30 = vadd.f32 %v4336_v21, %v4222_v32  ;;  %v6293_v13 = vpop.f32.mrb[87].mxu0 }
 0x3a2   : > { %v4224_v38 = vadd.f32 %v4202_v27, %v8743_v5  ;;  %v6267_v44 = vpop.f32.mrb[87].mxu1  ;;  %v4772_v32 = vpop.permute.xlu1 %4771 }
 0x3a6   : > { %v4341_v33 = vpop.f32.mrb[88].mxu0 }
 0x3a7   : > { %v4207_v37 = vpop.f32.mrb[88].mxu1  ;;  %v8779_v35 = vadd.f32 %v4341_v33, %v4223_v16  ;;  %v6296_v40 = vpop.f32.mrb[89].mxu0 }
 0x3a8   : > { %v4225_v47 = vadd.f32 %v4207_v37, %v8745_v56  ;;  %v4344_v0 = vpop.f32.mrb[90].mxu0  ;;  %v6270_v6 = vpop.f32.mrb[89].mxu1 }
 0x3a9   : > { %v8782_v36 = vadd.f32 %v4344_v0, %v4224_v38  ;;  %v6297_v34 = vpop.f32.mrb[91].mxu0  ;;  %v4210_v42 = vpop.f32.mrb[90].mxu1 }
 0x3aa   : > { %v6271_v58 = vpop.f32.mrb[91].mxu1 }
 0x3ae   : > { %v4349_v23 = vpop.f32.mrb[92].mxu0 }
 0x3af   : > { %v8784_v18 = vadd.f32 %v4349_v23, %v4225_v47  ;;  %v4460_v60 = vpop.f32.mrb[92].mxu1  ;;  %v6300_v5 = vpop.f32.mrb[93].mxu0 }
 0x3b0   : > { %v4514_v12 = vadd.f32 %v4460_v60, %v8749_v63  ;;  %v6306_v3 = vpop.f32.mrb[93].mxu1  ;;  %v4352_v10 = vpop.f32.mrb[94].mxu0 }
 0x3b1   : > { %v4463_v4 = vpop.f32.mrb[94].mxu1  ;;  %v6301_v48 = vpop.f32.mrb[95].mxu0 }
 0x3b2   : > { %v4515_v56 = vadd.f32 %v4463_v4, %v8752_v51  ;;  %v6307_v15 = vpop.f32.mrb[95].mxu1  ;;  %v4777_v3 = vpop.permute.xlu1 %4776 }
 0x3b6   : > { %v4600_v62 = vpop.f32.mrb[96].mxu0 }
 0x3b7   : > { %v4468_v57 = vpop.f32.mrb[96].mxu1  ;;  %v4654_v39 = vadd.f32 %v4600_v62, %v4514_v12  ;;  %v6336_v17 = vpop.f32.mrb[97].mxu0 }
 0x3b8   : > { %v4516_v46 = vadd.f32 %v4468_v57, %v8755_v53  ;;  %v6310_v63 = vpop.f32.mrb[97].mxu1  ;;  %v4603_v14 = vpop.f32.mrb[98].mxu0 }
 0x3b9   : > { %v4674_v55 = vadd.f32 %v8791_v26, %v4654_v39  ;;  %v4471_v22 = vpop.f32.mrb[98].mxu1  ;;  %v4655_v41 = vadd.f32 %v4603_v14, %v4515_v56  ;;  %v6337_v51 = vpop.f32.mrb[99].mxu0 }
 0x3ba   : > { %v4517_v43 = vadd.f32 %v4471_v22, %v8758_v45  ;;  %v6311_v28 = vpop.f32.mrb[99].mxu1 }
 0x3bb   : > { %v4700_v31 = vmul.f32 0.2, %v4674_v55  ;;  %v4675_v52 = vadd.f32 %v8791_v26, %v4655_v41  ;;  %vm4687_vm9 = vcmp.ge.f32.partialorder %v4674_v55, 0.0 }
 0x3bd   : > { %v4701_v53 = vmul.f32 0.2, %v4675_v52  ;;  %v4713_v19 = vsel %vm4687_vm9, %v4674_v55, %v4700_v31  ;;  %vm4688_vm10 = vcmp.ge.f32.partialorder %v4675_v52, 0.0 }
 0x3be   : > { %v4733_v25 = vsub.f32 %v4713_v19, %v8800_v9  ;;  %v4608_v54 = vpop.f32.mrb[100].mxu0 }
 0x3bf   : > { %v4476_v49 = vpop.f32.mrb[100].mxu1  ;;  %v4656_v45 = vadd.f32 %v4608_v54, %v4516_v46  ;;  %v6340_v59 = vpop.f32.mrb[101].mxu0  ;;  %v4714_v20 = vsel %vm4688_vm10, %v4675_v52, %v4701_v53 }
 0x3c0   : > { %v4824_v8 = vmul.f32 %v4762_v61, %v4733_v25  ;;  %v4518_v16 = vadd.f32 %v4476_v49, %v8761_v29  ;;  %v6314_v2 = vpop.f32.mrb[101].mxu1  ;;  %v4611_v21 = vpop.f32.mrb[102].mxu0  ;;  %v4734_v27 = vsub.f32 %v4714_v20, %v8800_v9 }
 0x3c1   : > { %v4676_v13 = vadd.f32 %v8791_v26, %v4656_v45  ;;  %v4479_v38 = vpop.f32.mrb[102].mxu1  ;;  %v4657_v44 = vadd.f32 %v4611_v21, %v4517_v43  ;;  %v6341_v33 = vpop.f32.mrb[103].mxu0 }
 0x3c2   : > { %v4519_v37 = vadd.f32 %v4479_v38, %v8764_v1  ;;  %v4825_v40 = vmul.f32 %v4767_v24, %v4734_v27  ;;  %v6315_v47 = vpop.f32.mrb[103].mxu1  ;;  %v4850_v34 = vmul.f32 %v4824_v8, %v4824_v8  ;;  %v4782_v53 = vpop.permute.xlu0 %4781 }
 0x3c3   : > { %v4702_v0 = vmul.f32 0.2, %v4676_v13  ;;  %v4677_v6 = vadd.f32 %v8791_v26, %v4657_v44  ;;  %vm4689_vm11 = vcmp.ge.f32.partialorder %v4676_v13, 0.0 }
 0x3c4   : > { %v4837_v42 = vadd.f32 %v4825_v40, %v4824_v8  ;;  %v4851_v29 = vmul.f32 %v4825_v40, %v4825_v40 }
 0x3c5   : > { %v4703_v58 = vmul.f32 0.2, %v4677_v6  ;;  %v4715_v23 = vsel %vm4689_vm11, %v4676_v13, %v4702_v0  ;;  %vm4690_vm12 = vcmp.ge.f32.partialorder %v4677_v6, 0.0 }
 0x3c6   : > { %v4863_v60 = vadd.f32 %v4851_v29, %v4850_v34  ;;  %v4735_v5 = vsub.f32 %v4715_v23, %v8800_v9  ;;  %v4616_v12 = vpop.f32.mrb[104].mxu0  ;;  %v4792_v23 = vpop.permute.xlu0 %4791 }
 0x3c7   : > { %v4484_v10 = vpop.f32.mrb[104].mxu1  ;;  %v4658_v4 = vadd.f32 %v4616_v12, %v4518_v16  ;;  %v6344_v1 = vpop.f32.mrb[105].mxu0  ;;  %v4716_v48 = vsel %vm4690_vm12, %v4677_v6, %v4703_v58 }
 0x3c8   : > { %v4826_v56 = vmul.f32 %v4772_v32, %v4735_v5  ;;  %v4520_v15 = vadd.f32 %v4484_v10, %v8767_v7  ;;  %v6318_v62 = vpop.f32.mrb[105].mxu1  ;;  %v4619_v61 = vpop.f32.mrb[106].mxu0  ;;  %v4736_v57 = vsub.f32 %v4716_v48, %v8800_v9 }
 0x3c9   : > { %v4678_v39 = vadd.f32 %v8791_v26, %v4658_v4  ;;  %v4487_v17 = vpop.f32.mrb[106].mxu1  ;;  %v4659_v46 = vadd.f32 %v4619_v61, %v4519_v37  ;;  %v6345_v63 = vpop.f32.mrb[107].mxu0 }
 0x3ca   : > { %v4838_v14 = vadd.f32 %v4837_v42, %v4826_v56  ;;  %v4852_v55 = vmul.f32 %v4826_v56, %v4826_v56  ;;  %v4521_v22 = vadd.f32 %v4487_v17, %v8770_v11  ;;  %v4827_v41 = vmul.f32 %v4777_v3, %v4736_v57  ;;  %v6319_v51 = vpop.f32.mrb[107].mxu1  ;;  %v4787_v32 = vpop.permute.xlu1 %4786 }
 0x3cb   : > { %vm4691_vm13 = vcmp.ge.f32.partialorder %v4678_v39, 0.0  ;;  %v4704_v43 = vmul.f32 0.2, %v4678_v39  ;;  %v4679_v28 = vadd.f32 %v8791_v26, %v4659_v46 }
 0x3cc   : > { %v4864_v7 = vadd.f32 %v4863_v60, %v4852_v55  ;;  %v4839_v31 = vadd.f32 %v4838_v14, %v4827_v41  ;;  %v4853_v52 = vmul.f32 %v4827_v41, %v4827_v41 }
 0x3cd   : > { %v4717_v19 = vsel %vm4691_vm13, %v4678_v39, %v4704_v43  ;;  %v4705_v24 = vmul.f32 0.2, %v4679_v28  ;;  %vm4692_vm14 = vcmp.ge.f32.partialorder %v4679_v28, 0.0 }
 0x3ce   : > { %v4737_v25 = vsub.f32 %v4717_v19, %v8800_v9  ;;  %v4865_v54 = vadd.f32 %v4864_v7, %v4853_v52  ;;  %v4624_v49 = vpop.f32.mrb[108].mxu0  ;;  %v4797_v10 = vpop.permute.xlu1 %4796 }
 0x3cf   : > { %v4718_v45 = vsel %vm4692_vm14, %v4679_v28, %v4705_v24  ;;  %v4492_v11 = vpop.f32.mrb[108].mxu1  ;;  %v4660_v59 = vadd.f32 %v4624_v49, %v4520_v15  ;;  %v6348_v20 = vpop.f32.mrb[109].mxu0 }
 0x3d0   : > { %v4738_v8 = vsub.f32 %v4718_v45, %v8800_v9  ;;  %v4828_v16 = vmul.f32 %v4782_v53, %v4737_v25  ;;  %v4522_v2 = vadd.f32 %v4492_v11, %v8773_v50  ;;  %v6322_v21 = vpop.f32.mrb[109].mxu1  ;;  %v4627_v27 = vpop.f32.mrb[110].mxu0 }
 0x3d1   : > { %v4680_v13 = vadd.f32 %v8791_v26, %v4660_v59  ;;  %v4495_v38 = vpop.f32.mrb[110].mxu1  ;;  %v4661_v44 = vadd.f32 %v4627_v27, %v4521_v22  ;;  %v6349_v33 = vpop.f32.mrb[111].mxu0 }
 0x3d2   : > { %v4829_v37 = vmul.f32 %v4787_v32, %v4738_v8  ;;  %v4840_v40 = vadd.f32 %v4839_v31, %v4828_v16  ;;  %v4854_v47 = vmul.f32 %v4828_v16, %v4828_v16  ;;  %v4523_v0 = vadd.f32 %v4495_v38, %v8776_v30  ;;  %v6323_v6 = vpop.f32.mrb[111].mxu1  ;;  %v4802_v53 = vpop.permute.xlu0 %4801 }
 0x3d3   : > { %vm4693_vm15 = vcmp.ge.f32.partialorder %v4680_v13, 0.0  ;;  %v4706_v34 = vmul.f32 0.2, %v4680_v13  ;;  %v4681_v42 = vadd.f32 %v8791_v26, %v4661_v44 }
 0x3d4   : > { %v4841_v29 = vadd.f32 %v4840_v40, %v4829_v37  ;;  %v4855_v58 = vmul.f32 %v4829_v37, %v4829_v37  ;;  %v4866_v50 = vadd.f32 %v4865_v54, %v4854_v47  ;;  %v4807_v54 = vpop.permute.xlu1 %4806 }
 0x3d5   : > { %v4719_v60 = vsel %vm4693_vm15, %v4680_v13, %v4706_v34  ;;  %v4707_v5 = vmul.f32 0.2, %v4681_v42  ;;  %vm4694_vm0 = vcmp.ge.f32.partialorder %v4681_v42, 0.0 }
 0x3d6   : > { %v4867_v12 = vadd.f32 %v4866_v50, %v4855_v58  ;;  %v4739_v3 = vsub.f32 %v4719_v60, %v8800_v9  ;;  %v4632_v4 = vpop.f32.mrb[112].mxu0 }
 0x3d7   : > { %v4720_v1 = vsel %vm4694_vm0, %v4681_v42, %v4707_v5  ;;  %v4500_v48 = vpop.f32.mrb[112].mxu1  ;;  %v4662_v30 = vadd.f32 %v4632_v4, %v4522_v2  ;;  %v6352_v56 = vpop.f32.mrb[113].mxu0 }
 0x3d8   : > { %v4740_v15 = vsub.f32 %v4720_v1, %v8800_v9  ;;  %v4830_v62 = vmul.f32 %v4792_v23, %v4739_v3  ;;  %v4524_v61 = vadd.f32 %v4500_v48, %v8779_v35  ;;  %v6326_v57 = vpop.f32.mrb[113].mxu1  ;;  %v4635_v39 = vpop.f32.mrb[114].mxu0 }
 0x3d9   : > { %v4682_v17 = vadd.f32 %v8791_v26, %v4662_v30  ;;  %v4503_v46 = vpop.f32.mrb[114].mxu1  ;;  %v4663_v63 = vadd.f32 %v4635_v39, %v4523_v0  ;;  %v6353_v14 = vpop.f32.mrb[115].mxu0 }
 0x3da   : > { %v4831_v55 = vmul.f32 %v4797_v10, %v4740_v15  ;;  %v4842_v22 = vadd.f32 %v4841_v29, %v4830_v62  ;;  %v4856_v41 = vmul.f32 %v4830_v62, %v4830_v62  ;;  %v4525_v51 = vadd.f32 %v4503_v46, %v8782_v36  ;;  %v6327_v43 = vpop.f32.mrb[115].mxu1  ;;  %v4812_v5 = vpop.permute.xlu0 %4811 }
 0x3db   : > { %vm4695_vm1 = vcmp.ge.f32.partialorder %v4682_v17, 0.0  ;;  %v4708_v28 = vmul.f32 0.2, %v4682_v17  ;;  %v4683_v7 = vadd.f32 %v8791_v26, %v4663_v63  ;;  %v4817_v30 = vpop.permute.xlu1 %4816 }
 0x3dc   : > { %v4843_v31 = vadd.f32 %v4842_v22, %v4831_v55  ;;  %v4857_v52 = vmul.f32 %v4831_v55, %v4831_v55  ;;  %v4868_v35 = vadd.f32 %v4867_v12, %v4856_v41 }
 0x3dd   : > { %v4721_v19 = vsel %vm4695_vm1, %v4682_v17, %v4708_v28  ;;  %vm4696_vm2 = vcmp.ge.f32.partialorder %v4683_v7, 0.0  ;;  %v4709_v24 = vmul.f32 0.2, %v4683_v7 }
 0x3de   : > { %v4869_v25 = vadd.f32 %v4868_v35, %v4857_v52  ;;  %v4741_v32 = vsub.f32 %v4721_v19, %v8800_v9  ;;  %v4640_v49 = vpop.f32.mrb[116].mxu0  ;;  %v4822_v41 = vpop.permute.xlu0 %4821 }
 0x3df   : > { %v4722_v45 = vsel %vm4696_vm2, %v4683_v7, %v4709_v24  ;;  %v4508_v11 = vpop.f32.mrb[116].mxu1  ;;  %v4664_v36 = vadd.f32 %v4640_v49, %v4524_v61  ;;  %v6356_v59 = vpop.f32.mrb[117].mxu0 }
 0x3e0   : > { %v4832_v20 = vmul.f32 %v4802_v53, %v4741_v32  ;;  %v4742_v8 = vsub.f32 %v4722_v45, %v8800_v9  ;;  %v4526_v16 = vadd.f32 %v4508_v11, %v8784_v18  ;;  %v4643_v2 = vpop.f32.mrb[118].mxu0  ;;  %v6330_v21 = vpop.f32.mrb[117].mxu1 }
 0x3e1   : > { %v4684_v27 = vadd.f32 %v8791_v26, %v4664_v36  ;;  %v4665_v13 = vadd.f32 %v4643_v2, %v4525_v51  ;;  %v6357_v38 = vpop.f32.mrb[119].mxu0  ;;  %v4511_v44 = vpop.f32.mrb[118].mxu1 }
 0x3e2   : > { %v4844_v33 = vadd.f32 %v4843_v31, %v4832_v20  ;;  %v4858_v37 = vmul.f32 %v4832_v20, %v4832_v20  ;;  %v4833_v40 = vmul.f32 %v4807_v54, %v4742_v8  ;;  %v6331_v47 = vpop.f32.mrb[119].mxu1 }
 0x3e3   : > { %vm4697_vm3 = vcmp.ge.f32.partialorder %v4684_v27, 0.0  ;;  %v4710_v0 = vmul.f32 0.2, %v4684_v27  ;;  %v4685_v6 = vadd.f32 %v8791_v26, %v4665_v13 }
 0x3e4   : > { %v4870_v34 = vadd.f32 %v4869_v25, %v4858_v37  ;;  %v4845_v18 = vadd.f32 %v4844_v33, %v4833_v40  ;;  %v4859_v42 = vmul.f32 %v4833_v40, %v4833_v40 }
 0x3e5   : > { %v4723_v29 = vsel %vm4697_vm3, %v4684_v27, %v4710_v0  ;;  %vm4698_vm4 = vcmp.ge.f32.partialorder %v4685_v6, 0.0  ;;  %v4711_v58 = vmul.f32 0.2, %v4685_v6 }
 0x3e6   : > { %v4871_v50 = vadd.f32 %v4870_v34, %v4859_v42  ;;  %v4743_v23 = vsub.f32 %v4723_v29, %v8800_v9  ;;  %v4648_v60 = vpop.f32.mrb[120].mxu0 }
 0x3e7   : > { %v4724_v12 = vsel %vm4698_vm4, %v4685_v6, %v4711_v58  ;;  %v4666_v3 = vadd.f32 %v4648_v60, %v4526_v16  ;;  %v6360_v10 = vpop.f32.mrb[121].mxu0 }
 0x3e8   : > { %v4834_v4 = vmul.f32 %v4812_v5, %v4743_v23  ;;  %v4744_v1 = vsub.f32 %v4724_v12, %v8800_v9  ;;  %v4651_v48 = vpop.f32.mrb[122].mxu0 }
 0x3e9   : > { %v4686_v56 = vadd.f32 %v8791_v26, %v4666_v3  ;;  %v6361_v15 = vpop.f32.mrb[123].mxu0 }
 0x3ea   : > { %v4846_v62 = vadd.f32 %v4845_v18, %v4834_v4  ;;  %v4860_v61 = vmul.f32 %v4834_v4, %v4834_v4  ;;  %v4835_v57 = vmul.f32 %v4817_v30, %v4744_v1 }
 0x3eb   : > { %vm4699_vm5 = vcmp.ge.f32.partialorder %v4686_v56, 0.0  ;;  %v4712_v39 = vmul.f32 0.2, %v4686_v56 }
 0x3ec   : > { %v4872_v17 = vadd.f32 %v4871_v50, %v4860_v61  ;;  %v4847_v46 = vadd.f32 %v4846_v62, %v4835_v57  ;;  %v4861_v63 = vmul.f32 %v4835_v57, %v4835_v57 }
 0x3ed   : > { %v4725_v14 = vsel %vm4699_vm5, %v4686_v56, %v4712_v39 }
 0x3ee   : > { %v4873_v55 = vadd.f32 %v4872_v17, %v4861_v63  ;;  %v4745_v22 = vsub.f32 %v4725_v14, %v8800_v9 }
 0x3f0   : > { %v4836_v51 = vmul.f32 %v4822_v41, %v4745_v22 }
 0x3f2   : > { %v4848_v26 = vadd.f32 %v4847_v46, %v4836_v51  ;;  %v4862_v43 = vmul.f32 %v4836_v51, %v4836_v51 }
 0x3f4   : > { %4849 = vst [vmem:[%s434_s22] sm:$0xff] %v4848_v26  ;;  %v4874_v28 = vadd.f32 %v4873_v55, %v4862_v43 }
 0x3f6   : > { %4875 = vst [vmem:[%s442_s21] sm:$0xff] %v4874_v28 }
 0x3f7 PF: > { %s19_s9 = sadd.s32 1, %s6497_s9   ;;  %s8905_s27 = smov %s6489_s29 }
 0x3f8   : > { %p16_p10 = scmp.ge.s32.totalorder %s19_s9, 18   ;;  %s8906_s28 = smov %s6493_s30 }
 0x3f9   : > { %s8907_s29 = smov %s8910_s10  ;;  %s8908_s30 = smov %s8914_s11 }
 0x3fa   :  { %18 = sbr.rel (!%p16_p10) target bundleno = 3 (0x3), region = 122 }

</bundles_post_ra>
